<compile_context>
chip_gen: v6e
topology: v6e:2x2x1
jax: 0.10.0
libtpu: 0.0.40
codegen_flags: <defaults>
</compile_context>

<pallas_src>
import functools

import numpy as np
import jax
import jax.numpy as jnp
from jax import lax
from jax.experimental import pallas as pl
from jax.experimental.pallas import tpu as pltpu

LANE = 128                      # pad channel dims to a multiple of the lane width
_VMEM_LIMIT = 32 * 1024 * 1024  # explicit scoped-VMEM limit (safe on v5e/v6e/v7x)


def _ceil_to(x, m):
    return (x + m - 1) // m * m


# ---------------------------------------------------------------------------
# Kernel 1: conv1 (3x3, stride 1 or 2) + identity 1x1 conv, implicit GEMM,
#           plus per-image per-channel sum / sum-of-squares for BN statistics.
#           Taps are sliced directly from the (already padded) input ref.
# ---------------------------------------------------------------------------
def _head_kernel(x_ref, w1_ref, wi_ref,
                 y1_ref, yi_ref, s1_ref, q1_ref, si_ref, qi_ref,
                 *, stride, ho, wo):
    cin = w1_ref.shape[1]
    cout = w1_ref.shape[2]

    acc = jnp.zeros((ho * wo, cout), jnp.float32)
    for dy in range(3):
        for dx in range(3):
            if stride == 1:
                xv = x_ref.at[0]                              # (h+2, w+2, cin) view
                patch = xv[dy:dy + ho, dx:dx + wo, :]
            else:
                ph = x_ref.at[(dy % 2) * 2 + (dx % 2)]        # 2x2 polyphase plane
                patch = ph[dy // 2:dy // 2 + ho, dx // 2:dx // 2 + wo, :]
            p2 = patch.reshape(ho * wo, cin)                  # already bf16
            acc = acc + jnp.dot(p2, w1_ref[dy * 3 + dx],
                                preferred_element_type=jnp.float32)

    # identity branch: 1x1 conv (stride 2 == polyphase (1,1); stride 1 == interior)
    if stride == 1:
        ipatch = x_ref.at[0][1:1 + ho, 1:1 + wo, :]
    else:
        ipatch = x_ref.at[3][0:ho, 0:wo, :]
    iacc = jnp.dot(ipatch.reshape(ho * wo, cin), wi_ref[...],
                   preferred_element_type=jnp.float32)

    y1_ref[0] = acc.astype(jnp.bfloat16)
    yi_ref[0] = iacc.astype(jnp.bfloat16)
    s1_ref[0] = jnp.sum(acc, axis=0, keepdims=True)
    q1_ref[0] = jnp.sum(acc * acc, axis=0, keepdims=True)
    si_ref[0] = jnp.sum(iacc, axis=0, keepdims=True)
    qi_ref[0] = jnp.sum(iacc * iacc, axis=0, keepdims=True)


# ---------------------------------------------------------------------------
# Kernel 2: fused bn1 affine + ReLU prologue, in-kernel 1px zero pad (VMEM
#           scratch), then conv2 (3x3 s1) implicit GEMM, plus bn2 statistics.
# ---------------------------------------------------------------------------
def _conv2_kernel(h_ref, w2_ref, sc_ref, sh_ref,
                  y2_ref, s2_ref, q2_ref, hpad_ref, *, ho, wo):
    c = w2_ref.shape[2]

    # conv padding must be exact zeros (not affine(0)): zero the scratch every
    # step (cheap; also megacore-safe), then write only the affine'd interior.
    hpad_ref[...] = jnp.zeros_like(hpad_ref)
    interior = h_ref[0].astype(jnp.float32)                       # (ho, wo, c)
    interior = jnp.maximum(interior * sc_ref[...] + sh_ref[...], 0.0)
    hpad_ref[1:1 + ho, 1:1 + wo, :] = interior

    acc = jnp.zeros((ho * wo, c), jnp.float32)
    for dy in range(3):
        for dx in range(3):
            p2 = hpad_ref[dy:dy + ho, dx:dx + wo, :].reshape(ho * wo, c)
            acc = acc + jnp.dot(p2.astype(jnp.bfloat16), w2_ref[dy * 3 + dx],
                                preferred_element_type=jnp.float32)

    y2_ref[0] = acc.astype(jnp.bfloat16)
    s2_ref[0] = jnp.sum(acc, axis=0, keepdims=True)
    q2_ref[0] = jnp.sum(acc * acc, axis=0, keepdims=True)


# ---------------------------------------------------------------------------
# Kernel 3: bn2 affine + identity affine + residual add + ReLU (single pass).
# ---------------------------------------------------------------------------
def _tail_kernel(h_ref, i_ref, s2_ref, t2_ref, si_ref, ti_ref, o_ref):
    h = h_ref[0].astype(jnp.float32)
    idn = i_ref[0].astype(jnp.float32)
    y = h * s2_ref[...] + t2_ref[...] + idn * si_ref[...] + ti_ref[...]
    o_ref[0] = jnp.maximum(y, 0.0)


# ---------------------------------------------------------------------------
# BN statistics -> scale/shift (tiny per-channel math, plain JAX).
# ---------------------------------------------------------------------------
def _bn_scale_shift(sum_nc, ssq_nc, count, gamma, beta, eps=1e-5):
    s = jnp.sum(sum_nc, axis=(0, 1))
    q = jnp.sum(ssq_nc, axis=(0, 1))
    mean = s / count
    var = jnp.maximum(q / count - mean * mean, 0.0)   # biased (training-mode) var
    scale = gamma * lax.rsqrt(var + eps)
    shift = beta - mean * scale
    return scale[None, :], shift[None, :]


# ---------------------------------------------------------------------------
# ResidualUnit forward (NCHW in / NCHW out, like the PyTorch module).
# ---------------------------------------------------------------------------
def residual_unit_forward(params, x_nchw, downsample):
    x = jnp.transpose(x_nchw, (0, 2, 3, 1)).astype(jnp.float32)   # NHWC
    n, h, w, cin = x.shape
    cout = params['bn1_g'].shape[0]
    cp = _ceil_to(cin, LANE)
    qp = _ceil_to(cout, LANE)
    stride = 2 if downsample else 1

    # ---- parameters: channel-pad to lane multiples, bf16 for the MXU ----
    w1 = jnp.pad(params['conv1_w'],
                 ((0, 0), (0, 0), (0, cp - cin), (0, qp - cout)))
    w1 = w1.reshape(9, cp, qp).astype(jnp.bfloat16)
    w2 = jnp.pad(params['conv2_w'],
                 ((0, 0), (0, 0), (0, qp - cout), (0, qp - cout)))
    w2 = w2.reshape(9, qp, qp).astype(jnp.bfloat16)
    wi = jnp.pad(params['id_w'][0, 0],
                 ((0, cp - cin), (0, qp - cout))).astype(jnp.bfloat16)

    def padc(v):
        return jnp.pad(v, (0, qp - cout))   # padded channels: gamma=beta=0 -> stay 0

    g1, b1 = padc(params['bn1_g']), padc(params['bn1_b'])
    g2, b2 = padc(params['bn2_g']), padc(params['bn2_b'])

    # ---- input: channel pad + 1px spatial zero pad (+ polyphase for stride 2) ----
    # (XLA fuses these pads with the NCHW->NHWC transpose into one pass.)
    xq = jnp.pad(x, ((0, 0), (0, 0), (0, 0), (0, cp - cin)))
    xq = jnp.pad(xq, ((0, 0), (1, 1), (1, 1), (0, 0)))
    if stride == 1:
        ho, wo = h, w
        x_in = xq.astype(jnp.bfloat16)                            # (n, h+2, w+2, cp)
        x_spec = pl.BlockSpec((1, h + 2, w + 2, cp), lambda b: (b, 0, 0, 0))
    else:
        assert h % 2 == 0 and w % 2 == 0, "stride-2 path assumes even H and W"
        ho, wo = h // 2, w // 2
        hh, wh = (h + 2) // 2, (w + 2) // 2
        x_in = (xq.reshape(n, hh, 2, wh, 2, cp)
                  .transpose(0, 2, 4, 1, 3, 5)
                  .reshape(n * 4, hh, wh, cp)
                  .astype(jnp.bfloat16))                          # 2x2 polyphase
        x_spec = pl.BlockSpec((4, hh, wh, cp), lambda b: (b, 0, 0, 0))

    m = ho * wo
    count = float(n * m)
    cparams = pltpu.CompilerParams(dimension_semantics=("parallel",),
                                   vmem_limit_bytes=_VMEM_LIMIT)

    big_bf16 = jax.ShapeDtypeStruct((n, m, qp), jnp.bfloat16)
    stat_f32 = jax.ShapeDtypeStruct((n, 1, qp), jnp.float32)
    big_spec = pl.BlockSpec((1, m, qp), lambda b: (b, 0, 0))
    stat_spec = pl.BlockSpec((1, 1, qp), lambda b: (b, 0, 0))
    vec_spec = pl.BlockSpec((1, qp), lambda b: (0, 0))

    # ---- kernel 1: conv1 + identity 1x1 conv + BN statistics ----
    y1, yi, s1, q1, si, qi = pl.pallas_call(
        functools.partial(_head_kernel, stride=stride, ho=ho, wo=wo),
        out_shape=(big_bf16, big_bf16, stat_f32, stat_f32, stat_f32, stat_f32),
        grid=(n,),
        in_specs=[x_spec,
                  pl.BlockSpec((9, cp, qp), lambda b: (0, 0, 0)),
                  pl.BlockSpec((cp, qp), lambda b: (0, 0))],
        out_specs=(big_spec, big_spec, stat_spec, stat_spec, stat_spec, stat_spec),
        compiler_params=cparams,
    )(x_in, w1, wi)

    sc1, sh1 = _bn_scale_shift(s1, q1, count, g1, b1)

    # ---- kernel 2: bn1 affine + ReLU prologue, in-kernel pad, conv2, bn2 stats ----
    h_in = y1.reshape(n, ho, wo, qp)          # metadata-only reshape (no HBM pass)
    y2, s2, q2 = pl.pallas_call(
        functools.partial(_conv2_kernel, ho=ho, wo=wo),
        out_shape=(big_bf16, stat_f32, stat_f32),
        grid=(n,),
        in_specs=[pl.BlockSpec((1, ho, wo, qp), lambda b: (b, 0, 0, 0)),
                  pl.BlockSpec((9, qp, qp), lambda b: (0, 0, 0)),
                  vec_spec, vec_spec],
        out_specs=(big_spec, stat_spec, stat_spec),
        scratch_shapes=[pltpu.VMEM((ho + 2, wo + 2, qp), jnp.float32)],
        compiler_params=cparams,
    )(h_in, w2, sc1, sh1)

    sc2, sh2 = _bn_scale_shift(s2, q2, count, g2, b2)
    if downsample:
        gi_, bi_ = padc(params['down_bn_g']), padc(params['down_bn_b'])
        sci, shi = _bn_scale_shift(si, qi, count, gi_, bi_)
    else:
        sci = jnp.ones((1, qp), jnp.float32)
        shi = jnp.zeros((1, qp), jnp.float32)

    # ---- kernel 3: bn2 affine + identity affine + residual add + ReLU ----
    out = pl.pallas_call(
        _tail_kernel,
        out_shape=jax.ShapeDtypeStruct((n, m, qp), jnp.float32),
        grid=(n,),
        in_specs=[big_spec, big_spec, vec_spec, vec_spec, vec_spec, vec_spec],
        out_specs=big_spec,
        compiler_params=cparams,
    )(y2, yi, sc2, sh2, sci, shi)

    out = out.reshape(n, ho, wo, qp)[..., :cout]
    return jnp.transpose(out, (0, 3, 1, 2))   # back to NCHW


# ---------------------------------------------------------------------------
# Pure-JAX reference (training-mode BN, biased variance) for self-checking.
# ---------------------------------------------------------------------------
def residual_unit_reference(params, x_nchw, downsample):
    x = jnp.transpose(x_nchw, (0, 2, 3, 1)).astype(jnp.float32)
    dn = ('NHWC', 'HWIO', 'NHWC')

    def conv(v, wgt, s, p):
        return lax.conv_general_dilated(v, wgt, (s, s), ((p, p), (p, p)),
                                        dimension_numbers=dn)

    def bn(v, g, b, eps=1e-5):
        mean = jnp.mean(v, axis=(0, 1, 2))
        var = jnp.mean(jnp.square(v - mean), axis=(0, 1, 2))
        return (v - mean) * lax.rsqrt(var + eps) * g + b

    stride = 2 if downsample else 1
    hh = conv(x, params['conv1_w'], stride, 1)
    hh = jnp.maximum(bn(hh, params['bn1_g'], params['bn1_b']), 0.0)
    hh = conv(hh, params['conv2_w'], 1, 1)
    hh = bn(hh, params['bn2_g'], params['bn2_b'])
    if downsample:
        idn = bn(conv(x, params['id_w'], 2, 0),
                 params['down_bn_g'], params['down_bn_b'])
    else:
        idn = conv(x, params['id_w'], 1, 0)
    y = jnp.maximum(hh + idn, 0.0)
    return jnp.transpose(y, (0, 3, 1, 2))


# ---------------------------------------------------------------------------
# Deterministic parameter init (HWIO conv weights; BN affine params).
# ---------------------------------------------------------------------------
def init_params(key, n_input, n_output):
    k = jax.random.split(key, 6)

    def conv_w(kk, kh, kw, ci, co):
        return jax.random.normal(kk, (kh, kw, ci, co), jnp.float32) / np.sqrt(kh * kw * ci)

    def bn_p(kk, c):
        g = 1.0 + 0.1 * jax.random.normal(kk, (c,), jnp.float32)
        b = 0.1 * jax.random.normal(jax.random.fold_in(kk, 1), (c,), jnp.float32)
        return g, b

    p = {}
    p['conv1_w'] = conv_w(k[0], 3, 3, n_input, n_output)
    p['conv2_w'] = conv_w(k[1], 3, 3, n_output, n_output)
    p['id_w'] = conv_w(k[2], 1, 1, n_input, n_output)   # identity / downsample 1x1
    p['bn1_g'], p['bn1_b'] = bn_p(k[3], n_output)
    p['bn2_g'], p['bn2_b'] = bn_p(k[4], n_output)
    p['down_bn_g'], p['down_bn_b'] = bn_p(k[5], n_output)
    return p


if __name__ == "__main__":
    root = jax.random.PRNGKey(0)
    kx, kp0, kp1 = jax.random.split(root, 3)

    N, C_IN, C_OUT, H, W = 2, 32, 64, 16, 16
    x = jax.random.normal(kx, (N, C_IN, H, W), jnp.float32)

    for downsample, kp in ((False, kp0), (True, kp1)):
        params = init_params(kp, C_IN, C_OUT)
        fwd = jax.jit(functools.partial(residual_unit_forward, downsample=downsample))
        out = fwd(params, x)
        out = jax.block_until_ready(out)

        expected = (N, C_OUT, H // 2, W // 2) if downsample else (N, C_OUT, H, W)
        assert out.shape == expected, (out.shape, expected)
        assert bool(jnp.all(jnp.isfinite(out)))

        ref = residual_unit_reference(params, x, downsample)
        err = float(jnp.max(jnp.abs(out - ref)))
        # bf16 MXU inputs with f32 accumulation -> small numerical differences only
        assert err < 2e-1, f"downsample={downsample}: max abs err {err}"

    print("KERNEL_OK")
</pallas_src>

<mosaic_0001>
module attributes {stable_mosaic.version = 11 : i64} {
  func.func @_head_kernel(%arg0: i32, %arg1: memref<1x18x18x128xbf16, #tpu.memory_space<vmem>>, %arg2: memref<9x128x128xbf16, #tpu.memory_space<vmem>>, %arg3: memref<128x128xbf16, #tpu.memory_space<vmem>>, %arg4: memref<1x256x128xbf16, #tpu.memory_space<vmem>>, %arg5: memref<1x256x128xbf16, #tpu.memory_space<vmem>>, %arg6: memref<1x1x128xf32, #tpu.memory_space<vmem>>, %arg7: memref<1x1x128xf32, #tpu.memory_space<vmem>>, %arg8: memref<1x1x128xf32, #tpu.memory_space<vmem>>, %arg9: memref<1x1x128xf32, #tpu.memory_space<vmem>>) attributes {dimension_semantics = [#tpu.dimension_semantics<parallel>], iteration_bounds = array<i64: 2>, scalar_prefetch = 0 : i64, scratch_operands = 0 : i64, tpu.core_type = #tpu.core_type<tc>, window_params = [{transform_indices = @transform_0, window_bounds = array<i64: 1, 18, 18, 128>}, {pipeline_mode = #tpu.pipeline_mode<synchronous>, transform_indices = @transform_1, window_bounds = array<i64: 9, 128, 128>}, {pipeline_mode = #tpu.pipeline_mode<synchronous>, transform_indices = @transform_2, window_bounds = array<i64: 128, 128>}, {transform_indices = @transform_3, window_bounds = array<i64: 1, 256, 128>}, {transform_indices = @transform_4, window_bounds = array<i64: 1, 256, 128>}, {transform_indices = @transform_5, window_bounds = array<i64: 1, 1, 128>}, {transform_indices = @transform_6, window_bounds = array<i64: 1, 1, 128>}, {transform_indices = @transform_7, window_bounds = array<i64: 1, 1, 128>}, {transform_indices = @transform_8, window_bounds = array<i64: 1, 1, 128>}]} {
    %cst = arith.constant 0.000000e+00 : f32
    %0 = vector.broadcast %cst : f32 to vector<256x128xf32>
    %c0_i32 = arith.constant 0 : i32
    %c0_i32_0 = arith.constant 0 : i32
    %c0_i32_1 = arith.constant 0 : i32
    %c0_i32_2 = arith.constant 0 : i32
    %1 = tpu.memref_slice %arg1[%c0_i32, %c0_i32_0, %c0_i32_1, %c0_i32_2] : memref<1x18x18x128xbf16, #tpu.memory_space<vmem>> -> memref<1x18x18x128xbf16, #tpu.memory_space<vmem>>
    %2 = tpu.memref_squeeze %1 : memref<1x18x18x128xbf16, #tpu.memory_space<vmem>> -> memref<18x18x128xbf16, #tpu.memory_space<vmem>>
    %c0 = arith.constant 0 : index
    %c0_3 = arith.constant 0 : index
    %c0_4 = arith.constant 0 : index
    %3 = vector.load %2[%c0, %c0_3, %c0_4] : memref<18x18x128xbf16, #tpu.memory_space<vmem>>, vector<16x16x128xbf16>
    %4 = vector.shape_cast %3 : vector<16x16x128xbf16> to vector<256x128xbf16>
    %c0_5 = arith.constant 0 : index
    %c0_6 = arith.constant 0 : index
    %c0_7 = arith.constant 0 : index
    %5 = vector.load %arg2[%c0_5, %c0_6, %c0_7] : memref<9x128x128xbf16, #tpu.memory_space<vmem>>, vector<1x128x128xbf16>
    %6 = vector.shape_cast %5 : vector<1x128x128xbf16> to vector<128x128xbf16>
    %cst_8 = arith.constant dense<0.000000e+00> : vector<256x128xf32>
    %7 = tpu.matmul %4, %6, %cst_8 {dimension_numbers = #tpu.dot_dimension_numbers<[1], [0], [0], [1], [0, 0, 1, 1], [], []>} : vector<256x128xbf16>, vector<128x128xbf16>, vector<256x128xf32> -> vector<256x128xf32>
    %8 = arith.addf %0, %7 : vector<256x128xf32>
    %c0_i32_9 = arith.constant 0 : i32
    %c0_i32_10 = arith.constant 0 : i32
    %c0_i32_11 = arith.constant 0 : i32
    %c0_i32_12 = arith.constant 0 : i32
    %9 = tpu.memref_slice %arg1[%c0_i32_9, %c0_i32_10, %c0_i32_11, %c0_i32_12] : memref<1x18x18x128xbf16, #tpu.memory_space<vmem>> -> memref<1x18x18x128xbf16, #tpu.memory_space<vmem>>
    %10 = tpu.memref_squeeze %9 : memref<1x18x18x128xbf16, #tpu.memory_space<vmem>> -> memref<18x18x128xbf16, #tpu.memory_space<vmem>>
    %c0_13 = arith.constant 0 : index
    %c1 = arith.constant 1 : index
    %c0_14 = arith.constant 0 : index
    %11 = vector.load %10[%c0_13, %c1, %c0_14] : memref<18x18x128xbf16, #tpu.memory_space<vmem>>, vector<16x16x128xbf16>
    %12 = vector.shape_cast %11 : vector<16x16x128xbf16> to vector<256x128xbf16>
    %c1_15 = arith.constant 1 : index
    %c0_16 = arith.constant 0 : index
    %c0_17 = arith.constant 0 : index
    %13 = vector.load %arg2[%c1_15, %c0_16, %c0_17] : memref<9x128x128xbf16, #tpu.memory_space<vmem>>, vector<1x128x128xbf16>
    %14 = vector.shape_cast %13 : vector<1x128x128xbf16> to vector<128x128xbf16>
    %cst_18 = arith.constant dense<0.000000e+00> : vector<256x128xf32>
    %15 = tpu.matmul %12, %14, %cst_18 {dimension_numbers = #tpu.dot_dimension_numbers<[1], [0], [0], [1], [0, 0, 1, 1], [], []>} : vector<256x128xbf16>, vector<128x128xbf16>, vector<256x128xf32> -> vector<256x128xf32>
    %16 = arith.addf %8, %15 : vector<256x128xf32>
    %c0_i32_19 = arith.constant 0 : i32
    %c0_i32_20 = arith.constant 0 : i32
    %c0_i32_21 = arith.constant 0 : i32
    %c0_i32_22 = arith.constant 0 : i32
    %17 = tpu.memref_slice %arg1[%c0_i32_19, %c0_i32_20, %c0_i32_21, %c0_i32_22] : memref<1x18x18x128xbf16, #tpu.memory_space<vmem>> -> memref<1x18x18x128xbf16, #tpu.memory_space<vmem>>
    %18 = tpu.memref_squeeze %17 : memref<1x18x18x128xbf16, #tpu.memory_space<vmem>> -> memref<18x18x128xbf16, #tpu.memory_space<vmem>>
    %c0_23 = arith.constant 0 : index
    %c2 = arith.constant 2 : index
    %c0_24 = arith.constant 0 : index
    %19 = vector.load %18[%c0_23, %c2, %c0_24] : memref<18x18x128xbf16, #tpu.memory_space<vmem>>, vector<16x16x128xbf16>
    %20 = vector.shape_cast %19 : vector<16x16x128xbf16> to vector<256x128xbf16>
    %c2_25 = arith.constant 2 : index
    %c0_26 = arith.constant 0 : index
    %c0_27 = arith.constant 0 : index
    %21 = vector.load %arg2[%c2_25, %c0_26, %c0_27] : memref<9x128x128xbf16, #tpu.memory_space<vmem>>, vector<1x128x128xbf16>
    %22 = vector.shape_cast %21 : vector<1x128x128xbf16> to vector<128x128xbf16>
    %cst_28 = arith.constant dense<0.000000e+00> : vector<256x128xf32>
    %23 = tpu.matmul %20, %22, %cst_28 {dimension_numbers = #tpu.dot_dimension_numbers<[1], [0], [0], [1], [0, 0, 1, 1], [], []>} : vector<256x128xbf16>, vector<128x128xbf16>, vector<256x128xf32> -> vector<256x128xf32>
    %24 = arith.addf %16, %23 : vector<256x128xf32>
    %c0_i32_29 = arith.constant 0 : i32
    %c0_i32_30 = arith.constant 0 : i32
    %c0_i32_31 = arith.constant 0 : i32
    %c0_i32_32 = arith.constant 0 : i32
    %25 = tpu.memref_slice %arg1[%c0_i32_29, %c0_i32_30, %c0_i32_31, %c0_i32_32] : memref<1x18x18x128xbf16, #tpu.memory_space<vmem>> -> memref<1x18x18x128xbf16, #tpu.memory_space<vmem>>
    %26 = tpu.memref_squeeze %25 : memref<1x18x18x128xbf16, #tpu.memory_space<vmem>> -> memref<18x18x128xbf16, #tpu.memory_space<vmem>>
    %c1_33 = arith.constant 1 : index
    %c0_34 = arith.constant 0 : index
    %c0_35 = arith.constant 0 : index
    %27 = vector.load %26[%c1_33, %c0_34, %c0_35] : memref<18x18x128xbf16, #tpu.memory_space<vmem>>, vector<16x16x128xbf16>
    %28 = vector.shape_cast %27 : vector<16x16x128xbf16> to vector<256x128xbf16>
    %c3 = arith.constant 3 : index
    %c0_36 = arith.constant 0 : index
    %c0_37 = arith.constant 0 : index
    %29 = vector.load %arg2[%c3, %c0_36, %c0_37] : memref<9x128x128xbf16, #tpu.memory_space<vmem>>, vector<1x128x128xbf16>
    %30 = vector.shape_cast %29 : vector<1x128x128xbf16> to vector<128x128xbf16>
    %cst_38 = arith.constant dense<0.000000e+00> : vector<256x128xf32>
    %31 = tpu.matmul %28, %30, %cst_38 {dimension_numbers = #tpu.dot_dimension_numbers<[1], [0], [0], [1], [0, 0, 1, 1], [], []>} : vector<256x128xbf16>, vector<128x128xbf16>, vector<256x128xf32> -> vector<256x128xf32>
    %32 = arith.addf %24, %31 : vector<256x128xf32>
    %c0_i32_39 = arith.constant 0 : i32
    %c0_i32_40 = arith.constant 0 : i32
    %c0_i32_41 = arith.constant 0 : i32
    %c0_i32_42 = arith.constant 0 : i32
    %33 = tpu.memref_slice %arg1[%c0_i32_39, %c0_i32_40, %c0_i32_41, %c0_i32_42] : memref<1x18x18x128xbf16, #tpu.memory_space<vmem>> -> memref<1x18x18x128xbf16, #tpu.memory_space<vmem>>
    %34 = tpu.memref_squeeze %33 : memref<1x18x18x128xbf16, #tpu.memory_space<vmem>> -> memref<18x18x128xbf16, #tpu.memory_space<vmem>>
    %c1_43 = arith.constant 1 : index
    %c1_44 = arith.constant 1 : index
    %c0_45 = arith.constant 0 : index
    %35 = vector.load %34[%c1_43, %c1_44, %c0_45] : memref<18x18x128xbf16, #tpu.memory_space<vmem>>, vector<16x16x128xbf16>
    %36 = vector.shape_cast %35 : vector<16x16x128xbf16> to vector<256x128xbf16>
    %c4 = arith.constant 4 : index
    %c0_46 = arith.constant 0 : index
    %c0_47 = arith.constant 0 : index
    %37 = vector.load %arg2[%c4, %c0_46, %c0_47] : memref<9x128x128xbf16, #tpu.memory_space<vmem>>, vector<1x128x128xbf16>
    %38 = vector.shape_cast %37 : vector<1x128x128xbf16> to vector<128x128xbf16>
    %cst_48 = arith.constant dense<0.000000e+00> : vector<256x128xf32>
    %39 = tpu.matmul %36, %38, %cst_48 {dimension_numbers = #tpu.dot_dimension_numbers<[1], [0], [0], [1], [0, 0, 1, 1], [], []>} : vector<256x128xbf16>, vector<128x128xbf16>, vector<256x128xf32> -> vector<256x128xf32>
    %40 = arith.addf %32, %39 : vector<256x128xf32>
    %c0_i32_49 = arith.constant 0 : i32
    %c0_i32_50 = arith.constant 0 : i32
    %c0_i32_51 = arith.constant 0 : i32
    %c0_i32_52 = arith.constant 0 : i32
    %41 = tpu.memref_slice %arg1[%c0_i32_49, %c0_i32_50, %c0_i32_51, %c0_i32_52] : memref<1x18x18x128xbf16, #tpu.memory_space<vmem>> -> memref<1x18x18x128xbf16, #tpu.memory_space<vmem>>
    %42 = tpu.memref_squeeze %41 : memref<1x18x18x128xbf16, #tpu.memory_space<vmem>> -> memref<18x18x128xbf16, #tpu.memory_space<vmem>>
    %c1_53 = arith.constant 1 : index
    %c2_54 = arith.constant 2 : index
    %c0_55 = arith.constant 0 : index
    %43 = vector.load %42[%c1_53, %c2_54, %c0_55] : memref<18x18x128xbf16, #tpu.memory_space<vmem>>, vector<16x16x128xbf16>
    %44 = vector.shape_cast %43 : vector<16x16x128xbf16> to vector<256x128xbf16>
    %c5 = arith.constant 5 : index
    %c0_56 = arith.constant 0 : index
    %c0_57 = arith.constant 0 : index
    %45 = vector.load %arg2[%c5, %c0_56, %c0_57] : memref<9x128x128xbf16, #tpu.memory_space<vmem>>, vector<1x128x128xbf16>
    %46 = vector.shape_cast %45 : vector<1x128x128xbf16> to vector<128x128xbf16>
    %cst_58 = arith.constant dense<0.000000e+00> : vector<256x128xf32>
    %47 = tpu.matmul %44, %46, %cst_58 {dimension_numbers = #tpu.dot_dimension_numbers<[1], [0], [0], [1], [0, 0, 1, 1], [], []>} : vector<256x128xbf16>, vector<128x128xbf16>, vector<256x128xf32> -> vector<256x128xf32>
    %48 = arith.addf %40, %47 : vector<256x128xf32>
    %c0_i32_59 = arith.constant 0 : i32
    %c0_i32_60 = arith.constant 0 : i32
    %c0_i32_61 = arith.constant 0 : i32
    %c0_i32_62 = arith.constant 0 : i32
    %49 = tpu.memref_slice %arg1[%c0_i32_59, %c0_i32_60, %c0_i32_61, %c0_i32_62] : memref<1x18x18x128xbf16, #tpu.memory_space<vmem>> -> memref<1x18x18x128xbf16, #tpu.memory_space<vmem>>
    %50 = tpu.memref_squeeze %49 : memref<1x18x18x128xbf16, #tpu.memory_space<vmem>> -> memref<18x18x128xbf16, #tpu.memory_space<vmem>>
    %c2_63 = arith.constant 2 : index
    %c0_64 = arith.constant 0 : index
    %c0_65 = arith.constant 0 : index
    %51 = vector.load %50[%c2_63, %c0_64, %c0_65] : memref<18x18x128xbf16, #tpu.memory_space<vmem>>, vector<16x16x128xbf16>
    %52 = vector.shape_cast %51 : vector<16x16x128xbf16> to vector<256x128xbf16>
    %c6 = arith.constant 6 : index
    %c0_66 = arith.constant 0 : index
    %c0_67 = arith.constant 0 : index
    %53 = vector.load %arg2[%c6, %c0_66, %c0_67] : memref<9x128x128xbf16, #tpu.memory_space<vmem>>, vector<1x128x128xbf16>
    %54 = vector.shape_cast %53 : vector<1x128x128xbf16> to vector<128x128xbf16>
    %cst_68 = arith.constant dense<0.000000e+00> : vector<256x128xf32>
    %55 = tpu.matmul %52, %54, %cst_68 {dimension_numbers = #tpu.dot_dimension_numbers<[1], [0], [0], [1], [0, 0, 1, 1], [], []>} : vector<256x128xbf16>, vector<128x128xbf16>, vector<256x128xf32> -> vector<256x128xf32>
    %56 = arith.addf %48, %55 : vector<256x128xf32>
    %c0_i32_69 = arith.constant 0 : i32
    %c0_i32_70 = arith.constant 0 : i32
    %c0_i32_71 = arith.constant 0 : i32
    %c0_i32_72 = arith.constant 0 : i32
    %57 = tpu.memref_slice %arg1[%c0_i32_69, %c0_i32_70, %c0_i32_71, %c0_i32_72] : memref<1x18x18x128xbf16, #tpu.memory_space<vmem>> -> memref<1x18x18x128xbf16, #tpu.memory_space<vmem>>
    %58 = tpu.memref_squeeze %57 : memref<1x18x18x128xbf16, #tpu.memory_space<vmem>> -> memref<18x18x128xbf16, #tpu.memory_space<vmem>>
    %c2_73 = arith.constant 2 : index
    %c1_74 = arith.constant 1 : index
    %c0_75 = arith.constant 0 : index
    %59 = vector.load %58[%c2_73, %c1_74, %c0_75] : memref<18x18x128xbf16, #tpu.memory_space<vmem>>, vector<16x16x128xbf16>
    %60 = vector.shape_cast %59 : vector<16x16x128xbf16> to vector<256x128xbf16>
    %c7 = arith.constant 7 : index
    %c0_76 = arith.constant 0 : index
    %c0_77 = arith.constant 0 : index
    %61 = vector.load %arg2[%c7, %c0_76, %c0_77] : memref<9x128x128xbf16, #tpu.memory_space<vmem>>, vector<1x128x128xbf16>
    %62 = vector.shape_cast %61 : vector<1x128x128xbf16> to vector<128x128xbf16>
    %cst_78 = arith.constant dense<0.000000e+00> : vector<256x128xf32>
    %63 = tpu.matmul %60, %62, %cst_78 {dimension_numbers = #tpu.dot_dimension_numbers<[1], [0], [0], [1], [0, 0, 1, 1], [], []>} : vector<256x128xbf16>, vector<128x128xbf16>, vector<256x128xf32> -> vector<256x128xf32>
    %64 = arith.addf %56, %63 : vector<256x128xf32>
    %c0_i32_79 = arith.constant 0 : i32
    %c0_i32_80 = arith.constant 0 : i32
    %c0_i32_81 = arith.constant 0 : i32
    %c0_i32_82 = arith.constant 0 : i32
    %65 = tpu.memref_slice %arg1[%c0_i32_79, %c0_i32_80, %c0_i32_81, %c0_i32_82] : memref<1x18x18x128xbf16, #tpu.memory_space<vmem>> -> memref<1x18x18x128xbf16, #tpu.memory_space<vmem>>
    %66 = tpu.memref_squeeze %65 : memref<1x18x18x128xbf16, #tpu.memory_space<vmem>> -> memref<18x18x128xbf16, #tpu.memory_space<vmem>>
    %c2_83 = arith.constant 2 : index
    %c2_84 = arith.constant 2 : index
    %c0_85 = arith.constant 0 : index
    %67 = vector.load %66[%c2_83, %c2_84, %c0_85] : memref<18x18x128xbf16, #tpu.memory_space<vmem>>, vector<16x16x128xbf16>
    %68 = vector.shape_cast %67 : vector<16x16x128xbf16> to vector<256x128xbf16>
    %c8 = arith.constant 8 : index
    %c0_86 = arith.constant 0 : index
    %c0_87 = arith.constant 0 : index
    %69 = vector.load %arg2[%c8, %c0_86, %c0_87] : memref<9x128x128xbf16, #tpu.memory_space<vmem>>, vector<1x128x128xbf16>
    %70 = vector.shape_cast %69 : vector<1x128x128xbf16> to vector<128x128xbf16>
    %cst_88 = arith.constant dense<0.000000e+00> : vector<256x128xf32>
    %71 = tpu.matmul %68, %70, %cst_88 {dimension_numbers = #tpu.dot_dimension_numbers<[1], [0], [0], [1], [0, 0, 1, 1], [], []>} : vector<256x128xbf16>, vector<128x128xbf16>, vector<256x128xf32> -> vector<256x128xf32>
    %72 = arith.addf %64, %71 : vector<256x128xf32>
    %c0_i32_89 = arith.constant 0 : i32
    %c0_i32_90 = arith.constant 0 : i32
    %c0_i32_91 = arith.constant 0 : i32
    %c0_i32_92 = arith.constant 0 : i32
    %73 = tpu.memref_slice %arg1[%c0_i32_89, %c0_i32_90, %c0_i32_91, %c0_i32_92] : memref<1x18x18x128xbf16, #tpu.memory_space<vmem>> -> memref<1x18x18x128xbf16, #tpu.memory_space<vmem>>
    %74 = tpu.memref_squeeze %73 : memref<1x18x18x128xbf16, #tpu.memory_space<vmem>> -> memref<18x18x128xbf16, #tpu.memory_space<vmem>>
    %c1_93 = arith.constant 1 : index
    %c1_94 = arith.constant 1 : index
    %c0_95 = arith.constant 0 : index
    %75 = vector.load %74[%c1_93, %c1_94, %c0_95] : memref<18x18x128xbf16, #tpu.memory_space<vmem>>, vector<16x16x128xbf16>
    %76 = vector.shape_cast %75 : vector<16x16x128xbf16> to vector<256x128xbf16>
    %c0_96 = arith.constant 0 : index
    %c0_97 = arith.constant 0 : index
    %77 = vector.load %arg3[%c0_96, %c0_97] : memref<128x128xbf16, #tpu.memory_space<vmem>>, vector<128x128xbf16>
    %cst_98 = arith.constant dense<0.000000e+00> : vector<256x128xf32>
    %78 = tpu.matmul %76, %77, %cst_98 {dimension_numbers = #tpu.dot_dimension_numbers<[1], [0], [0], [1], [0, 0, 1, 1], [], []>} : vector<256x128xbf16>, vector<128x128xbf16>, vector<256x128xf32> -> vector<256x128xf32>
    %79 = arith.truncf %72 : vector<256x128xf32> to vector<256x128xbf16>
    %c0_99 = arith.constant 0 : index
    %c0_100 = arith.constant 0 : index
    %c0_101 = arith.constant 0 : index
    %80 = vector.load %arg4[%c0_99, %c0_100, %c0_101] : memref<1x256x128xbf16, #tpu.memory_space<vmem>>, vector<1x256x128xbf16>
    %81 = vector.shape_cast %80 : vector<1x256x128xbf16> to vector<256x128xbf16>
    %82 = vector.shape_cast %79 : vector<256x128xbf16> to vector<1x256x128xbf16>
    tpu.vector_store %arg4[%c0_99, %c0_100, %c0_101], %82 {strides = array<i32>} : memref<1x256x128xbf16, #tpu.memory_space<vmem>>, vector<1x256x128xbf16>,
    %83 = arith.truncf %78 : vector<256x128xf32> to vector<256x128xbf16>
    %c0_102 = arith.constant 0 : index
    %c0_103 = arith.constant 0 : index
    %c0_104 = arith.constant 0 : index
    %84 = vector.load %arg5[%c0_102, %c0_103, %c0_104] : memref<1x256x128xbf16, #tpu.memory_space<vmem>>, vector<1x256x128xbf16>
    %85 = vector.shape_cast %84 : vector<1x256x128xbf16> to vector<256x128xbf16>
    %86 = vector.shape_cast %83 : vector<256x128xbf16> to vector<1x256x128xbf16>
    tpu.vector_store %arg5[%c0_102, %c0_103, %c0_104], %86 {strides = array<i32>} : memref<1x256x128xbf16, #tpu.memory_space<vmem>>, vector<1x256x128xbf16>,
    %cst_105 = arith.constant dense<0.000000e+00> : vector<128xf32>
    %87 = vector.multi_reduction <add>, %72, %cst_105 [0] : vector<256x128xf32> to vector<128xf32>
    %88 = vector.shape_cast %87 : vector<128xf32> to vector<1x128xf32>
    %c0_106 = arith.constant 0 : index
    %c0_107 = arith.constant 0 : index
    %c0_108 = arith.constant 0 : index
    %89 = vector.load %arg6[%c0_106, %c0_107, %c0_108] : memref<1x1x128xf32, #tpu.memory_space<vmem>>, vector<1x1x128xf32>
    %90 = vector.shape_cast %89 : vector<1x1x128xf32> to vector<1x128xf32>
    %91 = vector.shape_cast %88 : vector<1x128xf32> to vector<1x1x128xf32>
    tpu.vector_store %arg6[%c0_106, %c0_107, %c0_108], %91 {strides = array<i32>} : memref<1x1x128xf32, #tpu.memory_space<vmem>>, vector<1x1x128xf32>,
    %92 = arith.mulf %72, %72 : vector<256x128xf32>
    %cst_109 = arith.constant dense<0.000000e+00> : vector<128xf32>
    %93 = vector.multi_reduction <add>, %92, %cst_109 [0] : vector<256x128xf32> to vector<128xf32>
    %94 = vector.shape_cast %93 : vector<128xf32> to vector<1x128xf32>
    %c0_110 = arith.constant 0 : index
    %c0_111 = arith.constant 0 : index
    %c0_112 = arith.constant 0 : index
    %95 = vector.load %arg7[%c0_110, %c0_111, %c0_112] : memref<1x1x128xf32, #tpu.memory_space<vmem>>, vector<1x1x128xf32>
    %96 = vector.shape_cast %95 : vector<1x1x128xf32> to vector<1x128xf32>
    %97 = vector.shape_cast %94 : vector<1x128xf32> to vector<1x1x128xf32>
    tpu.vector_store %arg7[%c0_110, %c0_111, %c0_112], %97 {strides = array<i32>} : memref<1x1x128xf32, #tpu.memory_space<vmem>>, vector<1x1x128xf32>,
    %cst_113 = arith.constant dense<0.000000e+00> : vector<128xf32>
    %98 = vector.multi_reduction <add>, %78, %cst_113 [0] : vector<256x128xf32> to vector<128xf32>
    %99 = vector.shape_cast %98 : vector<128xf32> to vector<1x128xf32>
    %c0_114 = arith.constant 0 : index
    %c0_115 = arith.constant 0 : index
    %c0_116 = arith.constant 0 : index
    %100 = vector.load %arg8[%c0_114, %c0_115, %c0_116] : memref<1x1x128xf32, #tpu.memory_space<vmem>>, vector<1x1x128xf32>
    %101 = vector.shape_cast %100 : vector<1x1x128xf32> to vector<1x128xf32>
    %102 = vector.shape_cast %99 : vector<1x128xf32> to vector<1x1x128xf32>
    tpu.vector_store %arg8[%c0_114, %c0_115, %c0_116], %102 {strides = array<i32>} : memref<1x1x128xf32, #tpu.memory_space<vmem>>, vector<1x1x128xf32>,
    %103 = arith.mulf %78, %78 : vector<256x128xf32>
    %cst_117 = arith.constant dense<0.000000e+00> : vector<128xf32>
    %104 = vector.multi_reduction <add>, %103, %cst_117 [0] : vector<256x128xf32> to vector<128xf32>
    %105 = vector.shape_cast %104 : vector<128xf32> to vector<1x128xf32>
    %c0_118 = arith.constant 0 : index
    %c0_119 = arith.constant 0 : index
    %c0_120 = arith.constant 0 : index
    %106 = vector.load %arg9[%c0_118, %c0_119, %c0_120] : memref<1x1x128xf32, #tpu.memory_space<vmem>>, vector<1x1x128xf32>
    %107 = vector.shape_cast %106 : vector<1x1x128xf32> to vector<1x128xf32>
    %108 = vector.shape_cast %105 : vector<1x128xf32> to vector<1x1x128xf32>
    tpu.vector_store %arg9[%c0_118, %c0_119, %c0_120], %108 {strides = array<i32>} : memref<1x1x128xf32, #tpu.memory_space<vmem>>, vector<1x1x128xf32>,
    return
  }
  func.func @transform_0(%arg0: i32) -> (i32, i32, i32, i32) {
    %c0_i32 = arith.constant 0 : i32
    %c0_i32_0 = arith.constant 0 : i32
    %c0_i32_1 = arith.constant 0 : i32
    %c0_i32_2 = arith.constant 0 : i32
    return %arg0, %c0_i32, %c0_i32_0, %c0_i32_1 : i32, i32, i32, i32
  }
  func.func @transform_1(%arg0: i32) -> (i32, i32, i32) {
    %c0_i32 = arith.constant 0 : i32
    %c0_i32_0 = arith.constant 0 : i32
    %c0_i32_1 = arith.constant 0 : i32
    %c0_i32_2 = arith.constant 0 : i32
    return %c0_i32, %c0_i32_0, %c0_i32_1 : i32, i32, i32
  }
  func.func @transform_2(%arg0: i32) -> (i32, i32) {
    %c0_i32 = arith.constant 0 : i32
    %c0_i32_0 = arith.constant 0 : i32
    %c0_i32_1 = arith.constant 0 : i32
    return %c0_i32, %c0_i32_0 : i32, i32
  }
  func.func @transform_3(%arg0: i32) -> (i32, i32, i32) {
    %c0_i32 = arith.constant 0 : i32
    %c0_i32_0 = arith.constant 0 : i32
    %c0_i32_1 = arith.constant 0 : i32
    return %arg0, %c0_i32, %c0_i32_0 : i32, i32, i32
  }
  func.func @transform_4(%arg0: i32) -> (i32, i32, i32) {
    %c0_i32 = arith.constant 0 : i32
    %c0_i32_0 = arith.constant 0 : i32
    %c0_i32_1 = arith.constant 0 : i32
    return %arg0, %c0_i32, %c0_i32_0 : i32, i32, i32
  }
  func.func @transform_5(%arg0: i32) -> (i32, i32, i32) {
    %c0_i32 = arith.constant 0 : i32
    %c0_i32_0 = arith.constant 0 : i32
    %c0_i32_1 = arith.constant 0 : i32
    return %arg0, %c0_i32, %c0_i32_0 : i32, i32, i32
  }
  func.func @transform_6(%arg0: i32) -> (i32, i32, i32) {
    %c0_i32 = arith.constant 0 : i32
    %c0_i32_0 = arith.constant 0 : i32
    %c0_i32_1 = arith.constant 0 : i32
    return %arg0, %c0_i32, %c0_i32_0 : i32, i32, i32
  }
  func.func @transform_7(%arg0: i32) -> (i32, i32, i32) {
    %c0_i32 = arith.constant 0 : i32
    %c0_i32_0 = arith.constant 0 : i32
    %c0_i32_1 = arith.constant 0 : i32
    return %arg0, %c0_i32, %c0_i32_0 : i32, i32, i32
  }
  func.func @transform_8(%arg0: i32) -> (i32, i32, i32) {
    %c0_i32 = arith.constant 0 : i32
    %c0_i32_0 = arith.constant 0 : i32
    %c0_i32_1 = arith.constant 0 : i32
    return %arg0, %c0_i32, %c0_i32_0 : i32, i32, i32
  }
}

module attributes {stable_mosaic.version = 11 : i64} {
  func.func @_conv2_kernel(%arg0: i32, %arg1: memref<1x16x16x128xbf16, #tpu.memory_space<vmem>>, %arg2: memref<9x128x128xbf16, #tpu.memory_space<vmem>>, %arg3: memref<1x128xf32, #tpu.memory_space<vmem>>, %arg4: memref<1x128xf32, #tpu.memory_space<vmem>>, %arg5: memref<1x256x128xbf16, #tpu.memory_space<vmem>>, %arg6: memref<1x1x128xf32, #tpu.memory_space<vmem>>, %arg7: memref<1x1x128xf32, #tpu.memory_space<vmem>>, %arg8: memref<18x18x128xf32, #tpu.memory_space<vmem>>) attributes {dimension_semantics = [#tpu.dimension_semantics<parallel>], iteration_bounds = array<i64: 2>, scalar_prefetch = 0 : i64, scratch_operands = 1 : i64, tpu.core_type = #tpu.core_type<tc>, window_params = [{transform_indices = @transform_0, window_bounds = array<i64: 1, 16, 16, 128>}, {pipeline_mode = #tpu.pipeline_mode<synchronous>, transform_indices = @transform_1, window_bounds = array<i64: 9, 128, 128>}, {pipeline_mode = #tpu.pipeline_mode<synchronous>, transform_indices = @transform_2, window_bounds = array<i64: 1, 128>}, {pipeline_mode = #tpu.pipeline_mode<synchronous>, transform_indices = @transform_3, window_bounds = array<i64: 1, 128>}, {transform_indices = @transform_4, window_bounds = array<i64: 1, 256, 128>}, {transform_indices = @transform_5, window_bounds = array<i64: 1, 1, 128>}, {transform_indices = @transform_6, window_bounds = array<i64: 1, 1, 128>}]} {
    %cst = arith.constant 0.000000e+00 : f32
    %0 = vector.broadcast %cst : f32 to vector<18x18x128xf32>
    %c0 = arith.constant 0 : index
    %c0_0 = arith.constant 0 : index
    %c0_1 = arith.constant 0 : index
    %1 = vector.load %arg8[%c0, %c0_0, %c0_1] : memref<18x18x128xf32, #tpu.memory_space<vmem>>, vector<18x18x128xf32>
    tpu.vector_store %arg8[%c0, %c0_0, %c0_1], %0 {strides = array<i32>} : memref<18x18x128xf32, #tpu.memory_space<vmem>>, vector<18x18x128xf32>,
    %c0_2 = arith.constant 0 : index
    %c0_3 = arith.constant 0 : index
    %c0_4 = arith.constant 0 : index
    %c0_5 = arith.constant 0 : index
    %2 = vector.load %arg1[%c0_2, %c0_3, %c0_4, %c0_5] : memref<1x16x16x128xbf16, #tpu.memory_space<vmem>>, vector<1x16x16x128xbf16>
    %3 = vector.shape_cast %2 : vector<1x16x16x128xbf16> to vector<16x16x128xbf16>
    %4 = arith.extf %3 : vector<16x16x128xbf16> to vector<16x16x128xf32>
    %c0_6 = arith.constant 0 : index
    %c0_7 = arith.constant 0 : index
    %5 = vector.load %arg3[%c0_6, %c0_7] : memref<1x128xf32, #tpu.memory_space<vmem>>, vector<1x128xf32>
    %6 = vector.shape_cast %5 : vector<1x128xf32> to vector<1x1x128xf32>
    %7 = vector.broadcast %6 : vector<1x1x128xf32> to vector<16x16x128xf32>
    %8 = arith.mulf %4, %7 : vector<16x16x128xf32>
    %c0_8 = arith.constant 0 : index
    %c0_9 = arith.constant 0 : index
    %9 = vector.load %arg4[%c0_8, %c0_9] : memref<1x128xf32, #tpu.memory_space<vmem>>, vector<1x128xf32>
    %10 = vector.shape_cast %9 : vector<1x128xf32> to vector<1x1x128xf32>
    %11 = vector.broadcast %10 : vector<1x1x128xf32> to vector<16x16x128xf32>
    %12 = arith.addf %8, %11 : vector<16x16x128xf32>
    %cst_10 = arith.constant 0.000000e+00 : f32
    %13 = vector.broadcast %cst_10 : f32 to vector<16x16x128xf32>
    %14 = arith.maximumf %12, %13 : vector<16x16x128xf32>
    %c1 = arith.constant 1 : index
    %c1_11 = arith.constant 1 : index
    %c0_12 = arith.constant 0 : index
    %15 = vector.load %arg8[%c1, %c1_11, %c0_12] : memref<18x18x128xf32, #tpu.memory_space<vmem>>, vector<16x16x128xf32>
    tpu.vector_store %arg8[%c1, %c1_11, %c0_12], %14 {strides = array<i32>} : memref<18x18x128xf32, #tpu.memory_space<vmem>>, vector<16x16x128xf32>,
    %cst_13 = arith.constant 0.000000e+00 : f32
    %16 = vector.broadcast %cst_13 : f32 to vector<256x128xf32>
    %c0_14 = arith.constant 0 : index
    %c0_15 = arith.constant 0 : index
    %c0_16 = arith.constant 0 : index
    %17 = vector.load %arg8[%c0_14, %c0_15, %c0_16] : memref<18x18x128xf32, #tpu.memory_space<vmem>>, vector<16x16x128xf32>
    %18 = vector.shape_cast %17 : vector<16x16x128xf32> to vector<256x128xf32>
    %19 = arith.truncf %18 : vector<256x128xf32> to vector<256x128xbf16>
    %c0_17 = arith.constant 0 : index
    %c0_18 = arith.constant 0 : index
    %c0_19 = arith.constant 0 : index
    %20 = vector.load %arg2[%c0_17, %c0_18, %c0_19] : memref<9x128x128xbf16, #tpu.memory_space<vmem>>, vector<1x128x128xbf16>
    %21 = vector.shape_cast %20 : vector<1x128x128xbf16> to vector<128x128xbf16>
    %cst_20 = arith.constant dense<0.000000e+00> : vector<256x128xf32>
    %22 = tpu.matmul %19, %21, %cst_20 {dimension_numbers = #tpu.dot_dimension_numbers<[1], [0], [0], [1], [0, 0, 1, 1], [], []>} : vector<256x128xbf16>, vector<128x128xbf16>, vector<256x128xf32> -> vector<256x128xf32>
    %23 = arith.addf %16, %22 : vector<256x128xf32>
    %c0_21 = arith.constant 0 : index
    %c1_22 = arith.constant 1 : index
    %c0_23 = arith.constant 0 : index
    %24 = vector.load %arg8[%c0_21, %c1_22, %c0_23] : memref<18x18x128xf32, #tpu.memory_space<vmem>>, vector<16x16x128xf32>
    %25 = vector.shape_cast %24 : vector<16x16x128xf32> to vector<256x128xf32>
    %26 = arith.truncf %25 : vector<256x128xf32> to vector<256x128xbf16>
    %c1_24 = arith.constant 1 : index
    %c0_25 = arith.constant 0 : index
    %c0_26 = arith.constant 0 : index
    %27 = vector.load %arg2[%c1_24, %c0_25, %c0_26] : memref<9x128x128xbf16, #tpu.memory_space<vmem>>, vector<1x128x128xbf16>
    %28 = vector.shape_cast %27 : vector<1x128x128xbf16> to vector<128x128xbf16>
    %cst_27 = arith.constant dense<0.000000e+00> : vector<256x128xf32>
    %29 = tpu.matmul %26, %28, %cst_27 {dimension_numbers = #tpu.dot_dimension_numbers<[1], [0], [0], [1], [0, 0, 1, 1], [], []>} : vector<256x128xbf16>, vector<128x128xbf16>, vector<256x128xf32> -> vector<256x128xf32>
    %30 = arith.addf %23, %29 : vector<256x128xf32>
    %c0_28 = arith.constant 0 : index
    %c2 = arith.constant 2 : index
    %c0_29 = arith.constant 0 : index
    %31 = vector.load %arg8[%c0_28, %c2, %c0_29] : memref<18x18x128xf32, #tpu.memory_space<vmem>>, vector<16x16x128xf32>
    %32 = vector.shape_cast %31 : vector<16x16x128xf32> to vector<256x128xf32>
    %33 = arith.truncf %32 : vector<256x128xf32> to vector<256x128xbf16>
    %c2_30 = arith.constant 2 : index
    %c0_31 = arith.constant 0 : index
    %c0_32 = arith.constant 0 : index
    %34 = vector.load %arg2[%c2_30, %c0_31, %c0_32] : memref<9x128x128xbf16, #tpu.memory_space<vmem>>, vector<1x128x128xbf16>
    %35 = vector.shape_cast %34 : vector<1x128x128xbf16> to vector<128x128xbf16>
    %cst_33 = arith.constant dense<0.000000e+00> : vector<256x128xf32>
    %36 = tpu.matmul %33, %35, %cst_33 {dimension_numbers = #tpu.dot_dimension_numbers<[1], [0], [0], [1], [0, 0, 1, 1], [], []>} : vector<256x128xbf16>, vector<128x128xbf16>, vector<256x128xf32> -> vector<256x128xf32>
    %37 = arith.addf %30, %36 : vector<256x128xf32>
    %c1_34 = arith.constant 1 : index
    %c0_35 = arith.constant 0 : index
    %c0_36 = arith.constant 0 : index
    %38 = vector.load %arg8[%c1_34, %c0_35, %c0_36] : memref<18x18x128xf32, #tpu.memory_space<vmem>>, vector<16x16x128xf32>
    %39 = vector.shape_cast %38 : vector<16x16x128xf32> to vector<256x128xf32>
    %40 = arith.truncf %39 : vector<256x128xf32> to vector<256x128xbf16>
    %c3 = arith.constant 3 : index
    %c0_37 = arith.constant 0 : index
    %c0_38 = arith.constant 0 : index
    %41 = vector.load %arg2[%c3, %c0_37, %c0_38] : memref<9x128x128xbf16, #tpu.memory_space<vmem>>, vector<1x128x128xbf16>
    %42 = vector.shape_cast %41 : vector<1x128x128xbf16> to vector<128x128xbf16>
    %cst_39 = arith.constant dense<0.000000e+00> : vector<256x128xf32>
    %43 = tpu.matmul %40, %42, %cst_39 {dimension_numbers = #tpu.dot_dimension_numbers<[1], [0], [0], [1], [0, 0, 1, 1], [], []>} : vector<256x128xbf16>, vector<128x128xbf16>, vector<256x128xf32> -> vector<256x128xf32>
    %44 = arith.addf %37, %43 : vector<256x128xf32>
    %c1_40 = arith.constant 1 : index
    %c1_41 = arith.constant 1 : index
    %c0_42 = arith.constant 0 : index
    %45 = vector.load %arg8[%c1_40, %c1_41, %c0_42] : memref<18x18x128xf32, #tpu.memory_space<vmem>>, vector<16x16x128xf32>
    %46 = vector.shape_cast %45 : vector<16x16x128xf32> to vector<256x128xf32>
    %47 = arith.truncf %46 : vector<256x128xf32> to vector<256x128xbf16>
    %c4 = arith.constant 4 : index
    %c0_43 = arith.constant 0 : index
    %c0_44 = arith.constant 0 : index
    %48 = vector.load %arg2[%c4, %c0_43, %c0_44] : memref<9x128x128xbf16, #tpu.memory_space<vmem>>, vector<1x128x128xbf16>
    %49 = vector.shape_cast %48 : vector<1x128x128xbf16> to vector<128x128xbf16>
    %cst_45 = arith.constant dense<0.000000e+00> : vector<256x128xf32>
    %50 = tpu.matmul %47, %49, %cst_45 {dimension_numbers = #tpu.dot_dimension_numbers<[1], [0], [0], [1], [0, 0, 1, 1], [], []>} : vector<256x128xbf16>, vector<128x128xbf16>, vector<256x128xf32> -> vector<256x128xf32>
    %51 = arith.addf %44, %50 : vector<256x128xf32>
    %c1_46 = arith.constant 1 : index
    %c2_47 = arith.constant 2 : index
    %c0_48 = arith.constant 0 : index
    %52 = vector.load %arg8[%c1_46, %c2_47, %c0_48] : memref<18x18x128xf32, #tpu.memory_space<vmem>>, vector<16x16x128xf32>
    %53 = vector.shape_cast %52 : vector<16x16x128xf32> to vector<256x128xf32>
    %54 = arith.truncf %53 : vector<256x128xf32> to vector<256x128xbf16>
    %c5 = arith.constant 5 : index
    %c0_49 = arith.constant 0 : index
    %c0_50 = arith.constant 0 : index
    %55 = vector.load %arg2[%c5, %c0_49, %c0_50] : memref<9x128x128xbf16, #tpu.memory_space<vmem>>, vector<1x128x128xbf16>
    %56 = vector.shape_cast %55 : vector<1x128x128xbf16> to vector<128x128xbf16>
    %cst_51 = arith.constant dense<0.000000e+00> : vector<256x128xf32>
    %57 = tpu.matmul %54, %56, %cst_51 {dimension_numbers = #tpu.dot_dimension_numbers<[1], [0], [0], [1], [0, 0, 1, 1], [], []>} : vector<256x128xbf16>, vector<128x128xbf16>, vector<256x128xf32> -> vector<256x128xf32>
    %58 = arith.addf %51, %57 : vector<256x128xf32>
    %c2_52 = arith.constant 2 : index
    %c0_53 = arith.constant 0 : index
    %c0_54 = arith.constant 0 : index
    %59 = vector.load %arg8[%c2_52, %c0_53, %c0_54] : memref<18x18x128xf32, #tpu.memory_space<vmem>>, vector<16x16x128xf32>
    %60 = vector.shape_cast %59 : vector<16x16x128xf32> to vector<256x128xf32>
    %61 = arith.truncf %60 : vector<256x128xf32> to vector<256x128xbf16>
    %c6 = arith.constant 6 : index
    %c0_55 = arith.constant 0 : index
    %c0_56 = arith.constant 0 : index
    %62 = vector.load %arg2[%c6, %c0_55, %c0_56] : memref<9x128x128xbf16, #tpu.memory_space<vmem>>, vector<1x128x128xbf16>
    %63 = vector.shape_cast %62 : vector<1x128x128xbf16> to vector<128x128xbf16>
    %cst_57 = arith.constant dense<0.000000e+00> : vector<256x128xf32>
    %64 = tpu.matmul %61, %63, %cst_57 {dimension_numbers = #tpu.dot_dimension_numbers<[1], [0], [0], [1], [0, 0, 1, 1], [], []>} : vector<256x128xbf16>, vector<128x128xbf16>, vector<256x128xf32> -> vector<256x128xf32>
    %65 = arith.addf %58, %64 : vector<256x128xf32>
    %c2_58 = arith.constant 2 : index
    %c1_59 = arith.constant 1 : index
    %c0_60 = arith.constant 0 : index
    %66 = vector.load %arg8[%c2_58, %c1_59, %c0_60] : memref<18x18x128xf32, #tpu.memory_space<vmem>>, vector<16x16x128xf32>
    %67 = vector.shape_cast %66 : vector<16x16x128xf32> to vector<256x128xf32>
    %68 = arith.truncf %67 : vector<256x128xf32> to vector<256x128xbf16>
    %c7 = arith.constant 7 : index
    %c0_61 = arith.constant 0 : index
    %c0_62 = arith.constant 0 : index
    %69 = vector.load %arg2[%c7, %c0_61, %c0_62] : memref<9x128x128xbf16, #tpu.memory_space<vmem>>, vector<1x128x128xbf16>
    %70 = vector.shape_cast %69 : vector<1x128x128xbf16> to vector<128x128xbf16>
    %cst_63 = arith.constant dense<0.000000e+00> : vector<256x128xf32>
    %71 = tpu.matmul %68, %70, %cst_63 {dimension_numbers = #tpu.dot_dimension_numbers<[1], [0], [0], [1], [0, 0, 1, 1], [], []>} : vector<256x128xbf16>, vector<128x128xbf16>, vector<256x128xf32> -> vector<256x128xf32>
    %72 = arith.addf %65, %71 : vector<256x128xf32>
    %c2_64 = arith.constant 2 : index
    %c2_65 = arith.constant 2 : index
    %c0_66 = arith.constant 0 : index
    %73 = vector.load %arg8[%c2_64, %c2_65, %c0_66] : memref<18x18x128xf32, #tpu.memory_space<vmem>>, vector<16x16x128xf32>
    %74 = vector.shape_cast %73 : vector<16x16x128xf32> to vector<256x128xf32>
    %75 = arith.truncf %74 : vector<256x128xf32> to vector<256x128xbf16>
    %c8 = arith.constant 8 : index
    %c0_67 = arith.constant 0 : index
    %c0_68 = arith.constant 0 : index
    %76 = vector.load %arg2[%c8, %c0_67, %c0_68] : memref<9x128x128xbf16, #tpu.memory_space<vmem>>, vector<1x128x128xbf16>
    %77 = vector.shape_cast %76 : vector<1x128x128xbf16> to vector<128x128xbf16>
    %cst_69 = arith.constant dense<0.000000e+00> : vector<256x128xf32>
    %78 = tpu.matmul %75, %77, %cst_69 {dimension_numbers = #tpu.dot_dimension_numbers<[1], [0], [0], [1], [0, 0, 1, 1], [], []>} : vector<256x128xbf16>, vector<128x128xbf16>, vector<256x128xf32> -> vector<256x128xf32>
    %79 = arith.addf %72, %78 : vector<256x128xf32>
    %80 = arith.truncf %79 : vector<256x128xf32> to vector<256x128xbf16>
    %c0_70 = arith.constant 0 : index
    %c0_71 = arith.constant 0 : index
    %c0_72 = arith.constant 0 : index
    %81 = vector.load %arg5[%c0_70, %c0_71, %c0_72] : memref<1x256x128xbf16, #tpu.memory_space<vmem>>, vector<1x256x128xbf16>
    %82 = vector.shape_cast %81 : vector<1x256x128xbf16> to vector<256x128xbf16>
    %83 = vector.shape_cast %80 : vector<256x128xbf16> to vector<1x256x128xbf16>
    tpu.vector_store %arg5[%c0_70, %c0_71, %c0_72], %83 {strides = array<i32>} : memref<1x256x128xbf16, #tpu.memory_space<vmem>>, vector<1x256x128xbf16>,
    %cst_73 = arith.constant dense<0.000000e+00> : vector<128xf32>
    %84 = vector.multi_reduction <add>, %79, %cst_73 [0] : vector<256x128xf32> to vector<128xf32>
    %85 = vector.shape_cast %84 : vector<128xf32> to vector<1x128xf32>
    %c0_74 = arith.constant 0 : index
    %c0_75 = arith.constant 0 : index
    %c0_76 = arith.constant 0 : index
    %86 = vector.load %arg6[%c0_74, %c0_75, %c0_76] : memref<1x1x128xf32, #tpu.memory_space<vmem>>, vector<1x1x128xf32>
    %87 = vector.shape_cast %86 : vector<1x1x128xf32> to vector<1x128xf32>
    %88 = vector.shape_cast %85 : vector<1x128xf32> to vector<1x1x128xf32>
    tpu.vector_store %arg6[%c0_74, %c0_75, %c0_76], %88 {strides = array<i32>} : memref<1x1x128xf32, #tpu.memory_space<vmem>>, vector<1x1x128xf32>,
    %89 = arith.mulf %79, %79 : vector<256x128xf32>
    %cst_77 = arith.constant dense<0.000000e+00> : vector<128xf32>
    %90 = vector.multi_reduction <add>, %89, %cst_77 [0] : vector<256x128xf32> to vector<128xf32>
    %91 = vector.shape_cast %90 : vector<128xf32> to vector<1x128xf32>
    %c0_78 = arith.constant 0 : index
    %c0_79 = arith.constant 0 : index
    %c0_80 = arith.constant 0 : index
    %92 = vector.load %arg7[%c0_78, %c0_79, %c0_80] : memref<1x1x128xf32, #tpu.memory_space<vmem>>, vector<1x1x128xf32>
    %93 = vector.shape_cast %92 : vector<1x1x128xf32> to vector<1x128xf32>
    %94 = vector.shape_cast %91 : vector<1x128xf32> to vector<1x1x128xf32>
    tpu.vector_store %arg7[%c0_78, %c0_79, %c0_80], %94 {strides = array<i32>} : memref<1x1x128xf32, #tpu.memory_space<vmem>>, vector<1x1x128xf32>,
    return
  }
  func.func @transform_0(%arg0: i32) -> (i32, i32, i32, i32) {
    %c0_i32 = arith.constant 0 : i32
    %c0_i32_0 = arith.constant 0 : i32
    %c0_i32_1 = arith.constant 0 : i32
    %c0_i32_2 = arith.constant 0 : i32
    return %arg0, %c0_i32, %c0_i32_0, %c0_i32_1 : i32, i32, i32, i32
  }
  func.func @transform_1(%arg0: i32) -> (i32, i32, i32) {
    %c0_i32 = arith.constant 0 : i32
    %c0_i32_0 = arith.constant 0 : i32
    %c0_i32_1 = arith.constant 0 : i32
    %c0_i32_2 = arith.constant 0 : i32
    return %c0_i32, %c0_i32_0, %c0_i32_1 : i32, i32, i32
  }
  func.func @transform_2(%arg0: i32) -> (i32, i32) {
    %c0_i32 = arith.constant 0 : i32
    %c0_i32_0 = arith.constant 0 : i32
    %c0_i32_1 = arith.constant 0 : i32
    return %c0_i32, %c0_i32_0 : i32, i32
  }
  func.func @transform_3(%arg0: i32) -> (i32, i32) {
    %c0_i32 = arith.constant 0 : i32
    %c0_i32_0 = arith.constant 0 : i32
    %c0_i32_1 = arith.constant 0 : i32
    return %c0_i32, %c0_i32_0 : i32, i32
  }
  func.func @transform_4(%arg0: i32) -> (i32, i32, i32) {
    %c0_i32 = arith.constant 0 : i32
    %c0_i32_0 = arith.constant 0 : i32
    %c0_i32_1 = arith.constant 0 : i32
    return %arg0, %c0_i32, %c0_i32_0 : i32, i32, i32
  }
  func.func @transform_5(%arg0: i32) -> (i32, i32, i32) {
    %c0_i32 = arith.constant 0 : i32
    %c0_i32_0 = arith.constant 0 : i32
    %c0_i32_1 = arith.constant 0 : i32
    return %arg0, %c0_i32, %c0_i32_0 : i32, i32, i32
  }
  func.func @transform_6(%arg0: i32) -> (i32, i32, i32) {
    %c0_i32 = arith.constant 0 : i32
    %c0_i32_0 = arith.constant 0 : i32
    %c0_i32_1 = arith.constant 0 : i32
    return %arg0, %c0_i32, %c0_i32_0 : i32, i32, i32
  }
}

module attributes {stable_mosaic.version = 11 : i64} {
  func.func @_tail_kernel(%arg0: i32, %arg1: memref<1x256x128xbf16, #tpu.memory_space<vmem>>, %arg2: memref<1x256x128xbf16, #tpu.memory_space<vmem>>, %arg3: memref<1x128xf32, #tpu.memory_space<vmem>>, %arg4: memref<1x128xf32, #tpu.memory_space<vmem>>, %arg5: memref<1x128xf32, #tpu.memory_space<vmem>>, %arg6: memref<1x128xf32, #tpu.memory_space<vmem>>, %arg7: memref<1x256x128xf32, #tpu.memory_space<vmem>>) attributes {dimension_semantics = [#tpu.dimension_semantics<parallel>], iteration_bounds = array<i64: 2>, scalar_prefetch = 0 : i64, scratch_operands = 0 : i64, tpu.core_type = #tpu.core_type<tc>, window_params = [{transform_indices = @transform_0, window_bounds = array<i64: 1, 256, 128>}, {transform_indices = @transform_1, window_bounds = array<i64: 1, 256, 128>}, {pipeline_mode = #tpu.pipeline_mode<synchronous>, transform_indices = @transform_2, window_bounds = array<i64: 1, 128>}, {pipeline_mode = #tpu.pipeline_mode<synchronous>, transform_indices = @transform_3, window_bounds = array<i64: 1, 128>}, {pipeline_mode = #tpu.pipeline_mode<synchronous>, transform_indices = @transform_4, window_bounds = array<i64: 1, 128>}, {pipeline_mode = #tpu.pipeline_mode<synchronous>, transform_indices = @transform_5, window_bounds = array<i64: 1, 128>}, {transform_indices = @transform_6, window_bounds = array<i64: 1, 256, 128>}]} {
    %c0 = arith.constant 0 : index
    %c0_0 = arith.constant 0 : index
    %c0_1 = arith.constant 0 : index
    %0 = vector.load %arg1[%c0, %c0_0, %c0_1] : memref<1x256x128xbf16, #tpu.memory_space<vmem>>, vector<1x256x128xbf16>
    %1 = vector.shape_cast %0 : vector<1x256x128xbf16> to vector<256x128xbf16>
    %2 = arith.extf %1 : vector<256x128xbf16> to vector<256x128xf32>
    %c0_2 = arith.constant 0 : index
    %c0_3 = arith.constant 0 : index
    %c0_4 = arith.constant 0 : index
    %3 = vector.load %arg2[%c0_2, %c0_3, %c0_4] : memref<1x256x128xbf16, #tpu.memory_space<vmem>>, vector<1x256x128xbf16>
    %4 = vector.shape_cast %3 : vector<1x256x128xbf16> to vector<256x128xbf16>
    %5 = arith.extf %4 : vector<256x128xbf16> to vector<256x128xf32>
    %c0_5 = arith.constant 0 : index
    %c0_6 = arith.constant 0 : index
    %6 = vector.load %arg3[%c0_5, %c0_6] : memref<1x128xf32, #tpu.memory_space<vmem>>, vector<1x128xf32>
    %7 = vector.broadcast %6 : vector<1x128xf32> to vector<256x128xf32>
    %8 = arith.mulf %2, %7 : vector<256x128xf32>
    %c0_7 = arith.constant 0 : index
    %c0_8 = arith.constant 0 : index
    %9 = vector.load %arg4[%c0_7, %c0_8] : memref<1x128xf32, #tpu.memory_space<vmem>>, vector<1x128xf32>
    %10 = vector.broadcast %9 : vector<1x128xf32> to vector<256x128xf32>
    %11 = arith.addf %8, %10 : vector<256x128xf32>
    %c0_9 = arith.constant 0 : index
    %c0_10 = arith.constant 0 : index
    %12 = vector.load %arg5[%c0_9, %c0_10] : memref<1x128xf32, #tpu.memory_space<vmem>>, vector<1x128xf32>
    %13 = vector.broadcast %12 : vector<1x128xf32> to vector<256x128xf32>
    %14 = arith.mulf %5, %13 : vector<256x128xf32>
    %15 = arith.addf %11, %14 : vector<256x128xf32>
    %c0_11 = arith.constant 0 : index
    %c0_12 = arith.constant 0 : index
    %16 = vector.load %arg6[%c0_11, %c0_12] : memref<1x128xf32, #tpu.memory_space<vmem>>, vector<1x128xf32>
    %17 = vector.broadcast %16 : vector<1x128xf32> to vector<256x128xf32>
    %18 = arith.addf %15, %17 : vector<256x128xf32>
    %cst = arith.constant 0.000000e+00 : f32
    %19 = vector.broadcast %cst : f32 to vector<256x128xf32>
    %20 = arith.maximumf %18, %19 : vector<256x128xf32>
    %c0_13 = arith.constant 0 : index
    %c0_14 = arith.constant 0 : index
    %c0_15 = arith.constant 0 : index
    %21 = vector.load %arg7[%c0_13, %c0_14, %c0_15] : memref<1x256x128xf32, #tpu.memory_space<vmem>>, vector<1x256x128xf32>
    %22 = vector.shape_cast %21 : vector<1x256x128xf32> to vector<256x128xf32>
    %23 = vector.shape_cast %20 : vector<256x128xf32> to vector<1x256x128xf32>
    tpu.vector_store %arg7[%c0_13, %c0_14, %c0_15], %23 {strides = array<i32>} : memref<1x256x128xf32, #tpu.memory_space<vmem>>, vector<1x256x128xf32>,
    return
  }
  func.func @transform_0(%arg0: i32) -> (i32, i32, i32) {
    %c0_i32 = arith.constant 0 : i32
    %c0_i32_0 = arith.constant 0 : i32
    %c0_i32_1 = arith.constant 0 : i32
    return %arg0, %c0_i32, %c0_i32_0 : i32, i32, i32
  }
  func.func @transform_1(%arg0: i32) -> (i32, i32, i32) {
    %c0_i32 = arith.constant 0 : i32
    %c0_i32_0 = arith.constant 0 : i32
    %c0_i32_1 = arith.constant 0 : i32
    return %arg0, %c0_i32, %c0_i32_0 : i32, i32, i32
  }
  func.func @transform_2(%arg0: i32) -> (i32, i32) {
    %c0_i32 = arith.constant 0 : i32
    %c0_i32_0 = arith.constant 0 : i32
    %c0_i32_1 = arith.constant 0 : i32
    return %c0_i32, %c0_i32_0 : i32, i32
  }
  func.func @transform_3(%arg0: i32) -> (i32, i32) {
    %c0_i32 = arith.constant 0 : i32
    %c0_i32_0 = arith.constant 0 : i32
    %c0_i32_1 = arith.constant 0 : i32
    return %c0_i32, %c0_i32_0 : i32, i32
  }
  func.func @transform_4(%arg0: i32) -> (i32, i32) {
    %c0_i32 = arith.constant 0 : i32
    %c0_i32_0 = arith.constant 0 : i32
    %c0_i32_1 = arith.constant 0 : i32
    return %c0_i32, %c0_i32_0 : i32, i32
  }
  func.func @transform_5(%arg0: i32) -> (i32, i32) {
    %c0_i32 = arith.constant 0 : i32
    %c0_i32_0 = arith.constant 0 : i32
    %c0_i32_1 = arith.constant 0 : i32
    return %c0_i32, %c0_i32_0 : i32, i32
  }
  func.func @transform_6(%arg0: i32) -> (i32, i32, i32) {
    %c0_i32 = arith.constant 0 : i32
    %c0_i32_0 = arith.constant 0 : i32
    %c0_i32_1 = arith.constant 0 : i32
    return %arg0, %c0_i32, %c0_i32_0 : i32, i32, i32
  }
}

</mosaic_0001>

<bundles_post_ra>
// kernel: residual_unit_forward.5
= control target key start
LH: loop header
LB: loop body
LE: loop exit
PB: predicated region body
PF: predicated region fallthrough
CT: control target
= control target key end

     0   :  { %s948_s21 = smov 0   ;;  %s1190_s0 = inlined_call_operand.vmem [shape: bf16[2,256,128], index: 0, kind: input, shape index: {}]   ;;  %s1191_s1 = inlined_call_operand.vmem [shape: bf16[2,256,128], index: 1, kind: input, shape index: {}]   ;;  %s1192_s2 = inlined_call_operand.vmem [shape: f32[1,128], index: 2, kind: input, shape index: {}]   ;;  %s1193_s3 = inlined_call_operand.vmem [shape: f32[1,128], index: 3, kind: input, shape index: {}]   ;;  %s1194_s4 = inlined_call_operand.vmem [shape: f32[1,128], index: 4, kind: input, shape index: {}]   ;;  %s1195_s5 = inlined_call_operand.vmem [shape: f32[1,128], index: 5, kind: input, shape index: {}]   ;;  %s1196_s6 = inlined_call_operand.vmem [shape: f32[2,256,128], index: 6, kind: output, shape index: {}]  }
   0x1 LB: > { %s719_s22 = sadd.s32 4294967295, %s911_s21   ;;  %p723_p0 = scmp.ge.s32.totalorder %s911_s21, 1  ;;  %s911_s21 = sphi %s948_s21, %s16_s21  }
   0x2   : > { %p222_p1 = scmp.lt.s32.totalorder %s911_s21, 3 }
   0x4   : > { %p223_p2 = pnand %p723_p0, %p222_p1 }
   0x5   : > { %p257_p3 = scmp.lt.s32.totalorder (!%p223_p2), %s719_s22, 1 }
   0x6   : > { %226 = sbr.rel (%p223_p2) target bundleno = 87 (0x57), region = 44 }
   0xb   : > { %s1198_s22 = smov (!%p257_p3, %s719_s22), 1  ;;  %v972_v0 = vld [vmem:[%s1192_s2] ss:$0 sm:$0xff] }
   0xc   : > { %s736_s23 = sshll.u32 %s1198_s22, 7  ;;  %v977_v1 = vld [vmem:[%s1194_s4] ss:$0 sm:$0xff]  ;;  %s738_s14 = sshll.u32 %s1198_s22, 8 }
   0xd   : > { %s962_s26 = scalar_lea.vmem %s1190_s0, %s736_s23  ;;  %s967_s29 = scalar_lea.vmem %s1191_s1, %s736_s23  ;;  %v986_v10 = vld [vmem:[%s1193_s3] ss:$0 sm:$0xff] }
   0xe   : > { %v740_v2 = vld [vmem:[%s962_s26] sm:$0xff]   ;;  %v867_v4 = vld [vmem:[%s962_s26 + $0x8] sm:$0xff]   ;;  %v868_v15 = vld [vmem:[%s962_s26 + $0x10] sm:$0xff]   ;;  %s1020_s17 = scalar_lea.vmem %s1196_s6, %s738_s14 }
   0xf   : > { %v804_v3 = vld [vmem:[%s967_s29] sm:$0xff]   ;;  %v741_v5 = vunpack.c.l.bf16 %v740_v2  ;;  %v742_v7 = vunpack.c.h.bf16 %v740_v2  ;;  %v882_v9 = vld [vmem:[%s967_s29 + $0x8] sm:$0xff]   ;;  %v745_v11 = vunpack.c.l.bf16 %v867_v4  ;;  %v746_v13 = vunpack.c.h.bf16 %v867_v4  ;;  %v883_v16 = vld [vmem:[%s967_s29 + $0x10] sm:$0xff]  }
  0x10   : > { %v805_v6 = vunpack.c.l.bf16 %v804_v3  ;;  %v806_v8 = vunpack.c.h.bf16 %v804_v3  ;;  %v809_v12 = vunpack.c.l.bf16 %v882_v9  ;;  %v810_v14 = vunpack.c.h.bf16 %v882_v9  ;;  %v1003_v29 = vld [vmem:[%s1195_s5] ss:$0 sm:$0xff]  ;;  %v869_v34 = vld [vmem:[%s962_s26 + $0x18] sm:$0xff]  }
  0x11   : > { %v407_v17 = vmul.f32 %v741_v5, %v972_v0  ;;  %v408_v19 = vmul.f32 %v742_v7, %v972_v0  ;;  %v409_v21 = vmul.f32 %v745_v11, %v972_v0  ;;  %v410_v23 = vmul.f32 %v746_v13, %v972_v0  ;;  %v884_v39 = vld [vmem:[%s967_s29 + $0x18] sm:$0xff]   ;;  %v870_v56 = vld [vmem:[%s962_s26 + $0x20] sm:$0xff]  }
  0x12   : > { %v485_v18 = vmul.f32 %v805_v6, %v977_v1  ;;  %v486_v20 = vmul.f32 %v806_v8, %v977_v1  ;;  %v487_v22 = vmul.f32 %v809_v12, %v977_v1  ;;  %v488_v24 = vmul.f32 %v810_v14, %v977_v1  ;;  %v885_v57 = vld [vmem:[%s967_s29 + $0x20] sm:$0xff]   ;;  %v871_v8 = vld [vmem:[%s962_s26 + $0x28] sm:$0xff]  }
  0x13   : > { %v446_v25 = vadd.f32 %v986_v10, %v407_v17  ;;  %v447_v26 = vadd.f32 %v986_v10, %v408_v19  ;;  %v749_v27 = vunpack.c.l.bf16 %v868_v15  ;;  %v813_v28 = vunpack.c.l.bf16 %v883_v16  ;;  %v886_v14 = vld [vmem:[%s967_s29 + $0x28] sm:$0xff]  }
  0x14   : > { %v448_v30 = vadd.f32 %v986_v10, %v409_v21  ;;  %v449_v31 = vadd.f32 %v986_v10, %v410_v23  ;;  %v750_v32 = vunpack.c.h.bf16 %v868_v15  ;;  %v814_v33 = vunpack.c.h.bf16 %v883_v16 }
  0x15   : > { %v517_v35 = vadd.f32 %v485_v18, %v446_v25  ;;  %v518_v36 = vadd.f32 %v486_v20, %v447_v26  ;;  %v411_v37 = vmul.f32 %v749_v27, %v972_v0  ;;  %v489_v38 = vmul.f32 %v813_v28, %v977_v1  ;;  %v872_v27 = vld [vmem:[%s962_s26 + $0x30] sm:$0xff]  }
  0x16   : > { %v519_v40 = vadd.f32 %v487_v22, %v448_v30  ;;  %v520_v41 = vadd.f32 %v488_v24, %v449_v31  ;;  %v412_v42 = vmul.f32 %v750_v32, %v972_v0  ;;  %v490_v43 = vmul.f32 %v814_v33, %v977_v1  ;;  %v887_v33 = vld [vmem:[%s967_s29 + $0x30] sm:$0xff]  }
  0x17   : > { %v556_v44 = vadd.f32 %v1003_v29, %v517_v35  ;;  %v557_v45 = vadd.f32 %v1003_v29, %v518_v36  ;;  %v450_v46 = vadd.f32 %v986_v10, %v411_v37  ;;  %v753_v47 = vunpack.c.l.bf16 %v869_v34 }
  0x18   : > { %v558_v48 = vadd.f32 %v1003_v29, %v519_v40  ;;  %v559_v49 = vadd.f32 %v1003_v29, %v520_v41  ;;  %v451_v50 = vadd.f32 %v986_v10, %v412_v42  ;;  %v817_v51 = vunpack.c.l.bf16 %v884_v39 }
  0x19   : > { %v588_v52 = vmax.f32 %v556_v44, 0.0  ;;  %v589_v53 = vmax.f32 %v557_v45, 0.0  ;;  %v521_v54 = vadd.f32 %v489_v38, %v450_v46  ;;  %v413_v55 = vmul.f32 %v753_v47, %v972_v0 }
  0x1a   : > { %v590_v58 = vmax.f32 %v558_v48, 0.0  ;;  %v591_v59 = vmax.f32 %v559_v49, 0.0  ;;  %v522_v60 = vadd.f32 %v490_v43, %v451_v50  ;;  %v491_v61 = vmul.f32 %v817_v51, %v977_v1  ;;  %v873_v50 = vld [vmem:[%s962_s26 + $0x38] sm:$0xff]  }
  0x1b   : > { %620 = vst [vmem:[%s1020_s17] sm:$0xff] %v588_v52  ;;  %621 = vst [vmem:[%s1020_s17 + $0x8] sm:$0xff] %v589_v53  ;;  %v560_v62 = vadd.f32 %v1003_v29, %v521_v54  ;;  %v452_v63 = vadd.f32 %v986_v10, %v413_v55  ;;  %v754_v2 = vunpack.c.h.bf16 %v869_v34  ;;  %v818_v3 = vunpack.c.h.bf16 %v884_v39  ;;  %v888_v51 = vld [vmem:[%s967_s29 + $0x38] sm:$0xff]  }
  0x1c   : > { %622 = vst [vmem:[%s1020_s17 + $0x10] sm:$0xff] %v590_v58  ;;  %623 = vst [vmem:[%s1020_s17 + $0x18] sm:$0xff] %v591_v59  ;;  %v561_v4 = vadd.f32 %v1003_v29, %v522_v60  ;;  %v757_v5 = vunpack.c.l.bf16 %v870_v56  ;;  %v821_v6 = vunpack.c.l.bf16 %v885_v57  ;;  %v758_v7 = vunpack.c.h.bf16 %v870_v56 }
  0x1d   : > { %v592_v9 = vmax.f32 %v560_v62, 0.0  ;;  %v523_v11 = vadd.f32 %v491_v61, %v452_v63  ;;  %v414_v12 = vmul.f32 %v754_v2, %v972_v0  ;;  %v492_v13 = vmul.f32 %v818_v3, %v977_v1  ;;  %v874_v2 = vld [vmem:[%s962_s26 + $0x40] sm:$0xff]  }
  0x1e   : > { %v593_v15 = vmax.f32 %v561_v4, 0.0  ;;  %v415_v16 = vmul.f32 %v757_v5, %v972_v0  ;;  %v493_v17 = vmul.f32 %v821_v6, %v977_v1  ;;  %v822_v18 = vunpack.c.h.bf16 %v885_v57 }
  0x1f   : > { %624 = vst [vmem:[%s1020_s17 + $0x20] sm:$0xff] %v592_v9  ;;  %v562_v19 = vadd.f32 %v1003_v29, %v523_v11  ;;  %v453_v20 = vadd.f32 %v986_v10, %v414_v12  ;;  %v416_v21 = vmul.f32 %v758_v7, %v972_v0  ;;  %v761_v22 = vunpack.c.l.bf16 %v871_v8  ;;  %v889_v7 = vld [vmem:[%s967_s29 + $0x40] sm:$0xff]  }
  0x20   : > { %625 = vst [vmem:[%s1020_s17 + $0x28] sm:$0xff] %v593_v15  ;;  %v454_v23 = vadd.f32 %v986_v10, %v415_v16  ;;  %v494_v24 = vmul.f32 %v822_v18, %v977_v1  ;;  %v825_v25 = vunpack.c.l.bf16 %v886_v14  ;;  %v762_v26 = vunpack.c.h.bf16 %v871_v8 }
  0x21   : > { %v594_v28 = vmax.f32 %v562_v19, 0.0  ;;  %v524_v30 = vadd.f32 %v492_v13, %v453_v20  ;;  %v455_v31 = vadd.f32 %v986_v10, %v416_v21  ;;  %v417_v32 = vmul.f32 %v761_v22, %v972_v0  ;;  %v875_v21 = vld [vmem:[%s962_s26 + $0x48] sm:$0xff]  }
  0x22   : > { %v525_v34 = vadd.f32 %v493_v17, %v454_v23  ;;  %v495_v35 = vmul.f32 %v825_v25, %v977_v1  ;;  %v826_v36 = vunpack.c.h.bf16 %v886_v14  ;;  %v418_v37 = vmul.f32 %v762_v26, %v972_v0  ;;  %v890_v26 = vld [vmem:[%s967_s29 + $0x48] sm:$0xff]  }
  0x23   : > { %626 = vst [vmem:[%s1020_s17 + $0x30] sm:$0xff] %v594_v28  ;;  %v563_v38 = vadd.f32 %v1003_v29, %v524_v30  ;;  %v526_v39 = vadd.f32 %v494_v24, %v455_v31  ;;  %v456_v40 = vadd.f32 %v986_v10, %v417_v32  ;;  %v765_v41 = vunpack.c.l.bf16 %v872_v27 }
  0x24   : > { %v564_v42 = vadd.f32 %v1003_v29, %v525_v34  ;;  %v457_v43 = vadd.f32 %v986_v10, %v418_v37  ;;  %v496_v44 = vmul.f32 %v826_v36, %v977_v1  ;;  %v829_v45 = vunpack.c.l.bf16 %v887_v33 }
  0x25   : > { %v595_v46 = vmax.f32 %v563_v38, 0.0  ;;  %v565_v47 = vadd.f32 %v1003_v29, %v526_v39  ;;  %v527_v48 = vadd.f32 %v495_v35, %v456_v40  ;;  %v419_v49 = vmul.f32 %v765_v41, %v972_v0 }
  0x26   : > { %v596_v52 = vmax.f32 %v564_v42, 0.0  ;;  %v528_v53 = vadd.f32 %v496_v44, %v457_v43  ;;  %v497_v54 = vmul.f32 %v829_v45, %v977_v1  ;;  %v766_v55 = vunpack.c.h.bf16 %v872_v27  ;;  %v876_v44 = vld [vmem:[%s962_s26 + $0x50] sm:$0xff]  }
  0x27   : > { %627 = vst [vmem:[%s1020_s17 + $0x38] sm:$0xff] %v595_v46  ;;  %v597_v56 = vmax.f32 %v565_v47, 0.0  ;;  %v566_v57 = vadd.f32 %v1003_v29, %v527_v48  ;;  %v458_v58 = vadd.f32 %v986_v10, %v419_v49  ;;  %v830_v59 = vunpack.c.h.bf16 %v887_v33  ;;  %v891_v45 = vld [vmem:[%s967_s29 + $0x50] sm:$0xff]  }
  0x28   : > { %628 = vst [vmem:[%s1020_s17 + $0x40] sm:$0xff] %v596_v52  ;;  %v567_v60 = vadd.f32 %v1003_v29, %v528_v53  ;;  %v420_v61 = vmul.f32 %v766_v55, %v972_v0  ;;  %v769_v62 = vunpack.c.l.bf16 %v873_v50  ;;  %v833_v63 = vunpack.c.l.bf16 %v888_v51 }
  0x29   : > { %629 = vst [vmem:[%s1020_s17 + $0x48] sm:$0xff] %v597_v56  ;;  %v598_v3 = vmax.f32 %v566_v57, 0.0  ;;  %v529_v4 = vadd.f32 %v497_v54, %v458_v58  ;;  %v498_v5 = vmul.f32 %v830_v59, %v977_v1  ;;  %v770_v6 = vunpack.c.h.bf16 %v873_v50  ;;  %v877_v58 = vld [vmem:[%s962_s26 + $0x58] sm:$0xff]  }
  0x2a   : > { %v599_v8 = vmax.f32 %v567_v60, 0.0  ;;  %v459_v9 = vadd.f32 %v986_v10, %v420_v61  ;;  %v421_v11 = vmul.f32 %v769_v62, %v972_v0  ;;  %v499_v12 = vmul.f32 %v833_v63, %v977_v1  ;;  %v892_v63 = vld [vmem:[%s967_s29 + $0x58] sm:$0xff]  }
  0x2b   : > { %630 = vst [vmem:[%s1020_s17 + $0x50] sm:$0xff] %v598_v3  ;;  %v568_v13 = vadd.f32 %v1003_v29, %v529_v4  ;;  %v834_v14 = vunpack.c.h.bf16 %v888_v51  ;;  %v422_v15 = vmul.f32 %v770_v6, %v972_v0  ;;  %v773_v16 = vunpack.c.l.bf16 %v874_v2 }
  0x2c   : > { %631 = vst [vmem:[%s1020_s17 + $0x58] sm:$0xff] %v599_v8  ;;  %v530_v17 = vadd.f32 %v498_v5, %v459_v9  ;;  %v460_v18 = vadd.f32 %v986_v10, %v421_v11  ;;  %v837_v19 = vunpack.c.l.bf16 %v889_v7  ;;  %v774_v20 = vunpack.c.h.bf16 %v874_v2 }
  0x2d   : > { %v600_v22 = vmax.f32 %v568_v13, 0.0  ;;  %v461_v23 = vadd.f32 %v986_v10, %v422_v15  ;;  %v500_v24 = vmul.f32 %v834_v14, %v977_v1  ;;  %v423_v25 = vmul.f32 %v773_v16, %v972_v0  ;;  %v878_v15 = vld [vmem:[%s962_s26 + $0x60] sm:$0xff]  }
  0x2e   : > { %v569_v27 = vadd.f32 %v1003_v29, %v530_v17  ;;  %v531_v28 = vadd.f32 %v499_v12, %v460_v18  ;;  %v501_v30 = vmul.f32 %v837_v19, %v977_v1  ;;  %v838_v31 = vunpack.c.h.bf16 %v889_v7 }
  0x2f   : > { %632 = vst [vmem:[%s1020_s17 + $0x60] sm:$0xff] %v600_v22  ;;  %v532_v32 = vadd.f32 %v500_v24, %v461_v23  ;;  %v462_v33 = vadd.f32 %v986_v10, %v423_v25  ;;  %v424_v34 = vmul.f32 %v774_v20, %v972_v0  ;;  %v777_v35 = vunpack.c.l.bf16 %v875_v21  ;;  %v893_v20 = vld [vmem:[%s967_s29 + $0x60] sm:$0xff]  }
  0x30   : > { %v601_v36 = vmax.f32 %v569_v27, 0.0  ;;  %v570_v37 = vadd.f32 %v1003_v29, %v531_v28  ;;  %v502_v38 = vmul.f32 %v838_v31, %v977_v1  ;;  %v841_v39 = vunpack.c.l.bf16 %v890_v26 }
  0x31   : > { %v571_v40 = vadd.f32 %v1003_v29, %v532_v32  ;;  %v533_v41 = vadd.f32 %v501_v30, %v462_v33  ;;  %v463_v42 = vadd.f32 %v986_v10, %v424_v34  ;;  %v425_v43 = vmul.f32 %v777_v35, %v972_v0 }
  0x32   : > { %633 = vst [vmem:[%s1020_s17 + $0x68] sm:$0xff] %v601_v36  ;;  %v602_v46 = vmax.f32 %v570_v37, 0.0  ;;  %v503_v47 = vmul.f32 %v841_v39, %v977_v1  ;;  %v778_v48 = vunpack.c.h.bf16 %v875_v21  ;;  %v842_v49 = vunpack.c.h.bf16 %v890_v26  ;;  %v894_v39 = vld [vmem:[%s967_s29 + $0x68] sm:$0xff]  }
  0x33   : > { %v603_v50 = vmax.f32 %v571_v40, 0.0  ;;  %v572_v51 = vadd.f32 %v1003_v29, %v533_v41  ;;  %v534_v52 = vadd.f32 %v502_v38, %v463_v42  ;;  %v464_v53 = vadd.f32 %v986_v10, %v425_v43  ;;  %v879_v38 = vld [vmem:[%s962_s26 + $0x68] sm:$0xff]  }
  0x34   : > { %634 = vst [vmem:[%s1020_s17 + $0x70] sm:$0xff] %v602_v46  ;;  %v426_v54 = vmul.f32 %v778_v48, %v972_v0  ;;  %v504_v55 = vmul.f32 %v842_v49, %v977_v1  ;;  %v781_v56 = vunpack.c.l.bf16 %v876_v44  ;;  %v845_v57 = vunpack.c.l.bf16 %v891_v45 }
  0x35   : > { %635 = vst [vmem:[%s1020_s17 + $0x78] sm:$0xff] %v603_v50  ;;  %v604_v59 = vmax.f32 %v572_v51, 0.0  ;;  %v573_v60 = vadd.f32 %v1003_v29, %v534_v52  ;;  %v535_v61 = vadd.f32 %v503_v47, %v464_v53  ;;  %v782_v62 = vunpack.c.h.bf16 %v876_v44  ;;  %v880_v52 = vld [vmem:[%s962_s26 + $0x70] sm:$0xff]  }
  0x36   : > { %v465_v2 = vadd.f32 %v986_v10, %v426_v54  ;;  %v427_v3 = vmul.f32 %v781_v56, %v972_v0  ;;  %v505_v4 = vmul.f32 %v845_v57, %v977_v1  ;;  %v846_v5 = vunpack.c.h.bf16 %v891_v45  ;;  %v895_v57 = vld [vmem:[%s967_s29 + $0x70] sm:$0xff]  }
  0x37   : > { %636 = vst [vmem:[%s1020_s17 + $0x80] sm:$0xff] %v604_v59  ;;  %v605_v6 = vmax.f32 %v573_v60, 0.0  ;;  %v574_v7 = vadd.f32 %v1003_v29, %v535_v61  ;;  %v428_v8 = vmul.f32 %v782_v62, %v972_v0  ;;  %v785_v9 = vunpack.c.l.bf16 %v877_v58 }
  0x38   : > { %v536_v11 = vadd.f32 %v504_v55, %v465_v2  ;;  %v466_v12 = vadd.f32 %v986_v10, %v427_v3  ;;  %v506_v13 = vmul.f32 %v846_v5, %v977_v1  ;;  %v849_v14 = vunpack.c.l.bf16 %v892_v63 }
  0x39   : > { %637 = vst [vmem:[%s1020_s17 + $0x88] sm:$0xff] %v605_v6  ;;  %v606_v16 = vmax.f32 %v574_v7, 0.0  ;;  %v467_v17 = vadd.f32 %v986_v10, %v428_v8  ;;  %v429_v18 = vmul.f32 %v785_v9, %v972_v0  ;;  %v786_v19 = vunpack.c.h.bf16 %v877_v58  ;;  %v881_v8 = vld [vmem:[%s962_s26 + $0x78] sm:$0xff]  }
  0x3a   : > { %v575_v21 = vadd.f32 %v1003_v29, %v536_v11  ;;  %v537_v22 = vadd.f32 %v505_v4, %v466_v12  ;;  %v507_v23 = vmul.f32 %v849_v14, %v977_v1  ;;  %v850_v24 = vunpack.c.h.bf16 %v892_v63  ;;  %v896_v14 = vld [vmem:[%s967_s29 + $0x78] sm:$0xff]  }
  0x3b   : > { %638 = vst [vmem:[%s1020_s17 + $0x90] sm:$0xff] %v606_v16  ;;  %v538_v25 = vadd.f32 %v506_v13, %v467_v17  ;;  %v468_v26 = vadd.f32 %v986_v10, %v429_v18  ;;  %v430_v27 = vmul.f32 %v786_v19, %v972_v0  ;;  %v789_v28 = vunpack.c.l.bf16 %v878_v15 }
  0x3c   : > { %v607_v30 = vmax.f32 %v575_v21, 0.0  ;;  %v576_v31 = vadd.f32 %v1003_v29, %v537_v22  ;;  %v508_v32 = vmul.f32 %v850_v24, %v977_v1  ;;  %v853_v33 = vunpack.c.l.bf16 %v893_v20 }
  0x3d   : > { %v577_v34 = vadd.f32 %v1003_v29, %v538_v25  ;;  %v539_v35 = vadd.f32 %v507_v23, %v468_v26  ;;  %v469_v36 = vadd.f32 %v986_v10, %v430_v27  ;;  %v431_v37 = vmul.f32 %v789_v28, %v972_v0 }
  0x3e   : > { %639 = vst [vmem:[%s1020_s17 + $0x98] sm:$0xff] %v607_v30  ;;  %v608_v40 = vmax.f32 %v576_v31, 0.0  ;;  %v509_v41 = vmul.f32 %v853_v33, %v977_v1  ;;  %v790_v42 = vunpack.c.h.bf16 %v878_v15  ;;  %v854_v43 = vunpack.c.h.bf16 %v893_v20 }
  0x3f   : > { %v609_v44 = vmax.f32 %v577_v34, 0.0  ;;  %v578_v45 = vadd.f32 %v1003_v29, %v539_v35  ;;  %v540_v46 = vadd.f32 %v508_v32, %v469_v36  ;;  %v470_v47 = vadd.f32 %v986_v10, %v431_v37 }
  0x40   : > { %640 = vst [vmem:[%s1020_s17 + $0xa0] sm:$0xff] %v608_v40  ;;  %v432_v48 = vmul.f32 %v790_v42, %v972_v0  ;;  %v510_v49 = vmul.f32 %v854_v43, %v977_v1  ;;  %v793_v50 = vunpack.c.l.bf16 %v879_v38  ;;  %v857_v51 = vunpack.c.l.bf16 %v894_v39 }
  0x41   : > { %641 = vst [vmem:[%s1020_s17 + $0xa8] sm:$0xff] %v609_v44  ;;  %v610_v53 = vmax.f32 %v578_v45, 0.0  ;;  %v579_v54 = vadd.f32 %v1003_v29, %v540_v46  ;;  %v541_v55 = vadd.f32 %v509_v41, %v470_v47  ;;  %v794_v56 = vunpack.c.h.bf16 %v879_v38 }
  0x42   : > { %v471_v58 = vadd.f32 %v986_v10, %v432_v48  ;;  %v433_v59 = vmul.f32 %v793_v50, %v972_v0  ;;  %v511_v60 = vmul.f32 %v857_v51, %v977_v1  ;;  %v858_v61 = vunpack.c.h.bf16 %v894_v39 }
  0x43   : > { %642 = vst [vmem:[%s1020_s17 + $0xb0] sm:$0xff] %v610_v53  ;;  %v611_v62 = vmax.f32 %v579_v54, 0.0  ;;  %v580_v63 = vadd.f32 %v1003_v29, %v541_v55  ;;  %v434_v2 = vmul.f32 %v794_v56, %v972_v0  ;;  %v797_v3 = vunpack.c.l.bf16 %v880_v52 }
  0x44   : > { %v542_v4 = vadd.f32 %v510_v49, %v471_v58  ;;  %v472_v5 = vadd.f32 %v986_v10, %v433_v59  ;;  %v512_v6 = vmul.f32 %v858_v61, %v977_v1  ;;  %v861_v7 = vunpack.c.l.bf16 %v895_v57 }
  0x45   : > { %643 = vst [vmem:[%s1020_s17 + $0xb8] sm:$0xff] %v611_v62  ;;  %v612_v9 = vmax.f32 %v580_v63, 0.0  ;;  %v473_v11 = vadd.f32 %v986_v10, %v434_v2  ;;  %v435_v12 = vmul.f32 %v797_v3, %v972_v0  ;;  %v798_v13 = vunpack.c.h.bf16 %v880_v52 }
  0x46   : > { %v581_v15 = vadd.f32 %v1003_v29, %v542_v4  ;;  %v543_v16 = vadd.f32 %v511_v60, %v472_v5  ;;  %v513_v17 = vmul.f32 %v861_v7, %v977_v1  ;;  %v862_v18 = vunpack.c.h.bf16 %v895_v57 }
  0x47   : > { %644 = vst [vmem:[%s1020_s17 + $0xc0] sm:$0xff] %v612_v9  ;;  %v544_v19 = vadd.f32 %v512_v6, %v473_v11  ;;  %v474_v20 = vadd.f32 %v986_v10, %v435_v12  ;;  %v436_v21 = vmul.f32 %v798_v13, %v972_v0  ;;  %v801_v22 = vunpack.c.l.bf16 %v881_v8 }
  0x48   : > { %v613_v23 = vmax.f32 %v581_v15, 0.0  ;;  %v582_v24 = vadd.f32 %v1003_v29, %v543_v16  ;;  %v514_v25 = vmul.f32 %v862_v18, %v977_v1  ;;  %v865_v26 = vunpack.c.l.bf16 %v896_v14 }
  0x49   : > { %v583_v27 = vadd.f32 %v1003_v29, %v544_v19  ;;  %v545_v28 = vadd.f32 %v513_v17, %v474_v20  ;;  %v475_v30 = vadd.f32 %v986_v10, %v436_v21  ;;  %v437_v31 = vmul.f32 %v801_v22, %v972_v0 }
  0x4a   : > { %645 = vst [vmem:[%s1020_s17 + $0xc8] sm:$0xff] %v613_v23  ;;  %v614_v32 = vmax.f32 %v582_v24, 0.0  ;;  %v515_v33 = vmul.f32 %v865_v26, %v977_v1  ;;  %v802_v34 = vunpack.c.h.bf16 %v881_v8  ;;  %v866_v35 = vunpack.c.h.bf16 %v896_v14 }
  0x4b   : > { %v615_v36 = vmax.f32 %v583_v27, 0.0  ;;  %v584_v37 = vadd.f32 %v1003_v29, %v545_v28  ;;  %v546_v38 = vadd.f32 %v514_v25, %v475_v30  ;;  %v476_v39 = vadd.f32 %v986_v10, %v437_v31 }
  0x4c   : > { %646 = vst [vmem:[%s1020_s17 + $0xd0] sm:$0xff] %v614_v32  ;;  %v438_v40 = vmul.f32 %v802_v34, %v972_v0  ;;  %v516_v41 = vmul.f32 %v866_v35, %v977_v1 }
  0x4d   : > { %647 = vst [vmem:[%s1020_s17 + $0xd8] sm:$0xff] %v615_v36  ;;  %v616_v42 = vmax.f32 %v584_v37, 0.0  ;;  %v585_v43 = vadd.f32 %v1003_v29, %v546_v38  ;;  %v547_v44 = vadd.f32 %v515_v33, %v476_v39 }
  0x4e   : > { %v477_v45 = vadd.f32 %v986_v10, %v438_v40 }
  0x4f   : > { %648 = vst [vmem:[%s1020_s17 + $0xe0] sm:$0xff] %v616_v42  ;;  %v617_v46 = vmax.f32 %v585_v43, 0.0  ;;  %v586_v47 = vadd.f32 %v1003_v29, %v547_v44 }
  0x50   : > { %v548_v48 = vadd.f32 %v516_v41, %v477_v45 }
  0x51   : > { %649 = vst [vmem:[%s1020_s17 + $0xe8] sm:$0xff] %v617_v46  ;;  %v618_v49 = vmax.f32 %v586_v47, 0.0 }
  0x52   : > { %v587_v50 = vadd.f32 %v1003_v29, %v548_v48 }
  0x53   : > { %650 = vst [vmem:[%s1020_s17 + $0xf0] sm:$0xff] %v618_v49 }
  0x54   : > { %v619_v0 = vmax.f32 %v587_v50, 0.0 }
  0x56   : > { %651 = vst [vmem:[%s1020_s17 + $0xf8] sm:$0xff] %v619_v0 }
  0x57 PF: > { %s16_s21 = sadd.s32 1, %s911_s21  }
  0x58   : > { %p13_p4 = scmp.ge.s32.totalorder %s16_s21, 4  }
  0x5a   :  { %15 = sbr.rel (!%p13_p4) target bundleno = 1 (0x1), region = 77 }

// kernel: residual_unit_forward.4
= control target key start
LH: loop header
LB: loop body
LE: loop exit
PB: predicated region body
PF: predicated region fallthrough
CT: control target
= control target key end

     0   :  { %s4838_s21 = smov 0   ;;  %s5962_s0 = inlined_call_operand.vmem [shape: bf16[2,16,16,128], index: 0, kind: input, shape index: {}]   ;;  %s5963_s1 = inlined_call_operand.vmem [shape: bf16[9,128,128], index: 1, kind: input, shape index: {}]   ;;  %s5964_s2 = inlined_call_operand.vmem [shape: f32[1,128], index: 2, kind: input, shape index: {}]   ;;  %s5965_s3 = inlined_call_operand.vmem [shape: f32[1,128], index: 3, kind: input, shape index: {}]   ;;  %s5966_s4 = inlined_call_operand.vmem [shape: bf16[2,256,128], index: 4, kind: output, shape index: {0}]   ;;  %s5967_s5 = inlined_call_operand.vmem [shape: f32[2,1,128], index: 5, kind: output, shape index: {1}]   ;;  %s5968_s6 = inlined_call_operand.vmem [shape: f32[2,1,128], index: 6, kind: output, shape index: {2}]  }
   0x1 LB: > { %s3594_s22 = sadd.s32 4294967295, %s4799_s21   ;;  %p3598_p0 = scmp.ge.s32.totalorder %s4799_s21, 1  ;;  %s4799_s21 = sphi %s4838_s21, %s17_s21  }
   0x2   : > { %p217_p1 = scmp.lt.s32.totalorder %s4799_s21, 3 }
   0x4   : > { %p218_p2 = pnand %p3598_p0, %p217_p1 }
   0x6   : > { %221 = sbr.rel (%p218_p2) target bundleno = 549 (0x225), region = 36 }
   0xb   : > { %v4720_v0 = vld [vmem:[%s5963_s1 + $0x78] sm:$0xff]   ;;  %v4852_v1 = vld [vmem:[%s5963_s1 + $0x70] sm:$0xff]   ;;  %v4801_v2 = vmov 0.0   ;;  %p253_p3 = scmp.lt.s32.totalorder %s3594_s22, 1  ;;  %v4722_v3 = vld [vmem:[%s5963_s1 + $0x68] sm:$0xff]  }
   0xc   : > { %270 = vst [vmem:[#allocation2] sm:$0xff] %v4801_v2  ;;  %271 = vst [vmem:[#allocation2 + $0x8] sm:$0xff] %v4801_v2  ;;  %4263 = vmatprep.subr.bf16.mxu0 %v4720_v0  ;;  %4695 = vmatprep.subr.bf16.mxu1 %v4720_v0  ;;  %v4723_v4 = vld [vmem:[%s5963_s1 + $0x60] sm:$0xff]   ;;  %v4724_v21 = vld [vmem:[%s5963_s1 + $0x58] sm:$0xff]  }
   0xd   : > { %272 = vst [vmem:[#allocation2 + $0x10] sm:$0x3] %v4801_v2  ;;  %273 = vst [vmem:[#allocation2 + $0x18] sm:$0xff] %v4801_v2  ;;  %4264 = vmatpush3.bf16.msra.mxu0 %v4720_v0  ;;  %4703 = vmatpush3.bf16.msra.mxu1 %v4720_v0  ;;  %s6028_s22 = smov (!%p253_p3, %s3594_s22), 1  ;;  %v4882_v11 = vld [vmem:[%s5964_s2] ss:$0 sm:$0xff] }
   0xe   : > { %274 = vst [vmem:[#allocation2 + $0x20] sm:$0xff] %v4801_v2  ;;  %275 = vst [vmem:[#allocation2 + $0x28] sm:$0x3] %v4801_v2  ;;  %4265 = vmatprep.subr.bf16.mxu0 %v4852_v1  ;;  %4696 = vmatprep.subr.bf16.mxu1 %v4852_v1  ;;  %s3839_s29 = sshll.u32 %s6028_s22, 7  ;;  %v4887_v12 = vld [vmem:[%s5965_s3] ss:$0 sm:$0xff]  ;;  %s265_s11 = scalar_lea.vmem %s5967_s5, %s6028_s22 }
   0xf   : > { %276 = vst [vmem:[#allocation2 + $0x30] sm:$0xff] %v4801_v2  ;;  %277 = vst [vmem:[#allocation2 + $0x38] sm:$0xff] %v4801_v2  ;;  %s4871_s8 = scalar_lea.vmem %s5962_s0, %s3839_s29  ;;  %v4725_v32 = vld [vmem:[%s5963_s1 + $0x50] sm:$0xff]   ;;  %v4726_v53 = vld [vmem:[%s5963_s1 + $0x48] sm:$0xff]   ;;  %s5869_s9 = scalar_lea.vmem %s5966_s4, %s3839_s29 }
  0x10   : > { %278 = vst [vmem:[#allocation2 + $0x40] sm:$0x3] %v4801_v2  ;;  %279 = vst [vmem:[#allocation2 + $0x48] sm:$0xff] %v4801_v2  ;;  %v4023_v7 = vld [vmem:[%s4871_s8 + $0x38] sm:$0xff]   ;;  %v3874_v13 = vld [vmem:[%s4871_s8] sm:$0xff]   ;;  %s268_s14 = scalar_lea.vmem %s5968_s6, %s6028_s22 }
  0x11   : > { %280 = vst [vmem:[#allocation2 + $0x50] sm:$0xff] %v4801_v2  ;;  %281 = vst [vmem:[#allocation2 + $0x58] sm:$0x3] %v4801_v2  ;;  %4266 = vmatpush3.bf16.msra.mxu0 %v4852_v1  ;;  %4704 = vmatpush3.bf16.msra.mxu1 %v4852_v1  ;;  %v3903_v9 = vunpack.c.l.bf16 %v4023_v7  ;;  %v3904_v10 = vunpack.c.h.bf16 %v4023_v7  ;;  %v3875_v14 = vunpack.c.l.bf16 %v3874_v13  ;;  %v3876_v15 = vunpack.c.h.bf16 %v3874_v13  ;;  %v4024_v16 = vld [vmem:[%s4871_s8 + $0x40] sm:$0xff]   ;;  %v4017_v30 = vld [vmem:[%s4871_s8 + $0x8] sm:$0xff]  }
  0x12   : > { %282 = vst [vmem:[#allocation2 + $0x60] sm:$0xff] %v4801_v2  ;;  %283 = vst [vmem:[#allocation2 + $0x68] sm:$0xff] %v4801_v2  ;;  %4267 = vmatprep.subr.bf16.mxu0 %v4722_v3  ;;  %4697 = vmatprep.subr.bf16.mxu1 %v4722_v3  ;;  %v3907_v19 = vunpack.c.l.bf16 %v4024_v16  ;;  %v3908_v20 = vunpack.c.h.bf16 %v4024_v16  ;;  %v4025_v31 = vld [vmem:[%s4871_s8 + $0x48] sm:$0xff]   ;;  %v3879_v39 = vunpack.c.l.bf16 %v4017_v30  ;;  %v3880_v40 = vunpack.c.h.bf16 %v4017_v30  ;;  %v4018_v41 = vld [vmem:[%s4871_s8 + $0x10] sm:$0xff]  }
  0x13   : > { %284 = vst [vmem:[#allocation2 + $0x70] sm:$0x3] %v4801_v2  ;;  %285 = vst [vmem:[#allocation2 + $0x78] sm:$0xff] %v4801_v2  ;;  %v595_v5 = vld [vmem:[#allocation2 + $0x1] sm:$0xff]  ;;  %v409_v17 = vmul.f32 %v3903_v9, %v4882_v11  ;;  %v410_v18 = vmul.f32 %v3904_v10, %v4882_v11  ;;  %v395_v22 = vmul.f32 %v3875_v14, %v4882_v11  ;;  %v4026_v42 = vld [vmem:[%s4871_s8 + $0x50] sm:$0xff]   ;;  %v3911_v46 = vunpack.c.l.bf16 %v4025_v31 }
  0x14   : > { %286 = vst [vmem:[#allocation2 + $0x80] sm:$0xff] %v4801_v2  ;;  %287 = vst [vmem:[#allocation2 + $0x88] sm:$0x3] %v4801_v2  ;;  %v596_v6 = vld [vmem:[#allocation2 + $0x9] sm:$0xff]  ;;  %v396_v23 = vmul.f32 %v3876_v15, %v4882_v11  ;;  %v411_v26 = vmul.f32 %v3907_v19, %v4882_v11  ;;  %v412_v27 = vmul.f32 %v3908_v20, %v4882_v11  ;;  %v3912_v49 = vunpack.c.h.bf16 %v4025_v31  ;;  %v4019_v62 = vld [vmem:[%s4871_s8 + $0x18] sm:$0xff]  }
  0x15   : > { %288 = vst [vmem:[#allocation2 + $0x90] sm:$0xff] %v4801_v2  ;;  %289 = vst [vmem:[#allocation2 + $0x98] sm:$0xff] %v4801_v2  ;;  %v627_v8 = vpack.c.bf16 %v596_v6, %v595_v5  ;;  %4268 = vmatpush3.bf16.msra.mxu0 %v4722_v3  ;;  %4705 = vmatpush3.bf16.msra.mxu1 %v4722_v3  ;;  %v448_v24 = vadd.f32 %v4887_v12, %v409_v17  ;;  %v3883_v51 = vunpack.c.l.bf16 %v4018_v41  ;;  %v4027_v7 = vld [vmem:[%s4871_s8 + $0x58] sm:$0xff]  }
  0x16   : > { %290 = vst [vmem:[#allocation2 + $0xa0] sm:$0x3] %v4801_v2  ;;  %291 = vst [vmem:[#allocation2 + $0xa8] sm:$0xff] %v4801_v2  ;;  %4269 = vmatprep.subr.bf16.mxu0 %v4723_v4  ;;  %4698 = vmatprep.subr.bf16.mxu1 %v4723_v4  ;;  %v449_v25 = vadd.f32 %v4887_v12, %v410_v18  ;;  %v4903_v28 = vadd.f32 %v4887_v12, %v395_v22  ;;  %v3884_v52 = vunpack.c.h.bf16 %v4018_v41  ;;  %v4020_v18 = vld [vmem:[%s4871_s8 + $0x20] sm:$0xff]  }
  0x17   : > { %292 = vst [vmem:[#allocation2 + $0xb0] sm:$0xff] %v4801_v2  ;;  %293 = vst [vmem:[#allocation2 + $0xb8] sm:$0x3] %v4801_v2  ;;  %4279 = vmatprep.mubr.bf16.mxu0 %v627_v8  ;;  %v4906_v29 = vadd.f32 %v4887_v12, %v396_v23  ;;  %v480_v33 = vmax.f32 %v448_v24, 0.0  ;;  %v4914_v35 = vadd.f32 %v4887_v12, %v411_v26  ;;  %v3915_v57 = vunpack.c.l.bf16 %v4026_v42  ;;  %v4727_v8 = vld [vmem:[%s5963_s1 + $0x40] sm:$0xff]  }
  0x18   : > { %294 = vst [vmem:[#allocation2 + $0xc0] sm:$0xff] %v4801_v2  ;;  %295 = vst [vmem:[#allocation2 + $0xc8] sm:$0xff] %v4801_v2  ;;  %v481_v34 = vmax.f32 %v449_v25, 0.0  ;;  %v4917_v36 = vadd.f32 %v4887_v12, %v412_v27  ;;  %v466_v37 = vmax.f32 %v4903_v28, 0.0  ;;  %v397_v47 = vmul.f32 %v3879_v39, %v4882_v11  ;;  %v4028_v23 = vld [vmem:[%s4871_s8 + $0x60] sm:$0xff]   ;;  %v4728_v25 = vld [vmem:[%s5963_s1 + $0x38] sm:$0xff]  }
  0x19   : > { %296 = vst [vmem:[#allocation2 + $0xd0] sm:$0x3] %v4801_v2  ;;  %297 = vst [vmem:[#allocation2 + $0xd8] sm:$0xff] %v4801_v2  ;;  %4270 = vmatpush3.bf16.msra.mxu0 %v4723_v4  ;;  %4706 = vmatpush3.bf16.msra.mxu1 %v4723_v4  ;;  %v467_v38 = vmax.f32 %v4906_v29, 0.0  ;;  %v482_v44 = vmax.f32 %v4914_v35, 0.0  ;;  %v398_v48 = vmul.f32 %v3880_v40, %v4882_v11  ;;  %v3916_v61 = vunpack.c.h.bf16 %v4026_v42  ;;  %v4729_v29 = vld [vmem:[%s5963_s1 + $0xb8] sm:$0xff]  }
  0x1a   : > { %298 = vst [vmem:[#allocation2 + $0xe0] sm:$0xff] %v4801_v2  ;;  %299 = vst [vmem:[#allocation2 + $0xe8] sm:$0x3] %v4801_v2  ;;  %4271 = vmatprep.subr.bf16.mxu0 %v4724_v21  ;;  %4699 = vmatprep.subr.bf16.mxu1 %v4724_v21  ;;  %v635_v43 = vpack.c.bf16 %v481_v34, %v480_v33  ;;  %v483_v45 = vmax.f32 %v4917_v36, 0.0  ;;  %v413_v50 = vmul.f32 %v3911_v46, %v4882_v11 }
  0x1b   : > { %300 = vst [vmem:[#allocation2 + $0xf0] sm:$0xff] %v4801_v2  ;;  %301 = vst [vmem:[#allocation2 + $0xf8] sm:$0xff] %v4801_v2  ;;  %v436_v54 = vadd.f32 %v4887_v12, %v397_v47  ;;  %v437_v55 = vadd.f32 %v4887_v12, %v398_v48  ;;  %v414_v56 = vmul.f32 %v3912_v49, %v4882_v11  ;;  %v3887_v13 = vunpack.c.l.bf16 %v4019_v62  ;;  %v4731_v48 = vld [vmem:[%s5963_s1 + $0xb0] sm:$0xff]  }
  0x1c   : > { %302 = vst [vmem:[#allocation2 + $0x100] sm:$0x3] %v4801_v2  ;;  %303 = vst [vmem:[#allocation2 + $0x108] sm:$0xff] %v4801_v2  ;;  %4295 = vmatprep.mubr.bf16.mxu1 %v635_v43  ;;  %v4935_v58 = vadd.f32 %v4887_v12, %v413_v50  ;;  %v399_v59 = vmul.f32 %v3883_v51, %v4882_v11  ;;  %v400_v60 = vmul.f32 %v3884_v52, %v4882_v11  ;;  %v4730_v43 = vld [vmem:[%s5963_s1 + $0x30] sm:$0xff]  }
  0x1d   : > { %304 = vst [vmem:[#allocation2 + $0x110] sm:$0xff] %v4801_v2  ;;  %305 = vst [vmem:[#allocation2 + $0x118] sm:$0x3] %v4801_v2  ;;  %4272 = vmatpush3.bf16.msra.mxu0 %v4724_v21  ;;  %4707 = vmatpush3.bf16.msra.mxu1 %v4724_v21  ;;  %v468_v63 = vmax.f32 %v436_v54, 0.0  ;;  %v469_v0 = vmax.f32 %v437_v55, 0.0  ;;  %v4941_v1 = vadd.f32 %v4887_v12, %v414_v56  ;;  %v3888_v17 = vunpack.c.h.bf16 %v4019_v62  ;;  %v4022_v62 = vld [vmem:[%s4871_s8 + $0x30] sm:$0xff]  }
  0x1e   : > { %306 = vst [vmem:[#allocation2 + $0x120] sm:$0xff] %v4801_v2  ;;  %307 = vst [vmem:[#allocation2 + $0x128] sm:$0xff] %v4801_v2  ;;  %4273 = vmatprep.subr.bf16.mxu0 %v4725_v32  ;;  %4700 = vmatprep.subr.bf16.mxu1 %v4725_v32  ;;  %v484_v3 = vmax.f32 %v4935_v58, 0.0  ;;  %v4946_v4 = vadd.f32 %v4887_v12, %v399_v59  ;;  %v4949_v5 = vadd.f32 %v4887_v12, %v400_v60 }
  0x1f   : > { %308 = vst [vmem:[#allocation2 + $0x130] sm:$0x3] %v4801_v2  ;;  %309 = vst [vmem:[#allocation2 + $0x138] sm:$0xff] %v4801_v2  ;;  %v416_v6 = vmul.f32 %v3916_v61, %v4882_v11  ;;  %v485_v9 = vmax.f32 %v4941_v1, 0.0  ;;  %v4968_v19 = vpack.c.bf16 %v467_v38, %v466_v37  ;;  %v401_v21 = vmul.f32 %v3887_v13, %v4882_v11 }
  0x20   : > { %310 = vst [vmem:[#allocation2 + $0x140] sm:$0xff] %v4801_v2  ;;  %311 = vst [vmem:[#allocation2 + $0x148] sm:$0x3] %v4801_v2  ;;  %v470_v14 = vmax.f32 %v4946_v4, 0.0  ;;  %v471_v15 = vmax.f32 %v4949_v5, 0.0  ;;  %v3919_v22 = vunpack.c.l.bf16 %v4027_v7  ;;  %v636_v24 = vpack.c.bf16 %v483_v45, %v482_v44  ;;  %v4732_v4 = vld [vmem:[%s5963_s1 + $0x28] sm:$0xff]  }
  0x21   : > { %312 = vst [vmem:[#allocation2 + $0x150] sm:$0xff] %v4801_v2  ;;  %313 = vst [vmem:[#allocation2 + $0x158] sm:$0xff] %v4801_v2  ;;  %4274 = vmatpush3.bf16.msra.mxu0 %v4725_v32  ;;  %4708 = vmatpush3.bf16.msra.mxu1 %v4725_v32  ;;  %v4965_v16 = vadd.f32 %v4887_v12, %v416_v6  ;;  %v402_v27 = vmul.f32 %v3888_v17, %v4882_v11  ;;  %v3920_v28 = vunpack.c.h.bf16 %v4027_v7  ;;  %v4733_v5 = vld [vmem:[%s5963_s1 + $0xa8] sm:$0xff]  }
  0x22   : > { %314 = vst [vmem:[#allocation2 + $0x160] sm:$0x3] %v4801_v2  ;;  %315 = vst [vmem:[#allocation2 + $0x168] sm:$0xff] %v4801_v2  ;;  %4275 = vmatprep.subr.bf16.mxu0 %v4726_v53  ;;  %4701 = vmatprep.subr.bf16.mxu1 %v4726_v53  ;;  %v4988_v30 = vadd.f32 %v4887_v12, %v401_v21  ;;  %v417_v31 = vmul.f32 %v3919_v22, %v4882_v11  ;;  %v3891_v32 = vunpack.c.l.bf16 %v4020_v18 }
  0x23   : > { %316 = vst [vmem:[#allocation2 + $0x170] sm:$0xff] %v4801_v2  ;;  %317 = vst [vmem:[#allocation2 + $0x178] sm:$0x3] %v4801_v2  ;;  %v487_v26 = vmax.f32 %v4965_v16, 0.0  ;;  %v4994_v35 = vadd.f32 %v4887_v12, %v402_v27  ;;  %v418_v36 = vmul.f32 %v3920_v28, %v4882_v11  ;;  %v3924_v46 = vunpack.c.h.bf16 %v4028_v23 }
  0x24   : > { %318 = vst [vmem:[#allocation2 + $0x180] sm:$0xff] %v4801_v2  ;;  %319 = vst [vmem:[#allocation2 + $0x188] sm:$0xff] %v4801_v2  ;;  %v472_v39 = vmax.f32 %v4988_v30, 0.0  ;;  %v5000_v40 = vadd.f32 %v4887_v12, %v417_v31  ;;  %v403_v41 = vmul.f32 %v3891_v32, %v4882_v11  ;;  %v637_v54 = vpack.c.bf16 %v485_v9, %v484_v3 }
  0x25   : > { %320 = vst [vmem:[#allocation2 + $0x190] sm:$0x3] %v4801_v2  ;;  %321 = vst [vmem:[#allocation2 + $0x198] sm:$0xff] %v4801_v2  ;;  %4276 = vmatpush3.bf16.msra.mxu0 %v4726_v53  ;;  %4709 = vmatpush3.bf16.msra.mxu1 %v4726_v53  ;;  %v4029_v53 = vld [vmem:[%s4871_s8 + $0x68] sm:$0xff]   ;;  %v420_v56 = vmul.f32 %v3924_v46, %v4882_v11 }
  0x26   : > { %322 = vst [vmem:[#allocation2 + $0x1a0] sm:$0xff] %v4801_v2  ;;  %323 = vst [vmem:[#allocation2 + $0x1a8] sm:$0x3] %v4801_v2  ;;  %v415_v2 = vmul.f32 %v3915_v57, %v4882_v11  ;;  %4277 = vmatprep.subr.bf16.mxu0 %v4727_v8  ;;  %4702 = vmatprep.subr.bf16.mxu1 %v4727_v8  ;;  %v488_v49 = vmax.f32 %v5000_v40, 0.0  ;;  %v5019_v50 = vadd.f32 %v4887_v12, %v403_v41  ;;  %v4736_v41 = vld [vmem:[%s5963_s1 + $0x18] sm:$0xff]  }
  0x27   : > { %513 = vst [vmem:[#allocation2 + $0xc1] sm:$0xff] %v480_v33  ;;  %514 = vst [vmem:[#allocation2 + $0xc9] sm:$0xff] %v481_v34  ;;  %v3892_v33 = vunpack.c.h.bf16 %v4020_v18  ;;  %v4991_v34 = vpack.c.bf16 %v469_v0, %v468_v63 }
  0x28   : > { %499 = vst [vmem:[#allocation2 + $0x19] sm:$0xff] %v466_v37  ;;  %500 = vst [vmem:[#allocation2 + $0x21] sm:$0xff] %v467_v38  ;;  %v4958_v10 = vadd.f32 %v4887_v12, %v415_v2  ;;  %v3923_v37 = vunpack.c.l.bf16 %v4028_v23  ;;  %v4021_v38 = vld [vmem:[%s4871_s8 + $0x28] sm:$0xff]   ;;  %v474_v59 = vmax.f32 %v5019_v50, 0.0  ;;  %v3927_v2 = vunpack.c.l.bf16 %v4029_v53 }
  0x29   : > { %515 = vst [vmem:[#allocation2 + $0xd9] sm:$0xff] %v482_v44  ;;  %516 = vst [vmem:[#allocation2 + $0xe1] sm:$0xff] %v483_v45  ;;  %v404_v42 = vmul.f32 %v3892_v33, %v4882_v11  ;;  %4278 = vmatpush3.bf16.msra.mxu0 %v4727_v8  ;;  %4710 = vmatpush3.bf16.msra.mxu1 %v4727_v8  ;;  %v473_v44 = vmax.f32 %v4994_v35, 0.0  ;;  %v5009_v45 = vadd.f32 %v4887_v12, %v418_v36 }
  0x2a   : > { %501 = vst [vmem:[#allocation2 + $0x31] sm:$0xff] %v468_v63  ;;  %502 = vst [vmem:[#allocation2 + $0x39] sm:$0xff] %v469_v0  ;;  %v486_v20 = vmax.f32 %v4958_v10, 0.0  ;;  %v419_v47 = vmul.f32 %v3923_v37, %v4882_v11  ;;  %4311 = vmatprep.subr.bf16.mxu1 %v4728_v25  ;;  %4359 = vmatprep.subr.bf16.mxu0 %v4729_v29  ;;  %v3895_v52 = vunpack.c.l.bf16 %v4021_v38  ;;  %v3896_v60 = vunpack.c.h.bf16 %v4021_v38 }
  0x2b   : > { %517 = vst [vmem:[#allocation2 + $0xf1] sm:$0xff] %v484_v3  ;;  %518 = vst [vmem:[#allocation2 + $0xf9] sm:$0xff] %v485_v9  ;;  %v5022_v51 = vadd.f32 %v4887_v12, %v404_v42  ;;  %v489_v55 = vmax.f32 %v5009_v45, 0.0  ;;  %v5043_v63 = vpack.c.bf16 %v471_v15, %v470_v14  ;;  %v5046_v0 = vadd.f32 %v4887_v12, %v420_v56  ;;  %v4030_v3 = vld [vmem:[%s4871_s8 + $0x70] sm:$0xff]   ;;  %v4737_v42 = vld [vmem:[%s5963_s1 + $0x98] sm:$0xff]  }
  0x2c   : > { %503 = vst [vmem:[#allocation2 + $0x49] sm:$0xff] %v470_v14  ;;  %504 = vst [vmem:[#allocation2 + $0x51] sm:$0xff] %v471_v15  ;;  %v5030_v57 = vadd.f32 %v4887_v12, %v419_v47  ;;  %4280 = vmatmul.mubr.bf16.vlgmr.msra.gmra.mxu0 %v4968_v19  ;;  %4296 = vmatmul.mubr.bf16.vlgmr.msra.gmra.mxu1 %v636_v24  ;;  %v405_v61 = vmul.f32 %v3895_v52, %v4882_v11  ;;  %v3928_v9 = vunpack.c.h.bf16 %v4029_v53  ;;  %v4740_v52 = vld [vmem:[%s5963_s1 + $0x8] sm:$0xff]  }
  0x2d   : > { %519 = vst [vmem:[#allocation2 + $0x109] sm:$0xff] %v486_v20  ;;  %520 = vst [vmem:[#allocation2 + $0x111] sm:$0xff] %v487_v26  ;;  %v475_v58 = vmax.f32 %v5022_v51, 0.0  ;;  %4312 = vmatpush3.bf16.msra.mxu1 %v4728_v25  ;;  %4360 = vmatpush3.bf16.msra.mxu0 %v4729_v29  ;;  %v638_v6 = vpack.c.bf16 %v487_v26, %v486_v20  ;;  %v406_v7 = vmul.f32 %v3896_v60, %v4882_v11  ;;  %v4734_v25 = vld [vmem:[%s5963_s1 + $0x20] sm:$0xff]   ;;  %v4741_v53 = vld [vmem:[%s5963_s1 + $0x88] sm:$0xff]  }
  0x2e   : > { %505 = vst [vmem:[#allocation2 + $0x61] sm:$0xff] %v472_v39  ;;  %506 = vst [vmem:[#allocation2 + $0x69] sm:$0xff] %v473_v44  ;;  %v490_v1 = vmax.f32 %v5030_v57, 0.0  ;;  %4313 = vmatprep.subr.bf16.mxu1 %v4730_v43  ;;  %4361 = vmatprep.subr.bf16.mxu0 %v4731_v48  ;;  %v5064_v8 = vadd.f32 %v4887_v12, %v405_v61  ;;  %v491_v10 = vmax.f32 %v5046_v0, 0.0  ;;  %v3899_v14 = vunpack.c.l.bf16 %v4022_v62  ;;  %v4735_v26 = vld [vmem:[%s5963_s1 + $0xa0] sm:$0xff]   ;;  %v1079_v57 = vld [vmem:[#allocation2 + $0xa] sm:$0xff] }
  0x2f   : > { %521 = vst [vmem:[#allocation2 + $0x121] sm:$0xff] %v488_v49  ;;  %522 = vst [vmem:[#allocation2 + $0x129] sm:$0xff] %v489_v55  ;;  %4283 = vmatprep.mubr.bf16.mxu0 %v4991_v34  ;;  %4299 = vmatprep.mubr.bf16.mxu1 %v637_v54  ;;  %v421_v13 = vmul.f32 %v3927_v2, %v4882_v11  ;;  %v3900_v15 = vunpack.c.h.bf16 %v4022_v62  ;;  %v445_v16 = vadd.f32 %v4887_v12, %v406_v7  ;;  %v1078_v56 = vld [vmem:[#allocation2 + $0x2] sm:$0xff]  ;;  %v533_v61 = vld [vmem:[#allocation2 + $0x18] sm:$0xff]  ;;  %v4802_v7 = vmov 0.0|0.0  }
  0x30   : > { %507 = vst [vmem:[#allocation2 + $0x79] sm:$0xff] %v474_v59  ;;  %508 = vst [vmem:[#allocation2 + $0x81] sm:$0xff] %v475_v58  ;;  %v476_v17 = vmax.f32 %v5064_v8, 0.0  ;;  %v422_v18 = vmul.f32 %v3928_v9, %v4882_v11  ;;  %v3931_v20 = vunpack.c.l.bf16 %v4030_v3  ;;  %v5076_v21 = vpack.c.bf16 %v473_v44, %v472_v39  ;;  %v534_v62 = vld [vmem:[#allocation2 + $0x20] sm:$0xff]  ;;  %v4744_v2 = vld [vmem:[%s5963_s1 + $0xf8] sm:$0xff]  }
  0x31   : > { %523 = vst [vmem:[#allocation2 + $0x139] sm:$0xff] %v490_v1  ;;  %4314 = vmatpush3.bf16.msra.mxu1 %v4730_v43  ;;  %4362 = vmatpush3.bf16.msra.mxu0 %v4731_v48  ;;  %524 = vst [vmem:[#allocation2 + $0x141] sm:$0xff] %v491_v10  ;;  %v460_v22 = vadd.f32 %v4887_v12, %v421_v13  ;;  %v407_v23 = vmul.f32 %v3899_v14, %v4882_v11  ;;  %v3932_v24 = vunpack.c.h.bf16 %v4030_v3  ;;  %v4738_v48 = vld [vmem:[%s5963_s1 + $0x10] sm:$0xff]   ;;  %v1080_v0 = vld [vmem:[#allocation2 + $0x1a] sm:$0xff] }
  0x32   : > { %4315 = vmatprep.subr.bf16.mxu1 %v4732_v4  ;;  %4363 = vmatprep.subr.bf16.mxu0 %v4733_v5  ;;  %v477_v27 = vmax.f32 %v445_v16, 0.0  ;;  %509 = vst [vmem:[#allocation2 + $0x91] sm:$0xff] %v476_v17  ;;  %v461_v28 = vadd.f32 %v4887_v12, %v422_v18  ;;  %v408_v29 = vmul.f32 %v3900_v15, %v4882_v11  ;;  %v4745_v3 = vld [vmem:[%s5963_s1 + $0x138] sm:$0xff]   ;;  %v4746_v15 = vld [vmem:[%s5963_s1 + $0xf0] sm:$0xff]  }
  0x33   : > { %v423_v30 = vmul.f32 %v3931_v20, %v4882_v11  ;;  %v5091_v31 = vpack.c.bf16 %v489_v55, %v488_v49  ;;  %v492_v32 = vmax.f32 %v460_v22, 0.0  ;;  %v446_v33 = vadd.f32 %v4887_v12, %v407_v23  ;;  %v4739_v49 = vld [vmem:[%s5963_s1 + $0x90] sm:$0xff]   ;;  %v1083_v8 = vld [vmem:[#allocation2 + $0x3a] sm:$0xff]  ;;  %v537_v16 = vld [vmem:[#allocation2 + $0x48] sm:$0xff] }
  0x34   : > { %v424_v35 = vmul.f32 %v3932_v24, %v4882_v11  ;;  %4284 = vmatmul.mubr.bf16.gmra.mxu0 %v5043_v63  ;;  %4300 = vmatmul.mubr.bf16.gmra.mxu1 %v638_v6  ;;  %510 = vst [vmem:[#allocation2 + $0x99] sm:$0xff] %v477_v27  ;;  %v493_v36 = vmax.f32 %v461_v28, 0.0  ;;  %v447_v37 = vadd.f32 %v4887_v12, %v408_v29  ;;  %v535_v6 = vld [vmem:[#allocation2 + $0x30] sm:$0xff]  ;;  %v4749_v28 = vld [vmem:[%s5963_s1 + $0x128] sm:$0xff]  }
  0x35   : > { %v462_v38 = vadd.f32 %v4887_v12, %v423_v30  ;;  %4316 = vmatpush3.bf16.msra.mxu1 %v4732_v4  ;;  %4364 = vmatpush3.bf16.msra.mxu0 %v4733_v5  ;;  %525 = vst [vmem:[#allocation2 + $0x151] sm:$0xff] %v492_v32  ;;  %v478_v39 = vmax.f32 %v446_v33, 0.0  ;;  %v5111_v46 = vpack.c.bf16 %v475_v58, %v474_v59  ;;  %v4742_v59 = vld [vmem:[%s5963_s1] sm:$0xff]   ;;  %v536_v4 = vld [vmem:[#allocation2 + $0x38] sm:$0xff]  ;;  %v1084_v18 = vld [vmem:[#allocation2 + $0x4a] sm:$0xff] }
  0x36   : > { %v463_v40 = vadd.f32 %v4887_v12, %v424_v35  ;;  %4317 = vmatprep.subr.bf16.mxu1 %v4734_v25  ;;  %4365 = vmatprep.subr.bf16.mxu0 %v4735_v26  ;;  %526 = vst [vmem:[#allocation2 + $0x159] sm:$0xff] %v493_v36  ;;  %v479_v43 = vmax.f32 %v447_v37, 0.0  ;;  %v5115_v47 = vpack.c.bf16 %v491_v10, %v490_v1  ;;  %v4743_v58 = vld [vmem:[%s5963_s1 + $0x80] sm:$0xff]   ;;  %v1082_v5 = vld [vmem:[#allocation2 + $0x32] sm:$0xff]  ;;  %v540_v24 = vld [vmem:[#allocation2 + $0x68] sm:$0xff] }
  0x37   : > { %v494_v44 = vmax.f32 %v462_v38, 0.0  ;;  %4287 = vmatprep.mubr.bf16.mxu0 %v5076_v21  ;;  %4303 = vmatprep.mubr.bf16.mxu1 %v5091_v31  ;;  %511 = vst [vmem:[#allocation2 + $0xa9] sm:$0xff] %v478_v39  ;;  %v5123_v50 = vpack.c.bf16 %v477_v27, %v476_v17  ;;  %v5125_v51 = vpack.c.bf16 %v493_v36, %v492_v32  ;;  %v1081_v1 = vld [vmem:[#allocation2 + $0x22] sm:$0xff]  ;;  %v538_v17 = vld [vmem:[#allocation2 + $0x50] sm:$0xff]  ;;  %v541_v35 = vld [vmem:[#allocation2 + $0x78] sm:$0xff] }
  0x38   : > { %v495_v45 = vmax.f32 %v463_v40, 0.0  ;;  %512 = vst [vmem:[#allocation2 + $0xb1] sm:$0xff] %v479_v43  ;;  %v5137_v54 = vpack.c.bf16 %v479_v43, %v478_v39  ;;  %v1110_v60 = vpack.c.bf16 %v1079_v57, %v1078_v56  ;;  %v5155_v9 = vpack.c.bf16 %v534_v62, %v533_v61  ;;  %v1085_v20 = vld [vmem:[#allocation2 + $0x52] sm:$0xff]  ;;  %v539_v23 = vld [vmem:[#allocation2 + $0x60] sm:$0xff]  ;;  %v4748_v27 = vld [vmem:[%s5963_s1 + $0xe8] sm:$0xff]  }
  0x39   : > { %527 = vst [vmem:[#allocation2 + $0x169] sm:$0xff] %v494_v44  ;;  %4318 = vmatpush3.bf16.msra.mxu1 %v4734_v25  ;;  %4366 = vmatpush3.bf16.msra.mxu0 %v4735_v26  ;;  %v5157_v10 = vpack.c.bf16 %v1081_v1, %v1080_v0  ;;  %v5159_v13 = vpack.c.bf16 %v536_v4, %v535_v6  ;;  %v4747_v22 = vld [vmem:[%s5963_s1 + $0x130] sm:$0xff]   ;;  %v1086_v25 = vld [vmem:[#allocation2 + $0x62] sm:$0xff]  ;;  %v1088_v37 = vld [vmem:[#allocation2 + $0x7a] sm:$0xff] }
  0x3a   : > { %528 = vst [vmem:[#allocation2 + $0x171] sm:$0xff] %v495_v45  ;;  %4319 = vmatprep.subr.bf16.mxu1 %v4736_v41  ;;  %4367 = vmatprep.subr.bf16.mxu0 %v4737_v42  ;;  %v5139_v55 = vpack.c.bf16 %v495_v45, %v494_v44  ;;  %v5161_v14 = vpack.c.bf16 %v1083_v8, %v1082_v5  ;;  %v1087_v26 = vld [vmem:[#allocation2 + $0x6a] sm:$0xff]  ;;  %v542_v36 = vld [vmem:[#allocation2 + $0x80] sm:$0xff]  ;;  %v4752_v45 = vld [vmem:[%s5963_s1 + $0xd8] sm:$0xff]  }
  0x3b   : > { %v5179_v29 = vpack.c.bf16 %v538_v17, %v537_v16  ;;  %v5181_v30 = vpack.c.bf16 %v1085_v20, %v1084_v18  ;;  %v5183_v32 = vpack.c.bf16 %v540_v24, %v539_v23  ;;  %v5185_v33 = vpack.c.bf16 %v1087_v26, %v1086_v25  ;;  %v1089_v38 = vld [vmem:[#allocation2 + $0x82] sm:$0xff]  ;;  %v1090_v43 = vld [vmem:[#allocation2 + $0x92] sm:$0xff]  ;;  %v1091_v44 = vld [vmem:[#allocation2 + $0x9a] sm:$0xff] }
  0x3c   : > { %4288 = vmatmul.mubr.bf16.gmra.mxu0 %v5111_v46  ;;  %4304 = vmatmul.mubr.bf16.gmra.mxu1 %v5115_v47  ;;  %v4750_v39 = vld [vmem:[%s5963_s1 + $0xe0] sm:$0xff]   ;;  %v5209_v56 = vpack.c.bf16 %v1091_v44, %v1090_v43  ;;  %v4754_v57 = vld [vmem:[%s5963_s1 + $0xd0] sm:$0xff]   ;;  %v548_v1 = vld [vmem:[#allocation2 + $0xc8] sm:$0xff] }
  0x3d   : > { %4320 = vmatpush3.bf16.msra.mxu1 %v4736_v41  ;;  %4368 = vmatpush3.bf16.msra.mxu0 %v4737_v42  ;;  %v4751_v40 = vld [vmem:[%s5963_s1 + $0x120] sm:$0xff]   ;;  %v543_v41 = vld [vmem:[#allocation2 + $0x90] sm:$0xff]  ;;  %v544_v42 = vld [vmem:[#allocation2 + $0x98] sm:$0xff] }
  0x3e   : > { %4321 = vmatprep.subr.bf16.mxu1 %v4738_v48  ;;  %4369 = vmatprep.subr.bf16.mxu0 %v4739_v49  ;;  %v4755_v61 = vld [vmem:[%s5963_s1 + $0x110] sm:$0xff]   ;;  %v547_v0 = vld [vmem:[#allocation2 + $0xc0] sm:$0xff]  ;;  %v4756_v6 = vld [vmem:[%s5963_s1 + $0xc8] sm:$0xff]  }
  0x3f   : > { %4291 = vmatprep.mubr.bf16.mxu0 %v5123_v50  ;;  %4307 = vmatprep.mubr.bf16.mxu1 %v5125_v51  ;;  %v1093_v62 = vld [vmem:[#allocation2 + $0xb2] sm:$0xff]  ;;  %v4757_v5 = vld [vmem:[%s5963_s1 + $0x108] sm:$0xff]   ;;  %v5232_v17 = vpack.c.bf16 %v548_v1, %v547_v0  ;;  %v4758_v23 = vld [vmem:[%s5963_s1 + $0xc0] sm:$0xff]  }
  0x40   : > { %v4031_v4 = vld [vmem:[%s4871_s8 + $0x78] sm:$0xff]   ;;  %v550_v25 = vld [vmem:[#allocation2 + $0xe0] sm:$0xff]  ;;  %v556_v0 = vld [vmem:[#allocation2 + $0x128] sm:$0xff] }
  0x41   : > { %4322 = vmatpush3.bf16.msra.mxu1 %v4738_v48  ;;  %4370 = vmatpush3.bf16.msra.mxu0 %v4739_v49  ;;  %v4753_v48 = vld [vmem:[%s5963_s1 + $0x118] sm:$0xff]   ;;  %v5203_v49 = vpack.c.bf16 %v542_v36, %v541_v35  ;;  %v3936_v8 = vunpack.c.h.bf16 %v4031_v4  ;;  %v551_v36 = vld [vmem:[#allocation2 + $0xf0] sm:$0xff]  ;;  %v1102_v1 = vld [vmem:[#allocation2 + $0x122] sm:$0xff] }
  0x42   : > { %4323 = vmatprep.subr.bf16.mxu1 %v4740_v52  ;;  %4371 = vmatprep.subr.bf16.mxu0 %v4741_v53  ;;  %v549_v24 = vld [vmem:[#allocation2 + $0xd8] sm:$0xff] }
  0x43   : > { %v1096_v26 = vld [vmem:[#allocation2 + $0xda] sm:$0xff]  ;;  %v5260_v44 = vpack.c.bf16 %v550_v25, %v549_v24  ;;  %v1106_v25 = vld [vmem:[#allocation2 + $0x152] sm:$0xff] }
  0x44   : > { %4292 = vmatmul.mubr.bf16.gmra.mxu0 %v5137_v54  ;;  %4308 = vmatmul.mubr.bf16.gmra.mxu1 %v5139_v55  ;;  %v560_v24 = vld [vmem:[#allocation2 + $0x158] sm:$0xff] }
  0x45   : > { %4324 = vmatpush3.bf16.msra.mxu1 %v4740_v52  ;;  %4372 = vmatpush3.bf16.msra.mxu0 %v4741_v53  ;;  %v5205_v52 = vpack.c.bf16 %v1089_v38, %v1088_v37  ;;  %v5207_v53 = vpack.c.bf16 %v544_v42, %v543_v41  ;;  %v552_v37 = vld [vmem:[#allocation2 + $0xf8] sm:$0xff] }
  0x46   : > { %4325 = vmatprep.subr.bf16.mxu1 %v4742_v59  ;;  %4373 = vmatprep.subr.bf16.mxu0 %v4743_v58  ;;  %v1098_v38 = vld [vmem:[#allocation2 + $0xf2] sm:$0xff] }
  0x47   : > { %4327 = vmatprep.mubr.bf16.mxu1 %v4802_v7  ;;  %4375 = vmatprep.mubr.bf16.mxu0 %v1110_v60  ;;  %v1092_v60 = vld [vmem:[#allocation2 + $0xaa] sm:$0xff]  ;;  %v3935_v7 = vunpack.c.l.bf16 %v4031_v4 }
  0x48   : > { %v5230_v16 = vpack.c.bf16 %v1093_v62, %v1092_v60  ;;  %v1100_v60 = vld [vmem:[#allocation2 + $0x10a] sm:$0xff]  ;;  %v555_v62 = vld [vmem:[#allocation2 + $0x120] sm:$0xff] }
  0x49   : > { %4326 = vmatpush3.bf16.msra.mxu1 %v4742_v59  ;;  %4374 = vmatpush3.bf16.msra.mxu0 %v4743_v58  ;;  %v545_v59 = vld [vmem:[#allocation2 + $0xa8] sm:$0xff]  ;;  %v546_v58 = vld [vmem:[#allocation2 + $0xb0] sm:$0xff]  ;;  %v425_v20 = vmul.f32 %v3935_v7, %v4882_v11  ;;  %v5277_v4 = vpack.c.bf16 %v556_v0, %v555_v62  ;;  %v557_v7 = vld [vmem:[#allocation2 + $0x138] sm:$0xff] }
  0x4a   : > { %4407 = vmatprep.subr.bf16.mxu1 %v4744_v2  ;;  %4455 = vmatprep.subr.bf16.mxu0 %v4745_v3  ;;  %v1706_v62 = vld [vmem:[#allocation2 + $0xd9] sm:$0xff]  ;;  %v1707_v0 = vld [vmem:[#allocation2 + $0xe1] sm:$0xff] }
  0x4b   : > { %v464_v35 = vadd.f32 %v4887_v12, %v425_v20  ;;  %v1104_v20 = vld [vmem:[#allocation2 + $0x13a] sm:$0xff] }
  0x4c   : > { %4328 = vmatmul.mubr.bf16.vlgmr.msra.gmra.mxu1 %v5155_v9  ;;  %4376 = vmatmul.mubr.bf16.vlgmr.msra.gmra.mxu0 %v5157_v10 }
  0x4d   : > { %4408 = vmatpush3.bf16.msra.mxu1 %v4744_v2  ;;  %4456 = vmatpush3.bf16.msra.mxu0 %v4745_v3  ;;  %v1094_v2 = vld [vmem:[#allocation2 + $0xc2] sm:$0xff]  ;;  %v1095_v3 = vld [vmem:[#allocation2 + $0xca] sm:$0xff]  ;;  %v496_v41 = vmax.f32 %v464_v35, 0.0 }
  0x4e   : > { %4331 = vmatprep.mubr.bf16.mxu1 %v5159_v13  ;;  %4379 = vmatprep.mubr.bf16.mxu0 %v5161_v14  ;;  %v5234_v18 = vpack.c.bf16 %v1095_v3, %v1094_v2  ;;  %v1103_v2 = vld [vmem:[#allocation2 + $0x12a] sm:$0xff] }
  0x4f   : > { %4409 = vmatprep.subr.bf16.mxu1 %v4746_v15  ;;  %4457 = vmatprep.subr.bf16.mxu0 %v4747_v22  ;;  %529 = vst [vmem:[#allocation2 + $0x181] sm:$0xff] %v496_v41 }
  0x51   : > { %4410 = vmatpush3.bf16.msra.mxu1 %v4746_v15  ;;  %4458 = vmatpush3.bf16.msra.mxu0 %v4747_v22  ;;  %v5228_v15 = vpack.c.bf16 %v546_v58, %v545_v59  ;;  %v426_v22 = vmul.f32 %v3936_v8, %v4882_v11  ;;  %v553_v59 = vld [vmem:[#allocation2 + $0x108] sm:$0xff]  ;;  %v554_v58 = vld [vmem:[#allocation2 + $0x110] sm:$0xff]  ;;  %v558_v8 = vld [vmem:[#allocation2 + $0x140] sm:$0xff] }
  0x52   : > { %4411 = vmatprep.subr.bf16.mxu1 %v4748_v27  ;;  %4459 = vmatprep.subr.bf16.mxu0 %v4749_v28  ;;  %v5273_v3 = vpack.c.bf16 %v554_v58, %v553_v59  ;;  %v4762_v59 = vld [vmem:[%s5963_s1 + $0x170] sm:$0xff]  }
  0x53   : > { %v465_v11 = vadd.f32 %v4887_v12, %v426_v22  ;;  %v4761_v12 = vld [vmem:[%s5963_s1 + $0x1b8] sm:$0xff]   ;;  %v1105_v22 = vld [vmem:[#allocation2 + $0x142] sm:$0xff]  ;;  %v4763_v58 = vld [vmem:[%s5963_s1 + $0x1b0] sm:$0xff]  }
  0x54   : > { %4332 = vmatmul.mubr.bf16.gmra.mxu1 %v5179_v29  ;;  %4380 = vmatmul.mubr.bf16.gmra.mxu0 %v5181_v30 }
  0x55   : > { %4335 = vmatprep.mubr.bf16.mxu1 %v5183_v32  ;;  %4383 = vmatprep.mubr.bf16.mxu0 %v5185_v33  ;;  %v497_v42 = vmax.f32 %v465_v11, 0.0 }
  0x56   : > { %4412 = vmatpush3.bf16.msra.mxu1 %v4748_v27  ;;  %4460 = vmatpush3.bf16.msra.mxu0 %v4749_v28  ;;  %v1097_v27 = vld [vmem:[#allocation2 + $0xe2] sm:$0xff] }
  0x57   : > { %4413 = vmatprep.subr.bf16.mxu1 %v4750_v39  ;;  %4461 = vmatprep.subr.bf16.mxu0 %v4751_v40  ;;  %v4759_v28 = vld [vmem:[%s5963_s1 + $0x100] sm:$0xff]   ;;  %530 = vst [vmem:[#allocation2 + $0x189] sm:$0xff] %v497_v42  ;;  %v5258_v43 = vpack.c.bf16 %v497_v42, %v496_v41 }
  0x5a   : > { %4414 = vmatpush3.bf16.msra.mxu1 %v4750_v39  ;;  %4462 = vmatpush3.bf16.msra.mxu0 %v4751_v40  ;;  %v1099_v39 = vld [vmem:[#allocation2 + $0xfa] sm:$0xff] }
  0x5b   : > { %4415 = vmatprep.subr.bf16.mxu1 %v4752_v45  ;;  %4463 = vmatprep.subr.bf16.mxu0 %v4753_v48  ;;  %v5253_v40 = vld [vmem:[%s5963_s1 + $0x178] sm:$0xff]  }
  0x5c   : > { %4336 = vmatmul.mubr.bf16.gmra.mxu1 %v5203_v49  ;;  %4384 = vmatmul.mubr.bf16.gmra.mxu0 %v5205_v52 }
  0x5d   : > { %4339 = vmatprep.mubr.bf16.mxu1 %v5207_v53  ;;  %4387 = vmatprep.mubr.bf16.mxu0 %v5209_v56 }
  0x5e   : > { %4416 = vmatpush3.bf16.msra.mxu1 %v4752_v45  ;;  %4464 = vmatpush3.bf16.msra.mxu0 %v4753_v48  ;;  %v5262_v45 = vpack.c.bf16 %v1097_v27, %v1096_v26  ;;  %v5264_v48 = vpack.c.bf16 %v552_v37, %v551_v36  ;;  %v1107_v26 = vld [vmem:[#allocation2 + $0x15a] sm:$0xff]  ;;  %v5285_v27 = vpack.c.bf16 %v558_v8, %v557_v7  ;;  %v561_v36 = vld [vmem:[#allocation2 + $0x168] sm:$0xff]  ;;  %v562_v37 = vld [vmem:[#allocation2 + $0x170] sm:$0xff] }
  0x5f   : > { %4417 = vmatprep.subr.bf16.mxu1 %v4754_v57  ;;  %4465 = vmatprep.subr.bf16.mxu0 %v4755_v61  ;;  %v5291_v11 = vpack.c.bf16 %v1107_v26, %v1106_v25  ;;  %v5297_v41 = vpack.c.bf16 %v562_v37, %v561_v36  ;;  %v5356_v7 = vpack.c.bf16 %v1707_v0, %v1706_v62  ;;  %v4775_v8 = vld [vmem:[%s5963_s1 + $0x180] sm:$0xff]   ;;  %v4776_v25 = vld [vmem:[%s5963_s1 + $0x1f8] sm:$0xff]  }
  0x60   : > { %v4777_v26 = vld [vmem:[%s5963_s1 + $0x238] sm:$0xff]  }
  0x62   : > { %4418 = vmatpush3.bf16.msra.mxu1 %v4754_v57  ;;  %4466 = vmatpush3.bf16.msra.mxu0 %v4755_v61  ;;  %v5266_v57 = vpack.c.bf16 %v1099_v39, %v1098_v38  ;;  %v1101_v61 = vld [vmem:[#allocation2 + $0x112] sm:$0xff]  ;;  %v1108_v38 = vld [vmem:[#allocation2 + $0x16a] sm:$0xff] }
  0x63   : > { %4419 = vmatprep.subr.bf16.mxu1 %v4756_v6  ;;  %4467 = vmatprep.subr.bf16.mxu0 %v4757_v5  ;;  %v1109_v39 = vld [vmem:[#allocation2 + $0x172] sm:$0xff] }
  0x64   : > { %4340 = vmatmul.mubr.bf16.gmra.mxu1 %v5228_v15  ;;  %4388 = vmatmul.mubr.bf16.gmra.mxu0 %v5230_v16  ;;  %v5299_v42 = vpack.c.bf16 %v1109_v39, %v1108_v38  ;;  %v1414_v38 = vld [vmem:[#allocation2 + $0x180] sm:$0xff]  ;;  %v1415_v39 = vld [vmem:[#allocation2 + $0x188] sm:$0xff] }
  0x65   : > { %4343 = vmatprep.mubr.bf16.mxu1 %v5232_v17  ;;  %4391 = vmatprep.mubr.bf16.mxu0 %v5234_v18 }
  0x66   : > { %4420 = vmatpush3.bf16.msra.mxu1 %v4756_v6  ;;  %4468 = vmatpush3.bf16.msra.mxu0 %v4757_v5  ;;  %v5275_v6 = vpack.c.bf16 %v1101_v61, %v1100_v60  ;;  %v5279_v5 = vpack.c.bf16 %v1103_v2, %v1102_v1  ;;  %v1704_v60 = vld [vmem:[#allocation2 + $0xc1] sm:$0xff]  ;;  %v1705_v61 = vld [vmem:[#allocation2 + $0xc9] sm:$0xff] }
  0x67   : > { %4421 = vmatprep.subr.bf16.mxu1 %v4758_v23  ;;  %4469 = vmatprep.subr.bf16.mxu0 %v4759_v28  ;;  %v4772_v1 = vld [vmem:[%s5963_s1 + $0x148] sm:$0xff]   ;;  %v5354_v2 = vpack.c.bf16 %v1705_v61, %v1704_v60  ;;  %v2916_v60 = vld [vmem:[#allocation2 + $0x3a] sm:$0xff] }
  0x6a   : > { %4422 = vmatpush3.bf16.msra.mxu1 %v4758_v23  ;;  %4470 = vmatpush3.bf16.msra.mxu0 %v4759_v28  ;;  %v559_v23 = vld [vmem:[#allocation2 + $0x150] sm:$0xff]  ;;  %v5287_v28 = vpack.c.bf16 %v1105_v22, %v1104_v20  ;;  %v1709_v22 = vld [vmem:[#allocation2 + $0xf9] sm:$0xff] }
  0x6b   : > { %4503 = vmatprep.subr.bf16.mxu1 %v5253_v40  ;;  %4551 = vmatprep.subr.bf16.mxu0 %v4761_v12  ;;  %v5289_v35 = vpack.c.bf16 %v560_v24, %v559_v23  ;;  %v1708_v20 = vld [vmem:[#allocation2 + $0xf1] sm:$0xff]  ;;  %v1710_v23 = vld [vmem:[#allocation2 + $0x109] sm:$0xff] }
  0x6c   : > { %4344 = vmatmul.mubr.bf16.gmra.mxu1 %v5260_v44  ;;  %4392 = vmatmul.mubr.bf16.gmra.mxu0 %v5262_v45  ;;  %v1711_v24 = vld [vmem:[#allocation2 + $0x111] sm:$0xff]  ;;  %v5374_v36 = vpack.c.bf16 %v1709_v22, %v1708_v20  ;;  %v2611_v22 = vld [vmem:[#allocation2 + $0x49] sm:$0xff] }
  0x6d   : > { %4347 = vmatprep.mubr.bf16.mxu1 %v5264_v48  ;;  %4395 = vmatprep.mubr.bf16.mxu0 %v5266_v57  ;;  %v5376_v37 = vpack.c.bf16 %v1711_v24, %v1710_v23  ;;  %v2612_v23 = vld [vmem:[#allocation2 + $0x51] sm:$0xff] }
  0x6e   : > { %v2917_v24 = vld [vmem:[#allocation2 + $0x4a] sm:$0xff] }
  0x74   : > { %4348 = vmatmul.mubr.bf16.gmra.mxu1 %v5273_v3  ;;  %4396 = vmatmul.mubr.bf16.gmra.mxu0 %v5275_v6 }
  0x75   : > { %4351 = vmatprep.mubr.bf16.mxu1 %v5277_v4  ;;  %4399 = vmatprep.mubr.bf16.mxu0 %v5279_v5 }
  0x7c   : > { %4352 = vmatmul.mubr.bf16.gmra.mxu1 %v5285_v27  ;;  %4400 = vmatmul.mubr.bf16.gmra.mxu0 %v5287_v28 }
  0x7d   : > { %4355 = vmatprep.mubr.bf16.mxu1 %v5289_v35  ;;  %4403 = vmatprep.mubr.bf16.mxu0 %v5291_v11 }
  0x84   : > { %4356 = vmatmul.mubr.bf16.gmra.mxu1 %v5297_v41  ;;  %4404 = vmatmul.mubr.bf16.gmra.mxu0 %v5299_v42 }
  0x85   : > { %4423 = vmatprep.mubr.bf16.mxu1 %v5155_v9  ;;  %4471 = vmatprep.mubr.bf16.mxu0 %v4968_v19  ;;  %v4764_v19 = vld [vmem:[%s5963_s1 + $0x168] sm:$0xff]  }
  0x86   : > { %v4765_v9 = vld [vmem:[%s5963_s1 + $0x1a8] sm:$0xff]  }
  0x8c   : > { %4424 = vmatmul.mubr.bf16.vlgmr.msra.gmra.mxu1 %v5159_v13  ;;  %4472 = vmatmul.mubr.bf16.vlgmr.msra.gmra.mxu0 %v4991_v34  ;;  %v4766_v34 = vld [vmem:[%s5963_s1 + $0x160] sm:$0xff]  }
  0x8d   : > { %4504 = vmatpush3.bf16.msra.mxu1 %v5253_v40  ;;  %4552 = vmatpush3.bf16.msra.mxu0 %v4761_v12  ;;  %v4768_v40 = vld [vmem:[%s5963_s1 + $0x158] sm:$0xff]  }
  0x8e   : > { %4427 = vmatprep.mubr.bf16.mxu1 %v5179_v29  ;;  %4475 = vmatprep.mubr.bf16.mxu0 %v5043_v63  ;;  %v4767_v63 = vld [vmem:[%s5963_s1 + $0x1a0] sm:$0xff]   ;;  %v4769_v12 = vld [vmem:[%s5963_s1 + $0x198] sm:$0xff]  }
  0x8f   : > { %4505 = vmatprep.subr.bf16.mxu1 %v4762_v59  ;;  %4553 = vmatprep.subr.bf16.mxu0 %v4763_v58 }
  0x91   : > { %4506 = vmatpush3.bf16.msra.mxu1 %v4762_v59  ;;  %4554 = vmatpush3.bf16.msra.mxu0 %v4763_v58  ;;  %v5390_v59 = vpack.c.bf16 %v1415_v39, %v1414_v38 }
  0x92   : > { %4507 = vmatprep.subr.bf16.mxu1 %v4764_v19  ;;  %4555 = vmatprep.subr.bf16.mxu0 %v4765_v9 }
  0x94   : > { %4428 = vmatmul.mubr.bf16.gmra.mxu1 %v5183_v32  ;;  %4476 = vmatmul.mubr.bf16.gmra.mxu0 %v5076_v21  ;;  %v4770_v21 = vld [vmem:[%s5963_s1 + $0x150] sm:$0xff]  }
  0x95   : > { %4431 = vmatprep.mubr.bf16.mxu1 %v5203_v49  ;;  %4479 = vmatprep.mubr.bf16.mxu0 %v5111_v46  ;;  %v4771_v46 = vld [vmem:[%s5963_s1 + $0x190] sm:$0xff]  }
  0x96   : > { %4508 = vmatpush3.bf16.msra.mxu1 %v4764_v19  ;;  %4556 = vmatpush3.bf16.msra.mxu0 %v4765_v9 }
  0x97   : > { %4509 = vmatprep.subr.bf16.mxu1 %v4766_v34  ;;  %4557 = vmatprep.subr.bf16.mxu0 %v4767_v63 }
  0x9a   : > { %4510 = vmatpush3.bf16.msra.mxu1 %v4766_v34  ;;  %4558 = vmatpush3.bf16.msra.mxu0 %v4767_v63 }
  0x9b   : > { %4511 = vmatprep.subr.bf16.mxu1 %v4768_v40  ;;  %4559 = vmatprep.subr.bf16.mxu0 %v4769_v12 }
  0x9c   : > { %4432 = vmatmul.mubr.bf16.gmra.mxu1 %v5207_v53  ;;  %4480 = vmatmul.mubr.bf16.gmra.mxu0 %v5123_v50  ;;  %v4773_v50 = vld [vmem:[%s5963_s1 + $0x188] sm:$0xff]  }
  0x9d   : > { %4435 = vmatprep.mubr.bf16.mxu1 %v5228_v15  ;;  %4483 = vmatprep.mubr.bf16.mxu0 %v5137_v54  ;;  %v4774_v54 = vld [vmem:[%s5963_s1 + $0x140] sm:$0xff]  }
  0x9e   : > { %4512 = vmatpush3.bf16.msra.mxu1 %v4768_v40  ;;  %4560 = vmatpush3.bf16.msra.mxu0 %v4769_v12 }
  0x9f   : > { %4513 = vmatprep.subr.bf16.mxu1 %v4770_v21  ;;  %4561 = vmatprep.subr.bf16.mxu0 %v4771_v46 }
  0xa2   : > { %4514 = vmatpush3.bf16.msra.mxu1 %v4770_v21  ;;  %4562 = vmatpush3.bf16.msra.mxu0 %v4771_v46  ;;  %v2610_v21 = vld [vmem:[#allocation2 + $0x39] sm:$0xff] }
  0xa3   : > { %4515 = vmatprep.subr.bf16.mxu1 %v4772_v1  ;;  %4563 = vmatprep.subr.bf16.mxu0 %v4773_v50  ;;  %v2915_v46 = vld [vmem:[#allocation2 + $0x32] sm:$0xff] }
  0xa4   : > { %4436 = vmatmul.mubr.bf16.gmra.mxu1 %v5232_v17  ;;  %4484 = vmatmul.mubr.bf16.gmra.mxu0 %v5354_v2 }
  0xa5   : > { %4439 = vmatprep.mubr.bf16.mxu1 %v5260_v44  ;;  %4487 = vmatprep.mubr.bf16.mxu0 %v5356_v7 }
  0xa6   : > { %4516 = vmatpush3.bf16.msra.mxu1 %v4772_v1  ;;  %4564 = vmatpush3.bf16.msra.mxu0 %v4773_v50  ;;  %v2947_v1 = vpack.c.bf16 %v2916_v60, %v2915_v46 }
  0xa7   : > { %4517 = vmatprep.subr.bf16.mxu1 %v4774_v54  ;;  %4565 = vmatprep.subr.bf16.mxu0 %v4775_v8 }
  0xaa   : > { %4518 = vmatpush3.bf16.msra.mxu1 %v4774_v54  ;;  %4566 = vmatpush3.bf16.msra.mxu0 %v4775_v8 }
  0xab   : > { %4599 = vmatprep.subr.bf16.mxu1 %v4776_v25  ;;  %4647 = vmatprep.subr.bf16.mxu0 %v4777_v26 }
  0xac   : > { %4440 = vmatmul.mubr.bf16.gmra.mxu1 %v5264_v48  ;;  %4488 = vmatmul.mubr.bf16.gmra.mxu0 %v5374_v36 }
  0xad   : > { %4443 = vmatprep.mubr.bf16.mxu1 %v5273_v3  ;;  %4491 = vmatprep.mubr.bf16.mxu0 %v5376_v37 }
  0xb4   : > { %4444 = vmatmul.mubr.bf16.gmra.mxu1 %v5277_v4  ;;  %4492 = vmatmul.mubr.bf16.gmra.mxu0 %v5091_v31  ;;  %v4778_v31 = vld [vmem:[%s5963_s1 + $0x1f0] sm:$0xff]  }
  0xb5   : > { %4447 = vmatprep.mubr.bf16.mxu1 %v5285_v27  ;;  %4495 = vmatprep.mubr.bf16.mxu0 %v5115_v47  ;;  %v4779_v47 = vld [vmem:[%s5963_s1 + $0x230] sm:$0xff]  }
  0xbc   : > { %4448 = vmatmul.mubr.bf16.gmra.mxu1 %v5289_v35  ;;  %4496 = vmatmul.mubr.bf16.gmra.mxu0 %v5125_v51  ;;  %v4780_v51 = vld [vmem:[%s5963_s1 + $0x1e8] sm:$0xff]  }
  0xbd   : > { %4451 = vmatprep.mubr.bf16.mxu1 %v5297_v41  ;;  %4499 = vmatprep.mubr.bf16.mxu0 %v5139_v55  ;;  %v4781_v55 = vld [vmem:[%s5963_s1 + $0x228] sm:$0xff]  }
  0xc4   : > { %4452 = vmatmul.mubr.bf16.gmra.mxu1 %v5390_v59  ;;  %4500 = vmatmul.mubr.bf16.gmra.mxu0 %v5258_v43 }
  0xc5   : > { %4519 = vmatprep.mubr.bf16.mxu1 %v5157_v10  ;;  %4567 = vmatprep.mubr.bf16.mxu0 %v5159_v13  ;;  %v4782_v10 = vld [vmem:[%s5963_s1 + $0x1e0] sm:$0xff]  }
  0xc6   : > { %v4783_v13 = vld [vmem:[%s5963_s1 + $0x220] sm:$0xff]  }
  0xcc   : > { %4520 = vmatmul.mubr.bf16.vlgmr.msra.gmra.mxu1 %v5161_v14  ;;  %4568 = vmatmul.mubr.bf16.vlgmr.msra.gmra.mxu0 %v5179_v29  ;;  %v4784_v14 = vld [vmem:[%s5963_s1 + $0x1d8] sm:$0xff]  }
  0xcd   : > { %4600 = vmatpush3.bf16.msra.mxu1 %v4776_v25  ;;  %4648 = vmatpush3.bf16.msra.mxu0 %v4777_v26  ;;  %v4785_v29 = vld [vmem:[%s5963_s1 + $0x218] sm:$0xff]   ;;  %v2613_v26 = vld [vmem:[#allocation2 + $0x61] sm:$0xff] }
  0xce   : > { %4523 = vmatprep.mubr.bf16.mxu1 %v5181_v30  ;;  %4571 = vmatprep.mubr.bf16.mxu0 %v5183_v32  ;;  %v4786_v30 = vld [vmem:[%s5963_s1 + $0x1d0] sm:$0xff]  }
  0xcf   : > { %4601 = vmatprep.subr.bf16.mxu1 %v4778_v31  ;;  %4649 = vmatprep.subr.bf16.mxu0 %v4779_v47  ;;  %v4787_v32 = vld [vmem:[%s5963_s1 + $0x210] sm:$0xff]  }
  0xd0   : > { %v2918_v25 = vld [vmem:[#allocation2 + $0x52] sm:$0xff] }
  0xd1   : > { %4602 = vmatpush3.bf16.msra.mxu1 %v4778_v31  ;;  %4650 = vmatpush3.bf16.msra.mxu0 %v4779_v47  ;;  %v2919_v31 = vld [vmem:[#allocation2 + $0x62] sm:$0xff]  ;;  %v2920_v47 = vld [vmem:[#allocation2 + $0x6a] sm:$0xff] }
  0xd2   : > { %4603 = vmatprep.subr.bf16.mxu1 %v4780_v51  ;;  %4651 = vmatprep.subr.bf16.mxu0 %v4781_v55 }
  0xd4   : > { %4524 = vmatmul.mubr.bf16.gmra.mxu1 %v5185_v33  ;;  %4572 = vmatmul.mubr.bf16.gmra.mxu0 %v5203_v49  ;;  %v4788_v33 = vld [vmem:[%s5963_s1 + $0x1c8] sm:$0xff]  }
  0xd5   : > { %4527 = vmatprep.mubr.bf16.mxu1 %v5205_v52  ;;  %4575 = vmatprep.mubr.bf16.mxu0 %v5207_v53  ;;  %v4789_v49 = vld [vmem:[%s5963_s1 + $0x208] sm:$0xff]   ;;  %v4790_v52 = vld [vmem:[%s5963_s1 + $0x1c0] sm:$0xff]  }
  0xd6   : > { %4604 = vmatpush3.bf16.msra.mxu1 %v4780_v51  ;;  %4652 = vmatpush3.bf16.msra.mxu0 %v4781_v55  ;;  %v4791_v53 = vld [vmem:[%s5963_s1 + $0x200] sm:$0xff]  }
  0xd7   : > { %4605 = vmatprep.subr.bf16.mxu1 %v4782_v10  ;;  %4653 = vmatprep.subr.bf16.mxu0 %v4783_v13 }
  0xda   : > { %4606 = vmatpush3.bf16.msra.mxu1 %v4782_v10  ;;  %4654 = vmatpush3.bf16.msra.mxu0 %v4783_v13  ;;  %v2642_v10 = vpack.c.bf16 %v2612_v23, %v2611_v22  ;;  %v2948_v13 = vpack.c.bf16 %v2918_v25, %v2917_v24 }
  0xdb   : > { %4607 = vmatprep.subr.bf16.mxu1 %v4784_v14  ;;  %4655 = vmatprep.subr.bf16.mxu0 %v4785_v29 }
  0xdc   : > { %4528 = vmatmul.mubr.bf16.gmra.mxu1 %v5209_v56  ;;  %4576 = vmatmul.mubr.bf16.gmra.mxu0 %v5228_v15 }
  0xdd   : > { %4531 = vmatprep.mubr.bf16.mxu1 %v5230_v16  ;;  %4579 = vmatprep.mubr.bf16.mxu0 %v5232_v17 }
  0xde   : > { %4608 = vmatpush3.bf16.msra.mxu1 %v4784_v14  ;;  %4656 = vmatpush3.bf16.msra.mxu0 %v4785_v29  ;;  %v2949_v29 = vpack.c.bf16 %v2920_v47, %v2919_v31 }
  0xdf   : > { %4609 = vmatprep.subr.bf16.mxu1 %v4786_v30  ;;  %4657 = vmatprep.subr.bf16.mxu0 %v4787_v32 }
  0xe2   : > { %4610 = vmatpush3.bf16.msra.mxu1 %v4786_v30  ;;  %4658 = vmatpush3.bf16.msra.mxu0 %v4787_v32 }
  0xe3   : > { %4611 = vmatprep.subr.bf16.mxu1 %v4788_v33  ;;  %4659 = vmatprep.subr.bf16.mxu0 %v4789_v49 }
  0xe4   : > { %4532 = vmatmul.mubr.bf16.gmra.mxu1 %v5234_v18  ;;  %4580 = vmatmul.mubr.bf16.gmra.mxu0 %v5260_v44 }
  0xe5   : > { %4535 = vmatprep.mubr.bf16.mxu1 %v5262_v45  ;;  %4583 = vmatprep.mubr.bf16.mxu0 %v5264_v48 }
  0xe6   : > { %4612 = vmatpush3.bf16.msra.mxu1 %v4788_v33  ;;  %4660 = vmatpush3.bf16.msra.mxu0 %v4789_v49 }
  0xe7   : > { %4613 = vmatprep.subr.bf16.mxu1 %v4790_v52  ;;  %4661 = vmatprep.subr.bf16.mxu0 %v4791_v53 }
  0xea   : > { %4614 = vmatpush3.bf16.msra.mxu1 %v4790_v52  ;;  %4662 = vmatpush3.bf16.msra.mxu0 %v4791_v53  ;;  %v2615_v52 = vld [vmem:[#allocation2 + $0x79] sm:$0xff]  ;;  %v2616_v53 = vld [vmem:[#allocation2 + $0x81] sm:$0xff] }
  0xeb   : > { %v2644_v25 = vpack.c.bf16 %v2616_v53, %v2615_v52  ;;  %v2925_v53 = vld [vmem:[#allocation2 + $0xaa] sm:$0xff] }
  0xec   : > { %v5454_v56 = vpop.f32.mrf.mxu0  ;;  %v5456_v15 = vpop.f32.mrf.mxu1  ;;  %4536 = vmatmul.mubr.bf16.gmra.mxu1 %v5266_v57  ;;  %4584 = vmatmul.mubr.bf16.gmra.mxu0 %v5273_v3 }
  0xed   : > { %4539 = vmatprep.mubr.bf16.mxu1 %v5275_v6  ;;  %4587 = vmatprep.mubr.bf16.mxu0 %v5277_v4 }
  0xee   : > { %v5462_v16 = vpop.f32.mrf.mxu0  ;;  %v5464_v17 = vpop.f32.mrf.mxu1 }
  0xf0   : > { %v5466_v18 = vpop.f32.mrf.mxu0  ;;  %v5468_v44 = vpop.f32.mrf.mxu1 }
  0xf2   : > { %v5470_v45 = vpop.f32.mrf.mxu0  ;;  %v5472_v48 = vpop.f32.mrf.mxu1 }
  0xf4   : > { %v5474_v58 = vpop.f32.mrf.mxu0  ;;  %v5476_v57 = vpop.f32.mrf.mxu1  ;;  %4540 = vmatmul.mubr.bf16.gmra.mxu1 %v5279_v5  ;;  %4588 = vmatmul.mubr.bf16.gmra.mxu0 %v5285_v27  ;;  %v2026_v27 = vld [vmem:[#allocation2 + $0x182] sm:$0xff] }
  0xf5   : > { %4543 = vmatprep.mubr.bf16.mxu1 %v5287_v28  ;;  %4591 = vmatprep.mubr.bf16.mxu0 %v5289_v35  ;;  %v2027_v28 = vld [vmem:[#allocation2 + $0x18a] sm:$0xff] }
  0xf6   : > { %v5482_v3 = vpop.f32.mrf.mxu0  ;;  %v5484_v6 = vpop.f32.mrf.mxu1  ;;  %v2609_v35 = vld [vmem:[#allocation2 + $0x31] sm:$0xff] }
  0xf7   : > { %v2641_v0 = vpack.c.bf16 %v2610_v21, %v2609_v35  ;;  %v2922_v35 = vld [vmem:[#allocation2 + $0x82] sm:$0xff]  ;;  %v2617_v21 = vld [vmem:[#allocation2 + $0x91] sm:$0xff] }
  0xf8   : > { %v5486_v4 = vpop.f32.mrf.mxu0  ;;  %v5488_v19 = vpop.f32.mrf.mxu1 }
  0xfa   : > { %v5490_v9 = vpop.f32.mrf.mxu0  ;;  %v5492_v34 = vpop.f32.mrf.mxu1 }
  0xfc   : > { %v5494_v63 = vpop.f32.mrf.mxu0  ;;  %v5496_v5 = vpop.f32.mrf.mxu1  ;;  %4544 = vmatmul.mubr.bf16.gmra.mxu1 %v5291_v11  ;;  %4592 = vmatmul.mubr.bf16.gmra.mxu0 %v5297_v41  ;;  %v5510_v11 = vpack.c.bf16 %v2027_v28, %v2026_v27  ;;  %v4792_v41 = vld [vmem:[#allocation2] sm:$0xff] }
  0xfd   : > { %4547 = vmatprep.mubr.bf16.mxu1 %v5299_v42  ;;  %4595 = vmatprep.mubr.bf16.mxu0 %v5390_v59  ;;  %v2350_v42 = vpack.c.bf16 %v4792_v41, %v4792_v41  ;;  %v2614_v59 = vld [vmem:[#allocation2 + $0x69] sm:$0xff]  ;;  %v2921_v28 = vld [vmem:[#allocation2 + $0x7a] sm:$0xff] }
  0xfe   : > { %v5502_v40 = vpop.f32.mrf.mxu0  ;;  %v5504_v12 = vpop.f32.mrf.mxu1  ;;  %v2643_v14 = vpack.c.bf16 %v2614_v59, %v2613_v26  ;;  %v2618_v41 = vld [vmem:[#allocation2 + $0x99] sm:$0xff]  ;;  %v2950_v26 = vpack.c.bf16 %v2922_v35, %v2921_v28 }
  0xff   : > { %v2645_v31 = vpack.c.bf16 %v2618_v41, %v2617_v21  ;;  %v2926_v28 = vld [vmem:[#allocation2 + $0xb2] sm:$0xff] }
 0x100   : > { %v5506_v61 = vpop.f32.mrf.mxu0  ;;  %v5508_v62 = vpop.f32.mrf.mxu1 }
 0x102   : > { %v5512_v50 = vpop.f32.mrf.mxu0  ;;  %v5514_v54 = vpop.f32.mrf.mxu1 }
 0x104   : > { %v5516_v8 = vpop.f32.mrf.mxu0  ;;  %v5518_v20 = vpop.f32.mrf.mxu1  ;;  %4548 = vmatmul.mubr.bf16.gmra.mxu1 %v5510_v11  ;;  %4596 = vmatmul.mubr.bf16.gmra.mxu0 %v2350_v42  ;;  %v2923_v42 = vld [vmem:[#allocation2 + $0x92] sm:$0xff] }
 0x105   : > { %4615 = vmatprep.mubr.bf16.mxu1 %v2641_v0  ;;  %4663 = vmatprep.mubr.bf16.mxu0 %v2947_v1  ;;  %v2924_v0 = vld [vmem:[#allocation2 + $0x9a] sm:$0xff] }
 0x106   : > { %v5521_v38 = vpop.f32.mrf.mxu0  ;;  %v5523_v39 = vpop.f32.mrf.mxu1  ;;  %v2951_v47 = vpack.c.bf16 %v2924_v0, %v2923_v42 }
 0x108   : > { %v5525_v51 = vpop.f32.mrf.mxu0  ;;  %v5527_v55 = vpop.f32.mrf.mxu1 }
 0x10a   : > { %v5529_v30 = vpop.f32.mrf.mxu0  ;;  %v5531_v32 = vpop.f32.mrf.mxu1 }
 0x10c   : > { %v4329_v33 = vpop.f32.mrf.mxu1  ;;  %v4377_v49 = vpop.f32.mrf.mxu0  ;;  %4616 = vmatmul.mubr.bf16.vlgmr.msra.gmra.mxu1 %v2642_v10  ;;  %4664 = vmatmul.mubr.bf16.vlgmr.msra.gmra.mxu0 %v2948_v13 }
 0x10d   : > { %v960_v27 = vadd.f32 %v4329_v33, %v5454_v56  ;;  %4619 = vmatprep.mubr.bf16.mxu1 %v2643_v14  ;;  %4667 = vmatprep.mubr.bf16.mxu0 %v2949_v29 }
 0x10e   : > { %v951_v46 = vpop.f32.mrf.mxu1  ;;  %v1225_v60 = vpop.f32.mrf.mxu0 }
 0x10f   : > { %v5534_v1 = vadd.f32 %v4377_v49, %v960_v27  ;;  %v952_v22 = vadd.f32 %v951_v46, %v5462_v16  ;;  %v2619_v16 = vld [vmem:[#allocation2 + $0xa9] sm:$0xff] }
 0x110   : > { %v4330_v23 = vpop.f32.mrf.mxu1  ;;  %v4378_v24 = vpop.f32.mrf.mxu0  ;;  %v2927_v46 = vld [vmem:[#allocation2 + $0xc2] sm:$0xff] }
 0x111   : > { %v5537_v59 = vadd.f32 %v1225_v60, %v952_v22  ;;  %v963_v56 = vadd.f32 %v4330_v23, %v5466_v18  ;;  %v2620_v18 = vld [vmem:[#allocation2 + $0xb1] sm:$0xff]  ;;  %v2952_v23 = vpack.c.bf16 %v2926_v28, %v2925_v53 }
 0x112   : > { %v954_v10 = vpop.f32.mrf.mxu1  ;;  %v1228_v13 = vpop.f32.mrf.mxu0  ;;  %v2928_v60 = vld [vmem:[#allocation2 + $0xca] sm:$0xff]  ;;  %v2646_v22 = vpack.c.bf16 %v2620_v18, %v2619_v16  ;;  %v2932_v18 = vld [vmem:[#allocation2 + $0xfa] sm:$0xff] }
 0x113   : > { %v5540_v14 = vadd.f32 %v4378_v24, %v963_v56  ;;  %v955_v29 = vadd.f32 %v954_v10, %v5470_v45 }
 0x114   : > { %v4333_v33 = vpop.f32.mrf.mxu1  ;;  %v4381_v49 = vpop.f32.mrf.mxu0  ;;  %4620 = vmatmul.mubr.bf16.gmra.mxu1 %v2644_v25  ;;  %4668 = vmatmul.mubr.bf16.gmra.mxu0 %v2950_v26  ;;  %v2953_v25 = vpack.c.bf16 %v2928_v60, %v2927_v46 }
 0x115   : > { %v5543_v27 = vadd.f32 %v1228_v13, %v955_v29  ;;  %v976_v52 = vadd.f32 %v4333_v33, %v5474_v58  ;;  %4623 = vmatprep.mubr.bf16.mxu1 %v2645_v31  ;;  %4671 = vmatprep.mubr.bf16.mxu0 %v2951_v47  ;;  %v2929_v33 = vld [vmem:[#allocation2 + $0xda] sm:$0xff] }
 0x116   : > { %v967_v35 = vpop.f32.mrf.mxu1  ;;  %v1241_v21 = vpop.f32.mrf.mxu0 }
 0x117   : > { %v5546_v41 = vadd.f32 %v4381_v49, %v976_v52  ;;  %v968_v45 = vadd.f32 %v967_v35, %v5482_v3  ;;  %v2931_v52 = vld [vmem:[#allocation2 + $0xf2] sm:$0xff] }
 0x118   : > { %v4334_v42 = vpop.f32.mrf.mxu1  ;;  %v4382_v0 = vpop.f32.mrf.mxu0  ;;  %v2955_v60 = vpack.c.bf16 %v2932_v18, %v2931_v52 }
 0x119   : > { %v5549_v24 = vadd.f32 %v1241_v21, %v968_v45  ;;  %v979_v58 = vadd.f32 %v4334_v42, %v5486_v4  ;;  %v2930_v4 = vld [vmem:[#allocation2 + $0xe2] sm:$0xff] }
 0x11a   : > { %v970_v26 = vpop.f32.mrf.mxu1  ;;  %v1244_v56 = vpop.f32.mrf.mxu0  ;;  %v2954_v21 = vpack.c.bf16 %v2930_v4, %v2929_v33 }
 0x11b   : > { %v5552_v31 = vadd.f32 %v4382_v0, %v979_v58  ;;  %v971_v47 = vadd.f32 %v970_v26, %v5490_v9  ;;  %v2629_v26 = vld [vmem:[#allocation2 + $0x121] sm:$0xff] }
 0x11c   : > { %v4337_v10 = vpop.f32.mrf.mxu1  ;;  %v4385_v13 = vpop.f32.mrf.mxu0  ;;  %4624 = vmatmul.mubr.bf16.gmra.mxu1 %v2646_v22  ;;  %4672 = vmatmul.mubr.bf16.gmra.mxu0 %v2952_v23 }
 0x11d   : > { %v5555_v3 = vadd.f32 %v1244_v56, %v971_v47  ;;  %v992_v29 = vadd.f32 %v4337_v10, %v5494_v63  ;;  %4627 = vmatprep.mubr.bf16.mxu1 %v5354_v2  ;;  %4675 = vmatprep.mubr.bf16.mxu0 %v2953_v25  ;;  %v2934_v25 = vld [vmem:[#allocation2 + $0x112] sm:$0xff]  ;;  %v2630_v10 = vld [vmem:[#allocation2 + $0x129] sm:$0xff] }
 0x11e   : > { %v983_v49 = vpop.f32.mrf.mxu1  ;;  %v1257_v16 = vpop.f32.mrf.mxu0 }
 0x11f   : > { %v5559_v53 = vadd.f32 %v4385_v13, %v992_v29  ;;  %v984_v9 = vadd.f32 %v983_v49, %v5502_v40  ;;  %v2935_v13 = vld [vmem:[#allocation2 + $0x122] sm:$0xff] }
 0x120   : > { %v4338_v28 = vpop.f32.mrf.mxu1  ;;  %v4386_v35 = vpop.f32.mrf.mxu0 }
 0x121   : > { %v5562_v46 = vadd.f32 %v1257_v16, %v984_v9  ;;  %v995_v63 = vadd.f32 %v4338_v28, %v5506_v61  ;;  %v2933_v61 = vld [vmem:[#allocation2 + $0x10a] sm:$0xff] }
 0x122   : > { %v986_v2 = vpop.f32.mrf.mxu1  ;;  %v1260_v45 = vpop.f32.mrf.mxu0  ;;  %v2956_v49 = vpack.c.bf16 %v2934_v25, %v2933_v61  ;;  %v2634_v61 = vld [vmem:[#allocation2 + $0x159] sm:$0xff] }
 0x123   : > { %v5565_v42 = vadd.f32 %v4386_v35, %v995_v63  ;;  %v987_v0 = vadd.f32 %v986_v2, %v5512_v50  ;;  %v2936_v50 = vld [vmem:[#allocation2 + $0x12a] sm:$0xff]  ;;  %v2940_v25 = vld [vmem:[#allocation2 + $0x15a] sm:$0xff] }
 0x124   : > { %v4341_v22 = vpop.f32.mrf.mxu1  ;;  %v4389_v23 = vpop.f32.mrf.mxu0  ;;  %4628 = vmatmul.mubr.bf16.gmra.mxu1 %v5356_v7  ;;  %4676 = vmatmul.mubr.bf16.gmra.mxu0 %v2954_v21  ;;  %v2957_v52 = vpack.c.bf16 %v2936_v50, %v2935_v13 }
 0x125   : > { %v5569_v40 = vadd.f32 %v1260_v45, %v987_v0  ;;  %v1008_v58 = vadd.f32 %v4341_v22, %v5516_v8  ;;  %4631 = vmatprep.mubr.bf16.mxu1 %v5374_v36  ;;  %4679 = vmatprep.mubr.bf16.mxu0 %v2955_v60  ;;  %v2651_v8 = vpack.c.bf16 %v2630_v10, %v2629_v26  ;;  %v2632_v60 = vld [vmem:[#allocation2 + $0x141] sm:$0xff]  ;;  %v2633_v22 = vld [vmem:[#allocation2 + $0x151] sm:$0xff] }
 0x126   : > { %v999_v56 = vpop.f32.mrf.mxu1  ;;  %v1273_v47 = vpop.f32.mrf.mxu0  ;;  %v2938_v0 = vld [vmem:[#allocation2 + $0x142] sm:$0xff] }
 0x127   : > { %v5573_v29 = vadd.f32 %v4389_v23, %v1008_v58  ;;  %v1000_v7 = vadd.f32 %v999_v56, %v5521_v38  ;;  %v2631_v38 = vld [vmem:[#allocation2 + $0x139] sm:$0xff] }
 0x128   : > { %v4342_v33 = vpop.f32.mrf.mxu1  ;;  %v4390_v4 = vpop.f32.mrf.mxu0  ;;  %v2652_v10 = vpack.c.bf16 %v2632_v60, %v2631_v38 }
 0x129   : > { %v5576_v16 = vadd.f32 %v1273_v47, %v1000_v7  ;;  %v1011_v36 = vadd.f32 %v4342_v33, %v5525_v51  ;;  %v2937_v51 = vld [vmem:[#allocation2 + $0x13a] sm:$0xff]  ;;  %v2653_v7 = vpack.c.bf16 %v2634_v61, %v2633_v22 }
 0x12a   : > { %v1002_v18 = vpop.f32.mrf.mxu1  ;;  %v1276_v9 = vpop.f32.mrf.mxu0  ;;  %v2958_v13 = vpack.c.bf16 %v2938_v0, %v2937_v51 }
 0x12b   : > { %v5579_v28 = vadd.f32 %v4390_v4, %v1011_v36  ;;  %v1003_v35 = vadd.f32 %v1002_v18, %v5529_v30  ;;  %v2939_v30 = vld [vmem:[#allocation2 + $0x152] sm:$0xff] }
 0x12c   : > { %v4345_v21 = vpop.f32.mrf.mxu1  ;;  %v4393_v63 = vpop.f32.mrf.mxu0  ;;  %4632 = vmatmul.mubr.bf16.gmra.mxu1 %v5376_v37  ;;  %4680 = vmatmul.mubr.bf16.gmra.mxu0 %v2956_v49  ;;  %v2959_v33 = vpack.c.bf16 %v2940_v25, %v2939_v30 }
 0x12d   : > { %v5583_v2 = vadd.f32 %v1276_v9, %v1003_v35  ;;  %v1024_v45 = vadd.f32 %v4345_v21, %v5456_v15  ;;  %4635 = vmatprep.mubr.bf16.mxu1 %v2651_v8  ;;  %4683 = vmatprep.mubr.bf16.mxu0 %v2957_v52  ;;  %v2941_v21 = vld [vmem:[#allocation2 + $0x16a] sm:$0xff] }
 0x12e   : > { %v1015_v23 = vpop.f32.mrf.mxu1  ;;  %v1289_v58 = vpop.f32.mrf.mxu0 }
 0x12f   : > { %v5586_v26 = vadd.f32 %v4393_v63, %v1024_v45  ;;  %v1016_v37 = vadd.f32 %v1015_v23, %v5464_v17  ;;  %v2635_v17 = vld [vmem:[#allocation2 + $0x169] sm:$0xff]  ;;  %v2942_v63 = vld [vmem:[#allocation2 + $0x172] sm:$0xff] }
 0x130   : > { %v4346_v56 = vpop.f32.mrf.mxu1  ;;  %v4394_v47 = vpop.f32.mrf.mxu0  ;;  %v2960_v23 = vpack.c.bf16 %v2942_v63, %v2941_v21 }
 0x131   : > { %v5589_v50 = vadd.f32 %v1289_v58, %v1016_v37  ;;  %v1027_v15 = vadd.f32 %v4346_v56, %v5468_v44  ;;  %v2636_v44 = vld [vmem:[#allocation2 + $0x171] sm:$0xff] }
 0x132   : > { %v1018_v4 = vpop.f32.mrf.mxu1  ;;  %v1292_v49 = vpop.f32.mrf.mxu0  ;;  %v2654_v22 = vpack.c.bf16 %v2636_v44, %v2635_v17 }
 0x133   : > { %v5592_v36 = vadd.f32 %v4394_v47, %v1027_v15  ;;  %v1019_v8 = vadd.f32 %v1018_v4, %v5472_v48  ;;  %v2945_v15 = vld [vmem:[#allocation2 + $0x19a] sm:$0xff] }
 0x134   : > { %v4349_v52 = vpop.f32.mrf.mxu1  ;;  %v4397_v18 = vpop.f32.mrf.mxu0  ;;  %4636 = vmatmul.mubr.bf16.gmra.mxu1 %v2652_v10  ;;  %4684 = vmatmul.mubr.bf16.gmra.mxu0 %v2958_v13  ;;  %v2639_v10 = vld [vmem:[#allocation2 + $0x199] sm:$0xff] }
 0x135   : > { %v5595_v9 = vadd.f32 %v1292_v49, %v1019_v8  ;;  %v1040_v35 = vadd.f32 %v4349_v52, %v5476_v57  ;;  %4639 = vmatprep.mubr.bf16.mxu1 %v2653_v7  ;;  %4687 = vmatprep.mubr.bf16.mxu0 %v2959_v33  ;;  %v2946_v7 = vld [vmem:[#allocation2 + $0x1a2] sm:$0xff] }
 0x136   : > { %v1031_v38 = vpop.f32.mrf.mxu1  ;;  %v1305_v60 = vpop.f32.mrf.mxu0  ;;  %v2962_v17 = vpack.c.bf16 %v2946_v7, %v2945_v15 }
 0x137   : > { %v5598_v45 = vadd.f32 %v4397_v18, %v1040_v35  ;;  %v1032_v48 = vadd.f32 %v1031_v38, %v5484_v6 }
 0x138   : > { %v4350_v51 = vpop.f32.mrf.mxu1  ;;  %v4398_v0 = vpop.f32.mrf.mxu0 }
 0x139   : > { %v5601_v58 = vadd.f32 %v1305_v60, %v1032_v48  ;;  %v1043_v61 = vadd.f32 %v4350_v51, %v5488_v19  ;;  %v2640_v19 = vld [vmem:[#allocation2 + $0x1a1] sm:$0xff] }
 0x13a   : > { %v1034_v57 = vpop.f32.mrf.mxu1  ;;  %v1308_v30 = vpop.f32.mrf.mxu0  ;;  %v2656_v18 = vpack.c.bf16 %v2640_v19, %v2639_v10 }
 0x13b   : > { %v5604_v25 = vadd.f32 %v4398_v0, %v1043_v61  ;;  %v1035_v37 = vadd.f32 %v1034_v57, %v5492_v34 }
 0x13c   : > { %v4353_v56 = vpop.f32.mrf.mxu1  ;;  %v4401_v47 = vpop.f32.mrf.mxu0  ;;  %4640 = vmatmul.mubr.bf16.gmra.mxu1 %v2654_v22  ;;  %4688 = vmatmul.mubr.bf16.gmra.mxu0 %v2960_v23 }
 0x13d   : > { %v5607_v6 = vadd.f32 %v1308_v30, %v1035_v37  ;;  %v1056_v13 = vadd.f32 %v4353_v56, %v5496_v5  ;;  %4643 = vmatprep.mubr.bf16.mxu1 %v5258_v43  ;;  %4691 = vmatprep.mubr.bf16.mxu0 %v5510_v11 }
 0x13e   : > { %v1047_v33 = vpop.f32.mrf.mxu1  ;;  %v1321_v4 = vpop.f32.mrf.mxu0 }
 0x13f   : > { %v5612_v49 = vadd.f32 %v4401_v47, %v1056_v13  ;;  %v1048_v34 = vadd.f32 %v1047_v33, %v5504_v12 }
 0x140   : > { %v4354_v8 = vpop.f32.mrf.mxu1  ;;  %v4402_v52 = vpop.f32.mrf.mxu0 }
 0x141   : > { %v5615_v35 = vadd.f32 %v1321_v4, %v1048_v34  ;;  %v1059_v5 = vadd.f32 %v4354_v8, %v5508_v62 }
 0x142   : > { %v1050_v43 = vpop.f32.mrf.mxu1  ;;  %v1324_v44 = vpop.f32.mrf.mxu0 }
 0x143   : > { %v5618_v11 = vadd.f32 %v4402_v52, %v1059_v5  ;;  %v1051_v21 = vadd.f32 %v1050_v43, %v5514_v54 }
 0x144   : > { %v4357_v63 = vpop.f32.mrf.mxu1  ;;  %v4405_v38 = vpop.f32.mrf.mxu0  ;;  %4644 = vmatmul.mubr.bf16.gmra.mxu1 %v2656_v18  ;;  %4692 = vmatmul.mubr.bf16.gmra.mxu0 %v2962_v17 }
 0x145   : > { %v5621_v60 = vadd.f32 %v1324_v44, %v1051_v21  ;;  %v1072_v12 = vadd.f32 %v4357_v63, %v5518_v20 }
 0x146   : > { %v1063_v48 = vpop.f32.mrf.mxu1  ;;  %v1337_v51 = vpop.f32.mrf.mxu0 }
 0x147   : > { %v5624_v0 = vadd.f32 %v4405_v38, %v1072_v12  ;;  %v1064_v62 = vadd.f32 %v1063_v48, %v5523_v39 }
 0x148   : > { %v4358_v22 = vpop.f32.mrf.mxu1  ;;  %v4406_v23 = vpop.f32.mrf.mxu0 }
 0x149   : > { %v5627_v61 = vadd.f32 %v1337_v51, %v1064_v62  ;;  %v1075_v54 = vadd.f32 %v4358_v22, %v5527_v55 }
 0x14a   : > { %v1066_v57 = vpop.f32.mrf.mxu1  ;;  %v1340_v30 = vpop.f32.mrf.mxu0 }
 0x14b   : > { %v5630_v37 = vadd.f32 %v4406_v23, %v1075_v54  ;;  %v1067_v56 = vadd.f32 %v1066_v57, %v5531_v32 }
 0x14c   : > { %v4425_v47 = vpop.f32.mrf.mxu1  ;;  %v4473_v20 = vpop.f32.mrf.mxu0 }
 0x14d   : > { %v5633_v10 = vadd.f32 %v1340_v30, %v1067_v56  ;;  %v1660_v13 = vadd.f32 %v4425_v47, %v5534_v1 }
 0x14e   : > { %v1531_v19 = vpop.f32.mrf.mxu1  ;;  %v1837_v39 = vpop.f32.mrf.mxu0 }
 0x14f   : > { %v5636_v15 = vadd.f32 %v4473_v20, %v1660_v13  ;;  %v1658_v7 = vadd.f32 %v1531_v19, %v5537_v59 }
 0x150   : > { %v4426_v33 = vpop.f32.mrf.mxu1  ;;  %v4474_v55 = vpop.f32.mrf.mxu0 }
 0x151   : > { %v5639_v4 = vadd.f32 %v1837_v39, %v1658_v7  ;;  %v1661_v34 = vadd.f32 %v4426_v33, %v5540_v14 }
 0x152   : > { %v1534_v8 = vpop.f32.mrf.mxu1  ;;  %v1840_v32 = vpop.f32.mrf.mxu0 }
 0x153   : > { %v5642_v52 = vadd.f32 %v4474_v55, %v1661_v34  ;;  %v1659_v18 = vadd.f32 %v1534_v8, %v5543_v27 }
 0x154   : > { %v4429_v17 = vpop.f32.mrf.mxu1  ;;  %v4477_v1 = vpop.f32.mrf.mxu0 }
 0x155   : > { %v5645_v5 = vadd.f32 %v1840_v32, %v1659_v18  ;;  %v1664_v43 = vadd.f32 %v4429_v17, %v5546_v41 }
 0x156   : > { %v1547_v44 = vpop.f32.mrf.mxu1  ;;  %v1853_v59 = vpop.f32.mrf.mxu0 }
 0x157   : > { %v5648_v21 = vadd.f32 %v4477_v1, %v1664_v43  ;;  %v1662_v63 = vadd.f32 %v1547_v44, %v5549_v24 }
 0x158   : > { %v4430_v38 = vpop.f32.mrf.mxu1  ;;  %v4478_v14 = vpop.f32.mrf.mxu0 }
 0x159   : > { %v5651_v12 = vadd.f32 %v1853_v59, %v1662_v63  ;;  %v1665_v48 = vadd.f32 %v4430_v38, %v5552_v31 }
 0x15a   : > { %v1550_v51 = vpop.f32.mrf.mxu1  ;;  %v1856_v27 = vpop.f32.mrf.mxu0 }
 0x15b   : > { %v5654_v62 = vadd.f32 %v4478_v14, %v1665_v48  ;;  %v1663_v22 = vadd.f32 %v1550_v51, %v5555_v3 }
 0x15c   : > { %v4433_v23 = vpop.f32.mrf.mxu1  ;;  %v4481_v41 = vpop.f32.mrf.mxu0 }
 0x15d   : > { %v5657_v54 = vadd.f32 %v1856_v27, %v1663_v22  ;;  %v1668_v57 = vadd.f32 %v4433_v23, %v5559_v53 }
 0x15e   : > { %v1563_v30 = vpop.f32.mrf.mxu1  ;;  %v1869_v24 = vpop.f32.mrf.mxu0 }
 0x15f   : > { %v5660_v56 = vadd.f32 %v4481_v41, %v1668_v57  ;;  %v1666_v47 = vadd.f32 %v1563_v30, %v5562_v46 }
 0x160   : > { %v4434_v20 = vpop.f32.mrf.mxu1  ;;  %v4482_v31 = vpop.f32.mrf.mxu0 }
 0x161   : > { %v5663_v13 = vadd.f32 %v1869_v24, %v1666_v47  ;;  %v1669_v19 = vadd.f32 %v4434_v20, %v5565_v42 }
 0x162   : > { %v1566_v39 = vpop.f32.mrf.mxu1  ;;  %v1872_v3 = vpop.f32.mrf.mxu0 }
 0x163   : > { %v5666_v7 = vadd.f32 %v4482_v31, %v1669_v19  ;;  %v1667_v33 = vadd.f32 %v1566_v39, %v5569_v40 }
 0x164   : > { %v4437_v55 = vpop.f32.mrf.mxu1  ;;  %v4485_v53 = vpop.f32.mrf.mxu0 }
 0x165   : > { %v5669_v34 = vadd.f32 %v1872_v3, %v1667_v33  ;;  %v1672_v8 = vadd.f32 %v4437_v55, %v5573_v29 }
 0x166   : > { %v1579_v32 = vpop.f32.mrf.mxu1  ;;  %v1885_v46 = vpop.f32.mrf.mxu0 }
 0x167   : > { %v5672_v18 = vadd.f32 %v4485_v53, %v1672_v8  ;;  %v1670_v17 = vadd.f32 %v1579_v32, %v5576_v16 }
 0x168   : > { %v4438_v1 = vpop.f32.mrf.mxu1  ;;  %v4486_v42 = vpop.f32.mrf.mxu0 }
 0x169   : > { %v5675_v43 = vadd.f32 %v1885_v46, %v1670_v17  ;;  %v1673_v44 = vadd.f32 %v4438_v1, %v5579_v28 }
 0x16a   : > { %v1582_v59 = vpop.f32.mrf.mxu1  ;;  %v1888_v40 = vpop.f32.mrf.mxu0 }
 0x16b   : > { %v5678_v63 = vadd.f32 %v4486_v42, %v1673_v44  ;;  %v1671_v38 = vadd.f32 %v1582_v59, %v5583_v2 }
 0x16c   : > { %v4441_v14 = vpop.f32.mrf.mxu1  ;;  %v4489_v29 = vpop.f32.mrf.mxu0 }
 0x16d   : > { %v5681_v48 = vadd.f32 %v1888_v40, %v1671_v38  ;;  %v1676_v51 = vadd.f32 %v4441_v14, %v5586_v26 }
 0x16e   : > { %v1595_v27 = vpop.f32.mrf.mxu1  ;;  %v1901_v16 = vpop.f32.mrf.mxu0 }
 0x16f   : > { %v5684_v22 = vadd.f32 %v4489_v29, %v1676_v51  ;;  %v1674_v23 = vadd.f32 %v1595_v27, %v5589_v50 }
 0x170   : > { %v4442_v41 = vpop.f32.mrf.mxu1  ;;  %v4490_v28 = vpop.f32.mrf.mxu0 }
 0x171   : > { %v5687_v57 = vadd.f32 %v1901_v16, %v1674_v23  ;;  %v1677_v30 = vadd.f32 %v4442_v41, %v5592_v36 }
 0x172   : > { %v1598_v24 = vpop.f32.mrf.mxu1  ;;  %v1904_v2 = vpop.f32.mrf.mxu0 }
 0x173   : > { %v5690_v47 = vadd.f32 %v4490_v28, %v1677_v30  ;;  %v1675_v20 = vadd.f32 %v1598_v24, %v5595_v9 }
 0x174   : > { %v4445_v31 = vpop.f32.mrf.mxu1  ;;  %v4493_v26 = vpop.f32.mrf.mxu0 }
 0x175   : > { %v5693_v19 = vadd.f32 %v1904_v2, %v1675_v20  ;;  %v1680_v39 = vadd.f32 %v4445_v31, %v5598_v45 }
 0x176   : > { %v1611_v3 = vpop.f32.mrf.mxu1  ;;  %v1917_v50 = vpop.f32.mrf.mxu0 }
 0x177   : > { %v5696_v33 = vadd.f32 %v4493_v26, %v1680_v39  ;;  %v1678_v55 = vadd.f32 %v1611_v3, %v5601_v58 }
 0x178   : > { %v4446_v53 = vpop.f32.mrf.mxu1  ;;  %v4494_v36 = vpop.f32.mrf.mxu0 }
 0x179   : > { %v5699_v8 = vadd.f32 %v1917_v50, %v1678_v55  ;;  %v1681_v32 = vadd.f32 %v4446_v53, %v5604_v25 }
 0x17a   : > { %v1614_v46 = vpop.f32.mrf.mxu1  ;;  %v1920_v9 = vpop.f32.mrf.mxu0 }
 0x17b   : > { %5969 = vst [vmem:[#allocation3_spill] sm:$0xff] %v5699_v8  ;;  %v5702_v17 = vadd.f32 %v4494_v36, %v1681_v32  ;;  %v1679_v1 = vadd.f32 %v1614_v46, %v5607_v6 }
 0x17c   : > { %v4449_v42 = vpop.f32.mrf.mxu1  ;;  %v4497_v45 = vpop.f32.mrf.mxu0 }
 0x17d   : > { %5970 = vst [vmem:[#allocation4_spill] sm:$0xff] %v5702_v17  ;;  %v5705_v44 = vadd.f32 %v1920_v9, %v1679_v1  ;;  %v1684_v59 = vadd.f32 %v4449_v42, %v5612_v49 }
 0x17e   : > { %v1627_v40 = vpop.f32.mrf.mxu1  ;;  %v1933_v58 = vpop.f32.mrf.mxu0 }
 0x17f   : > { %5971 = vst [vmem:[#allocation5_spill] sm:$0xff] %v5705_v44  ;;  %v5708_v38 = vadd.f32 %v4497_v45, %v1684_v59  ;;  %v1682_v14 = vadd.f32 %v1627_v40, %v5615_v35 }
 0x180   : > { %v4450_v29 = vpop.f32.mrf.mxu1  ;;  %v4498_v25 = vpop.f32.mrf.mxu0 }
 0x181   : > { %v5711_v51 = vadd.f32 %v1933_v58, %v1682_v14  ;;  %v1685_v27 = vadd.f32 %v4450_v29, %v5618_v11 }
 0x182   : > { %v1630_v16 = vpop.f32.mrf.mxu1  ;;  %v1936_v6 = vpop.f32.mrf.mxu0 }
 0x183   : > { %5972 = vst [vmem:[#allocation6_spill] sm:$0xff] %v5711_v51  ;;  %v5714_v23 = vadd.f32 %v4498_v25, %v1685_v27  ;;  %v1683_v41 = vadd.f32 %v1630_v16, %v5621_v60 }
 0x184   : > { %v4453_v28 = vpop.f32.mrf.mxu1  ;;  %v4501_v49 = vpop.f32.mrf.mxu0 }
 0x185   : > { %5973 = vst [vmem:[#allocation7_spill] sm:$0xff] %v5714_v23  ;;  %v5717_v30 = vadd.f32 %v1936_v6, %v1683_v41  ;;  %v1688_v24 = vadd.f32 %v4453_v28, %v5624_v0 }
 0x186   : > { %v1643_v2 = vpop.f32.mrf.mxu1  ;;  %v1949_v35 = vpop.f32.mrf.mxu0 }
 0x187   : > { %5974 = vst [vmem:[#allocation8_spill] sm:$0xff] %v5717_v30  ;;  %v5720_v20 = vadd.f32 %v4501_v49, %v1688_v24  ;;  %v1686_v31 = vadd.f32 %v1643_v2, %v5627_v61 }
 0x188   : > { %v4454_v26 = vpop.f32.mrf.mxu1  ;;  %v4502_v11 = vpop.f32.mrf.mxu0 }
 0x189   : > { %v5723_v39 = vadd.f32 %v1949_v35, %v1686_v31  ;;  %v1689_v3 = vadd.f32 %v4454_v26, %v5630_v37 }
 0x18a   : > { %v1646_v50 = vpop.f32.mrf.mxu1  ;;  %v1952_v60 = vpop.f32.mrf.mxu0 }
 0x18b   : > { %5975 = vst [vmem:[#allocation9_spill] sm:$0xff] %v5723_v39  ;;  %v5726_v55 = vadd.f32 %v4502_v11, %v1689_v3  ;;  %v1687_v53 = vadd.f32 %v1646_v50, %v5633_v10 }
 0x18c   : > { %v4521_v36 = vpop.f32.mrf.mxu1  ;;  %v4569_v0 = vpop.f32.mrf.mxu0 }
 0x18d   : > { %5976 = vst [vmem:[#allocation10_spill] sm:$0xff] %v5726_v55  ;;  %v5729_v32 = vadd.f32 %v1952_v60, %v1687_v53  ;;  %v2272_v46 = vadd.f32 %v4521_v36, %v5636_v15 }
 0x18e   : > { %v2143_v9 = vpop.f32.mrf.mxu1  ;;  %v2450_v61 = vpop.f32.mrf.mxu0 }
 0x18f   : > { %5977 = vst [vmem:[#allocation11_spill] sm:$0xff] %v5729_v32  ;;  %v5732_v1 = vadd.f32 %v4569_v0, %v2272_v46  ;;  %v2270_v42 = vadd.f32 %v2143_v9, %v5639_v4 }
 0x190   : > { %v5735_v45 = vpop.f32.mrf.mxu1  ;;  %v5737_v37 = vpop.f32.mrf.mxu0 }
 0x191   : > { %v5739_v59 = vadd.f32 %v2450_v61, %v2270_v42 }
 0x192   : > { %v5741_v40 = vpop.f32.mrf.mxu1  ;;  %v5743_v10 = vpop.f32.mrf.mxu0 }
 0x194   : > { %v4525_v58 = vpop.f32.mrf.mxu1  ;;  %v4573_v14 = vpop.f32.mrf.mxu0 }
 0x195   : > { %v2276_v15 = vadd.f32 %v4525_v58, %v5648_v21 }
 0x196   : > { %v5746_v29 = vpop.f32.mrf.mxu1  ;;  %v5748_v25 = vpop.f32.mrf.mxu0 }
 0x197   : > { %v5750_v27 = vadd.f32 %v4573_v14, %v2276_v15 }
 0x198   : > { %v5752_v4 = vpop.f32.mrf.mxu1  ;;  %v5754_v16 = vpop.f32.mrf.mxu0 }
 0x19a   : > { %v5756_v6 = vpop.f32.mrf.mxu1  ;;  %v5758_v41 = vpop.f32.mrf.mxu0 }
 0x19c   : > { %v4529_v28 = vpop.f32.mrf.mxu1  ;;  %v4577_v49 = vpop.f32.mrf.mxu0 }
 0x19d   : > { %v2280_v24 = vadd.f32 %v4529_v28, %v5660_v56 }
 0x19e   : > { %v5761_v2 = vpop.f32.mrf.mxu1  ;;  %v5763_v21 = vpop.f32.mrf.mxu0 }
 0x19f   : > { %v5765_v35 = vadd.f32 %v4577_v49, %v2280_v24 }
 0x1a0   : > { %v5767_v31 = vpop.f32.mrf.mxu1  ;;  %v5769_v26 = vpop.f32.mrf.mxu0 }
 0x1a2   : > { %v5771_v11 = vpop.f32.mrf.mxu1  ;;  %v5773_v3 = vpop.f32.mrf.mxu0 }
 0x1a4   : > { %v4533_v50 = vpop.f32.mrf.mxu1  ;;  %v4581_v60 = vpop.f32.mrf.mxu0 }
 0x1a5   : > { %v2284_v53 = vadd.f32 %v4533_v50, %v5672_v18 }
 0x1a6   : > { %v5776_v36 = vpop.f32.mrf.mxu1  ;;  %v5778_v56 = vpop.f32.mrf.mxu0 }
 0x1a7   : > { %v5780_v0 = vadd.f32 %v4581_v60, %v2284_v53 }
 0x1a8   : > { %v5782_v46 = vpop.f32.mrf.mxu1  ;;  %v5784_v9 = vpop.f32.mrf.mxu0 }
 0x1aa   : > { %v5786_v61 = vpop.f32.mrf.mxu1  ;;  %v5788_v42 = vpop.f32.mrf.mxu0 }
 0x1ac   : > { %v4537_v58 = vpop.f32.mrf.mxu1  ;;  %v4585_v14 = vpop.f32.mrf.mxu0 }
 0x1ad   : > { %v2288_v15 = vadd.f32 %v4537_v58, %v5684_v22 }
 0x1ae   : > { %v5791_v28 = vpop.f32.mrf.mxu1  ;;  %v5793_v18 = vpop.f32.mrf.mxu0 }
 0x1af   : > { %v5795_v49 = vadd.f32 %v4585_v14, %v2288_v15 }
 0x1b0   : > { %v5797_v24 = vpop.f32.mrf.mxu1  ;;  %v5799_v50 = vpop.f32.mrf.mxu0 }
 0x1b2   : > { %v5801_v60 = vpop.f32.mrf.mxu1  ;;  %v5803_v53 = vpop.f32.mrf.mxu0 }
 0x1b3   : > { %5978 = vst [vmem:[#allocation12_spill] sm:$0xff] %v5803_v53 }
 0x1b4   : > { %v4541_v32 = vpop.f32.mrf.mxu1  ;;  %v4589_v55 = vpop.f32.mrf.mxu0 }
 0x1b5   : > { %v2292_v39 = vadd.f32 %v4541_v32, %v5696_v33 }
 0x1b6   : > { %v5806_v30 = vpop.f32.mrf.mxu1  ;;  %v5808_v22 = vpop.f32.mrf.mxu0 }
 0x1b7   : > { %5979 = vst [vmem:[#allocation13_spill] sm:$0xff] %v5808_v22  ;;  %v5810_v58 = vadd.f32 %v4589_v55, %v2292_v39 }
 0x1b8   : > { %v5812_v14 = vpop.f32.mrf.mxu1  ;;  %v5814_v15 = vpop.f32.mrf.mxu0 }
 0x1b9   : > { %5980 = vst [vmem:[#allocation14_spill] sm:$0xff] %v5810_v58  ;;  %5981 = vst [vmem:[#allocation15_spill] sm:$0xff] %v5812_v14 }
 0x1ba   : > { %5982 = vst [vmem:[#allocation16_spill] sm:$0xff] %v5814_v15  ;;  %v5816_v23 = vpop.f32.mrf.mxu1  ;;  %v5818_v51 = vpop.f32.mrf.mxu0 }
 0x1bb   : > { %5983 = vst [vmem:[#allocation17_spill] sm:$0xff] %v5816_v23  ;;  %5984 = vst [vmem:[#allocation18_spill] sm:$0xff] %v5818_v51 }
 0x1bc   : > { %v4545_v44 = vpop.f32.mrf.mxu1  ;;  %v4593_v17 = vpop.f32.mrf.mxu0 }
 0x1bd   : > { %v2296_v8 = vadd.f32 %v4545_v44, %v5708_v38 }
 0x1be   : > { %v5821_v53 = vpop.f32.mrf.mxu1  ;;  %v5823_v33 = vpop.f32.mrf.mxu0 }
 0x1bf   : > { %5985 = vst [vmem:[#allocation19_spill] sm:$0xff] %v5823_v33  ;;  %v5825_v32 = vadd.f32 %v4593_v17, %v2296_v8 }
 0x1c0   : > { %v5827_v39 = vpop.f32.mrf.mxu1  ;;  %v5829_v55 = vpop.f32.mrf.mxu0 }
 0x1c1   : > { %5986 = vst [vmem:[#allocation20_spill] sm:$0xff] %v5825_v32  ;;  %5987 = vst [vmem:[#allocation21_spill] sm:$0xff] %v5827_v39 }
 0x1c2   : > { %5988 = vst [vmem:[#allocation22_spill] sm:$0xff] %v5829_v55  ;;  %v5831_v58 = vpop.f32.mrf.mxu1  ;;  %v5833_v15 = vpop.f32.mrf.mxu0 }
 0x1c3   : > { %5989 = vst [vmem:[#allocation23_spill] sm:$0xff] %v5831_v58  ;;  %5990 = vst [vmem:[#allocation24_spill] sm:$0xff] %v5833_v15  ;;  %v2273_v15 = vadd.f32 %v5735_v45, %v5642_v52  ;;  %v2274_v52 = vadd.f32 %v5746_v29, %v5651_v12 }
 0x1c4   : > { %v4549_v23 = vpop.f32.mrf.mxu1  ;;  %v4597_v51 = vpop.f32.mrf.mxu0 }
 0x1c5   : > { %v2300_v22 = vadd.f32 %v4549_v23, %v5720_v20  ;;  %v2271_v23 = vadd.f32 %v5741_v40, %v5645_v5  ;;  %v2277_v5 = vadd.f32 %v5752_v4, %v5654_v62  ;;  %v2581_v29 = vadd.f32 %v5748_v25, %v2274_v52 }
 0x1c6   : > { %v5836_v14 = vpop.f32.mrf.mxu1  ;;  %v5838_v44 = vpop.f32.mrf.mxu0 }
 0x1c7   : > { %5991 = vst [vmem:[#allocation25_spill] sm:$0xff] %v5836_v14  ;;  %5992 = vst [vmem:[#allocation26_spill] sm:$0xff] %v5838_v44  ;;  %v5840_v38 = vadd.f32 %v4597_v51, %v2300_v22  ;;  %v2580_v51 = vadd.f32 %v5737_v37, %v2273_v15  ;;  %v2584_v4 = vadd.f32 %v5754_v16, %v2277_v5 }
 0x1c8   : > { %v5842_v8 = vpop.f32.mrf.mxu1  ;;  %v5844_v17 = vpop.f32.mrf.mxu0 }
 0x1c9   : > { %5993 = vst [vmem:[#allocation27_spill] sm:$0xff] %v5840_v38  ;;  %5994 = vst [vmem:[#allocation28_spill] sm:$0xff] %v5842_v8 }
 0x1ca   : > { %5995 = vst [vmem:[#allocation29_spill] sm:$0xff] %v5844_v17  ;;  %v5846_v32 = vpop.f32.mrf.mxu1  ;;  %v5848_v55 = vpop.f32.mrf.mxu0 }
 0x1cb   : > { %5996 = vst [vmem:[#allocation30_spill] sm:$0xff] %v5846_v32  ;;  %5997 = vst [vmem:[#allocation31_spill] sm:$0xff] %v5848_v55  ;;  %v2578_v55 = vadd.f32 %v5743_v10, %v2271_v23 }
 0x1cc   : > { %v4617_v58 = vpop.f32.mrf.mxu1  ;;  %v4665_v33 = vpop.f32.mrf.mxu0 }
 0x1cd   : > { %v2885_v22 = vadd.f32 %v4617_v58, %v5732_v1  ;;  %v2275_v1 = vadd.f32 %v5756_v6, %v5657_v54 }
 0x1ce   : > { %v2756_v20 = vpop.f32.mrf.mxu1  ;;  %v3062_v44 = vpop.f32.mrf.mxu0 }
 0x1cf   : > { %v2883_v38 = vadd.f32 %v2756_v20, %v5739_v59  ;;  %v3191_v14 = vadd.f32 %v4665_v33, %v2885_v22 }
 0x1d0   : > { %v4618_v17 = vpop.f32.mrf.mxu1  ;;  %v4666_v32 = vpop.f32.mrf.mxu0 }
 0x1d1   : > { %v2886_v8 = vadd.f32 %v4618_v17, %v2580_v51  ;;  %v3189_v37 = vadd.f32 %v3062_v44, %v2883_v38  ;;  %v2582_v38 = vadd.f32 %v5758_v41, %v2275_v1  ;;  %v3421_v23 = vmul.f32 %v3191_v14, %v3191_v14 }
 0x1d2   : > { %v2759_v45 = vpop.f32.mrf.mxu1  ;;  %v3065_v40 = vpop.f32.mrf.mxu0  ;;  %v2281_v51 = vadd.f32 %v5767_v31, %v5666_v7 }
 0x1d3   : > { %v3192_v15 = vadd.f32 %v4666_v32, %v2886_v8  ;;  %v2884_v39 = vadd.f32 %v2759_v45, %v2578_v55  ;;  %v3419_v6 = vmul.f32 %v3189_v37, %v3189_v37  ;;  %v2278_v8 = vadd.f32 %v5761_v2, %v5663_v13 }
 0x1d4   : > { %v4621_v12 = vpop.f32.mrf.mxu1  ;;  %v4669_v59 = vpop.f32.mrf.mxu0 }
 0x1d5   : > { %v3945_v10 = vpack.c.bf16 %v3192_v15, %v3191_v14  ;;  %v3190_v62 = vadd.f32 %v3065_v40, %v2884_v39  ;;  %v2889_v58 = vadd.f32 %v4621_v12, %v5750_v27  ;;  %v3422_v22 = vmul.f32 %v3192_v15, %v3192_v15 }
 0x1d6   : > { %v2772_v33 = vpop.f32.mrf.mxu1  ;;  %v3078_v54 = vpop.f32.mrf.mxu0  ;;  %v2585_v1 = vadd.f32 %v5763_v21, %v2278_v8  ;;  %v2285_v8 = vadd.f32 %v5782_v46, %v5678_v63  ;;  %v2283_v63 = vadd.f32 %v5786_v61, %v5681_v48 }
 0x1d7   : > { %4032 = vst [vmem:[%s5869_s9 + $0x8] sm:$0xff] %v3945_v10   ;;  %v3940_v32 = vpack.c.bf16 %v3190_v62, %v3189_v37  ;;  %v3381_v55 = vadd.f32 %v3190_v62, %v3189_v37  ;;  %v3420_v44 = vmul.f32 %v3190_v62, %v3190_v62  ;;  %v2887_v39 = vadd.f32 %v2772_v33, %v2581_v29 }
 0x1d8   : > { %v4622_v17 = vpop.f32.mrf.mxu1  ;;  %v4670_v25 = vpop.f32.mrf.mxu0  ;;  %v3195_v52 = vadd.f32 %v4669_v59, %v2889_v58  ;;  %v2590_v61 = vadd.f32 %v5788_v42, %v2283_v63 }
 0x1d9   : > { %3941 = vst [vmem:[%s5869_s9] sm:$0xff] %v3940_v32   ;;  %v3382_v16 = vadd.f32 %v3381_v55, %v3191_v14  ;;  %v3451_v20 = vadd.f32 %v3420_v44, %v3419_v6  ;;  %v2890_v27 = vadd.f32 %v4622_v17, %v2584_v4  ;;  %v3193_v5 = vadd.f32 %v3078_v54, %v2887_v39 }
 0x1da   : > { %v2775_v45 = vpop.f32.mrf.mxu1  ;;  %v3081_v40 = vpop.f32.mrf.mxu0  ;;  %v2279_v14 = vadd.f32 %v5771_v11, %v5669_v34 }
 0x1db   : > { %v3452_v41 = vadd.f32 %v3451_v20, %v3421_v23  ;;  %v3383_v37 = vadd.f32 %v3382_v16, %v3192_v15  ;;  %v3196_v13 = vadd.f32 %v4670_v25, %v2890_v27  ;;  %v2888_v2 = vadd.f32 %v2775_v45, %v2582_v38 }
 0x1dc   : > { %v4625_v12 = vpop.f32.mrf.mxu1  ;;  %v4673_v10 = vpop.f32.mrf.mxu0  ;;  %v3423_v29 = vmul.f32 %v3193_v5, %v3193_v5  ;;  %v2588_v15 = vadd.f32 %v5769_v26, %v2281_v51  ;;  %v2586_v44 = vadd.f32 %v5773_v3, %v2279_v14  ;;  %v2282_v38 = vadd.f32 %v5776_v36, %v5675_v43 }
 0x1dd   : > { %v3384_v62 = vadd.f32 %v3383_v37, %v3193_v5  ;;  %v3453_v7 = vadd.f32 %v3452_v41, %v3422_v22  ;;  %v3955_v31 = vpack.c.bf16 %v3196_v13, %v3195_v52  ;;  %v3194_v59 = vadd.f32 %v3081_v40, %v2888_v2 }
 0x1de   : > { %v2788_v4 = vpop.f32.mrf.mxu1  ;;  %v3094_v58 = vpop.f32.mrf.mxu0  ;;  %v2893_v54 = vadd.f32 %v4625_v12, %v5765_v35  ;;  %v3425_v26 = vmul.f32 %v3195_v52, %v3195_v52  ;;  %v3426_v22 = vmul.f32 %v3196_v13, %v3196_v13  ;;  %v2589_v36 = vadd.f32 %v5778_v56, %v2282_v38 }
 0x1df   : > { %v3454_v33 = vadd.f32 %v3453_v7, %v3423_v29  ;;  %4034 = vst [vmem:[%s5869_s9 + $0x18] sm:$0xff] %v3955_v31   ;;  %v2891_v21 = vadd.f32 %v2788_v4, %v2585_v1  ;;  %v3950_v6 = vpack.c.bf16 %v3194_v59, %v3193_v5  ;;  %v3385_v32 = vadd.f32 %v3384_v62, %v3194_v59 }
 0x1e0   : > { %v3424_v34 = vmul.f32 %v3194_v59, %v3194_v59  ;;  %v4626_v11 = vpop.f32.mrf.mxu1  ;;  %v4674_v55 = vpop.f32.mrf.mxu0  ;;  %v3199_v20 = vadd.f32 %v4673_v10, %v2893_v54  ;;  %v2592_v40 = vadd.f32 %v5784_v9, %v2285_v8  ;;  %v2286_v9 = vadd.f32 %v5791_v28, %v5687_v57 }
 0x1e1   : > { %v2894_v39 = vadd.f32 %v4626_v11, %v2588_v15  ;;  %4033 = vst [vmem:[%s5869_s9 + $0x10] sm:$0xff] %v3950_v6   ;;  %v3386_v17 = vadd.f32 %v3385_v32, %v3195_v52  ;;  %v3197_v35 = vadd.f32 %v3094_v58, %v2891_v21  ;;  %v2289_v31 = vadd.f32 %v5797_v24, %v5690_v47 }
 0x1e2   : > { %v3455_v25 = vadd.f32 %v3454_v33, %v3424_v34  ;;  %v2791_v23 = vpop.f32.mrf.mxu1  ;;  %v3097_v16 = vpop.f32.mrf.mxu0  ;;  %v3429_v4 = vmul.f32 %v3199_v20, %v3199_v20  ;;  %v2593_v28 = vadd.f32 %v5793_v18, %v2286_v9  ;;  %v2287_v47 = vadd.f32 %v5801_v60, %v5693_v19  ;;  %v5998_v60 = vld [vmem:[#allocation12_spill] sm:$0xff] }
 0x1e3   : > { %v3200_v27 = vadd.f32 %v4674_v55, %v2894_v39  ;;  %v2892_v51 = vadd.f32 %v2791_v23, %v2586_v44  ;;  %v3387_v5 = vadd.f32 %v3386_v17, %v3196_v13  ;;  %v3427_v37 = vmul.f32 %v3197_v35, %v3197_v35 }
 0x1e4   : > { %v3456_v3 = vadd.f32 %v3455_v25, %v3425_v26  ;;  %v4629_v45 = vpop.f32.mrf.mxu1  ;;  %v4677_v43 = vpop.f32.mrf.mxu0  ;;  %v2596_v38 = vadd.f32 %v5799_v50, %v2289_v31  ;;  %v6005_v31 = vld [vmem:[#allocation16_spill] sm:$0xff] }
 0x1e5   : > { %v3965_v46 = vpack.c.bf16 %v3200_v27, %v3199_v20  ;;  %v3198_v52 = vadd.f32 %v3097_v16, %v2892_v51  ;;  %v3388_v41 = vadd.f32 %v3387_v5, %v3197_v35  ;;  %v2897_v10 = vadd.f32 %v4629_v45, %v5780_v0  ;;  %v6000_v5 = vld [vmem:[#allocation4_spill] sm:$0xff]  ;;  %v6001_v45 = vld [vmem:[#allocation15_spill] sm:$0xff] }
 0x1e6   : > { %v3457_v2 = vadd.f32 %v3456_v3, %v3426_v22  ;;  %v2804_v1 = vpop.f32.mrf.mxu1  ;;  %v3110_v14 = vpop.f32.mrf.mxu0  ;;  %v3430_v34 = vmul.f32 %v3200_v27, %v3200_v27  ;;  %v2594_v22 = vadd.f32 %v5998_v60, %v2287_v47  ;;  %v5999_v3 = vld [vmem:[#allocation3_spill] sm:$0xff] }
 0x1e7   : > { %4036 = vst [vmem:[%s5869_s9 + $0x28] sm:$0xff] %v3965_v46   ;;  %v3960_v12 = vpack.c.bf16 %v3198_v52, %v3197_v35  ;;  %v3428_v13 = vmul.f32 %v3198_v52, %v3198_v52  ;;  %v2895_v62 = vadd.f32 %v2804_v1, %v2589_v36  ;;  %v3389_v29 = vadd.f32 %v3388_v41, %v3198_v52 }
 0x1e8   : > { %v3458_v56 = vadd.f32 %v3457_v2, %v3427_v37  ;;  %v4630_v7 = vpop.f32.mrf.mxu1  ;;  %v4678_v48 = vpop.f32.mrf.mxu0  ;;  %v3203_v21 = vadd.f32 %v4677_v43, %v2897_v10  ;;  %v2290_v50 = vadd.f32 %v5806_v30, %v5999_v3  ;;  %v2293_v43 = vadd.f32 %v6001_v45, %v6000_v5  ;;  %v6012_v45 = vld [vmem:[#allocation8_spill] sm:$0xff] }
 0x1e9   : > { %4035 = vst [vmem:[%s5869_s9 + $0x20] sm:$0xff] %v3960_v12   ;;  %v2898_v59 = vadd.f32 %v4630_v7, %v2592_v40  ;;  %v3390_v58 = vadd.f32 %v3389_v29, %v3199_v20  ;;  %v3201_v33 = vadd.f32 %v3110_v14, %v2895_v62  ;;  %v6002_v62 = vld [vmem:[#allocation13_spill] sm:$0xff] }
 0x1ea   : > { %v3459_v15 = vadd.f32 %v3458_v56, %v3428_v13  ;;  %v2807_v0 = vpop.f32.mrf.mxu1  ;;  %v3113_v54 = vpop.f32.mrf.mxu0  ;;  %v3433_v63 = vmul.f32 %v3203_v21, %v3203_v21  ;;  %v2597_v56 = vadd.f32 %v6002_v62, %v2290_v50  ;;  %v6003_v29 = vld [vmem:[#allocation5_spill] sm:$0xff]  ;;  %v6011_v50 = vld [vmem:[#allocation19_spill] sm:$0xff] }
 0x1eb   : > { %v3204_v6 = vadd.f32 %v4678_v48, %v2898_v59  ;;  %v2896_v32 = vadd.f32 %v2807_v0, %v2590_v61  ;;  %v3391_v11 = vadd.f32 %v3390_v58, %v3200_v27  ;;  %v3431_v39 = vmul.f32 %v3201_v33, %v3201_v33  ;;  %v6004_v7 = vld [vmem:[#allocation17_spill] sm:$0xff] }
 0x1ec   : > { %v3460_v42 = vadd.f32 %v3459_v15, %v3429_v4  ;;  %v4633_v55 = vpop.f32.mrf.mxu1  ;;  %v4681_v57 = vpop.f32.mrf.mxu0  ;;  %v2291_v48 = vadd.f32 %v6004_v7, %v6003_v29  ;;  %v2600_v59 = vadd.f32 %v6005_v31, %v2293_v43  ;;  %v6013_v43 = vld [vmem:[#allocation23_spill] sm:$0xff]  ;;  %v6018_v31 = vld [vmem:[#allocation25_spill] sm:$0xff] }
 0x1ed   : > { %v3975_v24 = vpack.c.bf16 %v3204_v6, %v3203_v21  ;;  %v3202_v44 = vadd.f32 %v3113_v54, %v2896_v32  ;;  %v3392_v8 = vadd.f32 %v3391_v11, %v3201_v33  ;;  %v2901_v16 = vadd.f32 %v4633_v55, %v5795_v49 }
 0x1ee   : > { %v3461_v26 = vadd.f32 %v3460_v42, %v3430_v34  ;;  %v2820_v17 = vpop.f32.mrf.mxu1  ;;  %v3126_v25 = vpop.f32.mrf.mxu0  ;;  %v3434_v14 = vmul.f32 %v3204_v6, %v3204_v6 }
 0x1ef   : > { %4038 = vst [vmem:[%s5869_s9 + $0x38] sm:$0xff] %v3975_v24   ;;  %v3970_v35 = vpack.c.bf16 %v3202_v44, %v3201_v33  ;;  %v3432_v23 = vmul.f32 %v3202_v44, %v3202_v44  ;;  %v2899_v20 = vadd.f32 %v2820_v17, %v2593_v28  ;;  %v3393_v27 = vadd.f32 %v3392_v8, %v3202_v44  ;;  %v6007_v28 = vld [vmem:[#allocation18_spill] sm:$0xff]  ;;  %v6010_v8 = vld [vmem:[#allocation21_spill] sm:$0xff] }
 0x1f0   : > { %v3462_v18 = vadd.f32 %v3461_v26, %v3431_v39  ;;  %v4634_v51 = vpop.f32.mrf.mxu1  ;;  %v4682_v19 = vpop.f32.mrf.mxu0  ;;  %v3207_v37 = vadd.f32 %v4681_v57, %v2901_v16  ;;  %v2598_v47 = vadd.f32 %v6007_v28, %v2291_v48  ;;  %v6008_v24 = vld [vmem:[#allocation6_spill] sm:$0xff]  ;;  %v6016_v48 = vld [vmem:[#allocation24_spill] sm:$0xff] }
 0x1f1   : > { %4037 = vst [vmem:[%s5869_s9 + $0x30] sm:$0xff] %v3970_v35   ;;  %v2902_v36 = vadd.f32 %v4634_v51, %v2596_v38  ;;  %v3394_v46 = vadd.f32 %v3393_v27, %v3203_v21  ;;  %v3205_v40 = vadd.f32 %v3126_v25, %v2899_v20  ;;  %v2294_v44 = vadd.f32 %v5821_v53, %v6008_v24  ;;  %v6009_v38 = vld [vmem:[#allocation7_spill] sm:$0xff] }
 0x1f2   : > { %v3463_v52 = vadd.f32 %v3462_v18, %v3432_v23  ;;  %v2823_v49 = vpop.f32.mrf.mxu1  ;;  %v3129_v41 = vpop.f32.mrf.mxu0  ;;  %v2297_v39 = vadd.f32 %v6010_v8, %v6009_v38  ;;  %v3437_v17 = vmul.f32 %v3207_v37, %v3207_v37  ;;  %v6021_v38 = vld [vmem:[#allocation26_spill] sm:$0xff] }
 0x1f3   : > { %v3208_v2 = vadd.f32 %v4682_v19, %v2902_v36  ;;  %v2900_v1 = vadd.f32 %v2823_v49, %v2594_v22  ;;  %v3395_v13 = vadd.f32 %v3394_v46, %v3204_v6  ;;  %v3435_v58 = vmul.f32 %v3205_v40, %v3205_v40  ;;  %v6006_v6 = vld [vmem:[#allocation14_spill] sm:$0xff] }
 0x1f4   : > { %v3464_v12 = vadd.f32 %v3463_v52, %v3433_v63  ;;  %v4637_v10 = vpop.f32.mrf.mxu1  ;;  %v4685_v30 = vpop.f32.mrf.mxu0  ;;  %v2601_v5 = vadd.f32 %v6011_v50, %v2294_v44  ;;  %v2295_v36 = vadd.f32 %v6013_v43, %v6012_v45  ;;  %v6014_v52 = vld [vmem:[#allocation22_spill] sm:$0xff] }
 0x1f5   : > { %v3985_v61 = vpack.c.bf16 %v3208_v2, %v3207_v37  ;;  %v3206_v9 = vadd.f32 %v3129_v41, %v2900_v1  ;;  %v3396_v4 = vadd.f32 %v3395_v13, %v3205_v40  ;;  %v2905_v32 = vadd.f32 %v4637_v10, %v6006_v6  ;;  %v6015_v13 = vld [vmem:[#allocation20_spill] sm:$0xff] }
 0x1f6   : > { %v3465_v15 = vadd.f32 %v3464_v12, %v3434_v14  ;;  %v2836_v33 = vpop.f32.mrf.mxu1  ;;  %v3142_v0 = vpop.f32.mrf.mxu0  ;;  %v3438_v19 = vmul.f32 %v3208_v2, %v3208_v2 }
 0x1f7   : > { %4040 = vst [vmem:[%s5869_s9 + $0x48] sm:$0xff] %v3985_v61   ;;  %v3980_v54 = vpack.c.bf16 %v3206_v9, %v3205_v40  ;;  %v3436_v21 = vmul.f32 %v3206_v9, %v3206_v9  ;;  %v2903_v34 = vadd.f32 %v2836_v33, %v2597_v56  ;;  %v3397_v11 = vadd.f32 %v3396_v4, %v3206_v9  ;;  %v6017_v9 = vld [vmem:[#allocation9_spill] sm:$0xff]  ;;  %v6019_v4 = vld [vmem:[#allocation10_spill] sm:$0xff] }
 0x1f8   : > { %v3466_v42 = vadd.f32 %v3465_v15, %v3435_v58  ;;  %v4638_v55 = vpop.f32.mrf.mxu1  ;;  %v4686_v57 = vpop.f32.mrf.mxu0  ;;  %v3211_v18 = vadd.f32 %v4685_v30, %v2905_v32  ;;  %v2604_v40 = vadd.f32 %v6014_v52, %v2297_v39  ;;  %v2602_v61 = vadd.f32 %v6016_v48, %v2295_v36  ;;  %v6020_v58 = vld [vmem:[#allocation28_spill] sm:$0xff]  ;;  %v6022_v39 = vld [vmem:[#allocation11_spill] sm:$0xff] }
 0x1f9   : > { %4039 = vst [vmem:[%s5869_s9 + $0x40] sm:$0xff] %v3980_v54   ;;  %v2906_v26 = vadd.f32 %v4638_v55, %v2600_v59  ;;  %v3398_v25 = vadd.f32 %v3397_v11, %v3207_v37  ;;  %v3209_v23 = vadd.f32 %v3142_v0, %v2903_v34  ;;  %v2298_v59 = vadd.f32 %v6018_v31, %v6017_v9 }
 0x1fa   : > { %v3467_v35 = vadd.f32 %v3466_v42, %v3436_v21  ;;  %v2839_v16 = vpop.f32.mrf.mxu1  ;;  %v3145_v20 = vpop.f32.mrf.mxu0  ;;  %v2301_v15 = vadd.f32 %v6020_v58, %v6019_v4  ;;  %v3441_v0 = vmul.f32 %v3211_v18, %v3211_v18 }
 0x1fb   : > { %v3212_v27 = vadd.f32 %v4686_v57, %v2906_v26  ;;  %v2904_v51 = vadd.f32 %v2839_v16, %v2598_v47  ;;  %v3399_v22 = vadd.f32 %v3398_v25, %v3208_v2  ;;  %v3439_v41 = vmul.f32 %v3209_v23, %v3209_v23  ;;  %v6023_v26 = vld [vmem:[#allocation30_spill] sm:$0xff] }
 0x1fc   : > { %v3468_v60 = vadd.f32 %v3467_v35, %v3437_v17  ;;  %v4641_v3 = vpop.f32.mrf.mxu1  ;;  %v4689_v53 = vpop.f32.mrf.mxu0  ;;  %v2605_v8 = vadd.f32 %v6021_v38, %v2298_v59  ;;  %v2299_v17 = vadd.f32 %v6023_v26, %v6022_v39 }
 0x1fd   : > { %v3995_v63 = vpack.c.bf16 %v3212_v27, %v3211_v18  ;;  %v3210_v46 = vadd.f32 %v3145_v20, %v2904_v51  ;;  %v3400_v49 = vadd.f32 %v3399_v22, %v3209_v23  ;;  %v2909_v10 = vadd.f32 %v4641_v3, %v6015_v13  ;;  %v6025_v3 = vld [vmem:[#allocation27_spill] sm:$0xff] }
 0x1fe   : > { %v3469_v37 = vadd.f32 %v3468_v60, %v3438_v19  ;;  %v2852_v1 = vpop.f32.mrf.mxu1  ;;  %v3158_v14 = vpop.f32.mrf.mxu0  ;;  %v3442_v57 = vmul.f32 %v3212_v27, %v3212_v27 }
 0x1ff   : > { %4042 = vst [vmem:[%s5869_s9 + $0x58] sm:$0xff] %v3995_v63   ;;  %v3990_v12 = vpack.c.bf16 %v3210_v46, %v3209_v23  ;;  %v3440_v2 = vmul.f32 %v3210_v46, %v3210_v46  ;;  %v2907_v30 = vadd.f32 %v2852_v1, %v2601_v5  ;;  %v3401_v56 = vadd.f32 %v3400_v49, %v3210_v46  ;;  %v6024_v23 = vld [vmem:[#allocation29_spill] sm:$0xff]  ;;  %v6026_v63 = vld [vmem:[#allocation31_spill] sm:$0xff] }
 0x200   : > { %v3470_v62 = vadd.f32 %v3469_v37, %v3439_v41  ;;  %v4642_v29 = vpop.f32.mrf.mxu1  ;;  %v4690_v7 = vpop.f32.mrf.mxu0  ;;  %v3215_v42 = vadd.f32 %v4689_v53, %v2909_v10  ;;  %v2608_v16 = vadd.f32 %v6024_v23, %v2301_v15  ;;  %v2606_v46 = vadd.f32 %v6026_v63, %v2299_v17 }
 0x201   : > { %4041 = vst [vmem:[%s5869_s9 + $0x50] sm:$0xff] %v3990_v12   ;;  %v2910_v33 = vadd.f32 %v4642_v29, %v2604_v40  ;;  %v3402_v54 = vadd.f32 %v3401_v56, %v3211_v18  ;;  %v3213_v6 = vadd.f32 %v3158_v14, %v2907_v30 }
 0x202   : > { %v3471_v21 = vadd.f32 %v3470_v62, %v3440_v2  ;;  %v2855_v32 = vpop.f32.mrf.mxu1  ;;  %v3161_v34 = vpop.f32.mrf.mxu0  ;;  %v3445_v40 = vmul.f32 %v3215_v42, %v3215_v42 }
 0x203   : > { %v3216_v11 = vadd.f32 %v4690_v7, %v2910_v33  ;;  %v2908_v55 = vadd.f32 %v2855_v32, %v2602_v61  ;;  %v3403_v47 = vadd.f32 %v3402_v54, %v3212_v27  ;;  %v3443_v18 = vmul.f32 %v3213_v6, %v3213_v6 }
 0x204   : > { %v3472_v28 = vadd.f32 %v3471_v21, %v3441_v0  ;;  %v4645_v24 = vpop.f32.mrf.mxu1  ;;  %v4693_v44 = vpop.f32.mrf.mxu0 }
 0x205   : > { %v4005_v25 = vpack.c.bf16 %v3216_v11, %v3215_v42  ;;  %v3214_v35 = vadd.f32 %v3161_v34, %v2908_v55  ;;  %v3404_v20 = vadd.f32 %v3403_v47, %v3213_v6  ;;  %v2913_v53 = vadd.f32 %v4645_v24, %v6025_v3 }
 0x206   : > { %v3473_v51 = vadd.f32 %v3472_v28, %v3442_v57  ;;  %v2868_v19 = vpop.f32.mrf.mxu1  ;;  %v3174_v60 = vpop.f32.mrf.mxu0  ;;  %v3446_v13 = vmul.f32 %v3216_v11, %v3216_v11 }
 0x207   : > { %4044 = vst [vmem:[%s5869_s9 + $0x68] sm:$0xff] %v4005_v25   ;;  %v4000_v22 = vpack.c.bf16 %v3214_v35, %v3213_v6  ;;  %v3444_v27 = vmul.f32 %v3214_v35, %v3214_v35  ;;  %v2911_v50 = vadd.f32 %v2868_v19, %v2605_v8  ;;  %v3405_v45 = vadd.f32 %v3404_v20, %v3214_v35 }
 0x208   : > { %v3474_v5 = vadd.f32 %v3473_v51, %v3443_v18  ;;  %v4646_v43 = vpop.f32.mrf.mxu1  ;;  %v4694_v36 = vpop.f32.mrf.mxu0  ;;  %v3219_v14 = vadd.f32 %v4693_v44, %v2913_v53 }
 0x209   : > { %4043 = vst [vmem:[%s5869_s9 + $0x60] sm:$0xff] %v4000_v22   ;;  %v2914_v52 = vadd.f32 %v4646_v43, %v2608_v16  ;;  %v3406_v49 = vadd.f32 %v3405_v45, %v3215_v42  ;;  %v3217_v37 = vadd.f32 %v3174_v60, %v2911_v50 }
 0x20a   : > { %v3475_v41 = vadd.f32 %v3474_v5, %v3444_v27  ;;  %v2871_v1 = vpop.f32.mrf.mxu1  ;;  %v3177_v62 = vpop.f32.mrf.mxu0  ;;  %v3449_v58 = vmul.f32 %v3219_v14, %v3219_v14 }
 0x20b   : > { %v3220_v12 = vadd.f32 %v4694_v36, %v2914_v52  ;;  %v2912_v2 = vadd.f32 %v2871_v1, %v2606_v46  ;;  %v3407_v30 = vadd.f32 %v3406_v49, %v3216_v11  ;;  %v3447_v48 = vmul.f32 %v3217_v37, %v3217_v37 }
 0x20c   : > { %v3476_v10 = vadd.f32 %v3475_v41, %v3445_v40 }
 0x20d   : > { %v4015_v56 = vpack.c.bf16 %v3220_v12, %v3219_v14  ;;  %v3218_v29 = vadd.f32 %v3177_v62, %v2912_v2  ;;  %v3408_v7 = vadd.f32 %v3407_v30, %v3217_v37  ;;  %v3450_v0 = vmul.f32 %v3220_v12, %v3220_v12 }
 0x20e   : > { %v3477_v61 = vadd.f32 %v3476_v10, %v3446_v13 }
 0x20f   : > { %4046 = vst [vmem:[%s5869_s9 + $0x78] sm:$0xff] %v4015_v56   ;;  %v4010_v9 = vpack.c.bf16 %v3218_v29, %v3217_v37  ;;  %v3448_v31 = vmul.f32 %v3218_v29, %v3218_v29  ;;  %v3409_v4 = vadd.f32 %v3408_v7, %v3218_v29 }
 0x210   : > { %v3478_v59 = vadd.f32 %v3477_v61, %v3447_v48 }
 0x211   : > { %4045 = vst [vmem:[%s5869_s9 + $0x70] sm:$0xff] %v4010_v9   ;;  %v3410_v15 = vadd.f32 %v3409_v4, %v3219_v14 }
 0x212   : > { %v3479_v33 = vadd.f32 %v3478_v59, %v3448_v31 }
 0x213   : > { %v3411_v54 = vadd.f32 %v3410_v15, %v3220_v12 }
 0x214   : > { %v3480_v21 = vadd.f32 %v3479_v33, %v3449_v58 }
 0x215   : > { %v3412_v6 = vrot.slane %v3411_v54, 4 }
 0x216   : > { %v3481_v32 = vadd.f32 %v3480_v21, %v3450_v0 }
 0x217   : > { %v3413_v34 = vadd.f32 %v3412_v6, %v3411_v54 }
 0x218   : > { %v3482_v42 = vrot.slane %v3481_v32, 4 }
 0x219   : > { %v3414_v11 = vrot.slane %v3413_v34, 2 }
 0x21a   : > { %v3483_v55 = vadd.f32 %v3482_v42, %v3481_v32 }
 0x21b   : > { %v3415_v57 = vadd.f32 %v3414_v11, %v3413_v34 }
 0x21c   : > { %v3484_v28 = vrot.slane %v3483_v55, 2 }
 0x21d   : > { %v3416_v47 = vrot.slane %v3415_v57, 1 }
 0x21e   : > { %v3485_v24 = vadd.f32 %v3484_v28, %v3483_v55 }
 0x21f   : > { %v3417_v44 = vadd.f32 %v3416_v47, %v3415_v57 }
 0x220   : > { %v3486_v38 = vrot.slane %v3485_v24, 1 }
 0x221   : > { %3418 = vst [vmem:[%s265_s11] sm:$0x1] %v3417_v44 }
 0x222   : > { %v3487_v8 = vadd.f32 %v3486_v38, %v3485_v24 }
 0x224   : > { %3488 = vst [vmem:[%s268_s14] sm:$0x1] %v3487_v8 }
 0x225 PF: > { %s17_s21 = sadd.s32 1, %s4799_s21  }
 0x226   : > { %p14_p4 = scmp.ge.s32.totalorder %s17_s21, 4  }
 0x228   :  { %16 = sbr.rel (!%p14_p4) target bundleno = 1 (0x1), region = 100 }

// kernel: residual_unit_forward.3
= control target key start
LH: loop header
LB: loop body
LE: loop exit
PB: predicated region body
PF: predicated region fallthrough
CT: control target
= control target key end

     0   :  { %s10412_s0 = inlined_call_operand.vmem [shape: bf16[2,18,18,128], index: 0, kind: input, shape index: {}]   ;;  %s10413_s1 = inlined_call_operand.vmem [shape: bf16[9,128,128], index: 1, kind: input, shape index: {}]   ;;  %s10414_s2 = inlined_call_operand.vmem [shape: bf16[128,128], index: 2, kind: input, shape index: {}]   ;;  %s10415_s3 = inlined_call_operand.vmem [shape: bf16[2,256,128], index: 3, kind: output, shape index: {0}]   ;;  %s10416_s4 = inlined_call_operand.vmem [shape: bf16[2,256,128], index: 4, kind: output, shape index: {1}]   ;;  %s10417_s5 = inlined_call_operand.vmem [shape: f32[2,1,128], index: 5, kind: output, shape index: {2}]   ;;  %s10418_s6 = inlined_call_operand.vmem [shape: f32[2,1,128], index: 6, kind: output, shape index: {3}]   ;;  %s10419_s7 = inlined_call_operand.hbm [shape: f32[2,1,128], index: 7, kind: output, shape index: {4}]   ;;  %s10420_s8 = inlined_call_operand.hbm [shape: f32[2,1,128], index: 8, kind: output, shape index: {5}]  }
   0x1   :  { %10445 = sst [smem:[#allocation48_spill]] %s10412_s0 }
   0x2   :  { %14 = vsyncpa [#allocation3], 0 }
   0x3   :  { %16 = vsyncpa [#allocation3 + $0x1], 0 }
   0x4   :  { %17 = vsyncpa [#allocation5], 0 }
   0x5   :  { %19 = vsyncpa [#allocation5 + $0x1], 0  ;;  %s8115_s27 = smov 0   ;;  %s8117_s28 = smov 0  }
   0x6   :  { %s8119_s29 = smov 0   ;;  %s8121_s30 = smov 0  }
   0x7 LB: > { %s8136_s9 = sadd.s32 4294967295, %s8066_s30   ;;  %s6153_s10 = sadd.s32 4294967294, %s8066_s30   ;;  %s8066_s30 = sphi %s8121_s30, %s10584_s30   ;;  %s8062_s29 = sphi %s8119_s29, %s10583_s29   ;;  %s8058_s28 = sphi %s8117_s28, %s10582_s28   ;;  %s8054_s27 = sphi %s8115_s27, %s10581_s27  }
   0x8   : > { %s8140_s11 = sadd.s32 1, %s8066_s30   ;;  %s204_s12 = sadd.s32 1, %s8062_s29 }
   0x9   : > { %s201_s13 = ssub.s32 %s8066_s30, %s8140_s11  ;;  %p214_p0 = scmp.ne.s32.totalorder %s8062_s29, %s8058_s28 }
   0xa   : > { %p202_p1 = scmp.eq.s32.totalorder %s201_s13, 0  ;;  %p215_p2 = scmp.eq.s32.totalorder %s8136_s9, 1 }
   0xb   : > { %p220_p3 = scmp.ne.s32.totalorder %s8058_s28, %s8054_s27  ;;  %p221_p4 = scmp.eq.s32.totalorder %s6153_s10, 1 }
   0xc   : > { %s8151_s14 = scalar_select %p202_p1, %s8062_s29, %s204_s12  }
   0xd   : > { %p8153_p5 = por %p215_p2, %p214_p0  ;;  %p8157_p6 = por %p221_p4, %p220_p3 }
   0xe   : > { %p6156_p7 = scmp.ge.s32.totalorder %s8066_s30, 1  ;;  %p279_p8 = scmp.lt.s32.totalorder %s8066_s30, 3 }
  0x10   : > { %p280_p9 = pnand %p6156_p7, %p279_p8 }
  0x12   : > { %283 = sbr.rel (%p280_p9) target bundleno = 638 (0x27e), region = 32 }
  0x17   : > { %v7843_v0 = vld [vmem:[%s10413_s1 + $0x78] sm:$0xff]   ;;  %p332_p10 = scmp.lt.s32.totalorder %s8136_s9, 1  ;;  %v7845_v2 = vld [vmem:[%s10413_s1 + $0x70] sm:$0xff]   ;;  %v7847_v4 = vld [vmem:[%s10413_s1 + $0x68] sm:$0xff]   ;;  %s10448_s0 = sld [smem:[#allocation48_spill]]  ;;  %vm1448_vm3 = vcmask 1042432  }
  0x18   : > { %v7844_v1 = vld [vmem:[%s10413_s1 + $0x38] sm:$0xff]   ;;  %7318 = vmatprep.subr.bf16.mxu0 %v7843_v0  ;;  %v7846_v3 = vld [vmem:[%s10413_s1 + $0x30] sm:$0xff]   ;;  %v7848_v5 = vld [vmem:[%s10413_s1 + $0x28] sm:$0xff]   ;;  %vm418_vm0 = vsmask.f32 3328  ;;  %vm1449_vm4 = vcmask 1046532  }
  0x19   : > { %7366 = vmatprep.subr.bf16.mxu1 %v7844_v1  ;;  %7319 = vmatpush3.bf16.msra.mxu0 %v7843_v0  ;;  %s8183_s13 = scalar_select %p332_p10, %s8136_s9, 1  ;;  %v7849_v6 = vld [vmem:[%s10413_s1 + $0x60] sm:$0xff]   ;;  %v7851_v8 = vld [vmem:[%s10413_s1 + $0x58] sm:$0xff]   ;;  %v7853_v10 = vld [vmem:[%s10413_s1 + $0x50] sm:$0xff]   ;;  %vm419_vm1 = vsmask.f32 7440 }
  0x1a   : > { %7367 = vmatpush3.bf16.msra.mxu1 %v7844_v1  ;;  %7320 = vmatprep.subr.bf16.mxu0 %v7845_v2  ;;  %v7850_v7 = vld [vmem:[%s10413_s1 + $0x20] sm:$0xff]   ;;  %v7852_v9 = vld [vmem:[%s10413_s1 + $0x18] sm:$0xff]   ;;  %v7854_v11 = vld [vmem:[%s10413_s1 + $0x10] sm:$0xff]   ;;  %s10322_s20 = sand.u32 1, %s8058_s28   ;;  %s6818_s24 = sshll.u32 %s8136_s9, 4 }
  0x1b   : > { %7368 = vmatprep.subr.bf16.mxu1 %v7846_v3  ;;  %s7798_s21 = smul.u32 216, %s8183_s13  ;;  %v7855_v17 = vld [vmem:[%s10413_s1 + $0x48] sm:$0xff]   ;;  %v7857_v37 = vld [vmem:[%s10413_s1 + $0x40] sm:$0xff]   ;;  %vm8245_vm2 = vmor %vm418_vm0, %vm419_vm1  ;;  %s349_s23 = scalar_lea.vmem %s10417_s5, %s8183_s13 }
  0x1c   : > { %v7856_v32 = vld [vmem:[%s10413_s1 + $0x8] sm:$0xff]   ;;  %v7858_v52 = vld [vmem:[%s10413_s1] sm:$0xff]   ;;  %vm8599_vm5 = vmor %vm1448_vm3, %vm1449_vm4  ;;  %s352_s17 = scalar_lea.vmem %s10418_s6, %s8183_s13  ;;  %s10444_s18 = scalar_lea.vmem [#allocation4], %s10322_s20 }
  0x1d   : > { %7321 = vmatpush3.bf16.msra.mxu0 %v7845_v2  ;;  %s8201_s12 = scalar_lea.vmem %s10448_s0, %s7798_s21  ;;  %s10340_s9 = scalar_lea.hbm %s10419_s7, %s6818_s24 }
  0x1e   : > { %7369 = vmatpush3.bf16.msra.mxu1 %v7846_v3  ;;  %7322 = vmatprep.subr.bf16.mxu0 %v7847_v4  ;;  %v354_v12 = vld [vmem:[%s8201_s12] sm:$0xf]  ;;  %v8211_v13 = vld [vmem:[%s8201_s12 + $0x4] sm:$0xf]  ;;  %v8214_v14 = vld [vmem:[%s8201_s12 + $0x8] sm:$0x1]  ;;  %s10347_s26 = scalar_lea.hbm %s10420_s8, %s6818_s24 }
  0x1f   : > { %7370 = vmatprep.subr.bf16.mxu1 %v7848_v5  ;;  %v422_v15 = vshrl.u32 %v354_v12, 16  ;;  %v425_v16 = vshll.u32 %v354_v12, 16  ;;  %v431_v18 = vshll.u32 %v8211_v13, 16  ;;  %v435_v19 = vshrl.u32 %v8211_v13, 16  ;;  %v8224_v22 = vld [vmem:[%s8201_s12 + $0xc] sm:$0xf] }
  0x20   : > { %v441_v20 = vshll.u32 %v8214_v14, 16  ;;  %v1456_v21 = vrot.slane %v8214_v14, 5  ;;  %v6202_v25 = vcombine.low %v354_v12, %v8211_v13  ;;  %v8228_v26 = vld [vmem:[%s8201_s12 + $0x10] sm:$0xf]  ;;  %v8231_v27 = vld [vmem:[%s8201_s12 + $0x14] sm:$0x1] }
  0x21   : > { %7323 = vmatpush3.bf16.msra.mxu0 %v7847_v4  ;;  %v424_v23 = vrot.slane %v422_v15, 4  ;;  %v427_v24 = vrot.slane %v425_v16, 5  ;;  %v433_v28 = vrot.slane %v431_v18, 5  ;;  %v437_v29 = vrot.slane %v435_v19, 4  ;;  %v8254_v50 = vld [vmem:[%s8201_s12 + $0x18] sm:$0xf] }
  0x22   : > { %7371 = vmatpush3.bf16.msra.mxu1 %v7848_v5  ;;  %7324 = vmatprep.subr.bf16.mxu0 %v7849_v6  ;;  %v443_v30 = vrot.slane %v441_v20, 5  ;;  %v446_v31 = vshrl.u32 %v8224_v22, 16  ;;  %v449_v34 = vshll.u32 %v8224_v22, 16  ;;  %v455_v35 = vshll.u32 %v8228_v26, 16  ;;  %v8257_v51 = vld [vmem:[%s8201_s12 + $0x1c] sm:$0xf] }
  0x23   : > { %7372 = vmatprep.subr.bf16.mxu1 %v7850_v7  ;;  %v428_v33 = vor.u32 %v427_v24, %v424_v23  ;;  %7382 = vmatprep.mubr.bf16.mxu1 %v6202_v25  ;;  %v459_v36 = vshrl.u32 %v8228_v26, 16  ;;  %v438_v39 = vor.u32 %v437_v29, %v433_v28  ;;  %v465_v41 = vshll.u32 %v8231_v27, 16  ;;  %v8265_v56 = vld [vmem:[%s8201_s12 + $0x20] sm:$0x1]  ;;  %v8269_v58 = vld [vmem:[%s8201_s12 + $0x24] sm:$0xf] }
  0x24   : > { %v448_v40 = vrot.slane %v446_v31, 4  ;;  %v451_v44 = vrot.slane %v449_v34, 5  ;;  %v457_v45 = vrot.slane %v455_v35, 5  ;;  %v6203_v49 = vcombine.low %v8224_v22, %v8228_v26  ;;  %v8277_v63 = vld [vmem:[%s8201_s12 + $0x28] sm:$0xf]  ;;  %v7861_v3 = vld [vmem:[%s10413_s1 + $0xb8] sm:$0xff]  }
  0x25   : > { %7325 = vmatpush3.bf16.msra.mxu0 %v7849_v6  ;;  %v429_v43 = vrot.slane %v428_v33, 4  ;;  %v461_v46 = vrot.slane %v459_v36, 4  ;;  %v439_v47 = vrot.slane %v438_v39, 4  ;;  %v467_v48 = vrot.slane %v465_v41, 5  ;;  %v8283_v5 = vld [vmem:[%s8201_s12 + $0x2c] sm:$0x1] }
  0x26   : > { %7373 = vmatpush3.bf16.msra.mxu1 %v7850_v7  ;;  %7326 = vmatprep.subr.bf16.mxu0 %v7851_v8  ;;  %v452_v54 = vor.u32 %v451_v44, %v448_v40  ;;  %v470_v57 = vshrl.u32 %v8254_v50, 16  ;;  %v473_v60 = vshll.u32 %v8254_v50, 16  ;;  %v479_v61 = vshll.u32 %v8257_v51, 16  ;;  %v7862_v12 = vld [vmem:[%s10413_s1 + $0xf8] sm:$0xff]   ;;  %v8297_v23 = vld [vmem:[%s8201_s12 + $0x30] sm:$0xf] }
  0x27   : > { %7374 = vmatprep.subr.bf16.mxu1 %v7852_v9  ;;  %v434_v53 = vsel %vm8245_vm2, %v429_v43, %v433_v28  ;;  %v462_v55 = vor.u32 %v461_v46, %v457_v45  ;;  %v444_v59 = vsel %vm8245_vm2, %v439_v47, %v443_v30  ;;  %v483_v62 = vshrl.u32 %v8257_v51, 16  ;;  %v7865_v34 = vld [vmem:[%s10413_s1 + $0xb0] sm:$0xff]   ;;  %v8312_v40 = vld [vmem:[%s8201_s12 + $0x38] sm:$0x1]  ;;  %s8068_s22 = smov [#allocation2]  }
  0x28   : > { %v6178_v0 = vcombine.low %v434_v53, %v444_v59  ;;  %v453_v1 = vrot.slane %v452_v54, 4  ;;  %v472_v4 = vrot.slane %v470_v57, 4  ;;  %v475_v6 = vrot.slane %v473_v60, 5  ;;  %v8309_v35 = vld [vmem:[%s8201_s12 + $0x34] sm:$0xf]  ;;  %v7869_v57 = vld [vmem:[%s10413_s1 + $0xa8] sm:$0xff]  }
  0x29   : > { %7327 = vmatpush3.bf16.msra.mxu0 %v7851_v8  ;;  %v463_v2 = vrot.slane %v462_v55, 4  ;;  %v481_v7 = vrot.slane %v479_v61, 5  ;;  %v485_v8 = vrot.slane %v483_v62, 4  ;;  %v6204_v15 = vcombine.low %v8254_v50, %v8257_v51  ;;  %v7866_v46 = vld [vmem:[%s10413_s1 + $0xf0] sm:$0xff]   ;;  %v8330_v55 = vld [vmem:[%s8201_s12 + $0x40] sm:$0xf] }
  0x2a   : > { %7375 = vmatpush3.bf16.msra.mxu1 %v7852_v9  ;;  %7328 = vmatprep.subr.bf16.mxu0 %v7853_v10  ;;  %v489_v9 = vshll.u32 %v8265_v56, 16  ;;  %v494_v16 = vshrl.u32 %v8269_v58, 16  ;;  %v476_v18 = vor.u32 %v475_v6, %v472_v4  ;;  %v497_v25 = vshll.u32 %v8269_v58, 16  ;;  %v1404_v42 = vld [vmem:[%s8201_s12 + $0x30] sm:$0xe] }
  0x2b   : > { %7376 = vmatprep.subr.bf16.mxu1 %v7854_v11  ;;  %7334 = vmatprep.mubr.bf16.mxu0 %v6178_v0  ;;  %v486_v19 = vor.u32 %v485_v8, %v481_v7  ;;  %v503_v28 = vshll.u32 %v8277_v63, 16  ;;  %v507_v29 = vshrl.u32 %v8277_v63, 16  ;;  %v6205_v33 = vcombine.low %v8269_v58, %v8277_v63  ;;  %v8345_v8 = vld [vmem:[%s8201_s12 + $0x44] sm:$0x1]  ;;  %v6679_v38 = vld [vmem:[%s8201_s12 + $0x54] sm:$0xe] }
  0x2c   : > { %v491_v20 = vrot.slane %v489_v9, 5  ;;  %v496_v24 = vrot.slane %v494_v16, 4  ;;  %v477_v30 = vrot.slane %v476_v18, 4  ;;  %v499_v36 = vrot.slane %v497_v25, 5 }
  0x2d   : > { %7329 = vmatpush3.bf16.msra.mxu0 %v7853_v10  ;;  %v458_v10 = vsel %vm8245_vm2, %v453_v1, %v457_v45  ;;  %v487_v31 = vrot.slane %v486_v19, 4  ;;  %v509_v39 = vrot.slane %v507_v29, 4  ;;  %v518_v41 = vshrl.u32 %v8297_v23, 16 }
  0x2e   : > { %7377 = vmatpush3.bf16.msra.mxu1 %v7854_v11  ;;  %7330 = vmatprep.subr.bf16.mxu0 %v7855_v17  ;;  %v468_v11 = vsel %vm8245_vm2, %v463_v2, %v467_v48  ;;  %v482_v43 = vsel %vm8245_vm2, %v477_v30, %v481_v7  ;;  %v521_v47 = vshll.u32 %v8297_v23, 16  ;;  %v8324_v48 = vld [vmem:[%s8201_s12 + $0x3c] sm:$0xf]  ;;  %v527_v60 = vshll.u32 %v8309_v35, 16  ;;  %v7870_v2 = vld [vmem:[%s10413_s1 + $0xe8] sm:$0xff]  }
  0x2f   : > { %7378 = vmatprep.subr.bf16.mxu1 %v7856_v32  ;;  %v492_v44 = vsel %vm8245_vm2, %v487_v31, %v491_v20  ;;  %v520_v54 = vrot.slane %v518_v41, 4  ;;  %v531_v22 = vshrl.u32 %v8309_v35, 16  ;;  %v6206_v0 = vcombine.low %v8297_v23, %v8309_v35  ;;  %v8357_v20 = vld [vmem:[%s8201_s12 + $0x4c] sm:$0xf]  ;;  %v7873_v23 = vld [vmem:[%s10413_s1 + $0xa0] sm:$0xff]  }
  0x30   : > { %v6180_v50 = vcombine.low %v482_v43, %v492_v44  ;;  %v523_v59 = vrot.slane %v521_v47, 5  ;;  %v542_v1 = vshrl.u32 %v8324_v48, 16  ;;  %v529_v4 = vrot.slane %v527_v60, 5  ;;  %v8367_v30 = vld [vmem:[%s8201_s12 + $0x50] sm:$0x1]  ;;  %v7874_v31 = vld [vmem:[%s10413_s1 + $0xe0] sm:$0xff]  }
  0x31   : > { %7331 = vmatpush3.bf16.msra.mxu0 %v7855_v17  ;;  %v6179_v17 = vcombine.low %v458_v10, %v468_v11  ;;  %v533_v6 = vrot.slane %v531_v22, 4  ;;  %v551_v19 = vshll.u32 %v8330_v55, 16  ;;  %v555_v25 = vshrl.u32 %v8330_v55, 16 }
  0x32   : > { %7379 = vmatpush3.bf16.msra.mxu1 %v7856_v32  ;;  %7332 = vmatprep.subr.bf16.mxu0 %v7857_v37  ;;  %v513_v32 = vshll.u32 %v8283_v5, 16  ;;  %v544_v11 = vrot.slane %v542_v1, 4  ;;  %v6207_v29 = vcombine.low %v8324_v48, %v8330_v55  ;;  %v575_v58 = vshll.u32 %v8357_v20, 16 }
  0x33   : > { %7380 = vmatprep.subr.bf16.mxu1 %v7858_v52  ;;  %v534_v18 = vor.u32 %v533_v6, %v529_v4  ;;  %v557_v43 = vrot.slane %v555_v25, 4 }
  0x34   : > { %v515_v45 = vrot.slane %v513_v32, 5  ;;  %v577_v60 = vrot.slane %v575_v58, 5 }
  0x35   : > { %7333 = vmatpush3.bf16.msra.mxu0 %v7857_v37  ;;  %v505_v37 = vrot.slane %v503_v28, 5  ;;  %v561_v28 = vshll.u32 %v8345_v8, 16 }
  0x36   : > { %7381 = vmatpush3.bf16.msra.mxu1 %v7858_v52  ;;  %7414 = vmatprep.subr.bf16.mxu0 %v7861_v3  ;;  %v500_v52 = vor.u32 %v499_v36, %v496_v24  ;;  %v553_v36 = vrot.slane %v551_v19, 5  ;;  %v7882_v19 = vld [vmem:[%s10413_s1 + $0xd0] sm:$0xff]  }
  0x37   : > { %7462 = vmatprep.subr.bf16.mxu1 %v7862_v12  ;;  %v510_v53 = vor.u32 %v509_v39, %v505_v37  ;;  %v8376_v39 = vld [vmem:[%s8201_s12 + $0x54] sm:$0xf]  ;;  %v563_v44 = vrot.slane %v561_v28, 5 }
  0x38   : > { %7335 = vmatmul.mubr.bf16.vlgmr.msra.gmra.mxu0 %v6179_v17  ;;  %v501_v61 = vrot.slane %v500_v52, 4 }
  0x39   : > { %7383 = vmatmul.mubr.bf16.vlgmr.msra.gmra.mxu1 %v6203_v49  ;;  %7415 = vmatpush3.bf16.msra.mxu0 %v7861_v3  ;;  %v537_v49 = vshll.u32 %v8312_v40, 16  ;;  %v511_v62 = vrot.slane %v510_v53, 4  ;;  %v524_v3 = vor.u32 %v523_v59, %v520_v54  ;;  %v558_v54 = vor.u32 %v557_v43, %v553_v36  ;;  %v8393_v59 = vld [vmem:[%s8201_s12 + $0x58] sm:$0xf] }
  0x3a   : > { %7463 = vmatpush3.bf16.msra.mxu1 %v7862_v12  ;;  %7386 = vmatprep.mubr.bf16.mxu1 %v6204_v15  ;;  %v506_v9 = vsel %vm8245_vm2, %v501_v61, %v505_v37  ;;  %v545_v12 = vshll.u32 %v8324_v48, 16  ;;  %v8353_v15 = vld [vmem:[%s8201_s12 + $0x48] sm:$0xf] }
  0x3b   : > { %7338 = vmatprep.mubr.bf16.mxu0 %v6180_v50  ;;  %7416 = vmatprep.subr.bf16.mxu0 %v7865_v34  ;;  %v539_v7 = vrot.slane %v537_v49, 5  ;;  %v516_v10 = vsel %vm8245_vm2, %v511_v62, %v515_v45  ;;  %v525_v17 = vrot.slane %v524_v3, 4  ;;  %v566_v37 = vshrl.u32 %v8353_v15, 16  ;;  %v7878_v50 = vld [vmem:[%s10413_s1 + $0xd8] sm:$0xff]  }
  0x3c   : > { %7464 = vmatprep.subr.bf16.mxu1 %v7866_v46  ;;  %v6181_v16 = vcombine.low %v506_v9, %v516_v10  ;;  %v547_v24 = vrot.slane %v545_v12, 5  ;;  %v569_v45 = vshll.u32 %v8353_v15, 16  ;;  %v585_v49 = vshll.u32 %v8367_v30, 16  ;;  %v8407_v10 = vld [vmem:[%s8201_s12 + $0x60] sm:$0xf] }
  0x3d   : > { %7417 = vmatpush3.bf16.msra.mxu0 %v7865_v34  ;;  %v530_v32 = vsel %vm8245_vm2, %v525_v17, %v529_v4  ;;  %v535_v34 = vrot.slane %v534_v18, 4  ;;  %v568_v48 = vrot.slane %v566_v37, 4  ;;  %v6208_v61 = vcombine.low %v8353_v15, %v8357_v20  ;;  %v8416_v18 = vld [vmem:[%s8201_s12 + $0x64] sm:$0xf] }
  0x3e   : > { %7465 = vmatpush3.bf16.msra.mxu1 %v7866_v46  ;;  %7418 = vmatprep.subr.bf16.mxu0 %v7869_v57  ;;  %v548_v41 = vor.u32 %v547_v24, %v544_v11  ;;  %v7877_v46 = vld [vmem:[%s10413_s1 + $0x98] sm:$0xff]   ;;  %v590_v3 = vshrl.u32 %v8376_v39, 16  ;;  %v587_v6 = vrot.slane %v585_v49, 5  ;;  %v599_v9 = vshll.u32 %v8393_v59, 16  ;;  %v7881_v11 = vld [vmem:[%s10413_s1 + $0x90] sm:$0xff]  }
  0x3f   : > { %7466 = vmatprep.subr.bf16.mxu1 %v7870_v2  ;;  %v540_v47 = vsel %vm8245_vm2, %v535_v34, %v539_v7  ;;  %v593_v7 = vshll.u32 %v8376_v39, 16  ;;  %v603_v17 = vshrl.u32 %v8393_v59, 16  ;;  %v6209_v37 = vcombine.low %v8376_v39, %v8393_v59  ;;  %v8438_v39 = vld [vmem:[%s8201_s12 + $0x6c] sm:$0xf] }
  0x40   : > { %7339 = vmatmul.mubr.bf16.gmra.mxu0 %v6181_v16  ;;  %v6182_v52 = vcombine.low %v530_v32, %v540_v47  ;;  %v549_v53 = vrot.slane %v548_v41, 4  ;;  %v592_v16 = vrot.slane %v590_v3, 4  ;;  %v601_v28 = vrot.slane %v599_v9, 5 }
  0x41   : > { %7387 = vmatmul.mubr.bf16.gmra.mxu1 %v6205_v33  ;;  %7419 = vmatpush3.bf16.msra.mxu0 %v7869_v57  ;;  %v579_v33 = vshrl.u32 %v8357_v20, 16  ;;  %v571_v57 = vrot.slane %v569_v45, 5  ;;  %v595_v25 = vrot.slane %v593_v7, 5  ;;  %v605_v34 = vrot.slane %v603_v17, 4  ;;  %v8460_v7 = vld [vmem:[%s8201_s12 + $0x78] sm:$0xf] }
  0x42   : > { %7390 = vmatprep.mubr.bf16.mxu1 %v6206_v0  ;;  %7467 = vmatpush3.bf16.msra.mxu1 %v7870_v2  ;;  %v554_v62 = vsel %vm8245_vm2, %v549_v53, %v553_v36  ;;  %v559_v0 = vrot.slane %v558_v54, 4  ;;  %v8401_v2 = vld [vmem:[%s8201_s12 + $0x5c] sm:$0x1]  ;;  %v617_v45 = vshll.u32 %v8407_v10, 16 }
  0x43   : > { %7420 = vmatprep.subr.bf16.mxu0 %v7873_v23  ;;  %7468 = vmatprep.subr.bf16.mxu1 %v7874_v31  ;;  %v581_v22 = vrot.slane %v579_v33, 4  ;;  %v572_v1 = vor.u32 %v571_v57, %v568_v48  ;;  %v609_v36 = vshll.u32 %v8401_v2, 16  ;;  %v596_v43 = vor.u32 %v595_v25, %v592_v16 }
  0x44   : > { %7342 = vmatprep.mubr.bf16.mxu0 %v6182_v52  ;;  %v564_v12 = vsel %vm8245_vm2, %v559_v0, %v563_v44  ;;  %v8432_v44 = vld [vmem:[%s8201_s12 + $0x68] sm:$0x1]  ;;  %v606_v48 = vor.u32 %v605_v34, %v601_v28  ;;  %v623_v33 = vshll.u32 %v8416_v18, 16  ;;  %v619_v54 = vrot.slane %v617_v45, 5  ;;  %v7889_v0 = vld [vmem:[%s10413_s1 + $0x80] sm:$0xff]  }
  0x45   : > { %7421 = vmatpush3.bf16.msra.mxu0 %v7873_v23  ;;  %v582_v4 = vor.u32 %v581_v22, %v577_v60  ;;  %v573_v15 = vrot.slane %v572_v1, 4  ;;  %v6183_v23 = vcombine.low %v554_v62, %v564_v12  ;;  %v611_v58 = vrot.slane %v609_v36, 5  ;;  %v8451_v62 = vld [vmem:[%s8201_s12 + $0x74] sm:$0x1]  ;;  %v8472_v36 = vld [vmem:[%s8201_s12 + $0x7c] sm:$0xf] }
  0x46   : > { %7469 = vmatpush3.bf16.msra.mxu1 %v7874_v31  ;;  %7422 = vmatprep.subr.bf16.mxu0 %v7877_v46  ;;  %v7885_v31 = vld [vmem:[%s10413_s1 + $0x88] sm:$0xff]   ;;  %v597_v52 = vrot.slane %v596_v43, 4  ;;  %v627_v57 = vshrl.u32 %v8416_v18, 16  ;;  %v607_v22 = vrot.slane %v606_v48, 4  ;;  %v625_v49 = vrot.slane %v623_v33, 5 }
  0x47   : > { %7470 = vmatprep.subr.bf16.mxu1 %v7878_v50  ;;  %v583_v24 = vrot.slane %v582_v4, 4  ;;  %v578_v32 = vsel %vm8245_vm2, %v573_v15, %v577_v60  ;;  %v8445_v60 = vld [vmem:[%s8201_s12 + $0x70] sm:$0xf]  ;;  %v7890_v15 = vld [vmem:[%s10413_s1 + $0xc0] sm:$0xff]   ;;  %v657_v34 = vshll.u32 %v8451_v62, 16  ;;  %v662_v43 = vshrl.u32 %v8460_v7, 16 }
  0x48   : > { %7343 = vmatmul.mubr.bf16.gmra.mxu0 %v6183_v23  ;;  %v602_v1 = vsel %vm8245_vm2, %v597_v52, %v601_v28  ;;  %v629_v4 = vrot.slane %v627_v57, 4  ;;  %v612_v9 = vsel %vm8245_vm2, %v607_v22, %v611_v58  ;;  %v647_v12 = vshll.u32 %v8445_v60, 16  ;;  %v8485_v48 = vld [vmem:[%s8201_s12 + $0x80] sm:$0x1]  ;;  %v8498_v57 = vld [vmem:[%s10413_s1 + $0x178] sm:$0xff]  }
  0x49   : > { %7391 = vmatmul.mubr.bf16.gmra.mxu1 %v6207_v29  ;;  %7423 = vmatpush3.bf16.msra.mxu0 %v7877_v46  ;;  %v588_v41 = vsel %vm8245_vm2, %v583_v24, %v587_v6  ;;  %v614_v29 = vshrl.u32 %v8407_v10, 16  ;;  %v7886_v46 = vld [vmem:[%s10413_s1 + $0xc8] sm:$0xff]   ;;  %v638_v6 = vshrl.u32 %v8438_v39, 16  ;;  %v6185_v16 = vcombine.low %v602_v1, %v612_v9 }
  0x4a   : > { %7394 = vmatprep.mubr.bf16.mxu1 %v6208_v61  ;;  %v6184_v47 = vcombine.low %v578_v32, %v588_v41  ;;  %7471 = vmatpush3.bf16.msra.mxu1 %v7878_v50  ;;  %v633_v61 = vshll.u32 %v8432_v44, 16  ;;  %v6210_v50 = vcombine.low %v8407_v10, %v8416_v18  ;;  %v630_v23 = vor.u32 %v629_v4, %v625_v49 }
  0x4b   : > { %7424 = vmatprep.subr.bf16.mxu0 %v7881_v11  ;;  %v616_v53 = vrot.slane %v614_v29, 4  ;;  %7472 = vmatprep.subr.bf16.mxu1 %v7882_v19  ;;  %v640_v24 = vrot.slane %v638_v6, 4  ;;  %v649_v28 = vrot.slane %v647_v12, 5  ;;  %v651_v32 = vshrl.u32 %v8445_v60, 16  ;;  %v8482_v29 = vld [vmem:[%s10413_s1 + $0x138] sm:$0xff]  }
  0x4c   : > { %7346 = vmatprep.mubr.bf16.mxu0 %v6184_v47  ;;  %v635_v10 = vrot.slane %v633_v61, 5  ;;  %v631_v41 = vrot.slane %v630_v23, 4  ;;  %v665_v58 = vshll.u32 %v8460_v7, 16  ;;  %v671_v52 = vshll.u32 %v8472_v36, 16 }
  0x4d   : > { %7425 = vmatpush3.bf16.msra.mxu0 %v7881_v11  ;;  %v620_v3 = vor.u32 %v619_v54, %v616_v53  ;;  %v641_v11 = vshll.u32 %v8438_v39, 16  ;;  %v653_v47 = vrot.slane %v651_v32, 4  ;;  %v675_v53 = vshrl.u32 %v8472_v36, 16  ;;  %v8493_v54 = vld [vmem:[%s8201_s12 + $0x84] sm:$0xf] }
  0x4e   : > { %7426 = vmatprep.subr.bf16.mxu0 %v7885_v31  ;;  %7473 = vmatpush3.bf16.msra.mxu1 %v7882_v19  ;;  %v636_v33 = vsel %vm8245_vm2, %v631_v41, %v635_v10  ;;  %v667_v61 = vrot.slane %v665_v58, 5  ;;  %v673_v1 = vrot.slane %v671_v52, 5  ;;  %v681_v4 = vshll.u32 %v8485_v48, 16  ;;  %v378_v32 = vld [vmem:[%s8201_s12 + $0x90] sm:$0xf] }
  0x4f   : > { %v621_v17 = vrot.slane %v620_v3, 4  ;;  %7474 = vmatprep.subr.bf16.mxu1 %v7886_v46  ;;  %v643_v25 = vrot.slane %v641_v11, 5  ;;  %v677_v3 = vrot.slane %v675_v53, 4  ;;  %v6212_v6 = vcombine.low %v8460_v7, %v8472_v36 }
  0x50   : > { %7347 = vmatmul.mubr.bf16.gmra.mxu0 %v6185_v16  ;;  %v686_v12 = vshrl.u32 %v8493_v54, 16  ;;  %v683_v16 = vrot.slane %v681_v4, 5  ;;  %v689_v23 = vshll.u32 %v8493_v54, 16 }
  0x51   : > { %7395 = vmatmul.mubr.bf16.gmra.mxu1 %v6209_v37  ;;  %7427 = vmatpush3.bf16.msra.mxu0 %v7885_v31  ;;  %v626_v19 = vsel %vm8245_vm2, %v621_v17, %v625_v49  ;;  %v6211_v37 = vcombine.low %v8438_v39, %v8445_v60  ;;  %v644_v45 = vor.u32 %v643_v25, %v640_v24  ;;  %v659_v31 = vrot.slane %v657_v34, 5  ;;  %v8511_v17 = vld [vmem:[%s8201_s12 + $0x8c] sm:$0x1] }
  0x52   : > { %7398 = vmatprep.mubr.bf16.mxu1 %v6210_v50  ;;  %7475 = vmatpush3.bf16.msra.mxu1 %v7886_v46  ;;  %v664_v39 = vrot.slane %v662_v43, 4  ;;  %v6186_v22 = vcombine.low %v626_v19, %v636_v33  ;;  %v654_v46 = vor.u32 %v653_v47, %v649_v28  ;;  %v8501_v50 = vld [vmem:[%s8201_s12 + $0x88] sm:$0xf]  ;;  %v691_v41 = vrot.slane %v689_v23, 5  ;;  %v8529_v33 = vld [vmem:[%s8201_s12 + $0x98] sm:$0x1] }
  0x53   : > { %7428 = vmatprep.subr.bf16.mxu0 %v7889_v0  ;;  %7476 = vmatprep.subr.bf16.mxu1 %v7890_v15  ;;  %v645_v49 = vrot.slane %v644_v45, 4  ;;  %v695_v7 = vshll.u32 %v8501_v50, 16  ;;  %v8521_v45 = vld [vmem:[%s8201_s12 + $0x94] sm:$0xf]  ;;  %v6213_v58 = vcombine.low %v8493_v54, %v8501_v50 }
  0x54   : > { %7350 = vmatprep.mubr.bf16.mxu0 %v6186_v22  ;;  %v655_v10 = vrot.slane %v654_v46, 4  ;;  %v668_v11 = vor.u32 %v667_v61, %v664_v39  ;;  %v8532_v39 = vld [vmem:[%s8201_s12 + $0x9c] sm:$0xf]  ;;  %v710_v22 = vshrl.u32 %v378_v32, 16  ;;  %v8537_v46 = vld [vmem:[%s8201_s12 + $0xa0] sm:$0xf]  ;;  %v6214_v23 = vcombine.low %v378_v32, %v8521_v45 }
  0x55   : > { %7429 = vmatpush3.bf16.msra.mxu0 %v7889_v0  ;;  %v650_v9 = vsel %vm8245_vm2, %v645_v49, %v649_v28  ;;  %v678_v0 = vor.u32 %v677_v3, %v673_v1  ;;  %v688_v28 = vrot.slane %v686_v12, 4  ;;  %v697_v43 = vrot.slane %v695_v7, 5  ;;  %v382_v7 = vld [vmem:[%s8201_s12 + $0xa8] sm:$0xf] }
  0x56   : > { %7510 = vmatprep.subr.bf16.mxu0 %v8482_v29  ;;  %7477 = vmatpush3.bf16.msra.mxu1 %v7890_v15  ;;  %v660_v24 = vsel %vm8245_vm2, %v655_v10, %v659_v31  ;;  %v669_v25 = vrot.slane %v668_v11, 4  ;;  %v699_v15 = vshrl.u32 %v8501_v50, 16  ;;  %v713_v49 = vshll.u32 %v378_v32, 16  ;;  %v8542_v11 = vld [vmem:[%s8201_s12 + $0xa4] sm:$0x1] }
  0x57   : > { %7558 = vmatprep.subr.bf16.mxu1 %v8498_v57  ;;  %v6187_v34 = vcombine.low %v650_v9, %v660_v24  ;;  %v679_v19 = vrot.slane %v678_v0, 4  ;;  %v692_v53 = vor.u32 %v691_v41, %v688_v28  ;;  %v719_v54 = vshll.u32 %v8521_v45, 16 }
  0x58   : > { %v674_v47 = vsel %vm8245_vm2, %v669_v25, %v673_v1  ;;  %v701_v31 = vrot.slane %v699_v15, 4  ;;  %v715_v9 = vrot.slane %v713_v49, 5  ;;  %v723_v10 = vshrl.u32 %v8521_v45, 16 }
  0x59   : > { %7399 = vmatmul.mubr.bf16.gmra.mxu1 %v6211_v37  ;;  %v705_v37 = vshll.u32 %v8511_v17, 16  ;;  %7351 = vmatmul.mubr.bf16.gmra.mxu0 %v6187_v34  ;;  %v684_v52 = vsel %vm8245_vm2, %v679_v19, %v683_v16  ;;  %v693_v4 = vrot.slane %v692_v53, 4  ;;  %v721_v0 = vrot.slane %v719_v54, 5 }
  0x5a   : > { %7402 = vmatprep.mubr.bf16.mxu1 %v6212_v6  ;;  %v6188_v61 = vcombine.low %v674_v47, %v684_v52  ;;  %v702_v1 = vor.u32 %v701_v31, %v697_v43  ;;  %v712_v6 = vrot.slane %v710_v22, 4  ;;  %v729_v16 = vshll.u32 %v8529_v33, 16  ;;  %v8555_v31 = vld [vmem:[%s8201_s12 + $0xac] sm:$0xf] }
  0x5b   : > { %v707_v3 = vrot.slane %v705_v37, 5  ;;  %v698_v24 = vsel %vm8245_vm2, %v693_v4, %v697_v43  ;;  %v725_v28 = vrot.slane %v723_v10, 4  ;;  %v734_v15 = vshrl.u32 %v8532_v39, 16 }
  0x5c   : > { %7354 = vmatprep.mubr.bf16.mxu0 %v6188_v61  ;;  %v703_v12 = vrot.slane %v702_v1, 4  ;;  %v716_v25 = vor.u32 %v715_v9, %v712_v6  ;;  %v731_v19 = vrot.slane %v729_v16, 5  ;;  %v737_v41 = vshll.u32 %v8532_v39, 16  ;;  %v8560_v61 = vld [vmem:[%s8201_s12 + $0xb0] sm:$0x1] }
  0x5d   : > { %v743_v47 = vshll.u32 %v8537_v46, 16  ;;  %v726_v43 = vor.u32 %v725_v28, %v721_v0  ;;  %v736_v52 = vrot.slane %v734_v15, 4  ;;  %v753_v49 = vshll.u32 %v8542_v11, 16  ;;  %v8567_v6 = vld [vmem:[%s8201_s12 + $0xb4] sm:$0xf] }
  0x5e   : > { %v708_v34 = vsel %vm8245_vm2, %v703_v12, %v707_v3  ;;  %v717_v37 = vrot.slane %v716_v25, 4  ;;  %v739_v53 = vrot.slane %v737_v41, 5  ;;  %v6215_v54 = vcombine.low %v8532_v39, %v8537_v46  ;;  %v8574_v28 = vld [vmem:[%s8201_s12 + $0xb8] sm:$0xf] }
  0x5f   : > { %v6189_v32 = vcombine.low %v698_v24, %v708_v34  ;;  %v745_v22 = vrot.slane %v743_v47, 5  ;;  %v727_v3 = vrot.slane %v726_v43, 4  ;;  %v758_v4 = vshrl.u32 %v382_v7, 16 }
  0x60   : > { %v722_v1 = vsel %vm8245_vm2, %v717_v37, %v721_v0  ;;  %v740_v9 = vor.u32 %v739_v53, %v736_v52  ;;  %v755_v12 = vrot.slane %v753_v49, 5  ;;  %v761_v16 = vshll.u32 %v382_v7, 16 }
  0x61   : > { %7403 = vmatmul.mubr.bf16.gmra.mxu1 %v6213_v58  ;;  %v747_v58 = vshrl.u32 %v8537_v46, 16  ;;  %7355 = vmatmul.mubr.bf16.gmra.mxu0 %v6189_v32  ;;  %v760_v24 = vrot.slane %v758_v4, 4  ;;  %v767_v25 = vshll.u32 %v8555_v31, 16  ;;  %v771_v0 = vshrl.u32 %v8555_v31, 16 }
  0x62   : > { %7406 = vmatprep.mubr.bf16.mxu1 %v6214_v23  ;;  %v732_v23 = vsel %vm8245_vm2, %v727_v3, %v731_v19  ;;  %v741_v15 = vrot.slane %v740_v9, 4  ;;  %v763_v41 = vrot.slane %v761_v16, 5  ;;  %v777_v37 = vshll.u32 %v8560_v61, 16  ;;  %v8579_v19 = vld [vmem:[%s8201_s12 + $0xbc] sm:$0x1] }
  0x63   : > { %v749_v10 = vrot.slane %v747_v58, 4  ;;  %v6190_v39 = vcombine.low %v722_v1, %v732_v23  ;;  %v769_v47 = vrot.slane %v767_v25, 5  ;;  %v773_v32 = vrot.slane %v771_v0, 4  ;;  %v1400_v1 = vld [vmem:[%s8201_s12] sm:$0xe] }
  0x64   : > { %v6216_v43 = vcombine.low %v382_v7, %v8555_v31  ;;  %v746_v52 = vsel %vm8245_vm2, %v741_v15, %v745_v22  ;;  %v764_v58 = vor.u32 %v763_v41, %v760_v24  ;;  %v782_v49 = vshrl.u32 %v8567_v6, 16  ;;  %v7891_v15 = vld [vmem:[%s8201_s12 + $0xc] sm:$0xff]  }
  0x65   : > { %v750_v34 = vor.u32 %v749_v10, %v745_v22  ;;  %7358 = vmatprep.mubr.bf16.mxu0 %v6190_v39  ;;  %v774_v3 = vor.u32 %v773_v32, %v769_v47  ;;  %v779_v4 = vrot.slane %v777_v37, 5  ;;  %v785_v9 = vshll.u32 %v8567_v6, 16  ;;  %v1401_v10 = vld [vmem:[%s8201_s12 + $0xc] sm:$0xe] }
  0x66   : > { %v791_v7 = vshll.u32 %v8574_v28, 16  ;;  %v765_v22 = vrot.slane %v764_v58, 4  ;;  %v784_v23 = vrot.slane %v782_v49, 4  ;;  %v801_v32 = vshll.u32 %v8579_v19, 16 }
  0x67   : > { %v751_v53 = vrot.slane %v750_v34, 4  ;;  %v775_v25 = vrot.slane %v774_v3, 4  ;;  %v787_v0 = vrot.slane %v785_v9, 5  ;;  %v6217_v37 = vcombine.low %v8567_v6, %v8574_v28 }
  0x68   : > { %v793_v39 = vrot.slane %v791_v7, 5  ;;  %v770_v34 = vsel %vm8245_vm2, %v765_v22, %v769_v47  ;;  %v6226_v47 = vrot.slane %v1400_v1, 9  ;;  %v1453_v58 = vrot.slane %v8211_v13, 5  ;;  %v1403_v7 = vld [vmem:[%s8201_s12 + $0x24] sm:$0xe] }
  0x69   : > { %7407 = vmatmul.mubr.bf16.gmra.mxu1 %v6215_v54  ;;  %v756_v16 = vsel %vm8245_vm2, %v751_v53, %v755_v12  ;;  %v795_v54 = vshrl.u32 %v8574_v28, 16  ;;  %v788_v53 = vor.u32 %v787_v0, %v784_v23  ;;  %v803_v9 = vrot.slane %v801_v32, 5  ;;  %v1406_v32 = vld [vmem:[%s8201_s12 + $0x48] sm:$0xe] }
  0x6a   : > { %7410 = vmatprep.mubr.bf16.mxu1 %v6216_v43  ;;  %v6191_v24 = vcombine.low %v746_v52, %v756_v16  ;;  %v1402_v43 = vld [vmem:[%s8201_s12 + $0x18] sm:$0xe]  ;;  %v780_v52 = vsel %vm8245_vm2, %v775_v25, %v779_v4  ;;  %v6227_v6 = vrot.slane %v1401_v10, 9  ;;  %v1454_v22 = vsel %vm8599_vm5, %v6226_v47, %v1453_v58 }
  0x6b   : > { %v797_v41 = vrot.slane %v795_v54, 4  ;;  %v6192_v49 = vcombine.low %v770_v34, %v780_v52  ;;  %v789_v16 = vrot.slane %v788_v53, 4  ;;  %v1455_v54 = vrot.slane %v1453_v58, 4  ;;  %v1405_v34 = vld [vmem:[%s8201_s12 + $0x3c] sm:$0xe] }
  0x6c   : > { %7359 = vmatmul.mubr.bf16.gmra.mxu0 %v6191_v24  ;;  %v1460_v24 = vrot.slane %v8228_v26, 5  ;;  %v6228_v13 = vrot.slane %v1402_v43, 9  ;;  %v1467_v1 = vrot.slane %v8257_v51, 5  ;;  %v1470_v10 = vrot.slane %v8265_v56, 5  ;;  %v7895_v43 = vld [vmem:[%s8201_s12 + $0x24] sm:$0xff]  }
  0x6d   : > { %v798_v3 = vor.u32 %v797_v41, %v793_v39  ;;  %7362 = vmatprep.mubr.bf16.mxu0 %v6192_v49  ;;  %v794_v23 = vsel %vm8245_vm2, %v789_v16, %v793_v39  ;;  %v1457_v26 = vsel %vm8599_vm5, %v1455_v54, %v1456_v21  ;;  %v7892_v41 = vld [vmem:[%s8201_s12 + $0x18] sm:$0xff]   ;;  %v6229_v52 = vrot.slane %v1403_v7, 9 }
  0x6e   : > { %v8622_v25 = vsel %vm8599_vm5, %v6227_v6, %v1460_v24  ;;  %v1462_v0 = vrot.slane %v1460_v24, 4  ;;  %v6258_v56 = vcombine.low %v1454_v22, %v1457_v26  ;;  %v8630_v39 = vsel %vm8599_vm5, %v6228_v13, %v1467_v1 }
  0x6f   : > { %v799_v4 = vrot.slane %v798_v3, 4  ;;  %v1469_v14 = vrot.slane %v1467_v1, 4  ;;  %v1474_v53 = vrot.slane %v8277_v63, 5  ;;  %v1477_v49 = vrot.slane %v8283_v5, 5  ;;  %v7898_v3 = vld [vmem:[%s10413_s1 + $0x170] sm:$0xff]  }
  0x70   : > { %v1481_v16 = vrot.slane %v8309_v35, 5  ;;  %v1484_v5 = vrot.slane %v8312_v40, 5  ;;  %v6231_v22 = vrot.slane %v1405_v34, 9  ;;  %v1488_v54 = vrot.slane %v8330_v55, 5 }
  0x71   : > { %7411 = vmatmul.mubr.bf16.gmra.mxu1 %v6217_v37  ;;  %v804_v51 = vsel %vm8245_vm2, %v799_v4, %v803_v9  ;;  %v1471_v58 = vsel %vm8599_vm5, %v1469_v14, %v1470_v10  ;;  %v6230_v9 = vrot.slane %v1404_v42, 9  ;;  %v8650_v7 = vsel %vm8599_vm5, %v6229_v52, %v1474_v53  ;;  %v1408_v10 = vld [vmem:[%s8201_s12 + $0x60] sm:$0xe] }
  0x72   : > { %7478 = vmatprep.mubr.bf16.mxu1 %v7891_v15  ;;  %v6193_v21 = vcombine.low %v794_v23, %v804_v51  ;;  %v10453_v15 = vrot.slane %v8231_v27, 5  ;;  %v1407_v27 = vld [vmem:[%s8201_s12 + $0x54] sm:$0xe]  ;;  %v6260_v6 = vcombine.low %v8630_v39, %v1471_v58  ;;  %v1476_v63 = vrot.slane %v1474_v53, 4  ;;  %v1409_v39 = vld [vmem:[%s8201_s12 + $0x6c] sm:$0xe] }
  0x73   : > { %v1491_v42 = vrot.slane %v8345_v8, 5  ;;  %v8662_v4 = vsel %vm8599_vm5, %v6230_v9, %v1481_v16  ;;  %v1483_v13 = vrot.slane %v1481_v16, 4  ;;  %v6232_v1 = vrot.slane %v1406_v32, 9  ;;  %v7897_v23 = vld [vmem:[%s10413_s1 + $0x130] sm:$0xff]  }
  0x74   : > { %v1464_v37 = vsel %vm8599_vm5, %v1462_v0, %v10453_v15  ;;  %7363 = vmatmul.mubr.bf16.gmra.mxu0 %v6193_v21  ;;  %v8658_v24 = vsel %vm8599_vm5, %v1476_v63, %v1477_v49  ;;  %v8668_v40 = vsel %vm8599_vm5, %v6231_v22, %v1488_v54  ;;  %v1490_v55 = vrot.slane %v1488_v54, 4  ;;  %v1410_v63 = vld [vmem:[%s8201_s12 + $0x78] sm:$0xe]  ;;  %v1411_v54 = vld [vmem:[%s8201_s12 + $0x84] sm:$0xe] }
  0x75   : > { %v6259_v47 = vcombine.low %v8622_v25, %v1464_v37  ;;  %7430 = vmatprep.mubr.bf16.mxu0 %v6258_v56  ;;  %v6261_v35 = vcombine.low %v8650_v7, %v8658_v24  ;;  %v1495_v8 = vrot.slane %v8357_v20, 5  ;;  %v8678_v26 = vsel %vm8599_vm5, %v1483_v13, %v1484_v5  ;;  %v7896_v20 = vld [vmem:[%s8201_s12 + $0x30] sm:$0xff]   ;;  %v7902_v56 = vld [vmem:[%s10413_s1 + $0x168] sm:$0xff]  }
  0x76   : > { %v1498_v25 = vrot.slane %v8367_v30, 5  ;;  %v6233_v0 = vrot.slane %v1407_v27, 9  ;;  %v1502_v34 = vrot.slane %v8393_v59, 5  ;;  %v6262_v51 = vcombine.low %v8662_v4, %v8678_v26  ;;  %v7899_v59 = vld [vmem:[%s8201_s12 + $0x3c] sm:$0xff]   ;;  %v1414_v4 = vld [vmem:[%s8201_s12 + $0xa8] sm:$0xe] }
  0x77   : > { %v1497_v30 = vrot.slane %v1495_v8, 4  ;;  %v1505_v15 = vrot.slane %v8401_v2, 5  ;;  %v6234_v52 = vrot.slane %v1408_v10, 9  ;;  %v1509_v53 = vrot.slane %v8416_v18, 5 }
  0x78   : > { %v8702_v32 = vsel %vm8599_vm5, %v6233_v0, %v1502_v34  ;;  %v1504_v21 = vrot.slane %v1502_v34, 4  ;;  %v1512_v58 = vrot.slane %v8432_v44, 5  ;;  %v6235_v9 = vrot.slane %v1409_v39, 9 }
  0x79   : > { %7479 = vmatmul.mubr.bf16.vlgmr.msra.gmra.mxu1 %v7892_v41  ;;  %v8694_v41 = vsel %vm8599_vm5, %v6232_v1, %v1495_v8  ;;  %v8707_v37 = vsel %vm8599_vm5, %v1497_v30, %v1498_v25  ;;  %v1516_v27 = vrot.slane %v8445_v60, 5  ;;  %v8726_v44 = vsel %vm8599_vm5, %v6234_v52, %v1509_v53  ;;  %v7901_v60 = vld [vmem:[%s10413_s1 + $0x128] sm:$0xff]   ;;  %v7914_v52 = vld [vmem:[%s10413_s1 + $0x150] sm:$0xff]  }
  0x7a   : > { %7559 = vmatpush3.bf16.msra.mxu1 %v8498_v57  ;;  %7482 = vmatprep.mubr.bf16.mxu1 %v7895_v43  ;;  %v8687_v57 = vsel %vm8599_vm5, %v1490_v55, %v1491_v42  ;;  %v7906_v43 = vld [vmem:[%s10413_s1 + $0x160] sm:$0xff]   ;;  %v6264_v49 = vcombine.low %v8694_v41, %v8707_v37  ;;  %v8718_v2 = vsel %vm8599_vm5, %v1504_v21, %v1505_v15  ;;  %v6236_v16 = vrot.slane %v1410_v63, 9  ;;  %v7900_v8 = vld [vmem:[%s8201_s12 + $0x48] sm:$0xff]   ;;  %v7909_v21 = vld [vmem:[%s10413_s1 + $0x118] sm:$0xff]  }
  0x7b   : > { %7560 = vmatprep.subr.bf16.mxu1 %v7898_v3  ;;  %v6263_v14 = vcombine.low %v8668_v40, %v8687_v57  ;;  %v6265_v18 = vcombine.low %v8702_v32, %v8718_v2  ;;  %v1523_v5 = vrot.slane %v8472_v36, 5  ;;  %v1526_v22 = vrot.slane %v8485_v48, 5  ;;  %v7905_v36 = vld [vmem:[%s10413_s1 + $0x120] sm:$0xff]   ;;  %v7910_v48 = vld [vmem:[%s10413_s1 + $0x158] sm:$0xff]   ;;  %v6355_v57 = vld [vmem:[%s8201_s12 + $0x10] sm:$0xf] }
  0x7c   : > { %7431 = vmatmul.mubr.bf16.vlgmr.msra.gmra.mxu0 %v6259_v47  ;;  %v1511_v47 = vrot.slane %v1509_v53, 4  ;;  %v1530_v42 = vrot.slane %v8501_v50, 5  ;;  %v1533_v13 = vrot.slane %v8511_v17, 5  ;;  %v6237_v25 = vrot.slane %v1411_v54, 9  ;;  %v7917_v41 = vld [vmem:[%s10413_s1 + $0x108] sm:$0xff]  }
  0x7d   : > { %7511 = vmatpush3.bf16.msra.mxu0 %v8482_v29  ;;  %7434 = vmatprep.mubr.bf16.mxu0 %v6260_v6  ;;  %v8735_v29 = vsel %vm8599_vm5, %v6235_v9, %v1516_v27  ;;  %v1518_v6 = vrot.slane %v1516_v27, 4  ;;  %v8760_v50 = vsel %vm8599_vm5, %v6236_v16, %v1523_v5  ;;  %v1525_v17 = vrot.slane %v1523_v5, 4  ;;  %v1413_v9 = vld [vmem:[%s8201_s12 + $0x9c] sm:$0xe]  ;;  %v1415_v16 = vld [vmem:[%s8201_s12 + $0xb4] sm:$0xe] }
  0x7e   : > { %7561 = vmatpush3.bf16.msra.mxu1 %v7898_v3  ;;  %v1519_v3 = vrot.slane %v8451_v62, 5  ;;  %7512 = vmatprep.subr.bf16.mxu0 %v7897_v23  ;;  %v8740_v62 = vsel %vm8599_vm5, %v1511_v47, %v1512_v58  ;;  %v1532_v0 = vrot.slane %v1530_v42, 4  ;;  %v1537_v53 = vrot.slane %v8521_v45, 5 }
  0x7f   : > { %7562 = vmatprep.subr.bf16.mxu1 %v7902_v56  ;;  %v6266_v1 = vcombine.low %v8726_v44, %v8740_v62  ;;  %v8767_v34 = vsel %vm8599_vm5, %v1525_v17, %v1526_v22  ;;  %v1540_v58 = vrot.slane %v8529_v33, 5  ;;  %v1544_v7 = vrot.slane %v8537_v46, 5  ;;  %v7907_v22 = vld [vmem:[%s8201_s12 + $0x6c] sm:$0xff]  }
  0x80   : > { %v8753_v55 = vsel %vm8599_vm5, %v1518_v6, %v1519_v3  ;;  %v6268_v30 = vcombine.low %v8760_v50, %v8767_v34  ;;  %v8779_v39 = vsel %vm8599_vm5, %v1532_v0, %v1533_v13  ;;  %v6239_v24 = vrot.slane %v1413_v9, 9  ;;  %v7904_v3 = vld [vmem:[%s8201_s12 + $0x60] sm:$0xff]   ;;  %v6357_v9 = vld [vmem:[%s8201_s12 + $0x18] sm:$0xf] }
  0x81   : > { %7483 = vmatmul.mubr.bf16.gmra.mxu1 %v7896_v20  ;;  %7513 = vmatpush3.bf16.msra.mxu0 %v7897_v23  ;;  %v6267_v10 = vcombine.low %v8735_v29, %v8753_v55  ;;  %v1412_v20 = vld [vmem:[%s8201_s12 + $0x90] sm:$0xe]  ;;  %v8775_v23 = vsel %vm8599_vm5, %v6237_v25, %v1530_v42  ;;  %v1539_v45 = vrot.slane %v1537_v53, 4  ;;  %v1546_v33 = vrot.slane %v1544_v7, 4 }
  0x82   : > { %7486 = vmatprep.mubr.bf16.mxu1 %v7899_v59  ;;  %7563 = vmatpush3.bf16.msra.mxu1 %v7902_v56  ;;  %v7903_v56 = vld [vmem:[%s8201_s12 + $0x54] sm:$0xff]   ;;  %v6238_v59 = vrot.slane %v1412_v20, 9  ;;  %v6269_v15 = vcombine.low %v8775_v23, %v8779_v39  ;;  %v8806_v46 = vsel %vm8599_vm5, %v6239_v24, %v1544_v7  ;;  %v6240_v27 = vrot.slane %v1414_v4, 9  ;;  %v7921_v7 = vld [vmem:[%s10413_s1 + $0x100] sm:$0xff]   ;;  %v6358_v4 = vld [vmem:[%s8201_s12 + $0x1c] sm:$0xf] }
  0x83   : > { %7564 = vmatprep.subr.bf16.mxu1 %v7906_v43  ;;  %7514 = vmatprep.subr.bf16.mxu0 %v7901_v60  ;;  %v8814_v26 = vsel %vm8599_vm5, %v1539_v45, %v1540_v58  ;;  %v1551_v47 = vrot.slane %v8555_v31, 5  ;;  %v1554_v6 = vrot.slane %v8560_v61, 5  ;;  %v1558_v5 = vrot.slane %v8574_v28, 5  ;;  %v7918_v31 = vld [vmem:[%s10413_s1 + $0x148] sm:$0xff]   ;;  %v7922_v28 = vld [vmem:[%s10413_s1 + $0x140] sm:$0xff]  }
  0x84   : > { %7435 = vmatmul.mubr.bf16.gmra.mxu0 %v6261_v35  ;;  %v1547_v35 = vrot.slane %v8542_v11, 5  ;;  %v7913_v11 = vld [vmem:[%s10413_s1 + $0x110] sm:$0xff]   ;;  %v6241_v13 = vrot.slane %v1415_v16, 9  ;;  %v1561_v61 = vrot.slane %v8579_v19, 5  ;;  %v2334_v20 = vshrl.u32 %v6355_v57, 16 }
  0x85   : > { %7438 = vmatprep.mubr.bf16.mxu0 %v6262_v51  ;;  %7515 = vmatpush3.bf16.msra.mxu0 %v7901_v60  ;;  %v8835_v54 = vsel %vm8599_vm5, %v6240_v27, %v1551_v47  ;;  %v1553_v42 = vrot.slane %v1551_v47, 4  ;;  %v3092_v58 = vrot.slane %v6355_v57, 5  ;;  %v2345_v16 = vshrl.u32 %v6357_v9, 16 }
  0x86   : > { %7565 = vmatpush3.bf16.msra.mxu1 %v7906_v43  ;;  %7516 = vmatprep.subr.bf16.mxu0 %v7905_v36  ;;  %v8802_v43 = vsel %vm8599_vm5, %v6238_v59, %v1537_v53  ;;  %v8818_v51 = vsel %vm8599_vm5, %v1546_v33, %v1547_v35  ;;  %v8850_v17 = vsel %vm8599_vm5, %v6241_v13, %v1558_v5  ;;  %v6442_v59 = vld [vmem:[%s8201_s12 + $0xc] sm:$0xe]  ;;  %v2336_v35 = vrot.slane %v2334_v20, 4 }
  0x87   : > { %7566 = vmatprep.subr.bf16.mxu1 %v7910_v48  ;;  %v6270_v63 = vcombine.low %v8802_v43, %v8814_v26  ;;  %v6271_v60 = vcombine.low %v8806_v46, %v8818_v51  ;;  %v6458_v53 = vrot.slane %v6442_v59, 9  ;;  %v2358_v13 = vshrl.u32 %v6358_v4, 16 }
  0x88   : > { %v3099_v44 = vrot.slane %v6358_v4, 5 }
  0x89   : > { %7487 = vmatmul.mubr.bf16.gmra.mxu1 %v7900_v8  ;;  %7517 = vmatpush3.bf16.msra.mxu0 %v7905_v36  ;;  %v1560_v36 = vrot.slane %v1558_v5, 4  ;;  %v6354_v8 = vld [vmem:[%s8201_s12 + $0xc] sm:$0xf]  ;;  %v8877_v47 = vsel %vm8599_vm5, %v6458_v53, %v3092_v58  ;;  %v6443_v5 = vld [vmem:[%s8201_s12 + $0x18] sm:$0xe]  ;;  %v2360_v32 = vrot.slane %v2358_v13, 4 }
  0x8a   : > { %7490 = vmatprep.mubr.bf16.mxu1 %v7903_v56  ;;  %7567 = vmatpush3.bf16.msra.mxu1 %v7910_v48  ;;  %v8846_v48 = vsel %vm8599_vm5, %v1553_v42, %v1554_v6  ;;  %v2321_v25 = vshrl.u32 %v6354_v8, 16  ;;  %v2324_v0 = vshll.u32 %v6354_v8, 16  ;;  %v6359_v6 = vld [vmem:[%s8201_s12 + $0x20] sm:$0x1]  ;;  %v2354_v42 = vshll.u32 %v6358_v4, 16 }
  0x8b   : > { %7568 = vmatprep.subr.bf16.mxu1 %v7914_v52  ;;  %7518 = vmatprep.subr.bf16.mxu0 %v7909_v21  ;;  %v6272_v19 = vcombine.low %v8835_v54, %v8846_v48  ;;  %v8860_v40 = vsel %vm8599_vm5, %v1560_v36, %v1561_v61  ;;  %v7908_v61 = vld [vmem:[%s8201_s12 + $0x78] sm:$0xff]   ;;  %v3102_v62 = vrot.slane %v6359_v6, 5  ;;  %v3101_v4 = vrot.slane %v3099_v44, 4 }
  0x8c   : > { %7439 = vmatmul.mubr.bf16.gmra.mxu0 %v6263_v14  ;;  %v6356_v14 = vld [vmem:[%s8201_s12 + $0x14] sm:$0x1]  ;;  %v6273_v37 = vcombine.low %v8850_v17, %v8860_v40 }
  0x8d   : > { %7442 = vmatprep.mubr.bf16.mxu0 %v6264_v49  ;;  %7519 = vmatpush3.bf16.msra.mxu0 %v7909_v21  ;;  %v2330_v49 = vshll.u32 %v6355_v57, 16  ;;  %v2340_v56 = vshll.u32 %v6356_v14, 16  ;;  %v2323_v21 = vrot.slane %v2321_v25, 4  ;;  %v3095_v33 = vrot.slane %v6356_v14, 5  ;;  %v7911_v25 = vld [vmem:[%s8201_s12 + $0x84] sm:$0xff]  }
  0x8e   : > { %7569 = vmatpush3.bf16.msra.mxu1 %v7914_v52  ;;  %7520 = vmatprep.subr.bf16.mxu0 %v7913_v11  ;;  %v2326_v52 = vrot.slane %v2324_v0, 5  ;;  %v2347_v57 = vrot.slane %v2345_v16, 4  ;;  %v2364_v14 = vshll.u32 %v6359_v6, 16 }
  0x8f   : > { %7570 = vmatprep.subr.bf16.mxu1 %v7918_v31  ;;  %v2332_v24 = vrot.slane %v2330_v49, 5  ;;  %v2342_v45 = vrot.slane %v2340_v56, 5  ;;  %v2356_v56 = vrot.slane %v2354_v42, 5  ;;  %v8924_v42 = vsel %vm8599_vm5, %v3101_v4, %v3102_v62 }
  0x90   : > { %v2327_v27 = vor.u32 %v2326_v52, %v2323_v21  ;;  %v2366_v2 = vrot.slane %v2364_v14, 5 }
  0x91   : > { %7491 = vmatmul.mubr.bf16.gmra.mxu1 %v7904_v3  ;;  %7521 = vmatpush3.bf16.msra.mxu0 %v7913_v11  ;;  %v3094_v3 = vrot.slane %v3092_v58, 4  ;;  %v8884_v11 = vld [vmem:[%s10413_s1 + $0x1f8] sm:$0xff]   ;;  %v2361_v58 = vor.u32 %v2360_v32, %v2356_v56 }
  0x92   : > { %7494 = vmatprep.mubr.bf16.mxu1 %v7907_v22  ;;  %7571 = vmatpush3.bf16.msra.mxu1 %v7918_v31  ;;  %v2337_v22 = vor.u32 %v2336_v35, %v2332_v24  ;;  %v2348_v31 = vshll.u32 %v6357_v9, 16  ;;  %v2328_v36 = vrot.slane %v2327_v27, 4  ;;  %v6362_v9 = vld [vmem:[%s8201_s12 + $0x2c] sm:$0x1] }
  0x93   : > { %7572 = vmatprep.subr.bf16.mxu1 %v7922_v28  ;;  %7522 = vmatprep.subr.bf16.mxu0 %v7917_v41  ;;  %v8889_v8 = vsel %vm8599_vm5, %v3094_v3, %v3095_v33  ;;  %v2362_v3 = vrot.slane %v2361_v58, 4  ;;  %v3109_v62 = vrot.slane %v6362_v9, 5 }
  0x94   : > { %7443 = vmatmul.mubr.bf16.gmra.mxu0 %v6265_v18  ;;  %v2338_v0 = vrot.slane %v2337_v22, 4  ;;  %v6490_v49 = vcombine.low %v8877_v47, %v8889_v8  ;;  %v2350_v20 = vrot.slane %v2348_v31, 5  ;;  %v2333_v59 = vsel %vm8245_vm2, %v2328_v36, %v2332_v24  ;;  %v6444_v22 = vld [vmem:[%s8201_s12 + $0x24] sm:$0xe]  ;;  %v6363_v36 = vld [vmem:[%s8201_s12 + $0x30] sm:$0xf] }
  0x95   : > { %7446 = vmatprep.mubr.bf16.mxu0 %v6266_v1  ;;  %7523 = vmatpush3.bf16.msra.mxu0 %v7917_v41  ;;  %v6459_v18 = vrot.slane %v6443_v5, 9  ;;  %v6360_v1 = vld [vmem:[%s8201_s12 + $0x24] sm:$0xf]  ;;  %v6361_v41 = vld [vmem:[%s8201_s12 + $0x28] sm:$0xf]  ;;  %v2367_v14 = vsel %vm8245_vm2, %v2362_v3, %v2366_v2 }
  0x96   : > { %7573 = vmatpush3.bf16.msra.mxu1 %v7922_v28  ;;  %v8905_v28 = vld [vmem:[%s10413_s1 + $0x1b8] sm:$0xff]   ;;  %7524 = vmatprep.subr.bf16.mxu0 %v7921_v7  ;;  %v2343_v21 = vsel %vm8245_vm2, %v2338_v0, %v2342_v45  ;;  %v2351_v52 = vor.u32 %v2350_v20, %v2347_v57  ;;  %v2369_v24 = vshrl.u32 %v6360_v1, 16  ;;  %v2372_v35 = vshll.u32 %v6360_v1, 16  ;;  %v7912_v57 = vld [vmem:[%s8201_s12 + $0x90] sm:$0xff]  }
  0x97   : > { %7654 = vmatprep.subr.bf16.mxu1 %v8884_v11  ;;  %v8912_v53 = vcombine.low %v2333_v59, %v2343_v21  ;;  %v8917_v45 = vsel %vm8599_vm5, %v6459_v18, %v3099_v44  ;;  %v2378_v27 = vshll.u32 %v6361_v41, 16  ;;  %v2382_v5 = vshrl.u32 %v6361_v41, 16  ;;  %v7915_v59 = vld [vmem:[%s8201_s12 + $0x9c] sm:$0xff]  }
  0x98   : > { %v2352_v33 = vrot.slane %v2351_v52, 4  ;;  %v2371_v6 = vrot.slane %v2369_v24, 4  ;;  %v2374_v16 = vrot.slane %v2372_v35, 5  ;;  %v6460_v21 = vrot.slane %v6444_v22, 9  ;;  %v6445_v24 = vld [vmem:[%s8201_s12 + $0x30] sm:$0xe] }
  0x99   : > { %7495 = vmatmul.mubr.bf16.gmra.mxu1 %v7908_v61  ;;  %7525 = vmatpush3.bf16.msra.mxu0 %v7921_v7  ;;  %v2380_v13 = vrot.slane %v2378_v27, 5  ;;  %v2388_v61 = vshll.u32 %v6362_v9, 16  ;;  %v6364_v7 = vld [vmem:[%s8201_s12 + $0x34] sm:$0xf]  ;;  %v2384_v20 = vrot.slane %v2382_v5, 4  ;;  %v3106_v52 = vrot.slane %v6361_v41, 5 }
  0x9a   : > { %7498 = vmatprep.mubr.bf16.mxu1 %v7911_v25  ;;  %v2357_v31 = vsel %vm8245_vm2, %v2352_v33, %v2356_v56  ;;  %7606 = vmatprep.subr.bf16.mxu0 %v8905_v28  ;;  %v6491_v25 = vcombine.low %v8917_v45, %v8924_v42  ;;  %v2375_v0 = vor.u32 %v2374_v16, %v2371_v6  ;;  %v6365_v56 = vld [vmem:[%s8201_s12 + $0x38] sm:$0x1]  ;;  %v2393_v1 = vshrl.u32 %v6363_v36, 16  ;;  %v6366_v27 = vld [vmem:[%s8201_s12 + $0x3c] sm:$0xf] }
  0x9b   : > { %v8939_v32 = vcombine.low %v2357_v31, %v2367_v14  ;;  %v2390_v18 = vrot.slane %v2388_v61, 5  ;;  %v2385_v44 = vor.u32 %v2384_v20, %v2380_v13  ;;  %v8946_v29 = vsel %vm8599_vm5, %v6460_v21, %v3106_v52  ;;  %v6367_v22 = vld [vmem:[%s8201_s12 + $0x40] sm:$0xf]  ;;  %v7916_v14 = vld [vmem:[%s8201_s12 + $0xa8] sm:$0xff]  }
  0x9c   : > { %7447 = vmatmul.mubr.bf16.gmra.mxu0 %v6267_v10  ;;  %v2376_v2 = vrot.slane %v2375_v0, 4  ;;  %v3108_v55 = vrot.slane %v3106_v52, 4  ;;  %v2396_v10 = vshll.u32 %v6363_v36, 16  ;;  %v2402_v58 = vshll.u32 %v6364_v7, 16  ;;  %v7919_v52 = vld [vmem:[%s8201_s12 + $0xb4] sm:$0xff]  }
  0x9d   : > { %7450 = vmatprep.mubr.bf16.mxu0 %v6268_v30  ;;  %v2386_v50 = vrot.slane %v2385_v44, 4  ;;  %v2395_v34 = vrot.slane %v2393_v1, 4  ;;  %v2406_v30 = vshrl.u32 %v6364_v7, 16  ;;  %v2412_v4 = vshll.u32 %v6365_v56, 16 }
  0x9e   : > { %v2381_v41 = vsel %vm8245_vm2, %v2376_v2, %v2380_v13  ;;  %v8953_v9 = vsel %vm8599_vm5, %v3108_v55, %v3109_v62  ;;  %v2398_v35 = vrot.slane %v2396_v10, 5  ;;  %v2404_v33 = vrot.slane %v2402_v58, 5 }
  0x9f   : > { %v2391_v3 = vsel %vm8245_vm2, %v2386_v50, %v2390_v18  ;;  %v6492_v6 = vcombine.low %v8946_v29, %v8953_v9  ;;  %v2408_v16 = vrot.slane %v2406_v30, 4  ;;  %v6461_v5 = vrot.slane %v6445_v24, 9  ;;  %v6446_v18 = vld [vmem:[%s8201_s12 + $0x3c] sm:$0xe]  ;;  %v6370_v50 = vld [vmem:[%s8201_s12 + $0x4c] sm:$0xf] }
  0xa0   : > { %v8961_v31 = vcombine.low %v2381_v41, %v2391_v3  ;;  %v2399_v13 = vor.u32 %v2398_v35, %v2395_v34  ;;  %v2414_v61 = vrot.slane %v2412_v4, 5  ;;  %v3113_v36 = vrot.slane %v6364_v7, 5  ;;  %v6369_v7 = vld [vmem:[%s8201_s12 + $0x48] sm:$0xf]  ;;  %v7925_v29 = vld [vmem:[%s10413_s1 + $0x1b0] sm:$0xff]  }
  0xa1   : > { %7499 = vmatmul.mubr.bf16.gmra.mxu1 %v7912_v57  ;;  %v6368_v57 = vld [vmem:[%s8201_s12 + $0x44] sm:$0x1]  ;;  %v2409_v0 = vor.u32 %v2408_v16, %v2404_v33  ;;  %v3116_v20 = vrot.slane %v6365_v56, 5  ;;  %v2420_v21 = vshll.u32 %v6366_v27, 16  ;;  %v2426_v1 = vshll.u32 %v6367_v22, 16  ;;  %v7928_v9 = vld [vmem:[%s10413_s1 + $0x1e8] sm:$0xff]  }
  0xa2   : > { %7502 = vmatprep.mubr.bf16.mxu1 %v7915_v59  ;;  %v2417_v59 = vshrl.u32 %v6366_v27, 16  ;;  %v2400_v2 = vrot.slane %v2399_v13, 4  ;;  %v8972_v44 = vsel %vm8599_vm5, %v6461_v5, %v3113_v36  ;;  %v3115_v62 = vrot.slane %v3113_v36, 4  ;;  %v6371_v16 = vld [vmem:[%s8201_s12 + $0x50] sm:$0x1] }
  0xa3   : > { %v2410_v56 = vrot.slane %v2409_v0, 4  ;;  %v2422_v10 = vrot.slane %v2420_v21, 5  ;;  %v2430_v58 = vshrl.u32 %v6367_v22, 16  ;;  %v2436_v24 = vshll.u32 %v6368_v57, 16  ;;  %v6447_v0 = vld [vmem:[%s8201_s12 + $0x48] sm:$0xe] }
  0xa4   : > { %7451 = vmatmul.mubr.bf16.gmra.mxu0 %v6269_v15  ;;  %v2419_v55 = vrot.slane %v2417_v59, 4  ;;  %v2405_v23 = vsel %vm8245_vm2, %v2400_v2, %v2404_v33  ;;  %v8982_v39 = vsel %vm8599_vm5, %v3115_v62, %v3116_v20  ;;  %v2428_v15 = vrot.slane %v2426_v1, 5  ;;  %v7920_v20 = vld [vmem:[%s8201_s12 + $0xc0] sm:$0xff]  }
  0xa5   : > { %7454 = vmatprep.mubr.bf16.mxu0 %v6270_v63  ;;  %v2415_v41 = vsel %vm8245_vm2, %v2410_v56, %v2414_v61  ;;  %v6493_v43 = vcombine.low %v8972_v44, %v8982_v39  ;;  %v2432_v63 = vrot.slane %v2430_v58, 4  ;;  %v2438_v30 = vrot.slane %v2436_v24, 5 }
  0xa6   : > { %v2423_v26 = vor.u32 %v2422_v10, %v2419_v55  ;;  %v8989_v34 = vcombine.low %v2405_v23, %v2415_v41  ;;  %v6462_v35 = vrot.slane %v6446_v18, 9  ;;  %v3120_v33 = vrot.slane %v6367_v22, 5 }
  0xa7   : > { %v2433_v27 = vor.u32 %v2432_v63, %v2428_v15  ;;  %v3123_v3 = vrot.slane %v6368_v57, 5  ;;  %v2441_v5 = vshrl.u32 %v6369_v7, 16  ;;  %v2444_v36 = vshll.u32 %v6369_v7, 16  ;;  %v6372_v57 = vld [vmem:[%s8201_s12 + $0x54] sm:$0xf] }
  0xa8   : > { %v2424_v4 = vrot.slane %v2423_v26, 4  ;;  %v8994_v13 = vsel %vm8599_vm5, %v6462_v35, %v3120_v33  ;;  %v3122_v61 = vrot.slane %v3120_v33, 4  ;;  %v2454_v18 = vshrl.u32 %v6370_v50, 16  ;;  %v6373_v7 = vld [vmem:[%s8201_s12 + $0x58] sm:$0xf] }
  0xa9   : > { %7503 = vmatmul.mubr.bf16.gmra.mxu1 %v7916_v14  ;;  %v2450_v14 = vshll.u32 %v6370_v50, 16  ;;  %v2434_v22 = vrot.slane %v2433_v27, 4  ;;  %v2443_v21 = vrot.slane %v2441_v5, 4  ;;  %v2446_v2 = vrot.slane %v2444_v36, 5  ;;  %v6448_v27 = vld [vmem:[%s8201_s12 + $0x54] sm:$0xe] }
  0xaa   : > { %7506 = vmatprep.mubr.bf16.mxu1 %v7919_v52  ;;  %v2429_v59 = vsel %vm8245_vm2, %v2424_v4, %v2428_v15  ;;  %v9006_v52 = vsel %vm8599_vm5, %v3122_v61, %v3123_v3  ;;  %v2460_v1 = vshll.u32 %v6371_v16, 16  ;;  %v2456_v46 = vrot.slane %v2454_v18, 4  ;;  %v6377_v18 = vld [vmem:[%s8201_s12 + $0x68] sm:$0x1] }
  0xab   : > { %v2452_v62 = vrot.slane %v2450_v14, 5  ;;  %v2439_v56 = vsel %vm8245_vm2, %v2434_v22, %v2438_v30  ;;  %v6494_v55 = vcombine.low %v8994_v13, %v9006_v52  ;;  %v6463_v51 = vrot.slane %v6447_v0, 9  ;;  %v6376_v0 = vld [vmem:[%s8201_s12 + $0x64] sm:$0xf] }
  0xac   : > { %7455 = vmatmul.mubr.bf16.gmra.mxu0 %v6271_v60  ;;  %v6374_v60 = vld [vmem:[%s8201_s12 + $0x5c] sm:$0x1]  ;;  %v9017_v10 = vcombine.low %v2429_v59, %v2439_v56  ;;  %v2447_v58 = vor.u32 %v2446_v2, %v2443_v21  ;;  %v2462_v23 = vrot.slane %v2460_v1, 5  ;;  %v3127_v15 = vrot.slane %v6370_v50, 5 }
  0xad   : > { %7458 = vmatprep.mubr.bf16.mxu0 %v6272_v19  ;;  %v2457_v24 = vor.u32 %v2456_v46, %v2452_v62  ;;  %v3130_v41 = vrot.slane %v6371_v16, 5  ;;  %v2465_v54 = vshrl.u32 %v6372_v57, 16  ;;  %v2468_v48 = vshll.u32 %v6372_v57, 16  ;;  %v6375_v16 = vld [vmem:[%s8201_s12 + $0x60] sm:$0xf]  ;;  %v7926_v57 = vld [vmem:[%s10413_s1 + $0x1f0] sm:$0xff]  }
  0xae   : > { %v2448_v19 = vrot.slane %v2447_v58, 4  ;;  %v9024_v26 = vsel %vm8599_vm5, %v6463_v51, %v3127_v15  ;;  %v3129_v63 = vrot.slane %v3127_v15, 4  ;;  %v2474_v30 = vshll.u32 %v6373_v7, 16  ;;  %v6449_v46 = vld [vmem:[%s8201_s12 + $0x60] sm:$0xe] }
  0xaf   : > { %v2458_v35 = vrot.slane %v2457_v24, 4  ;;  %v2467_v50 = vrot.slane %v2465_v54, 4  ;;  %v2470_v33 = vrot.slane %v2468_v48, 5  ;;  %v2478_v4 = vshrl.u32 %v6373_v7, 16 }
  0xb0   : > { %v2453_v3 = vsel %vm8245_vm2, %v2448_v19, %v2452_v62  ;;  %v9031_v47 = vsel %vm8599_vm5, %v3129_v63, %v3130_v41  ;;  %v2476_v8 = vrot.slane %v2474_v30, 5  ;;  %v6464_v22 = vrot.slane %v6448_v27, 9  ;;  %v6379_v19 = vld [vmem:[%s8201_s12 + $0x70] sm:$0xf] }
  0xb1   : > { %7507 = vmatmul.mubr.bf16.gmra.mxu1 %v7920_v20  ;;  %v2463_v5 = vsel %vm8245_vm2, %v2458_v35, %v2462_v23  ;;  %v6495_v61 = vcombine.low %v9024_v26, %v9031_v47  ;;  %v2471_v36 = vor.u32 %v2470_v33, %v2467_v50  ;;  %v2480_v14 = vrot.slane %v2478_v4, 4  ;;  %v6380_v4 = vld [vmem:[%s8201_s12 + $0x74] sm:$0x1]  ;;  %v6387_v26 = vld [vmem:[%s8201_s12 + $0x90] sm:$0xf] }
  0xb2   : > { %7574 = vmatprep.mubr.bf16.mxu1 %v6490_v49  ;;  %v2484_v49 = vshll.u32 %v6374_v60, 16  ;;  %v9042_v20 = vcombine.low %v2453_v3, %v2463_v5  ;;  %v3134_v21 = vrot.slane %v6373_v7, 5  ;;  %v3137_v1 = vrot.slane %v6374_v60, 5  ;;  %v6378_v7 = vld [vmem:[%s8201_s12 + $0x6c] sm:$0xf]  ;;  %v7933_v47 = vld [vmem:[%s10413_s1 + $0x190] sm:$0xff]  }
  0xb3   : > { %v2472_v2 = vrot.slane %v2471_v36, 4  ;;  %v2481_v62 = vor.u32 %v2480_v14, %v2476_v8  ;;  %v2489_v56 = vshrl.u32 %v6375_v16, 16  ;;  %v2498_v51 = vshll.u32 %v6376_v0, 16  ;;  %v7930_v36 = vld [vmem:[%s10413_s1 + $0x1e0] sm:$0xff]  }
  0xb4   : > { %7459 = vmatmul.mubr.bf16.gmra.mxu0 %v6273_v37  ;;  %10454 = vst [vmem:[#allocation8_spill] sm:$0xff] %v9042_v20  ;;  %v2486_v59 = vrot.slane %v2484_v49, 5  ;;  %v9052_v17 = vsel %vm8599_vm5, %v6464_v22, %v3134_v21  ;;  %v3136_v40 = vrot.slane %v3134_v21, 4  ;;  %v2492_v37 = vshll.u32 %v6375_v16, 16 }
  0xb5   : > { %7526 = vmatprep.mubr.bf16.mxu0 %v8912_v53  ;;  %v2477_v58 = vsel %vm8245_vm2, %v2472_v2, %v2476_v8  ;;  %v2482_v23 = vrot.slane %v2481_v62, 4  ;;  %v2491_v60 = vrot.slane %v2489_v56, 4  ;;  %v2502_v15 = vshrl.u32 %v6376_v0, 16  ;;  %v7927_v8 = vld [vmem:[%s10413_s1 + $0x1a8] sm:$0xff]   ;;  %v9104_v56 = vld [vmem:[%s8201_s12 + $0x7c] sm:$0xf] }
  0xb6   : > { %v9066_v24 = vsel %vm8599_vm5, %v3136_v40, %v3137_v1  ;;  %v2494_v41 = vrot.slane %v2492_v37, 5  ;;  %v2500_v45 = vrot.slane %v2498_v51, 5  ;;  %v2508_v42 = vshll.u32 %v6377_v18, 16 }
  0xb7   : > { %v6496_v54 = vcombine.low %v9052_v17, %v9066_v24  ;;  %v6465_v48 = vrot.slane %v6449_v46, 9  ;;  %v3141_v35 = vrot.slane %v6376_v0, 5  ;;  %v3144_v33 = vrot.slane %v6377_v18, 5  ;;  %v6450_v18 = vld [vmem:[%s8201_s12 + $0x6c] sm:$0xe] }
  0xb8   : > { %v2495_v63 = vor.u32 %v2494_v41, %v2491_v60  ;;  %v2510_v30 = vrot.slane %v2508_v42, 5  ;;  %v2513_v27 = vshrl.u32 %v6378_v7, 16  ;;  %v2516_v3 = vshll.u32 %v6378_v7, 16  ;;  %v9114_v7 = vld [vmem:[%s8201_s12 + $0x80] sm:$0x1] }
  0xb9   : > { %7575 = vmatmul.mubr.bf16.vlgmr.msra.gmra.mxu1 %v6491_v25  ;;  %v2487_v25 = vsel %vm8245_vm2, %v2482_v23, %v2486_v59  ;;  %v9088_v16 = vsel %vm8599_vm5, %v6465_v48, %v3141_v35  ;;  %v3143_v5 = vrot.slane %v3141_v35, 4  ;;  %v2522_v14 = vshll.u32 %v6379_v19, 16  ;;  %v7929_v23 = vld [vmem:[%s10413_s1 + $0x1a0] sm:$0xff]  }
  0xba   : > { %7655 = vmatpush3.bf16.msra.mxu1 %v8884_v11  ;;  %7578 = vmatprep.mubr.bf16.mxu1 %v6492_v6  ;;  %v2504_v11 = vrot.slane %v2502_v15, 4  ;;  %v9079_v6 = vcombine.low %v2477_v58, %v2487_v25  ;;  %v2496_v49 = vrot.slane %v2495_v63, 4  ;;  %v2515_v59 = vrot.slane %v2513_v27, 4  ;;  %v6451_v25 = vld [vmem:[%s8201_s12 + $0x78] sm:$0xe] }
  0xbb   : > { %7656 = vmatprep.subr.bf16.mxu1 %v7926_v57  ;;  %v2518_v22 = vrot.slane %v2516_v3, 5  ;;  %v2526_v21 = vshrl.u32 %v6379_v19, 16  ;;  %v9100_v2 = vsel %vm8599_vm5, %v3143_v5, %v3144_v33  ;;  %v2524_v62 = vrot.slane %v2522_v14, 5  ;;  %v6384_v33 = vld [vmem:[%s8201_s12 + $0x84] sm:$0xf] }
  0xbc   : > { %10455 = vst [vmem:[#allocation9_spill] sm:$0xff] %v9079_v6  ;;  %v2505_v50 = vor.u32 %v2504_v11, %v2500_v45  ;;  %7527 = vmatmul.mubr.bf16.vlgmr.msra.gmra.mxu0 %v8939_v32  ;;  %v2532_v1 = vshll.u32 %v6380_v4, 16  ;;  %v6497_v40 = vcombine.low %v9088_v16, %v9100_v2  ;;  %v6466_v39 = vrot.slane %v6450_v18, 9  ;;  %v7932_v11 = vld [vmem:[%s10413_s1 + $0x1d8] sm:$0xff]   ;;  %v6385_v5 = vld [vmem:[%s8201_s12 + $0x88] sm:$0xf] }
  0xbd   : > { %7607 = vmatpush3.bf16.msra.mxu0 %v8905_v28  ;;  %7530 = vmatprep.mubr.bf16.mxu0 %v8961_v31  ;;  %v6381_v28 = vld [vmem:[%s8201_s12 + $0x78] sm:$0xf]  ;;  %v2519_v37 = vor.u32 %v2518_v22, %v2515_v59  ;;  %v2528_v51 = vrot.slane %v2526_v21, 4  ;;  %v3151_v41 = vrot.slane %v6380_v4, 5  ;;  %v2546_v42 = vshll.u32 %v9104_v56, 16  ;;  %v7937_v2 = vld [vmem:[%s10413_s1 + $0x180] sm:$0xff]  }
  0xbe   : > { %7657 = vmatpush3.bf16.msra.mxu1 %v7926_v57  ;;  %v2506_v0 = vrot.slane %v2505_v50, 4  ;;  %7608 = vmatprep.subr.bf16.mxu0 %v7925_v29  ;;  %v2501_v57 = vsel %vm8245_vm2, %v2496_v49, %v2500_v45  ;;  %v2534_v44 = vrot.slane %v2532_v1, 5  ;;  %v2537_v45 = vshrl.u32 %v6381_v28, 16  ;;  %v7931_v22 = vld [vmem:[%s10413_s1 + $0x198] sm:$0xff]   ;;  %v9159_v21 = vld [vmem:[%s8201_s12 + $0x8c] sm:$0x1] }
  0xbf   : > { %7658 = vmatprep.subr.bf16.mxu1 %v7928_v9  ;;  %v2520_v60 = vrot.slane %v2519_v37, 4  ;;  %v2529_v15 = vor.u32 %v2528_v51, %v2524_v62  ;;  %v2548_v35 = vrot.slane %v2546_v42, 5  ;;  %v2556_v50 = vshll.u32 %v9114_v7, 16  ;;  %v6391_v16 = vld [vmem:[%s8201_s12 + $0xa0] sm:$0xf] }
  0xc0   : > { %v2511_v46 = vsel %vm8245_vm2, %v2506_v0, %v2510_v30  ;;  %v6467_v49 = vrot.slane %v6451_v25, 9  ;;  %v2564_v1 = vshll.u32 %v6384_v33, 16  ;;  %v2570_v51 = vshll.u32 %v6385_v5, 16 }
  0xc1   : > { %7579 = vmatmul.mubr.bf16.gmra.mxu1 %v6493_v43  ;;  %v9119_v58 = vcombine.low %v2501_v57, %v2511_v46  ;;  %v3148_v43 = vrot.slane %v6379_v19, 5  ;;  %7609 = vmatpush3.bf16.msra.mxu0 %v7925_v29  ;;  %v2525_v48 = vsel %vm8245_vm2, %v2520_v60, %v2524_v62  ;;  %v2530_v19 = vrot.slane %v2529_v15, 4 }
  0xc2   : > { %7582 = vmatprep.mubr.bf16.mxu1 %v6494_v55  ;;  %7659 = vmatpush3.bf16.msra.mxu1 %v7928_v9  ;;  %v2540_v55 = vshll.u32 %v6381_v28, 16  ;;  %v2539_v29 = vrot.slane %v2537_v45, 4  ;;  %v2550_v9 = vshrl.u32 %v9104_v56, 16  ;;  %v2558_v59 = vrot.slane %v2556_v50, 5  ;;  %v6452_v28 = vld [vmem:[%s8201_s12 + $0x84] sm:$0xe] }
  0xc3   : > { %10456 = vst [vmem:[#allocation10_spill] sm:$0xff] %v9119_v58  ;;  %7660 = vmatprep.subr.bf16.mxu1 %v7930_v36  ;;  %7610 = vmatprep.subr.bf16.mxu0 %v7927_v8  ;;  %v9126_v13 = vsel %vm8599_vm5, %v6466_v39, %v3148_v43  ;;  %v3150_v52 = vrot.slane %v3148_v43, 4  ;;  %v2535_v4 = vsel %vm8245_vm2, %v2530_v19, %v2534_v44  ;;  %v3158_v57 = vrot.slane %v9114_v7, 5 }
  0xc4   : > { %7531 = vmatmul.mubr.bf16.gmra.mxu0 %v8989_v34  ;;  %v2542_v30 = vrot.slane %v2540_v55, 5  ;;  %v2552_v3 = vrot.slane %v2550_v9, 4  ;;  %v9152_v14 = vcombine.low %v2525_v48, %v2535_v4  ;;  %v2561_v62 = vshrl.u32 %v6384_v33, 16  ;;  %v6389_v9 = vld [vmem:[%s8201_s12 + $0x98] sm:$0x1] }
  0xc5   : > { %v9139_v63 = vsel %vm8599_vm5, %v3150_v52, %v3151_v41  ;;  %7534 = vmatprep.mubr.bf16.mxu0 %v9017_v10  ;;  %7611 = vmatpush3.bf16.msra.mxu0 %v7927_v8  ;;  %v3155_v8 = vrot.slane %v9104_v56, 5  ;;  %v2574_v7 = vshrl.u32 %v6385_v5, 16  ;;  %v2572_v43 = vrot.slane %v2570_v51, 5  ;;  %v6388_v52 = vld [vmem:[%s8201_s12 + $0x94] sm:$0xf] }
  0xc6   : > { %7661 = vmatpush3.bf16.msra.mxu1 %v7930_v36  ;;  %v6498_v27 = vcombine.low %v9126_v13, %v9139_v63  ;;  %v7934_v36 = vld [vmem:[%s10413_s1 + $0x1d0] sm:$0xff]   ;;  %7612 = vmatprep.subr.bf16.mxu0 %v7929_v23  ;;  %10457 = vst [vmem:[#allocation11_spill] sm:$0xff] %v9152_v14  ;;  %v2543_v0 = vor.u32 %v2542_v30, %v2539_v29  ;;  %v2563_v24 = vrot.slane %v2561_v62, 4  ;;  %v2580_v60 = vshll.u32 %v9159_v21, 16 }
  0xc7   : > { %7662 = vmatprep.subr.bf16.mxu1 %v7932_v11  ;;  %v2553_v18 = vor.u32 %v2552_v3, %v2548_v35  ;;  %v9171_v46 = vsel %vm8599_vm5, %v6467_v49, %v3155_v8  ;;  %v3157_v37 = vrot.slane %v3155_v8, 4  ;;  %v2576_v45 = vrot.slane %v2574_v7, 4  ;;  %v6453_v49 = vld [vmem:[%s8201_s12 + $0x90] sm:$0xe]  ;;  %v6454_v7 = vld [vmem:[%s8201_s12 + $0x9c] sm:$0xe] }
  0xc8   : > { %v2544_v56 = vrot.slane %v2543_v0, 4  ;;  %v2582_v42 = vrot.slane %v2580_v60, 5  ;;  %v6468_v25 = vrot.slane %v6452_v28, 9  ;;  %v3165_v29 = vrot.slane %v9159_v21, 5  ;;  %v9233_v28 = vld [vmem:[%s8201_s12 + $0xa4] sm:$0x1] }
  0xc9   : > { %7583 = vmatmul.mubr.bf16.gmra.mxu1 %v6495_v61  ;;  %v7936_v61 = vld [vmem:[%s10413_s1 + $0x1c8] sm:$0xff]   ;;  %7613 = vmatpush3.bf16.msra.mxu0 %v7929_v23  ;;  %v2554_v17 = vrot.slane %v2553_v18, 4  ;;  %v9184_v39 = vsel %vm8599_vm5, %v3157_v37, %v3158_v57  ;;  %v2577_v19 = vor.u32 %v2576_v45, %v2572_v43  ;;  %v2585_v30 = vshrl.u32 %v6387_v26, 16 }
  0xca   : > { %7586 = vmatprep.mubr.bf16.mxu1 %v6496_v54  ;;  %7663 = vmatpush3.bf16.msra.mxu1 %v7932_v11  ;;  %v2566_v54 = vrot.slane %v2564_v1, 5  ;;  %v2549_v44 = vsel %vm8245_vm2, %v2544_v56, %v2548_v35  ;;  %v6499_v23 = vcombine.low %v9171_v46, %v9184_v39  ;;  %v3162_v11 = vrot.slane %v6385_v5, 5  ;;  %v7938_v35 = vld [vmem:[%s10413_s1 + $0x1c0] sm:$0xff]   ;;  %v7935_v5 = vld [vmem:[%s10413_s1 + $0x188] sm:$0xff]  }
  0xcb   : > { %7664 = vmatprep.subr.bf16.mxu1 %v7934_v36  ;;  %7614 = vmatprep.subr.bf16.mxu0 %v7931_v22  ;;  %v2559_v15 = vsel %vm8245_vm2, %v2554_v17, %v2558_v59  ;;  %v2588_v4 = vshll.u32 %v6387_v26, 16  ;;  %v2594_v3 = vshll.u32 %v6388_v52, 16  ;;  %v2578_v0 = vrot.slane %v2577_v19, 4 }
  0xcc   : > { %v2567_v41 = vor.u32 %v2566_v54, %v2563_v24  ;;  %7535 = vmatmul.mubr.bf16.gmra.mxu0 %v9042_v20  ;;  %v9193_v55 = vcombine.low %v2549_v44, %v2559_v15  ;;  %v9203_v50 = vsel %vm8599_vm5, %v6468_v25, %v3162_v11  ;;  %v3164_v33 = vrot.slane %v3162_v11, 4  ;;  %v9244_v15 = vld [vmem:[%s10413_s1 + $0x238] sm:$0xff]   ;;  %v6616_v20 = vld [vmem:[%s8201_s12 + $0x90] sm:$0xf] }
  0xcd   : > { %7538 = vmatprep.mubr.bf16.mxu0 %v9079_v6  ;;  %7615 = vmatpush3.bf16.msra.mxu0 %v7931_v22  ;;  %v2587_v59 = vrot.slane %v2585_v30, 4  ;;  %v2598_v8 = vshrl.u32 %v6388_v52, 16  ;;  %v6390_v22 = vld [vmem:[%s8201_s12 + $0x9c] sm:$0xf]  ;;  %v2590_v18 = vrot.slane %v2588_v4, 5  ;;  %v2596_v57 = vrot.slane %v2594_v3, 5 }
  0xce   : > { %10458 = vst [vmem:[#allocation12_spill] sm:$0xff] %v9193_v55  ;;  %7665 = vmatpush3.bf16.msra.mxu1 %v7934_v36  ;;  %v2568_v48 = vrot.slane %v2567_v41, 4  ;;  %7616 = vmatprep.subr.bf16.mxu0 %v7933_v47  ;;  %v3166_v21 = vsel %vm8599_vm5, %v3164_v33, %v3165_v29  ;;  %v2604_v62 = vshll.u32 %v6389_v9, 16  ;;  %v2583_v13 = vsel %vm8245_vm2, %v2578_v0, %v2582_v42  ;;  %v6393_v29 = vld [vmem:[%s8201_s12 + $0xa8] sm:$0xf] }
  0xcf   : > { %7666 = vmatprep.subr.bf16.mxu1 %v7936_v61  ;;  %v6500_v63 = vcombine.low %v9203_v50, %v3166_v21  ;;  %v6469_v1 = vrot.slane %v6453_v49, 9  ;;  %v2591_v37 = vor.u32 %v2590_v18, %v2587_v59  ;;  %v3169_v26 = vrot.slane %v6388_v52, 5  ;;  %v6395_v4 = vld [vmem:[%s8201_s12 + $0xb0] sm:$0x1] }
  0xd0   : > { %v2573_v36 = vsel %vm8245_vm2, %v2568_v48, %v2572_v43  ;;  %v2606_v51 = vrot.slane %v2604_v62, 5  ;;  %v3172_v17 = vrot.slane %v6389_v9, 5  ;;  %v2609_v24 = vshrl.u32 %v6390_v22, 16  ;;  %v6394_v9 = vld [vmem:[%s8201_s12 + $0xac] sm:$0xf] }
  0xd1   : > { %7587 = vmatmul.mubr.bf16.gmra.mxu1 %v6497_v40  ;;  %v9227_v40 = vld [vmem:[%s10414_s2 + $0x38] sm:$0xff]   ;;  %7617 = vmatpush3.bf16.msra.mxu0 %v7933_v47  ;;  %v9235_v56 = vcombine.low %v2573_v36, %v2583_v13  ;;  %v2612_v54 = vshll.u32 %v6390_v22, 16  ;;  %v2592_v44 = vrot.slane %v2591_v37, 4  ;;  %v3170_v47 = vsel %vm8599_vm5, %v6469_v1, %v3169_v26 }
  0xd2   : > { %7590 = vmatprep.mubr.bf16.mxu1 %v6498_v27  ;;  %7667 = vmatpush3.bf16.msra.mxu1 %v7936_v61  ;;  %v2600_v27 = vrot.slane %v2598_v8, 4  ;;  %v3171_v43 = vrot.slane %v3169_v26, 4  ;;  %v2618_v60 = vshll.u32 %v6391_v16, 16  ;;  %v2611_v45 = vrot.slane %v2609_v24, 4  ;;  %v6398_v24 = vld [vmem:[%s8201_s12 + $0xbc] sm:$0x1] }
  0xd3   : > { %7668 = vmatprep.subr.bf16.mxu1 %v7938_v35  ;;  %10459 = vst [vmem:[#allocation13_spill] sm:$0xff] %v9235_v56  ;;  %7618 = vmatprep.subr.bf16.mxu0 %v7935_v5  ;;  %v2614_v52 = vrot.slane %v2612_v54, 5  ;;  %v2622_v42 = vshrl.u32 %v6391_v16, 16  ;;  %v2597_v25 = vsel %vm8245_vm2, %v2592_v44, %v2596_v57  ;;  %v2628_v19 = vshll.u32 %v9233_v28, 16 }
  0xd4   : > { %v2601_v61 = vor.u32 %v2600_v27, %v2596_v57  ;;  %7539 = vmatmul.mubr.bf16.gmra.mxu0 %v9119_v58  ;;  %v3173_v11 = vsel %vm8599_vm5, %v3171_v43, %v3172_v17  ;;  %v2620_v48 = vrot.slane %v2618_v60, 5  ;;  %v3176_v36 = vrot.slane %v6391_v16, 5  ;;  %v6396_v57 = vld [vmem:[%s8201_s12 + $0xb4] sm:$0xf]  ;;  %v6397_v27 = vld [vmem:[%s8201_s12 + $0xb8] sm:$0xf] }
  0xd5   : > { %7542 = vmatprep.mubr.bf16.mxu0 %v9152_v14  ;;  %7619 = vmatpush3.bf16.msra.mxu0 %v7935_v5  ;;  %v2615_v50 = vor.u32 %v2614_v52, %v2611_v45  ;;  %v2624_v33 = vrot.slane %v2622_v42, 4  ;;  %v2630_v49 = vrot.slane %v2628_v19, 5  ;;  %v6470_v5 = vrot.slane %v6454_v7, 9 }
  0xd6   : > { %7669 = vmatpush3.bf16.msra.mxu1 %v7938_v35  ;;  %v2602_v41 = vrot.slane %v2601_v61, 4  ;;  %7620 = vmatprep.subr.bf16.mxu0 %v7937_v2  ;;  %v6501_v35 = vcombine.low %v3170_v47, %v3173_v11  ;;  %v3179_v46 = vrot.slane %v9233_v28, 5  ;;  %v2633_v39 = vshrl.u32 %v6393_v29, 16 }
  0xd7   : > { %7750 = vmatprep.subr.bf16.mxu1 %v9227_v40  ;;  %v2616_v0 = vrot.slane %v2615_v50, 4  ;;  %v2625_v59 = vor.u32 %v2624_v33, %v2620_v48  ;;  %v3177_v8 = vsel %vm8599_vm5, %v6470_v5, %v3176_v36  ;;  %v3178_v22 = vrot.slane %v3176_v36, 4  ;;  %v6456_v50 = vld [vmem:[%s8201_s12 + $0xb4] sm:$0xe] }
  0xd8   : > { %v2607_v30 = vsel %vm8245_vm2, %v2602_v41, %v2606_v51  ;;  %v2636_v21 = vshll.u32 %v6393_v29, 16  ;;  %v2642_v18 = vshll.u32 %v6394_v9, 16  ;;  %v2635_v13 = vrot.slane %v2633_v39, 4 }
  0xd9   : > { %7591 = vmatmul.mubr.bf16.gmra.mxu1 %v6499_v23  ;;  %v9261_v3 = vcombine.low %v2597_v25, %v2607_v30  ;;  %v6455_v23 = vld [vmem:[%s8201_s12 + $0xa8] sm:$0xe]  ;;  %7621 = vmatpush3.bf16.msra.mxu0 %v7937_v2  ;;  %v2621_v62 = vsel %vm8245_vm2, %v2616_v0, %v2620_v48  ;;  %v2626_v16 = vrot.slane %v2625_v59, 4  ;;  %v3180_v2 = vsel %vm8599_vm5, %v3178_v22, %v3179_v46  ;;  %v6400_v46 = vld [vmem:[%s8201_s12 + $0xc4] sm:$0xf] }
  0xda   : > { %7594 = vmatprep.mubr.bf16.mxu1 %v6500_v63  ;;  %7702 = vmatprep.subr.bf16.mxu0 %v9244_v15  ;;  %v2646_v63 = vshrl.u32 %v6394_v9, 16  ;;  %v2638_v1 = vrot.slane %v2636_v21, 5  ;;  %v2644_v28 = vrot.slane %v2642_v18, 5  ;;  %v2652_v37 = vshll.u32 %v6395_v4, 16  ;;  %v6401_v21 = vld [vmem:[%s8201_s12 + $0xc8] sm:$0x1] }
  0xdb   : > { %10460 = vst [vmem:[#allocation14_spill] sm:$0xff] %v9261_v3  ;;  %v2631_v51 = vsel %vm8245_vm2, %v2626_v16, %v2630_v49  ;;  %v6502_v26 = vcombine.low %v3177_v8, %v3180_v2  ;;  %v6471_v17 = vrot.slane %v6455_v23, 9  ;;  %v3183_v47 = vrot.slane %v6394_v9, 5  ;;  %v6399_v49 = vld [vmem:[%s8201_s12 + $0xc0] sm:$0xf] }
  0xdc   : > { %7543 = vmatmul.mubr.bf16.gmra.mxu0 %v9193_v55  ;;  %v2648_v61 = vrot.slane %v2646_v63, 4  ;;  %v9279_v54 = vcombine.low %v2621_v62, %v2631_v51  ;;  %v2639_v7 = vor.u32 %v2638_v1, %v2635_v13  ;;  %v2654_v44 = vrot.slane %v2652_v37, 5  ;;  %v6457_v13 = vld [vmem:[%s8201_s12 + $0xc0] sm:$0xe]  ;;  %v6586_v37 = vld [vmem:[%s8201_s12 + $0x18] sm:$0xf] }
  0xdd   : > { %7546 = vmatprep.mubr.bf16.mxu0 %v9235_v56  ;;  %v3186_v60 = vrot.slane %v6395_v4, 5  ;;  %v2657_v41 = vshrl.u32 %v6396_v57, 16  ;;  %v2660_v45 = vshll.u32 %v6396_v57, 16  ;;  %v3184_v42 = vsel %vm8599_vm5, %v6471_v17, %v3183_v47  ;;  %v6587_v17 = vld [vmem:[%s8201_s12 + $0x1c] sm:$0xf] }
  0xde   : > { %10461 = vst [vmem:[#allocation15_spill] sm:$0xff] %v9279_v54  ;;  %v2649_v43 = vor.u32 %v2648_v61, %v2644_v28  ;;  %v2640_v52 = vrot.slane %v2639_v7, 4  ;;  %v3185_v25 = vrot.slane %v3183_v47, 4  ;;  %v2666_v11 = vshll.u32 %v6397_v27, 16 }
  0xdf   : > { %v2659_v19 = vrot.slane %v2657_v41, 4  ;;  %v2662_v29 = vrot.slane %v2660_v45, 5  ;;  %v2670_v30 = vshrl.u32 %v6397_v27, 16  ;;  %v2676_v4 = vshll.u32 %v6398_v24, 16 }
  0xe0   : > { %v2650_v48 = vrot.slane %v2649_v43, 4  ;;  %v2645_v9 = vsel %vm8245_vm2, %v2640_v52, %v2644_v28  ;;  %v2668_v33 = vrot.slane %v2666_v11, 5  ;;  %v6472_v8 = vrot.slane %v6456_v50, 9 }
  0xe1   : > { %7595 = vmatmul.mubr.bf16.gmra.mxu1 %v6501_v35  ;;  %v3187_v35 = vsel %vm8599_vm5, %v3185_v25, %v3186_v60  ;;  %v2663_v0 = vor.u32 %v2662_v29, %v2659_v19  ;;  %v2672_v59 = vrot.slane %v2670_v30, 4  ;;  %v2678_v23 = vrot.slane %v2676_v4, 5  ;;  %v6588_v29 = vld [vmem:[%s8201_s12 + $0x20] sm:$0x1] }
  0xe2   : > { %7598 = vmatprep.mubr.bf16.mxu1 %v6502_v26  ;;  %v2655_v5 = vsel %vm8245_vm2, %v2650_v48, %v2654_v44  ;;  %v6503_v36 = vcombine.low %v3184_v42, %v3187_v35  ;;  %v3190_v22 = vrot.slane %v6397_v27, 5  ;;  %v3193_v62 = vrot.slane %v6398_v24, 5 }
  0xe3   : > { %v9293_v39 = vcombine.low %v2645_v9, %v2655_v5  ;;  %v2664_v18 = vrot.slane %v2663_v0, 4  ;;  %v2673_v57 = vor.u32 %v2672_v59, %v2668_v33  ;;  %v2681_v16 = vshrl.u32 %v6399_v49, 16 }
  0xe4   : > { %7547 = vmatmul.mubr.bf16.gmra.mxu0 %v9261_v3  ;;  %v3191_v63 = vsel %vm8599_vm5, %v6472_v8, %v3190_v22  ;;  %v3192_v2 = vrot.slane %v3190_v22, 4  ;;  %v2684_v1 = vshll.u32 %v6399_v49, 16  ;;  %v2690_v28 = vshll.u32 %v6400_v46, 16  ;;  %v6589_v49 = vld [vmem:[%s8201_s12 + $0x24] sm:$0xf] }
  0xe5   : > { %10462 = vst [vmem:[#allocation16_spill] sm:$0xff] %v9293_v39  ;;  %7550 = vmatprep.mubr.bf16.mxu0 %v9279_v54  ;;  %v2669_v27 = vsel %vm8245_vm2, %v2664_v18, %v2668_v33  ;;  %v2674_v51 = vrot.slane %v2673_v57, 4  ;;  %v2683_v26 = vrot.slane %v2681_v16, 4  ;;  %v2694_v61 = vshrl.u32 %v6400_v46, 16 }
  0xe6   : > { %v3194_v24 = vsel %vm8599_vm5, %v3192_v2, %v3193_v62  ;;  %v2686_v7 = vrot.slane %v2684_v1, 5  ;;  %v2692_v44 = vrot.slane %v2690_v28, 5  ;;  %v2700_v47 = vshll.u32 %v6401_v21, 16 }
  0xe7   : > { %v2679_v43 = vsel %vm8245_vm2, %v2674_v51, %v2678_v23  ;;  %v6504_v60 = vcombine.low %v3191_v63, %v3194_v24  ;;  %v2696_v41 = vrot.slane %v2694_v61, 4  ;;  %v6473_v45 = vrot.slane %v6457_v13, 9  ;;  %v9326_v13 = vld [vmem:[%s8201_s12 + $0x2c] sm:$0x1]  ;;  %v6592_v63 = vld [vmem:[%s8201_s12 + $0x30] sm:$0xf] }
  0xe8   : > { %v9308_v52 = vcombine.low %v2669_v27, %v2679_v43  ;;  %v2687_v42 = vor.u32 %v2686_v7, %v2683_v26  ;;  %v2702_v25 = vrot.slane %v2700_v47, 5  ;;  %v3197_v11 = vrot.slane %v6400_v46, 5  ;;  %v6593_v27 = vld [vmem:[%s8201_s12 + $0x34] sm:$0xf]  ;;  %v7939_v51 = vld [vmem:[%s8201_s12 + $0x18] sm:$0xff]  }
  0xe9   : > { %7599 = vmatmul.mubr.bf16.gmra.mxu1 %v6503_v36  ;;  %v2697_v48 = vor.u32 %v2696_v41, %v2692_v44  ;;  %v3200_v19 = vrot.slane %v6401_v21, 5  ;;  %v3960_v30 = vshrl.u32 %v6586_v37, 16  ;;  %v3963_v50 = vshll.u32 %v6586_v37, 16  ;;  %v9321_v21 = vld [vmem:[%s8201_s12 + $0x28] sm:$0xf] }
  0xea   : > { %10463 = vst [vmem:[#allocation17_spill] sm:$0xff] %v9308_v52  ;;  %7602 = vmatprep.mubr.bf16.mxu1 %v6504_v60  ;;  %v2688_v9 = vrot.slane %v2687_v42, 4  ;;  %v3198_v35 = vsel %vm8599_vm5, %v6473_v45, %v3197_v11  ;;  %v3199_v33 = vrot.slane %v3197_v11, 4  ;;  %v3969_v4 = vshll.u32 %v6587_v17, 16  ;;  %v6594_v43 = vld [vmem:[%s8201_s12 + $0x38] sm:$0x1] }
  0xeb   : > { %v2698_v5 = vrot.slane %v2697_v48, 4  ;;  %v3962_v36 = vrot.slane %v3960_v30, 4  ;;  %v3965_v0 = vrot.slane %v3963_v50, 5  ;;  %v3973_v59 = vshrl.u32 %v6587_v17, 16 }
  0xec   : > { %7551 = vmatmul.mubr.bf16.gmra.mxu0 %v9293_v39  ;;  %v2693_v46 = vsel %vm8245_vm2, %v2688_v9, %v2692_v44  ;;  %v3201_v23 = vsel %vm8599_vm5, %v3199_v33, %v3200_v19  ;;  %v3971_v8 = vrot.slane %v3969_v4, 5  ;;  %v3979_v22 = vshll.u32 %v6588_v29, 16  ;;  %v7952_v39 = vld [vmem:[%s8201_s12 + $0x6c] sm:$0xff]  }
  0xed   : > { %7554 = vmatprep.mubr.bf16.mxu0 %v9308_v52  ;;  %v2703_v18 = vsel %vm8245_vm2, %v2698_v5, %v2702_v25  ;;  %v6505_v57 = vcombine.low %v3198_v35, %v3201_v23  ;;  %v3966_v62 = vor.u32 %v3965_v0, %v3962_v36  ;;  %v3975_v16 = vrot.slane %v3973_v59, 4  ;;  %v6595_v35 = vld [vmem:[%s8201_s12 + $0x3c] sm:$0xf] }
  0xee   : > { %v9329_v2 = vcombine.low %v2693_v46, %v2703_v18  ;;  %v3981_v1 = vrot.slane %v3979_v22, 5  ;;  %v3984_v28 = vshrl.u32 %v6589_v49, 16  ;;  %v3987_v37 = vshll.u32 %v6589_v49, 16  ;;  %v7940_v49 = vld [vmem:[%s8201_s12 + $0x24] sm:$0xff]   ;;  %v6596_v18 = vld [vmem:[%s8201_s12 + $0x40] sm:$0xf] }
  0xef   : > { %v3967_v26 = vrot.slane %v3966_v62, 4  ;;  %v3976_v61 = vor.u32 %v3975_v16, %v3971_v8  ;;  %v3993_v17 = vshll.u32 %v9321_v21, 16  ;;  %v3997_v24 = vshrl.u32 %v9321_v21, 16 }
  0xf0   : > { %10464 = vst [vmem:[#allocation18_spill] sm:$0xff] %v9329_v2  ;;  %v3986_v7 = vrot.slane %v3984_v28, 4  ;;  %v3989_v44 = vrot.slane %v3987_v37, 5  ;;  %v4003_v47 = vshll.u32 %v9326_v13, 16  ;;  %v4008_v19 = vshrl.u32 %v6592_v63, 16 }
  0xf1   : > { %7603 = vmatmul.mubr.bf16.gmra.mxu1 %v6505_v57  ;;  %v3972_v60 = vsel %vm8245_vm2, %v3967_v26, %v3971_v8  ;;  %v3977_v41 = vrot.slane %v3976_v61, 4  ;;  %v3995_v45 = vrot.slane %v3993_v17, 5  ;;  %v3999_v42 = vrot.slane %v3997_v24, 4  ;;  %v9354_v61 = vld [vmem:[%s8201_s12 + $0x44] sm:$0x1]  ;;  %v7945_v24 = vld [vmem:[%s10413_s1 + $0x230] sm:$0xff]  }
  0xf2   : > { %v3990_v25 = vor.u32 %v3989_v44, %v3986_v7  ;;  %v4005_v11 = vrot.slane %v4003_v47, 5  ;;  %v4011_v50 = vshll.u32 %v6592_v63, 16  ;;  %v4017_v9 = vshll.u32 %v6593_v27, 16 }
  0xf3   : > { %v3982_v29 = vsel %vm8245_vm2, %v3977_v41, %v3981_v1  ;;  %v4000_v30 = vor.u32 %v3999_v42, %v3995_v45  ;;  %v4010_v36 = vrot.slane %v4008_v19, 4  ;;  %v4021_v0 = vshrl.u32 %v6593_v27, 16  ;;  %v7943_v27 = vld [vmem:[%s8201_s12 + $0x30] sm:$0xff]  }
  0xf4   : > { %7555 = vmatmul.mubr.bf16.gmra.mxu0 %v9329_v2  ;;  %v6650_v33 = vcombine.low %v3972_v60, %v3982_v29  ;;  %v3991_v5 = vrot.slane %v3990_v25, 4  ;;  %v4013_v23 = vrot.slane %v4011_v50, 5  ;;  %v4019_v8 = vrot.slane %v4017_v9, 5  ;;  %v7946_v41 = vld [vmem:[%s10414_s2 + $0x30] sm:$0xff]  }
  0xf5   : > { %7622 = vmatprep.mubr.bf16.mxu0 %v7939_v51  ;;  %v4001_v46 = vrot.slane %v4000_v30, 4  ;;  %v4027_v22 = vshll.u32 %v6594_v43, 16  ;;  %v4023_v63 = vrot.slane %v4021_v0, 4  ;;  %v4032_v1 = vshrl.u32 %v6595_v35, 16  ;;  %v9366_v30 = vld [vmem:[%s8201_s12 + $0x4c] sm:$0xf] }
  0xf6   : > { %7670 = vmatprep.mubr.bf16.mxu1 %v6650_v33  ;;  %v3996_v62 = vsel %vm8245_vm2, %v3991_v5, %v3995_v45  ;;  %v4014_v51 = vor.u32 %v4013_v23, %v4010_v36  ;;  %v4035_v17 = vshll.u32 %v6595_v35, 16  ;;  %v6598_v45 = vld [vmem:[%s8201_s12 + $0x48] sm:$0xf]  ;;  %v4041_v19 = vshll.u32 %v6596_v18, 16 }
  0xf7   : > { %v4006_v28 = vsel %vm8245_vm2, %v4001_v46, %v4005_v11  ;;  %v4029_v26 = vrot.slane %v4027_v22, 5  ;;  %v4024_v43 = vor.u32 %v4023_v63, %v4019_v8  ;;  %v4034_v60 = vrot.slane %v4032_v1, 4  ;;  %v9375_v5 = vld [vmem:[%s10413_s1 + $0x228] sm:$0xff]  }
  0xf8   : > { %v7336_v4 = vpop.f32.mrf.mxu0  ;;  %v6651_v7 = vcombine.low %v3996_v62, %v4006_v28  ;;  %v4015_v25 = vrot.slane %v4014_v51, 4  ;;  %v4037_v11 = vrot.slane %v4035_v17, 5  ;;  %v4045_v29 = vshrl.u32 %v6596_v18, 16  ;;  %v6601_v51 = vld [vmem:[%s8201_s12 + $0x54] sm:$0xf] }
  0xf9   : > { %v7384_v59 = vpop.f32.mrf.mxu1  ;;  %v4025_v33 = vrot.slane %v4024_v43, 4  ;;  %v4056_v62 = vshrl.u32 %v6598_v45, 16  ;;  %v4065_v43 = vshll.u32 %v9366_v30, 16 }
  0xfa   : > { %v9346_v57 = vadd.f32 %v7384_v59, %v7336_v4  ;;  %v968_v16 = vpop.f32.mrf.mxu0  ;;  %7671 = vmatmul.mubr.bf16.vlgmr.msra.gmra.mxu1 %v6651_v7  ;;  %v4051_v4 = vshll.u32 %v9354_v61, 16  ;;  %v4020_v36 = vsel %vm8245_vm2, %v4015_v25, %v4019_v8  ;;  %v4038_v0 = vor.u32 %v4037_v11, %v4034_v60  ;;  %v7944_v8 = vld [vmem:[%s8201_s12 + $0x3c] sm:$0xff]   ;;  %v7947_v7 = vld [vmem:[%s8201_s12 + $0x48] sm:$0xff]  }
  0xfb   : > { %v1273_v37 = vpop.f32.mrf.mxu1  ;;  %7751 = vmatpush3.bf16.msra.mxu1 %v9227_v40  ;;  %v4043_v59 = vrot.slane %v4041_v19, 5  ;;  %v4047_v46 = vrot.slane %v4045_v29, 4  ;;  %v4030_v22 = vsel %vm8245_vm2, %v4025_v33, %v4029_v26  ;;  %v9386_v40 = vld [vmem:[%s8201_s12 + $0x50] sm:$0x1]  ;;  %v4069_v60 = vshrl.u32 %v9366_v30, 16  ;;  %v7953_v29 = vld [vmem:[%s10413_s1 + $0x220] sm:$0xff]  }
  0xfc   : > { %v9359_v44 = vadd.f32 %v1273_v37, %v968_v16  ;;  %v7337_v47 = vpop.f32.mrf.mxu0  ;;  %7623 = vmatmul.mubr.bf16.vlgmr.msra.gmra.mxu0 %v7940_v49  ;;  %v6652_v16 = vcombine.low %v4020_v36, %v4030_v22  ;;  %v4039_v1 = vrot.slane %v4038_v0, 4  ;;  %7752 = vmatprep.subr.bf16.mxu1 %v7946_v41  ;;  %v4059_v37 = vshll.u32 %v6598_v45, 16  ;;  %v9407_v36 = vld [vmem:[%s8201_s12 + $0x58] sm:$0xf] }
  0xfd   : > { %v7385_v42 = vpop.f32.mrf.mxu1  ;;  %7703 = vmatpush3.bf16.msra.mxu0 %v9244_v15  ;;  %7626 = vmatprep.mubr.bf16.mxu0 %v7943_v27  ;;  %v4053_v15 = vrot.slane %v4051_v4, 5  ;;  %v4048_v28 = vor.u32 %v4047_v46, %v4043_v59  ;;  %v7950_v27 = vld [vmem:[%s10414_s2 + $0x28] sm:$0xff]   ;;  %v4075_v19 = vshll.u32 %v9386_v40, 16  ;;  %v4067_v4 = vrot.slane %v4065_v43, 5 }
  0xfe   : > { %v9369_v9 = vadd.f32 %v7385_v42, %v7337_v47  ;;  %v971_v35 = vpop.f32.mrf.mxu0  ;;  %7704 = vmatprep.subr.bf16.mxu0 %v7945_v24  ;;  %v4058_v47 = vrot.slane %v4056_v62, 4  ;;  %7674 = vmatprep.mubr.bf16.mxu1 %v6652_v16  ;;  %v4044_v42 = vsel %vm8245_vm2, %v4039_v1, %v4043_v59  ;;  %v4061_v11 = vrot.slane %v4059_v37, 5  ;;  %v6604_v16 = vld [vmem:[%s8201_s12 + $0x60] sm:$0xf] }
  0xff   : > { %v1276_v49 = vpop.f32.mrf.mxu1  ;;  %v4049_v45 = vrot.slane %v4048_v28, 4  ;;  %7753 = vmatpush3.bf16.msra.mxu1 %v7946_v41  ;;  %v4080_v0 = vshrl.u32 %v6601_v51, 16  ;;  %v9418_v41 = vld [vmem:[%s8201_s12 + $0x5c] sm:$0x1]  ;;  %v4083_v62 = vshll.u32 %v6601_v51, 16 }
 0x100   : > { %v9381_v23 = vadd.f32 %v1276_v49, %v971_v35  ;;  %v7340_v18 = vpop.f32.mrf.mxu0  ;;  %v4071_v49 = vrot.slane %v4069_v60, 4  ;;  %v4062_v22 = vor.u32 %v4061_v11, %v4058_v47  ;;  %7754 = vmatprep.subr.bf16.mxu1 %v7950_v27  ;;  %v4089_v60 = vshll.u32 %v9407_v36, 16 }
 0x101   : > { %v7388_v63 = vpop.f32.mrf.mxu1  ;;  %7705 = vmatpush3.bf16.msra.mxu0 %v7945_v24  ;;  %v9413_v24 = vld [vmem:[%s10414_s2 + $0x20] sm:$0xff]   ;;  %v4054_v59 = vsel %vm8245_vm2, %v4049_v45, %v4053_v15  ;;  %v9426_v15 = vld [vmem:[%s10413_s1 + $0x218] sm:$0xff]   ;;  %v4085_v51 = vrot.slane %v4083_v62, 5  ;;  %v4099_v11 = vshll.u32 %v9418_v41, 16  ;;  %v9443_v62 = vld [vmem:[%s8201_s12 + $0x68] sm:$0x1] }
 0x102   : > { %v9393_v26 = vadd.f32 %v7388_v63, %v7340_v18  ;;  %v984_v17 = vpop.f32.mrf.mxu0  ;;  %7706 = vmatprep.subr.bf16.mxu0 %v9375_v5  ;;  %v4077_v18 = vrot.slane %v4075_v19, 5  ;;  %v6653_v63 = vcombine.low %v4044_v42, %v4054_v59  ;;  %v4072_v37 = vor.u32 %v4071_v49, %v4067_v4  ;;  %v9436_v19 = vld [vmem:[%s8201_s12 + $0x64] sm:$0xf] }
 0x103   : > { %v1289_v25 = vpop.f32.mrf.mxu1  ;;  %v4063_v43 = vrot.slane %v4062_v22, 4  ;;  %7755 = vmatpush3.bf16.msra.mxu1 %v7950_v27  ;;  %v4101_v22 = vrot.slane %v4099_v11, 5  ;;  %v4113_v11 = vshll.u32 %v9436_v19, 16 }
 0x104   : > { %v9404_v35 = vadd.f32 %v1289_v25, %v984_v17  ;;  %v7341_v33 = vpop.f32.mrf.mxu0  ;;  %7627 = vmatmul.mubr.bf16.gmra.mxu0 %v7944_v8  ;;  %v4082_v17 = vrot.slane %v4080_v0, 4  ;;  %v4093_v8 = vshrl.u32 %v9407_v36, 16  ;;  %7675 = vmatmul.mubr.bf16.gmra.mxu1 %v6653_v63  ;;  %v4073_v45 = vrot.slane %v4072_v37, 4  ;;  %v7948_v25 = vld [vmem:[%s8201_s12 + $0x54] sm:$0xff]  }
 0x105   : > { %v7389_v46 = vpop.f32.mrf.mxu1  ;;  %7630 = vmatprep.mubr.bf16.mxu0 %v7947_v7  ;;  %7707 = vmatpush3.bf16.msra.mxu0 %v9375_v5  ;;  %v4068_v7 = vsel %vm8245_vm2, %v4063_v43, %v4067_v4  ;;  %v4091_v0 = vrot.slane %v4089_v60, 5  ;;  %v4104_v63 = vshrl.u32 %v6604_v16, 16  ;;  %v7958_v4 = vld [vmem:[%s10414_s2 + $0x18] sm:$0xff]   ;;  %v4115_v48 = vrot.slane %v4113_v11, 5 }
 0x106   : > { %v9421_v1 = vadd.f32 %v7389_v46, %v7341_v33  ;;  %v987_v28 = vpop.f32.mrf.mxu0  ;;  %7708 = vmatprep.subr.bf16.mxu0 %v7953_v29  ;;  %v4086_v49 = vor.u32 %v4085_v51, %v4082_v17  ;;  %v4095_v59 = vrot.slane %v4093_v8, 4  ;;  %v4078_v5 = vsel %vm8245_vm2, %v4073_v45, %v4077_v18  ;;  %7756 = vmatprep.subr.bf16.mxu1 %v9413_v24  ;;  %v7951_v51 = vld [vmem:[%s8201_s12 + $0x60] sm:$0xff]   ;;  %v6607_v18 = vld [vmem:[%s8201_s12 + $0x6c] sm:$0xf] }
 0x107   : > { %v1292_v47 = vpop.f32.mrf.mxu1  ;;  %v6654_v37 = vcombine.low %v4068_v7, %v4078_v5  ;;  %v4106_v8 = vrot.slane %v4104_v63, 4  ;;  %v4117_v7 = vshrl.u32 %v9436_v19, 16  ;;  %v9470_v63 = vld [vmem:[%s8201_s12 + $0x70] sm:$0xf]  ;;  %7757 = vmatpush3.bf16.msra.mxu1 %v9413_v24 }
 0x108   : > { %v9431_v42 = vadd.f32 %v1292_v47, %v987_v28  ;;  %v7344_v46 = vpop.f32.mrf.mxu0  ;;  %v4107_v28 = vshll.u32 %v6604_v16, 16  ;;  %v4087_v47 = vrot.slane %v4086_v49, 4  ;;  %v4096_v27 = vor.u32 %v4095_v59, %v4091_v0  ;;  %v7961_v16 = vld [vmem:[%s10413_s1 + $0x210] sm:$0xff]   ;;  %7758 = vmatprep.subr.bf16.mxu1 %v7958_v4 }
 0x109   : > { %v7392_v33 = vpop.f32.mrf.mxu1  ;;  %7709 = vmatpush3.bf16.msra.mxu0 %v7953_v29  ;;  %7678 = vmatprep.mubr.bf16.mxu1 %v6654_v37  ;;  %v4119_v2 = vrot.slane %v4117_v7, 4  ;;  %v9474_v37 = vld [vmem:[%s8201_s12 + $0x74] sm:$0x1] }
 0x10a   : > { %v9449_v17 = vadd.f32 %v7392_v33, %v7344_v46  ;;  %v1000_v60 = vpop.f32.mrf.mxu0  ;;  %v4109_v45 = vrot.slane %v4107_v28, 5  ;;  %7710 = vmatprep.subr.bf16.mxu0 %v9426_v15  ;;  %v9462_v33 = vld [vmem:[%s10414_s2 + $0x10] sm:$0xff]   ;;  %v4092_v29 = vsel %vm8245_vm2, %v4087_v47, %v4091_v0  ;;  %v4097_v49 = vrot.slane %v4096_v27, 4  ;;  %v9479_v47 = vld [vmem:[%s10413_s1 + $0x208] sm:$0xff]  }
 0x10b   : > { %v1305_v43 = vpop.f32.mrf.mxu1  ;;  %v4123_v46 = vshll.u32 %v9443_v62, 16  ;;  %v4128_v0 = vshrl.u32 %v6607_v18, 16  ;;  %v4120_v52 = vor.u32 %v4119_v2, %v4115_v48  ;;  %7759 = vmatpush3.bf16.msra.mxu1 %v7958_v4 }
 0x10c   : > { %v9466_v59 = vadd.f32 %v1305_v43, %v1000_v60  ;;  %7631 = vmatmul.mubr.bf16.gmra.mxu0 %v7948_v25  ;;  %v7345_v28 = vpop.f32.mrf.mxu0  ;;  %v4110_v50 = vor.u32 %v4109_v45, %v4106_v8  ;;  %v4102_v27 = vsel %vm8245_vm2, %v4097_v49, %v4101_v22  ;;  %v4131_v60 = vshll.u32 %v6607_v18, 16  ;;  %v6610_v8 = vld [vmem:[%s8201_s12 + $0x78] sm:$0xf]  ;;  %7760 = vmatprep.subr.bf16.mxu1 %v9462_v33 }
 0x10d   : > { %v7393_v5 = vpop.f32.mrf.mxu1  ;;  %7634 = vmatprep.mubr.bf16.mxu0 %v7951_v51  ;;  %v4125_v43 = vrot.slane %v4123_v46, 5  ;;  %7711 = vmatpush3.bf16.msra.mxu0 %v9426_v15  ;;  %v6655_v45 = vcombine.low %v4092_v29, %v4102_v27  ;;  %v4130_v54 = vrot.slane %v4128_v0, 4  ;;  %v4141_v51 = vshrl.u32 %v9470_v63, 16  ;;  %v7955_v18 = vld [vmem:[%s8201_s12 + $0x78] sm:$0xff]  }
 0x10e   : > { %v9483_v24 = vadd.f32 %v7393_v5, %v7345_v28  ;;  %v1003_v11 = vpop.f32.mrf.mxu0  ;;  %v4111_v7 = vrot.slane %v4110_v50, 4  ;;  %7712 = vmatprep.subr.bf16.mxu0 %v7961_v16  ;;  %v4133_v49 = vrot.slane %v4131_v60, 5  ;;  %v4137_v5 = vshll.u32 %v9470_v63, 16  ;;  %v7966_v28 = vld [vmem:[%s10414_s2 + $0x8] sm:$0xff]  }
 0x10f   : > { %v1308_v25 = vpop.f32.mrf.mxu1  ;;  %7679 = vmatmul.mubr.bf16.gmra.mxu1 %v6655_v45  ;;  %v4121_v50 = vrot.slane %v4120_v52, 4  ;;  %v4147_v46 = vshll.u32 %v9474_v37, 16  ;;  %v9504_v45 = vld [vmem:[%s8201_s12 + $0x7c] sm:$0xf]  ;;  %v4152_v15 = vshrl.u32 %v6610_v8, 16  ;;  %v4155_v56 = vshll.u32 %v6610_v8, 16 }
 0x110   : > { %v9488_v3 = vadd.f32 %v1308_v25, %v1003_v11  ;;  %v4116_v2 = vsel %vm8245_vm2, %v4111_v7, %v4115_v48  ;;  %v7348_v29 = vpop.f32.mrf.mxu0  ;;  %v4134_v4 = vor.u32 %v4133_v49, %v4130_v54  ;;  %v4139_v27 = vrot.slane %v4137_v5, 5  ;;  %v9509_v7 = vld [vmem:[%s8201_s12 + $0x80] sm:$0x1]  ;;  %7761 = vmatpush3.bf16.msra.mxu1 %v9462_v33 }
 0x111   : > { %v7396_v22 = vpop.f32.mrf.mxu1  ;;  %v4143_v25 = vrot.slane %v4141_v51, 4  ;;  %7713 = vmatpush3.bf16.msra.mxu0 %v7961_v16  ;;  %v4126_v52 = vsel %vm8245_vm2, %v4121_v50, %v4125_v43  ;;  %v4149_v48 = vrot.slane %v4147_v46, 5  ;;  %v7969_v54 = vld [vmem:[%s10413_s1 + $0x200] sm:$0xff]   ;;  %v4154_v50 = vrot.slane %v4152_v15, 4  ;;  %7762 = vmatprep.subr.bf16.mxu1 %v7966_v28  ;;  %v9533_v15 = vld [vmem:[%s8201_s12 + $0x8c] sm:$0x1] }
 0x112   : > { %v9501_v0 = vadd.f32 %v7396_v22, %v7348_v29  ;;  %v1016_v11 = vpop.f32.mrf.mxu0  ;;  %7714 = vmatprep.subr.bf16.mxu0 %v9479_v47  ;;  %v6656_v22 = vcombine.low %v4116_v2, %v4126_v52  ;;  %v4135_v49 = vrot.slane %v4134_v4, 4  ;;  %v6613_v29 = vld [vmem:[%s8201_s12 + $0x84] sm:$0xf]  ;;  %v4157_v46 = vrot.slane %v4155_v56, 5  ;;  %v9530_v56 = vld [vmem:[%s8201_s12 + $0x88] sm:$0xf] }
 0x113   : > { %v1321_v60 = vpop.f32.mrf.mxu1  ;;  %v4144_v5 = vor.u32 %v4143_v25, %v4139_v27  ;;  %v7970_v43 = vld [vmem:[%s10414_s2] sm:$0xff]   ;;  %v4161_v2 = vshll.u32 %v9504_v45, 16  ;;  %v4165_v4 = vshrl.u32 %v9504_v45, 16  ;;  %10468 = vst [vmem:[#allocation22_spill] sm:$0xff] %v9533_v15  ;;  %v4176_v6 = vshrl.u32 %v6613_v29, 16 }
 0x114   : > { %10465 = vst [vmem:[#allocation19_spill] sm:$0xff] %v9501_v0  ;;  %v9515_v51 = vadd.f32 %v1321_v60, %v1016_v11  ;;  %7635 = vmatmul.mubr.bf16.gmra.mxu0 %v7952_v39  ;;  %v7349_v8 = vpop.f32.mrf.mxu0  ;;  %7682 = vmatprep.mubr.bf16.mxu1 %v6656_v22  ;;  %v4140_v33 = vsel %vm8245_vm2, %v4135_v49, %v4139_v27  ;;  %v4171_v39 = vshll.u32 %v9509_v7, 16  ;;  %v7956_v22 = vld [vmem:[%s8201_s12 + $0x84] sm:$0xff]  }
 0x115   : > { %v7397_v16 = vpop.f32.mrf.mxu1  ;;  %v4145_v25 = vrot.slane %v4144_v5, 4  ;;  %7638 = vmatprep.mubr.bf16.mxu0 %v7955_v18  ;;  %v4158_v55 = vor.u32 %v4157_v46, %v4154_v50  ;;  %v4163_v14 = vrot.slane %v4161_v2, 5  ;;  %v4167_v58 = vrot.slane %v4165_v4, 4  ;;  %7715 = vmatpush3.bf16.msra.mxu0 %v9479_v47 }
 0x116   : > { %10466 = vst [vmem:[#allocation20_spill] sm:$0xff] %v9515_v51  ;;  %v9526_v60 = vadd.f32 %v7397_v16, %v7349_v8  ;;  %v1019_v11 = vpop.f32.mrf.mxu0  ;;  %v4173_v49 = vrot.slane %v4171_v39, 5  ;;  %v4179_v16 = vshll.u32 %v6613_v29, 16  ;;  %v7959_v8 = vld [vmem:[%s8201_s12 + $0x90] sm:$0xff]   ;;  %7763 = vmatpush3.bf16.msra.mxu1 %v7966_v28  ;;  %7716 = vmatprep.subr.bf16.mxu0 %v7969_v54  ;;  %v4178_v2 = vrot.slane %v4176_v6, 4 }
 0x117   : > { %v1324_v52 = vpop.f32.mrf.mxu1  ;;  %v4150_v27 = vsel %vm8245_vm2, %v4145_v25, %v4149_v48  ;;  %v4159_v50 = vrot.slane %v4158_v55, 4  ;;  %v4168_v46 = vor.u32 %v4167_v58, %v4163_v14  ;;  %7764 = vmatprep.subr.bf16.mxu1 %v7970_v43  ;;  %v4185_v51 = vshll.u32 %v9530_v56, 16 }
 0x118   : > { %10467 = vst [vmem:[#allocation21_spill] sm:$0xff] %v9526_v60  ;;  %v9540_v18 = vadd.f32 %v1324_v52, %v1019_v11  ;;  %v6657_v60 = vcombine.low %v4140_v33, %v4150_v27  ;;  %v4181_v4 = vrot.slane %v4179_v16, 5  ;;  %v4189_v47 = vshrl.u32 %v9530_v56, 16  ;;  %v9551_v16 = vld [vmem:[%s8201_s12 + $0x94] sm:$0xf] }
 0x119   : > { %v7400_v5 = vpop.f32.mrf.mxu1  ;;  %v4195_v48 = vshll.u32 %v9533_v15, 16  ;;  %v4164_v28 = vsel %vm8245_vm2, %v4159_v50, %v4163_v14  ;;  %v4169_v29 = vrot.slane %v4168_v46, 4  ;;  %v7352_v33 = vpop.f32.mrf.mxu0  ;;  %v4200_v55 = vshrl.u32 %v6616_v20, 16  ;;  %7717 = vmatpush3.bf16.msra.mxu0 %v7969_v54  ;;  %v6619_v50 = vld [vmem:[%s8201_s12 + $0x9c] sm:$0xf] }
 0x11a   : > { %10469 = vst [vmem:[#allocation23_spill] sm:$0xff] %v9540_v18  ;;  %7683 = vmatmul.mubr.bf16.gmra.mxu1 %v6657_v60  ;;  %v4203_v58 = vshll.u32 %v6616_v20, 16  ;;  %v9548_v6 = vadd.f32 %v7400_v5, %v7352_v33  ;;  %v4182_v52 = vor.u32 %v4181_v4, %v4178_v2  ;;  %v4187_v39 = vrot.slane %v4185_v51, 5  ;;  %v9554_v18 = vld [vmem:[%s8201_s12 + $0x98] sm:$0x1]  ;;  %v7960_v33 = vld [vmem:[%s8201_s12 + $0x9c] sm:$0xff]  }
 0x11b   : > { %v1337_v25 = vpop.f32.mrf.mxu1  ;;  %v4191_v11 = vrot.slane %v4189_v47, 4  ;;  %10471 = vst [vmem:[#allocation25_spill] sm:$0xff] %v9554_v18  ;;  %7765 = vmatpush3.bf16.msra.mxu1 %v7970_v43  ;;  %v4174_v14 = vsel %vm8245_vm2, %v4169_v29, %v4173_v49  ;;  %v4197_v60 = vrot.slane %v4195_v48, 5  ;;  %v1032_v20 = vpop.f32.mrf.mxu0  ;;  %v4202_v54 = vrot.slane %v4200_v55, 4  ;;  %v9566_v55 = vld [vmem:[%s8201_s12 + $0xa0] sm:$0xf] }
 0x11c   : > { %10470 = vst [vmem:[#allocation24_spill] sm:$0xff] %v9548_v6  ;;  %7639 = vmatmul.mubr.bf16.gmra.mxu0 %v7956_v22  ;;  %v4205_v5 = vrot.slane %v4203_v58, 5  ;;  %v6658_v46 = vcombine.low %v4164_v28, %v4174_v14  ;;  %v4183_v51 = vrot.slane %v4182_v52, 4  ;;  %v9559_v4 = vadd.f32 %v1337_v25, %v1032_v20  ;;  %10473 = vst [vmem:[#allocation27_spill] sm:$0xff] %v9566_v55  ;;  %v9573_v52 = vld [vmem:[%s8201_s12 + $0xa4] sm:$0x1] }
 0x11d   : > { %v7401_v27 = vpop.f32.mrf.mxu1  ;;  %v4192_v2 = vor.u32 %v4191_v11, %v4187_v39  ;;  %7642 = vmatprep.mubr.bf16.mxu0 %v7959_v8  ;;  %v7353_v43 = vpop.f32.mrf.mxu0  ;;  %v4209_v22 = vshll.u32 %v9551_v16, 16  ;;  %v4213_v48 = vshrl.u32 %v9551_v16, 16  ;;  %v4219_v29 = vshll.u32 %v9554_v18, 16  ;;  %10475 = vst [vmem:[#allocation29_spill] sm:$0xff] %v9573_v52  ;;  %v7963_v14 = vld [vmem:[%s8201_s12 + $0xa8] sm:$0xff]  }
 0x11e   : > { %10472 = vst [vmem:[#allocation26_spill] sm:$0xff] %v9559_v4  ;;  %v4206_v49 = vor.u32 %v4205_v5, %v4202_v54  ;;  %7686 = vmatprep.mubr.bf16.mxu1 %v6658_v46  ;;  %v4188_v25 = vsel %vm8245_vm2, %v4183_v51, %v4187_v39  ;;  %v9570_v58 = vadd.f32 %v7401_v27, %v7353_v43  ;;  %v4224_v11 = vshrl.u32 %v6619_v50, 16  ;;  %v6622_v20 = vld [vmem:[%s8201_s12 + $0xa8] sm:$0xf] }
 0x11f   : > { %v1340_v47 = vpop.f32.mrf.mxu1  ;;  %v4193_v28 = vrot.slane %v4192_v2, 4  ;;  %v1035_v54 = vpop.f32.mrf.mxu0  ;;  %v4211_v4 = vrot.slane %v4209_v22, 5  ;;  %v4215_v6 = vrot.slane %v4213_v48, 4  ;;  %v4221_v18 = vrot.slane %v4219_v29, 5 }
 0x120   : > { %10474 = vst [vmem:[#allocation28_spill] sm:$0xff] %v9570_v58  ;;  %v4207_v5 = vrot.slane %v4206_v49, 4  ;;  %v9579_v15 = vadd.f32 %v1340_v47, %v1035_v54  ;;  %v4226_v39 = vrot.slane %v4224_v11, 4  ;;  %v4227_v27 = vshll.u32 %v6619_v50, 16 }
 0x121   : > { %v7404_v8 = vpop.f32.mrf.mxu1  ;;  %v4198_v46 = vsel %vm8245_vm2, %v4193_v28, %v4197_v60  ;;  %v4216_v58 = vor.u32 %v4215_v6, %v4211_v4  ;;  %v7356_v0 = vpop.f32.mrf.mxu0  ;;  %v4233_v49 = vshll.u32 %v9566_v55, 16  ;;  %v4237_v29 = vshrl.u32 %v9566_v55, 16  ;;  %v9589_v28 = vld [vmem:[%s8201_s12 + $0xac] sm:$0xf] }
 0x122   : > { %10476 = vst [vmem:[#allocation30_spill] sm:$0xff] %v9579_v15  ;;  %v6659_v2 = vcombine.low %v4188_v25, %v4198_v46  ;;  %v4212_v43 = vsel %vm8245_vm2, %v4207_v5, %v4211_v4  ;;  %v9584_v22 = vadd.f32 %v7404_v8, %v7356_v0  ;;  %v4229_v48 = vrot.slane %v4227_v27, 5  ;;  %10478 = vst [vmem:[#allocation32_spill] sm:$0xff] %v9589_v28  ;;  %v9594_v27 = vld [vmem:[%s8201_s12 + $0xb0] sm:$0x1] }
 0x123   : > { %v1353_v51 = vpop.f32.mrf.mxu1  ;;  %v4243_v60 = vshll.u32 %v9573_v52, 16  ;;  %v4217_v50 = vrot.slane %v4216_v58, 4  ;;  %v4235_v25 = vrot.slane %v4233_v49, 5  ;;  %v1048_v6 = vpop.f32.mrf.mxu0  ;;  %v4248_v4 = vshrl.u32 %v6622_v20, 16  ;;  %10480 = vst [vmem:[#allocation34_spill] sm:$0xff] %v9594_v27 }
 0x124   : > { %10477 = vst [vmem:[#allocation31_spill] sm:$0xff] %v9584_v22  ;;  %7687 = vmatmul.mubr.bf16.gmra.mxu1 %v6659_v2  ;;  %7643 = vmatmul.mubr.bf16.gmra.mxu0 %v7960_v33  ;;  %v4251_v11 = vshll.u32 %v6622_v20, 16  ;;  %v4230_v54 = vor.u32 %v4229_v48, %v4226_v39  ;;  %v4239_v0 = vrot.slane %v4237_v29, 4  ;;  %v9591_v5 = vadd.f32 %v1353_v51, %v1048_v6  ;;  %v6625_v20 = vld [vmem:[%s8201_s12 + $0xb4] sm:$0xf] }
 0x125   : > { %v7405_v47 = vpop.f32.mrf.mxu1  ;;  %v4245_v8 = vrot.slane %v4243_v60, 5  ;;  %7646 = vmatprep.mubr.bf16.mxu0 %v7963_v14  ;;  %v4222_v22 = vsel %vm8245_vm2, %v4217_v50, %v4221_v18  ;;  %v7357_v58 = vpop.f32.mrf.mxu0  ;;  %v4250_v33 = vrot.slane %v4248_v4, 4  ;;  %v4257_v49 = vshll.u32 %v9589_v28, 16  ;;  %v7964_v4 = vld [vmem:[%s8201_s12 + $0xb4] sm:$0xff]   ;;  %v9624_v52 = vld [vmem:[%s8201_s12 + $0xc4] sm:$0xf] }
 0x126   : > { %10479 = vst [vmem:[#allocation33_spill] sm:$0xff] %v9591_v5  ;;  %v4253_v2 = vrot.slane %v4251_v11, 5  ;;  %v6660_v39 = vcombine.low %v4212_v43, %v4222_v22  ;;  %v4231_v48 = vrot.slane %v4230_v54, 4  ;;  %v4240_v29 = vor.u32 %v4239_v0, %v4235_v25  ;;  %v9606_v11 = vld [vmem:[%s8201_s12 + $0xb8] sm:$0xf]  ;;  %10485 = vst [vmem:[#allocation39_spill] sm:$0xff] %v9624_v52 }
 0x127   : > { %v1356_v46 = vpop.f32.mrf.mxu1  ;;  %v9600_v51 = vadd.f32 %v7405_v47, %v7357_v58  ;;  %v1051_v60 = vpop.f32.mrf.mxu0  ;;  %v4259_v5 = vrot.slane %v4257_v49, 5  ;;  %v4261_v18 = vshrl.u32 %v9589_v28, 16  ;;  %v4267_v50 = vshll.u32 %v9594_v27, 16  ;;  %10482 = vst [vmem:[#allocation36_spill] sm:$0xff] %v9606_v11  ;;  %v7967_v58 = vld [vmem:[%s8201_s12 + $0xc0] sm:$0xff]  }
 0x128   : > { %v4254_v6 = vor.u32 %v4253_v2, %v4250_v33  ;;  %7690 = vmatprep.mubr.bf16.mxu1 %v6660_v39  ;;  %v4236_v43 = vsel %vm8245_vm2, %v4231_v48, %v4235_v25  ;;  %v4241_v22 = vrot.slane %v4240_v29, 4  ;;  %v9610_v47 = vadd.f32 %v1356_v46, %v1051_v60  ;;  %v6628_v29 = vld [vmem:[%s8201_s12 + $0xc0] sm:$0xf] }
 0x129   : > { %10481 = vst [vmem:[#allocation35_spill] sm:$0xff] %v9600_v51  ;;  %v7408_v14 = vpop.f32.mrf.mxu1  ;;  %v4272_v54 = vshrl.u32 %v6625_v20, 16  ;;  %v4263_v2 = vrot.slane %v4261_v18, 4  ;;  %v4269_v49 = vrot.slane %v4267_v50, 5  ;;  %v9614_v51 = vld [vmem:[%s8201_s12 + $0xbc] sm:$0x1] }
 0x12a   : > { %10483 = vst [vmem:[#allocation37_spill] sm:$0xff] %v9610_v47  ;;  %v4255_v33 = vrot.slane %v4254_v6, 4  ;;  %10484 = vst [vmem:[#allocation38_spill] sm:$0xff] %v9614_v51  ;;  %v4275_v15 = vshll.u32 %v6625_v20, 16  ;;  %v4246_v39 = vsel %vm8245_vm2, %v4241_v22, %v4245_v8  ;;  %v4281_v25 = vshll.u32 %v9606_v11, 16 }
 0x12b   : > { %v1369_v0 = vpop.f32.mrf.mxu1  ;;  %v4274_v27 = vrot.slane %v4272_v54, 4  ;;  %v4285_v48 = vshrl.u32 %v9606_v11, 16  ;;  %v6661_v60 = vcombine.low %v4236_v43, %v4246_v39  ;;  %v4264_v18 = vor.u32 %v4263_v2, %v4259_v5 }
 0x12c   : > { %v4260_v6 = vsel %vm8245_vm2, %v4255_v33, %v4259_v5  ;;  %v7360_v47 = vpop.f32.mrf.mxu0  ;;  %7647 = vmatmul.mubr.bf16.gmra.mxu0 %v7964_v4  ;;  %v4277_v50 = vrot.slane %v4275_v15, 5  ;;  %v4283_v8 = vrot.slane %v4281_v25, 5  ;;  %v4291_v54 = vshll.u32 %v9614_v51, 16 }
 0x12d   : > { %v7409_v46 = vpop.f32.mrf.mxu1  ;;  %v9626_v20 = vadd.f32 %v7408_v14, %v7360_v47  ;;  %v4287_v22 = vrot.slane %v4285_v48, 4  ;;  %7650 = vmatprep.mubr.bf16.mxu0 %v7967_v58  ;;  %7691 = vmatmul.mubr.bf16.gmra.mxu1 %v6661_v60  ;;  %v4265_v43 = vrot.slane %v4264_v18, 4  ;;  %v4296_v33 = vshrl.u32 %v6628_v29, 16  ;;  %v9632_v14 = vld [vmem:[%s8201_s12 + $0xc8] sm:$0x1] }
 0x12e   : > { %v4278_v39 = vor.u32 %v4277_v50, %v4274_v27  ;;  %v1064_v5 = vpop.f32.mrf.mxu0  ;;  %v4299_v4 = vshll.u32 %v6628_v29, 16  ;;  %v4293_v2 = vrot.slane %v4291_v54, 5  ;;  %10488 = vst [vmem:[#allocation42_spill] sm:$0xff] %v9632_v14  ;;  %v4305_v47 = vshll.u32 %v9624_v52, 16  ;;  %v7968_v50 = vld [vmem:[%s8201_s12 + $0xcc] sm:$0xff]  }
 0x12f   : > { %10486 = vst [vmem:[#allocation40_spill] sm:$0xff] %v9626_v20  ;;  %v1372_v11 = vpop.f32.mrf.mxu1  ;;  %v4288_v15 = vor.u32 %v4287_v22, %v4283_v8  ;;  %v9629_v28 = vadd.f32 %v1369_v0, %v1064_v5  ;;  %v4270_v58 = vsel %vm8245_vm2, %v4265_v43, %v4269_v49  ;;  %v4298_v27 = vrot.slane %v4296_v33, 4  ;;  %v6631_v29 = vld [vmem:[%s8201_s12 + $0xcc] sm:$0xf]  ;;  %v9653_v33 = vld [vmem:[%s8201_s12 + $0xd4] sm:$0x1] }
 0x130   : > { %v4279_v48 = vrot.slane %v4278_v39, 4  ;;  %v7361_v60 = vpop.f32.mrf.mxu0  ;;  %v4301_v18 = vrot.slane %v4299_v4, 5  ;;  %v6662_v22 = vcombine.low %v4260_v6, %v4270_v58  ;;  %v4307_v5 = vrot.slane %v4305_v47, 5  ;;  %v9646_v39 = vld [vmem:[%s8201_s12 + $0xd0] sm:$0xf]  ;;  %10492 = vst [vmem:[#allocation46_spill] sm:$0xff] %v9653_v33 }
 0x131   : > { %10487 = vst [vmem:[#allocation41_spill] sm:$0xff] %v9629_v28  ;;  %v7412_v25 = vpop.f32.mrf.mxu1  ;;  %v4289_v54 = vrot.slane %v4288_v15, 4  ;;  %v9639_v0 = vadd.f32 %v7409_v46, %v7361_v60  ;;  %v4309_v49 = vshrl.u32 %v9624_v52, 16  ;;  %v4315_v43 = vshll.u32 %v9632_v14, 16  ;;  %10490 = vst [vmem:[#allocation44_spill] sm:$0xff] %v9646_v39 }
 0x132   : > { %v4284_v20 = vsel %vm8245_vm2, %v4279_v48, %v4283_v8  ;;  %v1067_v51 = vpop.f32.mrf.mxu0  ;;  %v4302_v55 = vor.u32 %v4301_v18, %v4298_v27  ;;  %7694 = vmatprep.mubr.bf16.mxu1 %v6662_v22  ;;  %v4320_v4 = vshrl.u32 %v6631_v29, 16  ;;  %v4323_v15 = vshll.u32 %v6631_v29, 16  ;;  %v6674_v18 = vld [vmem:[%s8201_s12 + $0x18] sm:$0xe] }
 0x133   : > { %10489 = vst [vmem:[#allocation43_spill] sm:$0xff] %v9639_v0  ;;  %v1385_v28 = vpop.f32.mrf.mxu1  ;;  %v4294_v6 = vsel %vm8245_vm2, %v4289_v54, %v4293_v2  ;;  %v9650_v46 = vadd.f32 %v1372_v11, %v1067_v51  ;;  %v4311_v48 = vrot.slane %v4309_v49, 4  ;;  %v4317_v60 = vrot.slane %v4315_v43, 5  ;;  %v6675_v54 = vld [vmem:[%s8201_s12 + $0x24] sm:$0xe] }
 0x134   : > { %v6663_v47 = vcombine.low %v4284_v20, %v4294_v6  ;;  %v4303_v58 = vrot.slane %v4302_v55, 4  ;;  %v7364_v27 = vpop.f32.mrf.mxu0  ;;  %7651 = vmatmul.mubr.bf16.gmra.mxu0 %v7968_v50  ;;  %v4322_v22 = vrot.slane %v4320_v4, 4  ;;  %v4325_v14 = vrot.slane %v4323_v15, 5 }
 0x135   : > { %10491 = vst [vmem:[#allocation45_spill] sm:$0xff] %v9650_v46  ;;  %v7413_v8 = vpop.f32.mrf.mxu1  ;;  %v9656_v0 = vadd.f32 %v7412_v25, %v7364_v27  ;;  %v4329_v51 = vshll.u32 %v9646_v39, 16  ;;  %v4312_v20 = vor.u32 %v4311_v48, %v4307_v5  ;;  %v4333_v55 = vshrl.u32 %v9646_v39, 16 }
 0x136   : > { %7695 = vmatmul.mubr.bf16.gmra.mxu1 %v6663_v47  ;;  %v4308_v2 = vsel %vm8245_vm2, %v4303_v58, %v4307_v5  ;;  %v4339_v29 = vshll.u32 %v9653_v33, 16  ;;  %v1080_v50 = vpop.f32.mrf.mxu0  ;;  %v4326_v25 = vor.u32 %v4325_v14, %v4322_v22  ;;  %v6690_v6 = vrot.slane %v6674_v18, 9  ;;  %v7971_v58 = vld [vmem:[%s8201_s12 + $0x1c] sm:$0xf]  ;;  %v7972_v33 = vld [vmem:[%s8201_s12 + $0x20] sm:$0x1] }
 0x137   : > { %10493 = vst [vmem:[#allocation47_spill] sm:$0xff] %v9656_v0  ;;  %v1388_v11 = vpop.f32.mrf.mxu1  ;;  %v4331_v49 = vrot.slane %v4329_v51, 5  ;;  %v9664_v43 = vadd.f32 %v1385_v28, %v1080_v50  ;;  %v4313_v15 = vrot.slane %v4312_v20, 4  ;;  %v4335_v47 = vrot.slane %v4333_v55, 4  ;;  %v6676_v22 = vld [vmem:[%s8201_s12 + $0x30] sm:$0xe] }
 0x138   : > { %v4341_v27 = vrot.slane %v4339_v29, 5  ;;  %v7365_v0 = vpop.f32.mrf.mxu0  ;;  %v4731_v5 = vrot.slane %v7971_v58, 5  ;;  %v4327_v48 = vrot.slane %v4326_v25, 4  ;;  %v4734_v39 = vrot.slane %v7972_v33, 5 }
 0x139   : > { %v7480_v4 = vpop.f32.mrf.mxu1  ;;  %v9667_v46 = vadd.f32 %v7413_v8, %v7365_v0  ;;  %v6691_v52 = vrot.slane %v6675_v54, 9  ;;  %v4318_v28 = vsel %vm8245_vm2, %v4313_v15, %v4317_v60  ;;  %v4336_v18 = vor.u32 %v4335_v47, %v4331_v49  ;;  %v6677_v54 = vld [vmem:[%s8201_s12 + $0x3c] sm:$0xe] }
 0x13a   : > { %v1083_v51 = vpop.f32.mrf.mxu0  ;;  %v4732_v20 = vsel %vm8599_vm5, %v6690_v6, %v4731_v5  ;;  %v4733_v55 = vrot.slane %v4731_v5, 4  ;;  %v6664_v29 = vcombine.low %v4308_v2, %v4318_v28  ;;  %v4332_v0 = vsel %vm8245_vm2, %v4327_v48, %v4331_v49  ;;  %v7973_v48 = vld [vmem:[%s8201_s12 + $0x34] sm:$0xf]  ;;  %v7974_v28 = vld [vmem:[%s8201_s12 + $0x38] sm:$0x1] }
 0x13b   : > { %v2113_v14 = vpop.f32.mrf.mxu1  ;;  %v9677_v8 = vadd.f32 %v1388_v11, %v1083_v51  ;;  %v10494_v33 = vrot.slane %v9321_v21, 5  ;;  %v4337_v25 = vrot.slane %v4336_v18, 4  ;;  %v6692_v49 = vrot.slane %v6676_v22, 9 }
 0x13c   : > { %v4735_v6 = vsel %vm8599_vm5, %v4733_v55, %v4734_v39  ;;  %v7432_v15 = vpop.f32.mrf.mxu0  ;;  %7698 = vmatprep.mubr.bf16.mxu1 %v6664_v29  ;;  %v4748_v18 = vrot.slane %v7974_v28, 5  ;;  %v10496_v51 = vrot.slane %v9326_v13, 5  ;;  %v6693_v22 = vrot.slane %v6677_v54, 9  ;;  %v7975_v29 = vld [vmem:[%s8201_s12 + $0x40] sm:$0xf] }
 0x13d   : > { %v4739_v50 = vsel %vm8599_vm5, %v6691_v52, %v10494_v33  ;;  %v7481_v60 = vpop.f32.mrf.mxu1  ;;  %v10495_v2 = vmov %v10494_v33  ;;  %v6722_v11 = vcombine.low %v4732_v20, %v4735_v6  ;;  %v1855_v58 = vadd.f32 %v7432_v15, %v9346_v57  ;;  %v6678_v33 = vld [vmem:[%s8201_s12 + $0x48] sm:$0xe] }
 0x13e   : > { %v4740_v47 = vrot.slane %v10495_v2, 4  ;;  %v4745_v52 = vrot.slane %v7973_v48, 5  ;;  %v4342_v39 = vsel %vm8245_vm2, %v4337_v25, %v4341_v27  ;;  %v1726_v55 = vpop.f32.mrf.mxu0  ;;  %v4752_v20 = vrot.slane %v7975_v29, 5 }
 0x13f   : > { %v2116_v5 = vpop.f32.mrf.mxu1  ;;  %v6665_v57 = vcombine.low %v4332_v0, %v4342_v39  ;;  %7718 = vmatprep.mubr.bf16.mxu0 %v6722_v11  ;;  %v9699_v6 = vadd.f32 %v7480_v4, %v1855_v58  ;;  %v1853_v2 = vadd.f32 %v1726_v55, %v9359_v44  ;;  %v4759_v11 = vrot.slane %v9366_v30, 5 }
 0x140   : > { %v4742_v21 = vsel %vm8599_vm5, %v4740_v47, %v10496_v51  ;;  %v7433_v27 = vpop.f32.mrf.mxu0  ;;  %v4746_v13 = vsel %vm8599_vm5, %v6692_v49, %v4745_v52  ;;  %v4747_v25 = vrot.slane %v4745_v52, 4  ;;  %v4753_v54 = vsel %vm8599_vm5, %v6693_v22, %v4752_v20  ;;  %v6681_v22 = vld [vmem:[%s8201_s12 + $0x6c] sm:$0xe] }
 0x141   : > { %v6723_v15 = vcombine.low %v4739_v50, %v4742_v21  ;;  %v7484_v48 = vpop.f32.mrf.mxu1  ;;  %v4754_v47 = vrot.slane %v4752_v20, 4  ;;  %7699 = vmatmul.mubr.bf16.gmra.mxu1 %v6665_v57  ;;  %v9707_v0 = vadd.f32 %v2113_v14, %v1853_v2  ;;  %v1856_v4 = vadd.f32 %v7433_v27, %v9369_v9  ;;  %v6680_v9 = vld [vmem:[%s8201_s12 + $0x60] sm:$0xe] }
 0x142   : > { %v6694_v50 = vrot.slane %v6678_v33, 9  ;;  %7766 = vmatprep.mubr.bf16.mxu1 %v8912_v53  ;;  %v1729_v49 = vpop.f32.mrf.mxu0  ;;  %v4749_v58 = vsel %vm8599_vm5, %v4747_v25, %v4748_v18  ;;  %v10497_v52 = vrot.slane %v9354_v61, 5  ;;  %v4762_v14 = vrot.slane %v9386_v40, 5 }
 0x143   : > { %7719 = vmatmul.mubr.bf16.vlgmr.msra.gmra.mxu0 %v6723_v15  ;;  %v2129_v44 = vpop.f32.mrf.mxu1  ;;  %v6695_v39 = vrot.slane %v6679_v38, 9  ;;  %v4769_v51 = vrot.slane %v9418_v41, 5  ;;  %v9721_v21 = vadd.f32 %v7481_v60, %v1856_v4  ;;  %v1854_v30 = vadd.f32 %v1729_v49, %v9381_v23 }
 0x144   : > { %v4756_v28 = vsel %vm8599_vm5, %v4754_v47, %v10497_v52  ;;  %v6724_v53 = vcombine.low %v4746_v13, %v4749_v58  ;;  %v7436_v29 = vpop.f32.mrf.mxu0  ;;  %v4760_v61 = vsel %vm8599_vm5, %v6694_v50, %v4759_v11  ;;  %v4761_v20 = vrot.slane %v4759_v11, 4 }
 0x145   : > { %v7485_v55 = vpop.f32.mrf.mxu1  ;;  %v6725_v18 = vcombine.low %v4753_v54, %v4756_v28  ;;  %v4766_v33 = vrot.slane %v9407_v36, 5  ;;  %v9728_v40 = vadd.f32 %v2116_v5, %v1854_v30  ;;  %v1859_v41 = vadd.f32 %v7436_v29, %v9393_v26 }
 0x146   : > { %7722 = vmatprep.mubr.bf16.mxu0 %v6724_v53  ;;  %v6696_v57 = vrot.slane %v6680_v9, 9  ;;  %v4773_v23 = vrot.slane %v9436_v19, 5  ;;  %v1742_v15 = vpop.f32.mrf.mxu0  ;;  %v4763_v2 = vsel %vm8599_vm5, %v4761_v20, %v4762_v14  ;;  %v6697_v13 = vrot.slane %v6681_v22, 9  ;;  %v6682_v14 = vld [vmem:[%s8201_s12 + $0x78] sm:$0xe] }
 0x147   : > { %v2132_v60 = vpop.f32.mrf.mxu1  ;;  %v4767_v38 = vsel %vm8599_vm5, %v6695_v39, %v4766_v33  ;;  %v4768_v27 = vrot.slane %v4766_v33, 4  ;;  %v9736_v25 = vadd.f32 %v7484_v48, %v1859_v41  ;;  %v1857_v36 = vadd.f32 %v1742_v15, %v9404_v35  ;;  %v6683_v15 = vld [vmem:[%s8201_s12 + $0x84] sm:$0xe] }
 0x148   : > { %v6726_v5 = vcombine.low %v4760_v61, %v4763_v2  ;;  %v4776_v26 = vrot.slane %v9443_v62, 5  ;;  %v4783_v47 = vrot.slane %v9474_v37, 5  ;;  %v7437_v19 = vpop.f32.mrf.mxu0  ;;  %v4775_v50 = vrot.slane %v4773_v23, 4 }
 0x149   : > { %v7488_v54 = vpop.f32.mrf.mxu1  ;;  %v4770_v4 = vsel %vm8599_vm5, %v4768_v27, %v4769_v51  ;;  %v4780_v11 = vrot.slane %v9470_v63, 5  ;;  %7767 = vmatmul.mubr.bf16.vlgmr.msra.gmra.mxu1 %v8939_v32  ;;  %v9745_v48 = vadd.f32 %v2129_v44, %v1857_v36  ;;  %v1860_v35 = vadd.f32 %v7437_v19, %v9421_v1 }
 0x14a   : > { %v6727_v49 = vcombine.low %v4767_v38, %v4770_v4  ;;  %7770 = vmatprep.mubr.bf16.mxu1 %v8961_v31  ;;  %v1745_v62 = vpop.f32.mrf.mxu0  ;;  %v4774_v37 = vsel %vm8599_vm5, %v6696_v57, %v4773_v23  ;;  %v4777_v1 = vsel %vm8599_vm5, %v4775_v50, %v4776_v26  ;;  %v4787_v31 = vrot.slane %v9504_v45, 5  ;;  %v10499_v50 = vld [vmem:[#allocation22_spill] sm:$0xff] }
 0x14b   : > { %7723 = vmatmul.mubr.bf16.gmra.mxu0 %v6725_v18  ;;  %v2145_v58 = vpop.f32.mrf.mxu1  ;;  %v4781_v63 = vsel %vm8599_vm5, %v6697_v13, %v4780_v11  ;;  %v4782_v52 = vrot.slane %v4780_v11, 4  ;;  %v9753_v32 = vadd.f32 %v7485_v55, %v1860_v35  ;;  %v1858_v44 = vadd.f32 %v1745_v62, %v9431_v42 }
 0x14c   : > { %7726 = vmatprep.mubr.bf16.mxu0 %v6726_v5  ;;  %v7440_v39 = vpop.f32.mrf.mxu0  ;;  %v6728_v29 = vcombine.low %v4774_v37, %v4777_v1  ;;  %v6698_v42 = vrot.slane %v6682_v14, 9  ;;  %v4789_v45 = vrot.slane %v4787_v31, 4  ;;  %v4790_v33 = vrot.slane %v9509_v7, 5  ;;  %v10498_v5 = vld [vmem:[#allocation19_spill] sm:$0xff]  ;;  %v10501_v37 = vld [vmem:[#allocation25_spill] sm:$0xff] }
 0x14d   : > { %v7489_v28 = vpop.f32.mrf.mxu1  ;;  %v4784_v9 = vsel %vm8599_vm5, %v4782_v52, %v4783_v47  ;;  %v9762_v51 = vadd.f32 %v2132_v60, %v1858_v44  ;;  %v1863_v30 = vadd.f32 %v7440_v39, %v9449_v17  ;;  %v4794_v7 = vrot.slane %v9530_v56, 5  ;;  %v10502_v44 = vld [vmem:[#allocation8_spill] sm:$0xff]  ;;  %v10503_v1 = vld [vmem:[#allocation21_spill] sm:$0xff] }
 0x14e   : > { %v6729_v55 = vcombine.low %v4781_v63, %v4784_v9  ;;  %v1758_v22 = vpop.f32.mrf.mxu0  ;;  %v4791_v27 = vsel %vm8599_vm5, %v4789_v45, %v4790_v33  ;;  %v4801_v13 = vrot.slane %v9551_v16, 5  ;;  %v6699_v47 = vrot.slane %v6683_v15, 9  ;;  %v10504_v39 = vld [vmem:[#allocation9_spill] sm:$0xff] }
 0x14f   : > { %v2148_v53 = vpop.f32.mrf.mxu1  ;;  %v9765_v18 = vadd.f32 %v7488_v54, %v1863_v30  ;;  %v1861_v61 = vadd.f32 %v1758_v22, %v9466_v59  ;;  %v4788_v59 = vsel %vm8599_vm5, %v6698_v42, %v4787_v31  ;;  %v4796_v4 = vrot.slane %v4794_v7, 4 }
 0x150   : > { %v7441_v41 = vpop.f32.mrf.mxu0  ;;  %v6730_v56 = vcombine.low %v4788_v59, %v4791_v27  ;;  %v4797_v11 = vrot.slane %v10499_v50, 5  ;;  %v4803_v16 = vrot.slane %v4801_v13, 4  ;;  %v4804_v63 = vrot.slane %v10501_v37, 5 }
 0x151   : > { %v7492_v20 = vpop.f32.mrf.mxu1  ;;  %7771 = vmatmul.mubr.bf16.gmra.mxu1 %v8989_v34  ;;  %v9770_v17 = vadd.f32 %v2145_v58, %v1861_v61  ;;  %v1864_v60 = vadd.f32 %v7441_v41, %v9483_v24  ;;  %v6684_v24 = vld [vmem:[%s8201_s12 + $0x90] sm:$0xe]  ;;  %v4795_v30 = vsel %vm8599_vm5, %v6699_v47, %v4794_v7  ;;  %v10508_v7 = vld [vmem:[#allocation24_spill] sm:$0xff] }
 0x152   : > { %7774 = vmatprep.mubr.bf16.mxu1 %v9017_v10  ;;  %v1761_v23 = vpop.f32.mrf.mxu0  ;;  %v4805_v41 = vsel %vm8599_vm5, %v4803_v16, %v4804_v63  ;;  %v10512_v16 = vld [vmem:[#allocation10_spill] sm:$0xff]  ;;  %v10513_v63 = vld [vmem:[#allocation28_spill] sm:$0xff] }
 0x153   : > { %7727 = vmatmul.mubr.bf16.gmra.mxu0 %v6727_v49  ;;  %v2161_v57 = vpop.f32.mrf.mxu1  ;;  %v9778_v2 = vadd.f32 %v7489_v28, %v1864_v60  ;;  %v1862_v34 = vadd.f32 %v1761_v23, %v9488_v3  ;;  %v6700_v3 = vrot.slane %v6684_v24, 9  ;;  %v10500_v49 = vld [vmem:[#allocation20_spill] sm:$0xff] }
 0x154   : > { %7730 = vmatprep.mubr.bf16.mxu0 %v6728_v29  ;;  %v7444_v10 = vpop.f32.mrf.mxu0  ;;  %v10505_v29 = vld [vmem:[#allocation27_spill] sm:$0xff]  ;;  %v6686_v60 = vld [vmem:[%s8201_s12 + $0xa8] sm:$0xe] }
 0x155   : > { %v7493_v38 = vpop.f32.mrf.mxu1  ;;  %v9785_v36 = vadd.f32 %v2148_v53, %v1862_v34  ;;  %v1867_v54 = vadd.f32 %v7444_v10, %v10498_v5  ;;  %v4798_v53 = vsel %vm8599_vm5, %v4796_v4, %v4797_v11  ;;  %v4802_v22 = vsel %vm8599_vm5, %v6700_v3, %v4801_v13  ;;  %v10510_v4 = vld [vmem:[#allocation26_spill] sm:$0xff] }
 0x156   : > { %v1774_v19 = vpop.f32.mrf.mxu0  ;;  %v4808_v42 = vrot.slane %v10505_v29, 5  ;;  %v6731_v27 = vcombine.low %v4795_v30, %v4798_v53  ;;  %v6687_v30 = vld [vmem:[%s8201_s12 + $0xb4] sm:$0xe]  ;;  %v10515_v53 = vld [vmem:[#allocation36_spill] sm:$0xff] }
 0x157   : > { %v2164_v26 = vpop.f32.mrf.mxu1  ;;  %v9789_v35 = vadd.f32 %v7492_v20, %v1867_v54  ;;  %v1865_v58 = vadd.f32 %v1774_v19, %v10500_v49  ;;  %v10506_v20 = vld [vmem:[#allocation23_spill] sm:$0xff]  ;;  %v10509_v54 = vld [vmem:[#allocation29_spill] sm:$0xff]  ;;  %v6702_v19 = vrot.slane %v6686_v60, 9 }
 0x158   : > { %v7445_v52 = vpop.f32.mrf.mxu0  ;;  %v4810_v5 = vrot.slane %v4808_v42, 4  ;;  %v4811_v47 = vrot.slane %v10509_v54, 5  ;;  %v10517_v60 = vld [vmem:[#allocation39_spill] sm:$0xff] }
 0x159   : > { %v7496_v62 = vpop.f32.mrf.mxu1  ;;  %7775 = vmatmul.mubr.bf16.gmra.mxu1 %v10502_v44  ;;  %v9794_v28 = vadd.f32 %v2161_v57, %v1865_v58  ;;  %v1868_v14 = vadd.f32 %v7445_v52, %v10503_v1  ;;  %v10507_v57 = vld [vmem:[#allocation32_spill] sm:$0xff]  ;;  %v10514_v1 = vld [vmem:[#allocation11_spill] sm:$0xff] }
 0x15a   : > { %7778 = vmatprep.mubr.bf16.mxu1 %v10504_v39  ;;  %v1777_v9 = vpop.f32.mrf.mxu0  ;;  %v4815_v23 = vrot.slane %v10507_v57, 5  ;;  %v4812_v39 = vsel %vm8599_vm5, %v4810_v5, %v4811_v47  ;;  %v10519_v5 = vld [vmem:[#allocation38_spill] sm:$0xff] }
 0x15b   : > { %7731 = vmatmul.mubr.bf16.gmra.mxu0 %v6729_v55  ;;  %v2177_v31 = vpop.f32.mrf.mxu1  ;;  %v6685_v55 = vld [vmem:[%s8201_s12 + $0x9c] sm:$0xe]  ;;  %v9806_v61 = vadd.f32 %v7493_v38, %v1868_v14  ;;  %v1866_v45 = vadd.f32 %v1777_v9, %v10506_v20  ;;  %v6732_v38 = vcombine.low %v4802_v22, %v4805_v41  ;;  %v6688_v41 = vld [vmem:[%s8201_s12 + $0xc0] sm:$0xe]  ;;  %v4825_v54 = vrot.slane %v10519_v5, 5 }
 0x15c   : > { %7734 = vmatprep.mubr.bf16.mxu0 %v6730_v56  ;;  %v7448_v59 = vpop.f32.mrf.mxu0  ;;  %v6701_v13 = vrot.slane %v6685_v55, 9  ;;  %v4817_v3 = vrot.slane %v4815_v23, 4  ;;  %v4816_v9 = vsel %vm8599_vm5, %v6702_v19, %v4815_v23  ;;  %v10516_v55 = vld [vmem:[#allocation30_spill] sm:$0xff]  ;;  %v6704_v47 = vrot.slane %v6688_v41, 9 }
 0x15d   : > { %v7497_v33 = vpop.f32.mrf.mxu1  ;;  %v9813_v15 = vadd.f32 %v2164_v26, %v1866_v45  ;;  %v1871_v34 = vadd.f32 %v7448_v59, %v10508_v7  ;;  %v10511_v26 = vld [vmem:[#allocation34_spill] sm:$0xff]  ;;  %v10518_v7 = vld [vmem:[#allocation31_spill] sm:$0xff] }
 0x15e   : > { %v1790_v10 = vpop.f32.mrf.mxu0  ;;  %v4818_v49 = vrot.slane %v10511_v26, 5  ;;  %v4809_v14 = vsel %vm8599_vm5, %v6701_v13, %v4808_v42  ;;  %v4829_v42 = vrot.slane %v10517_v60, 5  ;;  %v6703_v13 = vrot.slane %v6687_v30, 9  ;;  %v10525_v30 = vld [vmem:[#allocation44_spill] sm:$0xff] }
 0x15f   : > { %v2180_v24 = vpop.f32.mrf.mxu1  ;;  %v9817_v56 = vadd.f32 %v7496_v62, %v1871_v34  ;;  %v1869_v50 = vadd.f32 %v1790_v10, %v10510_v4  ;;  %v6733_v23 = vcombine.low %v4809_v14, %v4812_v39  ;;  %v10520_v4 = vld [vmem:[#allocation33_spill] sm:$0xff] }
 0x160   : > { %v7449_v58 = vpop.f32.mrf.mxu0  ;;  %v4819_v45 = vsel %vm8599_vm5, %v4817_v3, %v4818_v49  ;;  %v4831_v26 = vrot.slane %v4829_v42, 4  ;;  %v10521_v49 = vld [vmem:[#allocation42_spill] sm:$0xff]  ;;  %v10524_v14 = vld [vmem:[#allocation13_spill] sm:$0xff]  ;;  %v4830_v41 = vsel %vm8599_vm5, %v6704_v47, %v4829_v42 }
 0x161   : > { %v7500_v11 = vpop.f32.mrf.mxu1  ;;  %7779 = vmatmul.mubr.bf16.gmra.mxu1 %v10512_v16  ;;  %v9822_v37 = vadd.f32 %v2177_v31, %v1869_v50  ;;  %v1872_v52 = vadd.f32 %v7449_v58, %v10513_v63  ;;  %v4822_v31 = vrot.slane %v10515_v53, 5  ;;  %v10522_v16 = vld [vmem:[#allocation12_spill] sm:$0xff]  ;;  %v4836_v53 = vrot.slane %v10525_v30, 5  ;;  %v10529_v42 = vld [vmem:[#allocation41_spill] sm:$0xff] }
 0x162   : > { %7782 = vmatprep.mubr.bf16.mxu1 %v10514_v1  ;;  %v1793_v62 = vpop.f32.mrf.mxu0 }
 0x163   : > { %7735 = vmatmul.mubr.bf16.gmra.mxu0 %v6731_v27  ;;  %v2193_v44 = vpop.f32.mrf.mxu1  ;;  %v9834_v22 = vadd.f32 %v7497_v33, %v1872_v52  ;;  %v1870_v29 = vadd.f32 %v1793_v62, %v10516_v55  ;;  %v6734_v33 = vcombine.low %v4816_v9, %v4819_v45  ;;  %v10523_v52 = vld [vmem:[#allocation35_spill] sm:$0xff]  ;;  %v4823_v39 = vsel %vm8599_vm5, %v6703_v13, %v4822_v31 }
 0x164   : > { %7738 = vmatprep.mubr.bf16.mxu0 %v6732_v38  ;;  %v7452_v57 = vpop.f32.mrf.mxu0  ;;  %v4824_v38 = vrot.slane %v4822_v31, 4  ;;  %v10527_v31 = vld [vmem:[#allocation40_spill] sm:$0xff]  ;;  %v4838_v5 = vrot.slane %v4836_v53, 4 }
 0x165   : > { %v7501_v20 = vpop.f32.mrf.mxu1  ;;  %v9841_v59 = vadd.f32 %v2180_v24, %v1870_v29  ;;  %v1875_v34 = vadd.f32 %v7452_v57, %v10518_v7  ;;  %v4832_v24 = vrot.slane %v10521_v49, 5  ;;  %v10526_v29 = vld [vmem:[#allocation37_spill] sm:$0xff] }
 0x166   : > { %v1806_v10 = vpop.f32.mrf.mxu0  ;;  %v4826_v9 = vsel %vm8599_vm5, %v4824_v38, %v4825_v54  ;;  %v6689_v57 = vld [vmem:[%s8201_s12 + $0xcc] sm:$0xe]  ;;  %v10528_v54 = vld [vmem:[#allocation46_spill] sm:$0xff]  ;;  %s6822_s12 = sshll.u32 %s8183_s13, 7 }
 0x167   : > { %v2196_v27 = vpop.f32.mrf.mxu1  ;;  %v9845_v19 = vadd.f32 %v7500_v11, %v1875_v34  ;;  %v1873_v50 = vadd.f32 %v1806_v10, %v10520_v4  ;;  %v4833_v60 = vsel %vm8599_vm5, %v4831_v26, %v4832_v24  ;;  %v6735_v13 = vcombine.low %v4823_v39, %v4826_v9  ;;  %v10530_v24 = vld [vmem:[#allocation14_spill] sm:$0xff]  ;;  %v10533_v9 = vld [vmem:[#allocation45_spill] sm:$0xff]  ;;  %s10189_s10 = scalar_lea.vmem %s10415_s3, %s6822_s12  ;;  %s10243_s19 = scalar_lea.vmem %s10416_s4, %s6822_s12 }
 0x168   : > { %v7453_v58 = vpop.f32.mrf.mxu0  ;;  %v6705_v38 = vrot.slane %v6689_v57, 9  ;;  %v4839_v4 = vrot.slane %v10528_v54, 5  ;;  %s325_s12 = scalar_lea.vmem [#allocation2], %s10322_s20 }
 0x169   : > { %v7504_v3 = vpop.f32.mrf.mxu1  ;;  %7783 = vmatmul.mubr.bf16.gmra.mxu1 %v10522_v16  ;;  %v9850_v63 = vadd.f32 %v2193_v44, %v1873_v50  ;;  %v1876_v1 = vadd.f32 %v7453_v58, %v10523_v52  ;;  %v10531_v58 = vld [vmem:[#allocation43_spill] sm:$0xff]  ;;  %s5969_s25 = sshll.u32 %s325_s12, 4  ;;  %s10342_s25 = int_to_ptr.vmem [resolvable:$true] %s5969_s25 }
 0x16a   : > { %7786 = vmatprep.mubr.bf16.mxu1 %v10524_v14  ;;  %v1809_v11 = vpop.f32.mrf.mxu0  ;;  %s7976_s21 = scalar_lea.vmem %s10342_s25, 16 }
 0x16b   : > { %7739 = vmatmul.mubr.bf16.gmra.mxu0 %v6733_v23  ;;  %v2209_v62 = vpop.f32.mrf.mxu1  ;;  %v9859_v55 = vadd.f32 %v7501_v20, %v1876_v1  ;;  %v1874_v44 = vadd.f32 %v1809_v11, %v10526_v29  ;;  %v6736_v20 = vcombine.low %v4830_v41, %v4833_v60  ;;  %v10532_v1 = vld [vmem:[#allocation15_spill] sm:$0xff]  ;;  %v4840_v11 = vsel %vm8599_vm5, %v4838_v5, %v4839_v4  ;;  %p7977_p11 = scmp.ne.s32.totalorder %s10342_s25, %s7976_s21 }
 0x16c   : > { %7742 = vmatprep.mubr.bf16.mxu0 %v6734_v33  ;;  %v7456_v7 = vpop.f32.mrf.mxu0  ;;  %v10534_v41 = vld [vmem:[#allocation47_spill] sm:$0xff] }
 0x16d   : > { %v7505_v45 = vpop.f32.mrf.mxu1  ;;  %v9867_v34 = vadd.f32 %v2196_v27, %v1874_v44  ;;  %v1879_v23 = vadd.f32 %v7456_v7, %v10527_v31  ;;  %p7978_p12 = pnand %p7977_p11, %p8153_p5 }
 0x16e   : > { %v1822_v33 = vpop.f32.mrf.mxu0 }
 0x16f   : > { %v2212_v10 = vpop.f32.mrf.mxu1  ;;  %v9871_v50 = vadd.f32 %v7504_v3, %v1879_v23  ;;  %v1877_v47 = vadd.f32 %v1822_v33, %v10529_v42  ;;  %v4837_v3 = vsel %vm8599_vm5, %v6705_v38, %v4836_v53  ;;  %v10535_v33 = vld [vmem:[#allocation16_spill] sm:$0xff]  ;;  %v10536_v38 = vld [vmem:[#allocation17_spill] sm:$0xff]  ;;  %p7979_p13 = pneg %p7978_p12 }
 0x170   : > { %v7457_v26 = vpop.f32.mrf.mxu0  ;;  %v6737_v57 = vcombine.low %v4837_v3, %v4840_v11 }
 0x171   : > { %v7508_v49 = vpop.f32.mrf.mxu1  ;;  %7787 = vmatmul.mubr.bf16.gmra.mxu1 %v10530_v24  ;;  %v9875_v27 = vadd.f32 %v2209_v62, %v1877_v47  ;;  %v1880_v16 = vadd.f32 %v7457_v26, %v10531_v58 }
 0x172   : > { %7790 = vmatprep.mubr.bf16.mxu1 %v10532_v1  ;;  %v1825_v14 = vpop.f32.mrf.mxu0  ;;  %v10537_v1 = vld [vmem:[#allocation18_spill] sm:$0xff] }
 0x173   : > { %7743 = vmatmul.mubr.bf16.gmra.mxu0 %v6735_v13  ;;  %v2225_v52 = vpop.f32.mrf.mxu1  ;;  %v9883_v39 = vadd.f32 %v7505_v45, %v1880_v16  ;;  %v1878_v30 = vadd.f32 %v1825_v14, %v10533_v9 }
 0x174   : > { %7746 = vmatprep.mubr.bf16.mxu0 %v6736_v20  ;;  %v7460_v62 = vpop.f32.mrf.mxu0 }
 0x175   : > { %v7509_v29 = vpop.f32.mrf.mxu1  ;;  %v9886_v44 = vadd.f32 %v2212_v10, %v1878_v30  ;;  %v1883_v60 = vadd.f32 %v7460_v62, %v10534_v41 }
 0x176   : > { %v1838_v31 = vpop.f32.mrf.mxu0 }
 0x177   : > { %v2228_v7 = vpop.f32.mrf.mxu1  ;;  %v9889_v23 = vadd.f32 %v7508_v49, %v1883_v60  ;;  %v1881_v53 = vadd.f32 %v1838_v31, %v9664_v43 }
 0x178   : > { %v7461_v12 = vpop.f32.mrf.mxu0 }
 0x179   : > { %v7576_v13 = vpop.f32.mrf.mxu1  ;;  %7791 = vmatmul.mubr.bf16.gmra.mxu1 %v10535_v33  ;;  %v9893_v45 = vadd.f32 %v2225_v52, %v1881_v53  ;;  %v1884_v20 = vadd.f32 %v7461_v12, %v9667_v46 }
 0x17a   : > { %7794 = vmatprep.mubr.bf16.mxu1 %v10536_v38  ;;  %v1841_v5 = vpop.f32.mrf.mxu0 }
 0x17b   : > { %7747 = vmatmul.mubr.bf16.gmra.mxu0 %v6737_v57  ;;  %v3365_v10 = vpop.f32.mrf.mxu1  ;;  %v9897_v54 = vadd.f32 %v7509_v29, %v1884_v20  ;;  %v1882_v4 = vadd.f32 %v1841_v5, %v9677_v8 }
 0x17c   : > { %v7528_v47 = vpop.f32.mrf.mxu0 }
 0x17d   : > { %v7577_v42 = vpop.f32.mrf.mxu1  ;;  %v9900_v43 = vadd.f32 %v2228_v7, %v1882_v4  ;;  %v2996_v49 = vadd.f32 %v7528_v47, %v9699_v6 }
 0x17e   : > { %v2867_v24 = vpop.f32.mrf.mxu0 }
 0x17f   : > { %v3368_v26 = vpop.f32.mrf.mxu1  ;;  %v9903_v58 = vadd.f32 %v7576_v13, %v2996_v49  ;;  %v2994_v46 = vadd.f32 %v2867_v24, %v9707_v0 }
 0x180   : > { %v7529_v52 = vpop.f32.mrf.mxu0 }
 0x181   : > { %v7580_v16 = vpop.f32.mrf.mxu1  ;;  %7795 = vmatmul.mubr.bf16.gmra.mxu1 %v10537_v1  ;;  %v9907_v14 = vadd.f32 %v3365_v10, %v2994_v46  ;;  %v2997_v8 = vadd.f32 %v7529_v52, %v9721_v21 }
 0x182   : > { %v2870_v11 = vpop.f32.mrf.mxu0 }
 0x183   : > { %v3381_v3 = vpop.f32.mrf.mxu1  ;;  %v9910_v9 = vadd.f32 %v7577_v42, %v2997_v8  ;;  %v2995_v6 = vadd.f32 %v2870_v11, %v9728_v40 }
 0x184   : > { %v7532_v29 = vpop.f32.mrf.mxu0 }
 0x185   : > { %v7581_v30 = vpop.f32.mrf.mxu1  ;;  %v9913_v62 = vadd.f32 %v3368_v26, %v2995_v6  ;;  %v3000_v0 = vadd.f32 %v7532_v29, %v9736_v25 }
 0x186   : > { %v2883_v60 = vpop.f32.mrf.mxu0 }
 0x187   : > { %v3384_v41 = vpop.f32.mrf.mxu1  ;;  %v9916_v57 = vadd.f32 %v7580_v16, %v3000_v0  ;;  %v2998_v7 = vadd.f32 %v2883_v60, %v9745_v48 }
 0x188   : > { %v7533_v21 = vpop.f32.mrf.mxu0 }
 0x189   : > { %v7584_v31 = vpop.f32.mrf.mxu1  ;;  %v9919_v53 = vadd.f32 %v3381_v3, %v2998_v7  ;;  %v3001_v13 = vadd.f32 %v7533_v21, %v9753_v32 }
 0x18a   : > { %v2886_v40 = vpop.f32.mrf.mxu0 }
 0x18b   : > { %v3397_v12 = vpop.f32.mrf.mxu1  ;;  %v9922_v33 = vadd.f32 %v7581_v30, %v3001_v13  ;;  %v2999_v20 = vadd.f32 %v2886_v40, %v9762_v51 }
 0x18c   : > { %v7536_v25 = vpop.f32.mrf.mxu0 }
 0x18d   : > { %v7585_v10 = vpop.f32.mrf.mxu1  ;;  %v9925_v38 = vadd.f32 %v3384_v41, %v2999_v20  ;;  %v3004_v5 = vadd.f32 %v7536_v25, %v9765_v18 }
 0x18e   : > { %v2899_v48 = vpop.f32.mrf.mxu0 }
 0x18f   : > { %v3400_v4 = vpop.f32.mrf.mxu1  ;;  %v9928_v42 = vadd.f32 %v7584_v31, %v3004_v5  ;;  %v3002_v47 = vadd.f32 %v2899_v48, %v9770_v17 }
 0x190   : > { %v7537_v32 = vpop.f32.mrf.mxu0 }
 0x191   : > { %v7588_v49 = vpop.f32.mrf.mxu1  ;;  %v9931_v26 = vadd.f32 %v3397_v12, %v3002_v47  ;;  %v3005_v24 = vadd.f32 %v7537_v32, %v9778_v2 }
 0x192   : > { %v2902_v51 = vpop.f32.mrf.mxu0 }
 0x193   : > { %v3413_v46 = vpop.f32.mrf.mxu1  ;;  %v9934_v16 = vadd.f32 %v7585_v10, %v3005_v24  ;;  %v3003_v52 = vadd.f32 %v2902_v51, %v9785_v36 }
 0x194   : > { %v7540_v18 = vpop.f32.mrf.mxu0 }
 0x195   : > { %v7589_v1 = vpop.f32.mrf.mxu1  ;;  %v9937_v8 = vadd.f32 %v3400_v4, %v3003_v52  ;;  %v3008_v3 = vadd.f32 %v7540_v18, %v9789_v35 }
 0x196   : > { %v2915_v17 = vpop.f32.mrf.mxu0 }
 0x197   : > { %v3416_v11 = vpop.f32.mrf.mxu1  ;;  %v9940_v6 = vadd.f32 %v7588_v49, %v3008_v3  ;;  %v3006_v30 = vadd.f32 %v2915_v17, %v9794_v28 }
 0x198   : > { %v7541_v2 = vpop.f32.mrf.mxu0 }
 0x199   : > { %v7592_v29 = vpop.f32.mrf.mxu1  ;;  %v9943_v0 = vadd.f32 %v3413_v46, %v3006_v30  ;;  %v3009_v41 = vadd.f32 %v7541_v2, %v9806_v61 }
 0x19a   : > { %v2918_v36 = vpop.f32.mrf.mxu0 }
 0x19b   : > { %v3429_v60 = vpop.f32.mrf.mxu1  ;;  %v9946_v7 = vadd.f32 %v7589_v1, %v3009_v41  ;;  %v3007_v31 = vadd.f32 %v2918_v36, %v9813_v15 }
 0x19c   : > { %v7544_v35 = vpop.f32.mrf.mxu0 }
 0x19d   : > { %v7593_v21 = vpop.f32.mrf.mxu1  ;;  %v9949_v13 = vadd.f32 %v3416_v11, %v3007_v31  ;;  %v3012_v12 = vadd.f32 %v7544_v35, %v9817_v56 }
 0x19e   : > { %v2931_v28 = vpop.f32.mrf.mxu0 }
 0x19f   : > { %v3432_v40 = vpop.f32.mrf.mxu1  ;;  %v9952_v20 = vadd.f32 %v7592_v29, %v3012_v12  ;;  %v3010_v10 = vadd.f32 %v2931_v28, %v9822_v37 }
 0x1a0   : > { %v7545_v61 = vpop.f32.mrf.mxu0 }
 0x1a1   : > { %v7596_v25 = vpop.f32.mrf.mxu1  ;;  %v9955_v5 = vadd.f32 %v3429_v60, %v3010_v10  ;;  %v3013_v4 = vadd.f32 %v7545_v61, %v9834_v22 }
 0x1a2   : > { %v2934_v15 = vpop.f32.mrf.mxu0 }
 0x1a3   : > { %v3445_v48 = vpop.f32.mrf.mxu1  ;;  %v9958_v47 = vadd.f32 %v7593_v21, %v3013_v4  ;;  %v3011_v49 = vadd.f32 %v2934_v15, %v9841_v59 }
 0x1a4   : > { %v7548_v56 = vpop.f32.mrf.mxu0 }
 0x1a5   : > { %v7597_v32 = vpop.f32.mrf.mxu1  ;;  %v9961_v24 = vadd.f32 %v3432_v40, %v3011_v49  ;;  %v3016_v46 = vadd.f32 %v7548_v56, %v9845_v19 }
 0x1a6   : > { %v2947_v37 = vpop.f32.mrf.mxu0 }
 0x1a7   : > { %v3448_v51 = vpop.f32.mrf.mxu1  ;;  %v9964_v52 = vadd.f32 %v7596_v25, %v3016_v46  ;;  %v3014_v1 = vadd.f32 %v2947_v37, %v9850_v63 }
 0x1a8   : > { %v7549_v22 = vpop.f32.mrf.mxu0 }
 0x1a9   : > { %v7600_v18 = vpop.f32.mrf.mxu1  ;;  %v9967_v3 = vadd.f32 %v3445_v48, %v3014_v1  ;;  %v3017_v11 = vadd.f32 %v7549_v22, %v9859_v55 }
 0x1aa   : > { %v2950_v59 = vpop.f32.mrf.mxu0 }
 0x1ab   : > { %v3461_v17 = vpop.f32.mrf.mxu1  ;;  %v9970_v30 = vadd.f32 %v7597_v32, %v3017_v11  ;;  %v3015_v29 = vadd.f32 %v2950_v59, %v9867_v34 }
 0x1ac   : > { %v7552_v19 = vpop.f32.mrf.mxu0 }
 0x1ad   : > { %10538 = vst [vmem:[#allocation19_spill] sm:$0xff] %v9970_v30  ;;  %v7601_v2 = vpop.f32.mrf.mxu1  ;;  %v9973_v41 = vadd.f32 %v3448_v51, %v3015_v29  ;;  %v3020_v60 = vadd.f32 %v7552_v19, %v9871_v50 }
 0x1ae   : > { %v2963_v63 = vpop.f32.mrf.mxu0 }
 0x1af   : > { %10539 = vst [vmem:[#allocation22_spill] sm:$0xff] %v9973_v41  ;;  %v3464_v36 = vpop.f32.mrf.mxu1  ;;  %v9976_v31 = vadd.f32 %v7600_v18, %v3020_v60  ;;  %v3018_v21 = vadd.f32 %v2963_v63, %v9875_v27 }
 0x1b0   : > { %v7553_v35 = vpop.f32.mrf.mxu0 }
 0x1b1   : > { %v9979_v55 = vadd.f32 %v3461_v17, %v3018_v21  ;;  %v3021_v12 = vadd.f32 %v7553_v35, %v9883_v39  ;;  %v7604_v40 = vpop.f32.mrf.mxu1 }
 0x1b2   : > { %v2966_v28 = vpop.f32.mrf.mxu0 }
 0x1b3   : > { %v9982_v34 = vadd.f32 %v7601_v2, %v3021_v12  ;;  %v3019_v10 = vadd.f32 %v2966_v28, %v9886_v44  ;;  %v3477_v25 = vpop.f32.mrf.mxu1 }
 0x1b4   : > { %v7556_v61 = vpop.f32.mrf.mxu0 }
 0x1b5   : > { %10540 = vst [vmem:[#allocation20_spill] sm:$0xff] %v9982_v34  ;;  %v9985_v50 = vadd.f32 %v3464_v36, %v3019_v10  ;;  %v3024_v4 = vadd.f32 %v7556_v61, %v9889_v23  ;;  %v7605_v48 = vpop.f32.mrf.mxu1 }
 0x1b6   : > { %v2979_v15 = vpop.f32.mrf.mxu0 }
 0x1b7   : > { %10541 = vst [vmem:[#allocation25_spill] sm:$0xff] %v9985_v50  ;;  %v9988_v27 = vadd.f32 %v7604_v40, %v3024_v4  ;;  %v3022_v49 = vadd.f32 %v2979_v15, %v9893_v45  ;;  %v3480_v39 = vpop.f32.mrf.mxu1 }
 0x1b8   : > { %v7557_v32 = vpop.f32.mrf.mxu0 }
 0x1b9   : > { %v9991_v56 = vadd.f32 %v3477_v25, %v3022_v49  ;;  %v3025_v46 = vadd.f32 %v7557_v32, %v9897_v54 }
 0x1ba   : > { %v2982_v51 = vpop.f32.mrf.mxu0  ;;  %v9997_v18 = vpop.f32.mrf.mxu1 }
 0x1bb   : > { %v9994_v44 = vadd.f32 %v7605_v48, %v3025_v46  ;;  %v3023_v37 = vadd.f32 %v2982_v51, %v9900_v43 }
 0x1bc   : > { %v7624_v1 = vpop.f32.mrf.mxu0  ;;  %v10004_v11 = vpop.f32.mrf.mxu1 }
 0x1bd   : > { %10542 = vst [vmem:[#allocation8_spill] sm:$0xff] %v9994_v44  ;;  %v9999_v23 = vadd.f32 %v3480_v39, %v3023_v37  ;;  %v10002_v22 = vadd.f32 %v7624_v1, %v9903_v58 }
 0x1be   : > { %v3752_v45 = vpop.f32.mrf.mxu0  ;;  %v10011_v59 = vpop.f32.mrf.mxu1 }
 0x1bf   : > { %10543 = vst [vmem:[#allocation21_spill] sm:$0xff] %v9999_v23  ;;  %v10007_v17 = vadd.f32 %v3752_v45, %v9907_v14 }
 0x1c0   : > { %v10009_v54 = vpop.f32.mrf.mxu0  ;;  %v10015_v43 = vpop.f32.mrf.mxu1 }
 0x1c2   : > { %v10013_v29 = vpop.f32.mrf.mxu0 }
 0x1c4   : > { %v7628_v2 = vpop.f32.mrf.mxu0  ;;  %v10020_v58 = vpop.f32.mrf.mxu1 }
 0x1c5   : > { %v10018_v19 = vadd.f32 %v7628_v2, %v9916_v57 }
 0x1c6   : > { %v3768_v60 = vpop.f32.mrf.mxu0  ;;  %v10025_v14 = vpop.f32.mrf.mxu1 }
 0x1c7   : > { %v10023_v36 = vadd.f32 %v3768_v60, %v9919_v53 }
 0x1c8   : > { %v7629_v63 = vpop.f32.mrf.mxu0  ;;  %v10027_v21 = vpop.f32.mrf.mxu1 }
 0x1ca   : > { %v3771_v35 = vpop.f32.mrf.mxu0  ;;  %v10029_v12 = vpop.f32.mrf.mxu1 }
 0x1cc   : > { %v7632_v40 = vpop.f32.mrf.mxu0 }
 0x1cd   : > { %v10032_v28 = vadd.f32 %v7632_v40, %v9928_v42 }
 0x1ce   : > { %v3784_v57 = vpop.f32.mrf.mxu0 }
 0x1cf   : > { %v10035_v10 = vadd.f32 %v3784_v57, %v9931_v26  ;;  %v10037_v25 = vpop.f32.mrf.mxu1 }
 0x1d0   : > { %v7633_v53 = vpop.f32.mrf.mxu0 }
 0x1d1   : > { %v10039_v61 = vpop.f32.mrf.mxu1 }
 0x1d2   : > { %v3787_v4 = vpop.f32.mrf.mxu0 }
 0x1d3   : > { %v10041_v48 = vpop.f32.mrf.mxu1 }
 0x1d4   : > { %v7636_v15 = vpop.f32.mrf.mxu0 }
 0x1d5   : > { %v10044_v49 = vadd.f32 %v7636_v15, %v9940_v6  ;;  %v10046_v32 = vpop.f32.mrf.mxu1 }
 0x1d6   : > { %v3800_v42 = vpop.f32.mrf.mxu0 }
 0x1d7   : > { %v10049_v39 = vadd.f32 %v3800_v42, %v9943_v0 }
 0x1d8   : > { %v7637_v26 = vpop.f32.mrf.mxu0 }
 0x1da   : > { %v10051_v46 = vpop.f32.mrf.mxu1  ;;  %v3803_v51 = vpop.f32.mrf.mxu0 }
 0x1dc   : > { %v10053_v37 = vpop.f32.mrf.mxu1  ;;  %v7640_v1 = vpop.f32.mrf.mxu0 }
 0x1dd   : > { %v10056_v45 = vadd.f32 %v7640_v1, %v9952_v20 }
 0x1de   : > { %v10058_v2 = vpop.f32.mrf.mxu1  ;;  %v3816_v6 = vpop.f32.mrf.mxu0 }
 0x1df   : > { %v10061_v60 = vadd.f32 %v3816_v6, %v9955_v5 }
 0x1e0   : > { %v10063_v40 = vpop.f32.mrf.mxu1  ;;  %v7641_v0 = vpop.f32.mrf.mxu0 }
 0x1e1   : > { %10544 = vst [vmem:[#allocation9_spill] sm:$0xff] %v10061_v60 }
 0x1e2   : > { %v3819_v57 = vpop.f32.mrf.mxu0 }
 0x1e4   : > { %v10065_v15 = vpop.f32.mrf.mxu1  ;;  %v7644_v42 = vpop.f32.mrf.mxu0 }
 0x1e5   : > { %v10068_v23 = vadd.f32 %v7644_v42, %v9964_v52 }
 0x1e6   : > { %v10070_v44 = vpop.f32.mrf.mxu1  ;;  %v3832_v20 = vpop.f32.mrf.mxu0 }
 0x1e7   : > { %10545 = vst [vmem:[#allocation27_spill] sm:$0xff] %v10068_v23  ;;  %10546 = vst [vmem:[#allocation23_spill] sm:$0xff] %v10070_v44  ;;  %v10073_v1 = vadd.f32 %v3832_v20, %v9967_v3 }
 0x1e8   : > { %v10075_v50 = vpop.f32.mrf.mxu1  ;;  %v7645_v5 = vpop.f32.mrf.mxu0 }
 0x1e9   : > { %10547 = vst [vmem:[#allocation32_spill] sm:$0xff] %v10073_v1  ;;  %10548 = vst [vmem:[#allocation24_spill] sm:$0xff] %v10075_v50 }
 0x1ea   : > { %v10077_v6 = vpop.f32.mrf.mxu1  ;;  %v3835_v34 = vpop.f32.mrf.mxu0 }
 0x1eb   : > { %10549 = vst [vmem:[#allocation29_spill] sm:$0xff] %v10077_v6 }
 0x1ec   : > { %v7648_v60 = vpop.f32.mrf.mxu0 }
 0x1ed   : > { %v10080_v41 = vadd.f32 %v7648_v60, %v9976_v31  ;;  %v10082_v30 = vpop.f32.mrf.mxu1 }
 0x1ee   : > { %v3848_v52 = vpop.f32.mrf.mxu0 }
 0x1ef   : > { %10550 = vst [vmem:[#allocation26_spill] sm:$0xff] %v10080_v41  ;;  %v10085_v42 = vadd.f32 %v3848_v52, %v9979_v55  ;;  %v10087_v23 = vpop.f32.mrf.mxu1 }
 0x1f0   : > { %10552 = vst [vmem:[#allocation10_spill] sm:$0xff] %v10087_v23  ;;  %v7649_v3 = vpop.f32.mrf.mxu0 }
 0x1f1   : > { %10551 = vst [vmem:[#allocation34_spill] sm:$0xff] %v10085_v42  ;;  %v10089_v20 = vpop.f32.mrf.mxu1 }
 0x1f2   : > { %10553 = vst [vmem:[#allocation28_spill] sm:$0xff] %v10089_v20  ;;  %v3851_v1 = vpop.f32.mrf.mxu0 }
 0x1f3   : > { %v10091_v50 = vpop.f32.mrf.mxu1 }
 0x1f4   : > { %v7652_v6 = vpop.f32.mrf.mxu0 }
 0x1f5   : > { %v10094_v44 = vadd.f32 %v7652_v6, %v9988_v27  ;;  %v3882_v27 = vadd.f32 %v10009_v54, %v9910_v9  ;;  %v3880_v6 = vadd.f32 %v10013_v29, %v9913_v62  ;;  %v3898_v29 = vadd.f32 %v7641_v0, %v9958_v47 }
 0x1f6   : > { %v10096_v31 = vpop.f32.mrf.mxu1  ;;  %v3864_v60 = vpop.f32.mrf.mxu0 }
 0x1f7   : > { %10554 = vst [vmem:[#allocation11_spill] sm:$0xff] %v10094_v44  ;;  %v10099_v41 = vadd.f32 %v3864_v60, %v9991_v56  ;;  %v3886_v44 = vadd.f32 %v7629_v63, %v9922_v33  ;;  %v3884_v56 = vadd.f32 %v3771_v35, %v9925_v38  ;;  %v3890_v60 = vadd.f32 %v7633_v53, %v9934_v16 }
 0x1f8   : > { %v10101_v55 = vpop.f32.mrf.mxu1  ;;  %v10103_v52 = vpop.f32.mrf.mxu0  ;;  %v4636_v54 = vadd.f32 %v10011_v59, %v3882_v27  ;;  %v4634_v62 = vadd.f32 %v10015_v43, %v3880_v6  ;;  %v10129_v33 = vadd.f32 %v10020_v58, %v10018_v19  ;;  %v3894_v38 = vadd.f32 %v7637_v26, %v9946_v7 }
 0x1f9   : > { %10555 = vst [vmem:[#allocation36_spill] sm:$0xff] %v10099_v41  ;;  %10556 = vst [vmem:[#allocation30_spill] sm:$0xff] %v10103_v52  ;;  %v4635_v41 = vadd.f32 %v9997_v18, %v10002_v22  ;;  %v4637_v16 = vadd.f32 %v10025_v14, %v10023_v36  ;;  %v10135_v18 = vadd.f32 %v10027_v21, %v3886_v44 }
 0x1fa   : > { %v10105_v42 = vpop.f32.mrf.mxu1  ;;  %v10109_v23 = vpop.f32.mrf.mxu0  ;;  %v3892_v22 = vadd.f32 %v3803_v51, %v9949_v13  ;;  %v10145_v59 = vadd.f32 %v10037_v25, %v10032_v28  ;;  %v10149_v7 = vadd.f32 %v10039_v61, %v10035_v10  ;;  %v10152_v44 = vadd.f32 %v10041_v48, %v3890_v60  ;;  %v10559_v28 = vld [vmem:[#allocation19_spill] sm:$0xff]  ;;  %v10561_v61 = vld [vmem:[#allocation9_spill] sm:$0xff]  ;;  %v10569_v60 = vld [vmem:[#allocation10_spill] sm:$0xff] }
 0x1fb   : > { %10558 = vst [vmem:[#allocation31_spill] sm:$0xff] %v10109_v23  ;;  %v3888_v23 = vadd.f32 %v3787_v4, %v9937_v8  ;;  %v10138_v8 = vadd.f32 %v10029_v12, %v3884_v56  ;;  %v10160_v13 = vadd.f32 %v10051_v46, %v10044_v49  ;;  %v10164_v19 = vadd.f32 %v10053_v37, %v10049_v39  ;;  %v10562_v4 = vld [vmem:[#allocation23_spill] sm:$0xff]  ;;  %v10563_v49 = vld [vmem:[#allocation24_spill] sm:$0xff] }
 0x1fc   : > { %v10107_v20 = vpop.f32.mrf.mxu1  ;;  %v3896_v58 = vadd.f32 %v3819_v57, %v9961_v24  ;;  %v10170_v63 = vadd.f32 %v10058_v2, %v3894_v38  ;;  %v10174_v35 = vadd.f32 %v10063_v40, %v3892_v22  ;;  %v10178_v12 = vadd.f32 %v10065_v15, %v10056_v45  ;;  %v10560_v24 = vld [vmem:[#allocation22_spill] sm:$0xff]  ;;  %v10565_v51 = vld [vmem:[#allocation27_spill] sm:$0xff]  ;;  %v10566_v45 = vld [vmem:[#allocation20_spill] sm:$0xff] }
 0x1fd   : > { %10557 = vst [vmem:[#allocation39_spill] sm:$0xff] %v10107_v20  ;;  %v4633_v20 = vadd.f32 %v10004_v11, %v10007_v17  ;;  %v10156_v43 = vadd.f32 %v10046_v32, %v3888_v23  ;;  %v3902_v10 = vadd.f32 %v7645_v5, %v10559_v28  ;;  %v3900_v25 = vadd.f32 %v3835_v34, %v10560_v24  ;;  %v10564_v34 = vld [vmem:[#allocation29_spill] sm:$0xff]  ;;  %v10568_v56 = vld [vmem:[#allocation32_spill] sm:$0xff] }
 0x1fe   : > { %v10193_v48 = vadd.f32 %v10562_v4, %v10561_v61  ;;  %v10196_v32 = vadd.f32 %v10563_v49, %v3898_v29  ;;  %v10199_v46 = vadd.f32 %v10564_v34, %v3896_v58  ;;  %v10203_v37 = vadd.f32 %v10082_v30, %v10565_v51  ;;  %v10567_v40 = vld [vmem:[#allocation25_spill] sm:$0xff] }
 0x1ff   : > { %v3906_v2 = vadd.f32 %v7649_v3, %v10566_v45  ;;  %v3904_v0 = vadd.f32 %v3851_v1, %v10567_v40  ;;  %v10216_v3 = vadd.f32 %v10091_v50, %v3900_v25  ;;  %v10571_v1 = vld [vmem:[#allocation26_spill] sm:$0xff]  ;;  %v10575_v25 = vld [vmem:[#allocation21_spill] sm:$0xff] }
 0x200   : > { %v10574_v50 = vld [vmem:[#allocation30_spill] sm:$0xff] }
 0x201   : > { %v10123_v52 = vpop.f32.mrf.mxu1  ;;  %v10228_v28 = vadd.f32 %v10105_v42, %v3906_v2 }
 0x203   : > { %v7720_v9 = vpop.f32.mrf.mxu0  ;;  %v10141_v11 = vpop.f32.mrf.mxu1 }
 0x204   : > { %v5133_v47 = vadd.f32 %v7720_v9, %v4635_v41  ;;  %v10210_v9 = vadd.f32 %v10569_v60, %v10568_v56  ;;  %v10577_v42 = vld [vmem:[#allocation39_spill] sm:$0xff] }
 0x205   : > { %v5004_v17 = vpop.f32.mrf.mxu0  ;;  %v10167_v36 = vpop.f32.mrf.mxu1  ;;  %v10246_v4 = vadd.f32 %v10577_v42, %v3904_v0 }
 0x206   : > { %v5131_v23 = vadd.f32 %v5004_v17, %v4633_v20  ;;  %v10572_v17 = vld [vmem:[#allocation34_spill] sm:$0xff]  ;;  %v5748_v58 = vmul.f32 %v5133_v47, %v5133_v47 }
 0x207   : > { %v7721_v14 = vpop.f32.mrf.mxu0  ;;  %v10182_v53 = vpop.f32.mrf.mxu1  ;;  %v10224_v29 = vadd.f32 %v10101_v55, %v10572_v17 }
 0x208   : > { %v5134_v21 = vadd.f32 %v7721_v14, %v4636_v54  ;;  %v5746_v5 = vmul.f32 %v5131_v23, %v5131_v23  ;;  %v10570_v54 = vld [vmem:[#allocation28_spill] sm:$0xff] }
 0x209   : > { %v5007_v41 = vpop.f32.mrf.mxu0  ;;  %v7768_v57 = vpop.f32.mrf.mxu1  ;;  %v10213_v30 = vadd.f32 %v10570_v54, %v3902_v10  ;;  %v10573_v10 = vld [vmem:[#allocation8_spill] sm:$0xff] }
 0x20a   : > { %v6896_v39 = vpack.c.bf16 %v5134_v21, %v5133_v47  ;;  %v5132_v26 = vadd.f32 %v5007_v41, %v4634_v62  ;;  %v10220_v62 = vadd.f32 %v10096_v31, %v10571_v1  ;;  %v10232_v24 = vadd.f32 %v10574_v50, %v10573_v10  ;;  %v10576_v31 = vld [vmem:[#allocation31_spill] sm:$0xff] }
 0x20b   : > { %v7724_v15 = vpop.f32.mrf.mxu0  ;;  %v5261_v38 = vpop.f32.mrf.mxu1  ;;  %v10236_v41 = vadd.f32 %v10576_v31, %v10575_v25  ;;  %v5749_v51 = vmul.f32 %v5134_v21, %v5134_v21 }
 0x20c   : > { %7048 = vst [vmem:[%s10189_s10 + $0x8] sm:$0xff] %v6896_v39   ;;  %v6891_v20 = vpack.c.bf16 %v5132_v26, %v5131_v23  ;;  %v5708_v27 = vadd.f32 %v5132_v26, %v5131_v23  ;;  %v5747_v6 = vmul.f32 %v5132_v26, %v5132_v26  ;;  %v5854_v34 = vmul.f32 %v5261_v38, %v5261_v38 }
 0x20d   : > { %v5020_v22 = vpop.f32.mrf.mxu0  ;;  %v7769_v55 = vpop.f32.mrf.mxu1  ;;  %v5137_v2 = vadd.f32 %v7724_v15, %v10129_v33  ;;  %v5856_v15 = vmul.f32 %v7768_v57, %v7768_v57 }
 0x20e   : > { %6892 = vst [vmem:[%s10189_s10] sm:$0xff] %v6891_v20   ;;  %v5709_v14 = vadd.f32 %v5708_v27, %v5133_v47  ;;  %v5778_v23 = vadd.f32 %v5747_v6, %v5746_v5  ;;  %v5135_v47 = vadd.f32 %v5020_v22, %v4637_v16  ;;  %v6976_v49 = vpack.c.bf16 %v7769_v55, %v7768_v57  ;;  %v10578_v22 = vld [vmem:[#allocation11_spill] sm:$0xff] }
 0x20f   : > { %v7725_v61 = vpop.f32.mrf.mxu0  ;;  %v5264_v45 = vpop.f32.mrf.mxu1  ;;  %v10254_v33 = vadd.f32 %v10123_v52, %v10578_v22  ;;  %v5857_v25 = vmul.f32 %v7769_v55, %v7769_v55 }
 0x210   : > { %v5779_v39 = vadd.f32 %v5778_v23, %v5748_v58  ;;  %v5710_v26 = vadd.f32 %v5709_v14, %v5134_v21  ;;  %v5138_v40 = vadd.f32 %v7725_v61, %v10135_v18  ;;  %7063 = vst [vmem:[%s10243_s19 + $0x8] sm:$0xff] %v6976_v49   ;;  %v6971_v20 = vpack.c.bf16 %v5264_v45, %v5261_v38 }
 0x211   : > { %v5023_v5 = vpop.f32.mrf.mxu0  ;;  %v5816_v27 = vadd.f32 %v5264_v45, %v5261_v38  ;;  %v5855_v16 = vmul.f32 %v5264_v45, %v5264_v45  ;;  %v7772_v0 = vpop.f32.mrf.mxu1  ;;  %v5750_v56 = vmul.f32 %v5135_v47, %v5135_v47 }
 0x212   : > { %v5711_v6 = vadd.f32 %v5710_v26, %v5135_v47  ;;  %v5780_v60 = vadd.f32 %v5779_v39, %v5749_v51  ;;  %v6906_v54 = vpack.c.bf16 %v5138_v40, %v5137_v2  ;;  %v5136_v1 = vadd.f32 %v5023_v5, %v10138_v8  ;;  %6972 = vst [vmem:[%s10243_s19] sm:$0xff] %v6971_v20  }
 0x213   : > { %v7728_v21 = vpop.f32.mrf.mxu0  ;;  %v5817_v18 = vadd.f32 %v7768_v57, %v5816_v27  ;;  %v5886_v17 = vadd.f32 %v5855_v16, %v5854_v34  ;;  %v5277_v58 = vpop.f32.mrf.mxu1  ;;  %v5752_v8 = vmul.f32 %v5137_v2, %v5137_v2  ;;  %v5753_v42 = vmul.f32 %v5138_v40, %v5138_v40 }
 0x214   : > { %v5781_v38 = vadd.f32 %v5780_v60, %v5750_v56  ;;  %7050 = vst [vmem:[%s10189_s10 + $0x18] sm:$0xff] %v6906_v54   ;;  %v6901_v14 = vpack.c.bf16 %v5136_v1, %v5135_v47  ;;  %v5712_v23 = vadd.f32 %v5711_v6, %v5136_v1  ;;  %v5751_v10 = vmul.f32 %v5136_v1, %v5136_v1 }
 0x215   : > { %v5036_v50 = vpop.f32.mrf.mxu0  ;;  %v5887_v31 = vadd.f32 %v5886_v17, %v5856_v15  ;;  %v5818_v61 = vadd.f32 %v7769_v55, %v5817_v18  ;;  %v7773_v49 = vpop.f32.mrf.mxu1  ;;  %v5858_v51 = vmul.f32 %v5277_v58, %v5277_v58  ;;  %v5141_v27 = vadd.f32 %v7728_v21, %v10145_v59 }
 0x216   : > { %7049 = vst [vmem:[%s10189_s10 + $0x10] sm:$0xff] %v6901_v14   ;;  %v5713_v52 = vadd.f32 %v5712_v23, %v5137_v2  ;;  %v5782_v39 = vadd.f32 %v5781_v38, %v5751_v10  ;;  %v5139_v57 = vadd.f32 %v5036_v50, %v10149_v7  ;;  %v6986_v47 = vpack.c.bf16 %v7773_v49, %v7772_v0 }
 0x217   : > { %v7729_v26 = vpop.f32.mrf.mxu0  ;;  %v5819_v34 = vadd.f32 %v5818_v61, %v5277_v58  ;;  %v5888_v45 = vadd.f32 %v5887_v31, %v5857_v25  ;;  %v5280_v20 = vpop.f32.mrf.mxu1  ;;  %v5860_v38 = vmul.f32 %v7772_v0, %v7772_v0  ;;  %v10275_v23 = vadd.f32 %v10182_v53, %v10236_v41 }
 0x218   : > { %v5783_v5 = vadd.f32 %v5782_v39, %v5752_v8  ;;  %v5714_v16 = vadd.f32 %v5713_v52, %v5138_v40  ;;  %v5142_v55 = vadd.f32 %v7729_v26, %v10152_v44  ;;  %7065 = vst [vmem:[%s10243_s19 + $0x18] sm:$0xff] %v6986_v47   ;;  %v6981_v2 = vpack.c.bf16 %v5280_v20, %v5277_v58  ;;  %v10579_v44 = vld [vmem:[#allocation36_spill] sm:$0xff] }
 0x219   : > { %v5039_v6 = vpop.f32.mrf.mxu0  ;;  %v5889_v56 = vadd.f32 %v5888_v45, %v5858_v51  ;;  %v5820_v60 = vadd.f32 %v5819_v34, %v5280_v20  ;;  %v5859_v54 = vmul.f32 %v5280_v20, %v5280_v20  ;;  %v7776_v7 = vpop.f32.mrf.mxu1  ;;  %v5754_v22 = vmul.f32 %v5139_v57, %v5139_v57 }
 0x21a   : > { %v5715_v1 = vadd.f32 %v5714_v16, %v5139_v57  ;;  %v5784_v15 = vadd.f32 %v5783_v5, %v5753_v42  ;;  %v6916_v18 = vpack.c.bf16 %v5142_v55, %v5141_v27  ;;  %7064 = vst [vmem:[%s10243_s19 + $0x10] sm:$0xff] %v6981_v2   ;;  %v5140_v40 = vadd.f32 %v5039_v6, %v10156_v43 }
 0x21b   : > { %v7732_v17 = vpop.f32.mrf.mxu0  ;;  %v5821_v59 = vadd.f32 %v7772_v0, %v5820_v60  ;;  %v5890_v21 = vadd.f32 %v5889_v56, %v5859_v54  ;;  %v10267_v14 = vadd.f32 %v10141_v11, %v10579_v44  ;;  %v10271_v58 = vadd.f32 %v10167_v36, %v10232_v24  ;;  %v5293_v50 = vpop.f32.mrf.mxu1 }
 0x21c   : > { %v5785_v10 = vadd.f32 %v5784_v15, %v5754_v22  ;;  %7052 = vst [vmem:[%s10189_s10 + $0x28] sm:$0xff] %v6916_v18   ;;  %v5861_v25 = vmul.f32 %v7773_v49, %v7773_v49  ;;  %v6911_v8 = vpack.c.bf16 %v5140_v40, %v5139_v57  ;;  %v5756_v61 = vmul.f32 %v5141_v27, %v5141_v27 }
 0x21d   : > { %v5052_v0 = vpop.f32.mrf.mxu0  ;;  %v5891_v31 = vadd.f32 %v5890_v21, %v5860_v38  ;;  %v5822_v43 = vadd.f32 %v7773_v49, %v5821_v59  ;;  %v7777_v11 = vpop.f32.mrf.mxu1  ;;  %v5716_v42 = vadd.f32 %v5715_v1, %v5140_v40  ;;  %v5755_v52 = vmul.f32 %v5140_v40, %v5140_v40 }
 0x21e   : > { %v5145_v36 = vadd.f32 %v7732_v17, %v10160_v13  ;;  %v5862_v53 = vmul.f32 %v5293_v50, %v5293_v50  ;;  %v6996_v26 = vpack.c.bf16 %v7777_v11, %v7776_v7  ;;  %7051 = vst [vmem:[%s10189_s10 + $0x20] sm:$0xff] %v6911_v8   ;;  %v5143_v49 = vadd.f32 %v5052_v0, %v10164_v19 }
 0x21f   : > { %v7733_v24 = vpop.f32.mrf.mxu0  ;;  %v5823_v39 = vadd.f32 %v5822_v43, %v5293_v50  ;;  %v5892_v41 = vadd.f32 %v5891_v31, %v5861_v25  ;;  %v5717_v34 = vadd.f32 %v5716_v42, %v5141_v27  ;;  %v5786_v51 = vadd.f32 %v5785_v10, %v5755_v52  ;;  %v5296_v45 = vpop.f32.mrf.mxu1 }
 0x220   : > { %v5146_v57 = vadd.f32 %v7733_v24, %v10170_v63  ;;  %7067 = vst [vmem:[%s10243_s19 + $0x28] sm:$0xff] %v6996_v26   ;;  %v6991_v20 = vpack.c.bf16 %v5296_v45, %v5293_v50  ;;  %v5863_v13 = vmul.f32 %v5296_v45, %v5296_v45  ;;  %v5757_v6 = vmul.f32 %v5142_v55, %v5142_v55 }
 0x221   : > { %v5055_v47 = vpop.f32.mrf.mxu0  ;;  %v5893_v5 = vadd.f32 %v5892_v41, %v5862_v53  ;;  %v5824_v16 = vadd.f32 %v5823_v39, %v5296_v45  ;;  %v5787_v56 = vadd.f32 %v5786_v51, %v5756_v61  ;;  %v7780_v2 = vpop.f32.mrf.mxu1  ;;  %v5718_v60 = vadd.f32 %v5717_v34, %v5142_v55 }
 0x222   : > { %v6926_v54 = vpack.c.bf16 %v5146_v57, %v5145_v36  ;;  %v5864_v1 = vmul.f32 %v7776_v7, %v7776_v7  ;;  %7066 = vst [vmem:[%s10243_s19 + $0x20] sm:$0xff] %v6991_v20   ;;  %v5144_v19 = vadd.f32 %v5055_v47, %v10174_v35  ;;  %v5760_v63 = vmul.f32 %v5145_v36, %v5145_v36 }
 0x223   : > { %v7736_v27 = vpop.f32.mrf.mxu0  ;;  %v5825_v22 = vadd.f32 %v7776_v7, %v5824_v16  ;;  %v5894_v15 = vadd.f32 %v5893_v5, %v5863_v13  ;;  %v5719_v18 = vadd.f32 %v5718_v60, %v5143_v49  ;;  %v5758_v17 = vmul.f32 %v5143_v49, %v5143_v49  ;;  %v5309_v59 = vpop.f32.mrf.mxu1 }
 0x224   : > { %v5788_v38 = vadd.f32 %v5787_v56, %v5757_v6  ;;  %7054 = vst [vmem:[%s10189_s10 + $0x38] sm:$0xff] %v6926_v54   ;;  %v5865_v40 = vmul.f32 %v7777_v11, %v7777_v11  ;;  %v6921_v55 = vpack.c.bf16 %v5144_v19, %v5143_v49  ;;  %v5759_v7 = vmul.f32 %v5144_v19, %v5144_v19 }
 0x225   : > { %v5068_v21 = vpop.f32.mrf.mxu0  ;;  %v5895_v44 = vadd.f32 %v5894_v15, %v5864_v1  ;;  %v5826_v10 = vadd.f32 %v7777_v11, %v5825_v22  ;;  %v7781_v0 = vpop.f32.mrf.mxu1  ;;  %v5720_v25 = vadd.f32 %v5719_v18, %v5144_v19  ;;  %v5149_v31 = vadd.f32 %v7736_v27, %v10178_v12 }
 0x226   : > { %v5789_v50 = vadd.f32 %v5788_v38, %v5758_v17  ;;  %v5866_v8 = vmul.f32 %v5309_v59, %v5309_v59  ;;  %v7006_v42 = vpack.c.bf16 %v7781_v0, %v7780_v2  ;;  %7053 = vst [vmem:[%s10189_s10 + $0x30] sm:$0xff] %v6921_v55   ;;  %v5147_v11 = vadd.f32 %v5068_v21, %v10193_v48 }
 0x227   : > { %v7737_v35 = vpop.f32.mrf.mxu0  ;;  %v5827_v43 = vadd.f32 %v5826_v10, %v5309_v59  ;;  %v5896_v61 = vadd.f32 %v5895_v44, %v5865_v40  ;;  %v5721_v52 = vadd.f32 %v5720_v25, %v5145_v36  ;;  %v5312_v39 = vpop.f32.mrf.mxu1  ;;  %v5761_v45 = vmul.f32 %v5146_v57, %v5146_v57 }
 0x228   : > { %v5790_v24 = vadd.f32 %v5789_v50, %v5759_v7  ;;  %v5150_v53 = vadd.f32 %v7737_v35, %v10196_v32  ;;  %7069 = vst [vmem:[%s10243_s19 + $0x38] sm:$0xff] %v7006_v42   ;;  %v7001_v34 = vpack.c.bf16 %v5312_v39, %v5309_v59  ;;  %v5867_v12 = vmul.f32 %v5312_v39, %v5312_v39 }
 0x229   : > { %v5071_v41 = vpop.f32.mrf.mxu0  ;;  %v5897_v26 = vadd.f32 %v5896_v61, %v5866_v8  ;;  %v5828_v51 = vadd.f32 %v5827_v43, %v5312_v39  ;;  %v7784_v47 = vpop.f32.mrf.mxu1  ;;  %v5722_v5 = vadd.f32 %v5721_v52, %v5146_v57  ;;  %v5868_v16 = vmul.f32 %v7780_v2, %v7780_v2 }
 0x22a   : > { %v5791_v49 = vadd.f32 %v5790_v24, %v5760_v63  ;;  %v6936_v20 = vpack.c.bf16 %v5150_v53, %v5149_v31  ;;  %7068 = vst [vmem:[%s10243_s19 + $0x30] sm:$0xff] %v7001_v34   ;;  %v5764_v48 = vmul.f32 %v5149_v31, %v5149_v31  ;;  %v5762_v32 = vmul.f32 %v5147_v11, %v5147_v11 }
 0x22b   : > { %v7740_v36 = vpop.f32.mrf.mxu0  ;;  %v5829_v13 = vadd.f32 %v7780_v2, %v5828_v51  ;;  %v5898_v6 = vadd.f32 %v5897_v26, %v5867_v12  ;;  %v5723_v56 = vadd.f32 %v5722_v5, %v5147_v11  ;;  %v5325_v54 = vpop.f32.mrf.mxu1  ;;  %v5148_v27 = vadd.f32 %v5071_v41, %v10199_v46 }
 0x22c   : > { %v5792_v60 = vadd.f32 %v5791_v49, %v5761_v45  ;;  %7056 = vst [vmem:[%s10189_s10 + $0x48] sm:$0xff] %v6936_v20   ;;  %v5869_v22 = vmul.f32 %v7781_v0, %v7781_v0  ;;  %v5765_v57 = vmul.f32 %v5150_v53, %v5150_v53  ;;  %v5870_v40 = vmul.f32 %v5325_v54, %v5325_v54 }
 0x22d   : > { %v5084_v1 = vpop.f32.mrf.mxu0  ;;  %v5899_v15 = vadd.f32 %v5898_v6, %v5868_v16  ;;  %v5830_v19 = vadd.f32 %v7781_v0, %v5829_v13  ;;  %v7785_v18 = vpop.f32.mrf.mxu1  ;;  %v6931_v17 = vpack.c.bf16 %v5148_v27, %v5147_v11  ;;  %v5724_v2 = vadd.f32 %v5723_v56, %v5148_v27 }
 0x22e   : > { %v5793_v63 = vadd.f32 %v5792_v60, %v5762_v32  ;;  %v5763_v38 = vmul.f32 %v5148_v27, %v5148_v27  ;;  %v7016_v10 = vpack.c.bf16 %v7785_v18, %v7784_v47  ;;  %v5153_v25 = vadd.f32 %v7740_v36, %v10203_v37 }
 0x22f   : > { %v7741_v59 = vpop.f32.mrf.mxu0  ;;  %v5831_v21 = vadd.f32 %v5830_v19, %v5325_v54  ;;  %v5900_v44 = vadd.f32 %v5899_v15, %v5869_v22  ;;  %7055 = vst [vmem:[%s10189_s10 + $0x40] sm:$0xff] %v6931_v17   ;;  %v5725_v55 = vadd.f32 %v5724_v2, %v5149_v31  ;;  %v5328_v50 = vpop.f32.mrf.mxu1  ;;  %v5151_v0 = vadd.f32 %v5084_v1, %v10210_v9 }
 0x230   : > { %v5794_v46 = vadd.f32 %v5793_v63, %v5763_v38  ;;  %7071 = vst [vmem:[%s10243_s19 + $0x48] sm:$0xff] %v7016_v10   ;;  %v7011_v43 = vpack.c.bf16 %v5328_v50, %v5325_v54  ;;  %v5871_v61 = vmul.f32 %v5328_v50, %v5328_v50  ;;  %v5154_v39 = vadd.f32 %v7741_v59, %v10213_v30 }
 0x231   : > { %v5087_v7 = vpop.f32.mrf.mxu0  ;;  %v5901_v35 = vadd.f32 %v5900_v44, %v5870_v40  ;;  %v5832_v8 = vadd.f32 %v5831_v21, %v5328_v50  ;;  %v7788_v52 = vpop.f32.mrf.mxu1  ;;  %v5726_v24 = vadd.f32 %v5725_v55, %v5150_v53  ;;  %v5872_v41 = vmul.f32 %v7784_v47, %v7784_v47 }
 0x232   : > { %v5795_v42 = vadd.f32 %v5794_v46, %v5764_v48  ;;  %v5152_v31 = vadd.f32 %v5087_v7, %v10216_v3  ;;  %v5873_v37 = vmul.f32 %v7785_v18, %v7785_v18  ;;  %7070 = vst [vmem:[%s10243_s19 + $0x40] sm:$0xff] %v7011_v43   ;;  %v5766_v51 = vmul.f32 %v5151_v0, %v5151_v0 }
 0x233   : > { %v7744_v11 = vpop.f32.mrf.mxu0  ;;  %v5833_v26 = vadd.f32 %v7784_v47, %v5832_v8  ;;  %v5902_v9 = vadd.f32 %v5901_v35, %v5871_v61  ;;  %v5727_v34 = vadd.f32 %v5726_v24, %v5151_v0  ;;  %v5341_v45 = vpop.f32.mrf.mxu1  ;;  %v6946_v49 = vpack.c.bf16 %v5154_v39, %v5153_v25 }
 0x234   : > { %v5796_v12 = vadd.f32 %v5795_v42, %v5765_v57  ;;  %v5768_v53 = vmul.f32 %v5153_v25, %v5153_v25  ;;  %v6941_v30 = vpack.c.bf16 %v5152_v31, %v5151_v0  ;;  %v5767_v6 = vmul.f32 %v5152_v31, %v5152_v31 }
 0x235   : > { %v5100_v5 = vpop.f32.mrf.mxu0  ;;  %v5903_v20 = vadd.f32 %v5902_v9, %v5872_v41  ;;  %v5834_v36 = vadd.f32 %v7785_v18, %v5833_v26  ;;  %7058 = vst [vmem:[%s10189_s10 + $0x58] sm:$0xff] %v6946_v49   ;;  %v7789_v3 = vpop.f32.mrf.mxu1  ;;  %v5728_v13 = vadd.f32 %v5727_v34, %v5152_v31  ;;  %v5157_v47 = vadd.f32 %v7744_v11, %v10220_v62 }
 0x236   : > { %v5797_v16 = vadd.f32 %v5796_v12, %v5766_v51  ;;  %v5874_v32 = vmul.f32 %v5341_v45, %v5341_v45  ;;  %v7026_v54 = vpack.c.bf16 %v7789_v3, %v7788_v52  ;;  %7057 = vst [vmem:[%s10189_s10 + $0x50] sm:$0xff] %v6941_v30   ;;  %v5155_v15 = vadd.f32 %v5100_v5, %v10224_v29 }
 0x237   : > { %v7745_v48 = vpop.f32.mrf.mxu0  ;;  %v5835_v56 = vadd.f32 %v5834_v36, %v5341_v45  ;;  %v5904_v60 = vadd.f32 %v5903_v20, %v5873_v37  ;;  %v5729_v27 = vadd.f32 %v5728_v13, %v5153_v25  ;;  %v5344_v22 = vpop.f32.mrf.mxu1  ;;  %v5769_v2 = vmul.f32 %v5154_v39, %v5154_v39 }
 0x238   : > { %v5798_v1 = vadd.f32 %v5797_v16, %v5767_v6  ;;  %v5158_v19 = vadd.f32 %v7745_v48, %v10228_v28  ;;  %7073 = vst [vmem:[%s10243_s19 + $0x58] sm:$0xff] %v7026_v54   ;;  %v7021_v18 = vpack.c.bf16 %v5344_v22, %v5341_v45  ;;  %v5875_v62 = vmul.f32 %v5344_v22, %v5344_v22 }
 0x239   : > { %v5103_v57 = vpop.f32.mrf.mxu0  ;;  %v5905_v63 = vadd.f32 %v5904_v60, %v5874_v32  ;;  %v5836_v17 = vadd.f32 %v5835_v56, %v5344_v22  ;;  %v7792_v59 = vpop.f32.mrf.mxu1  ;;  %v5730_v21 = vadd.f32 %v5729_v27, %v5154_v39  ;;  %v5876_v10 = vmul.f32 %v7788_v52, %v7788_v52 }
 0x23a   : > { %v5799_v38 = vadd.f32 %v5798_v1, %v5768_v53  ;;  %v6956_v40 = vpack.c.bf16 %v5158_v19, %v5157_v47  ;;  %7072 = vst [vmem:[%s10243_s19 + $0x50] sm:$0xff] %v7021_v18   ;;  %v5772_v29 = vmul.f32 %v5157_v47, %v5157_v47  ;;  %v5770_v28 = vmul.f32 %v5155_v15, %v5155_v15 }
 0x23b   : > { %v7748_v44 = vpop.f32.mrf.mxu0  ;;  %v5837_v55 = vadd.f32 %v7788_v52, %v5836_v17  ;;  %v5906_v46 = vadd.f32 %v5905_v63, %v5875_v62  ;;  %v5731_v50 = vadd.f32 %v5730_v21, %v5155_v15  ;;  %v5357_v0 = vpop.f32.mrf.mxu1  ;;  %v5156_v7 = vadd.f32 %v5103_v57, %v10246_v4 }
 0x23c   : > { %v5800_v25 = vadd.f32 %v5799_v38, %v5769_v2  ;;  %7060 = vst [vmem:[%s10189_s10 + $0x68] sm:$0xff] %v6956_v40   ;;  %v5877_v43 = vmul.f32 %v7789_v3, %v7789_v3  ;;  %v5773_v42 = vmul.f32 %v5158_v19, %v5158_v19  ;;  %v5878_v26 = vmul.f32 %v5357_v0, %v5357_v0 }
 0x23d   : > { %v5116_v35 = vpop.f32.mrf.mxu0  ;;  %v5907_v8 = vadd.f32 %v5906_v46, %v5876_v10  ;;  %v5838_v61 = vadd.f32 %v7789_v3, %v5837_v55  ;;  %v7793_v39 = vpop.f32.mrf.mxu1  ;;  %v6951_v31 = vpack.c.bf16 %v5156_v7, %v5155_v15  ;;  %v5732_v52 = vadd.f32 %v5731_v50, %v5156_v7 }
 0x23e   : > { %v5801_v24 = vadd.f32 %v5800_v25, %v5770_v28  ;;  %v5771_v11 = vmul.f32 %v5156_v7, %v5156_v7  ;;  %v7036_v34 = vpack.c.bf16 %v7793_v39, %v7792_v59  ;;  %v5161_v45 = vadd.f32 %v7748_v44, %v10254_v33 }
 0x23f   : > { %v7749_v41 = vpop.f32.mrf.mxu0  ;;  %v5839_v37 = vadd.f32 %v5838_v61, %v5357_v0  ;;  %v5908_v9 = vadd.f32 %v5907_v8, %v5877_v43  ;;  %7059 = vst [vmem:[%s10189_s10 + $0x60] sm:$0xff] %v6951_v31   ;;  %v5733_v51 = vadd.f32 %v5732_v52, %v5157_v47  ;;  %v5360_v12 = vpop.f32.mrf.mxu1  ;;  %v5159_v49 = vadd.f32 %v5116_v35, %v10267_v14 }
 0x240   : > { %v5802_v4 = vadd.f32 %v5801_v24, %v5771_v11  ;;  %7075 = vst [vmem:[%s10243_s19 + $0x68] sm:$0xff] %v7036_v34   ;;  %v7031_v53 = vpack.c.bf16 %v5360_v12, %v5357_v0  ;;  %v5879_v30 = vmul.f32 %v5360_v12, %v5360_v12  ;;  %v5162_v6 = vadd.f32 %v7749_v41, %v10271_v58 }
 0x241   : > { %v5119_v5 = vpop.f32.mrf.mxu0  ;;  %v5909_v20 = vadd.f32 %v5908_v9, %v5878_v26  ;;  %v5840_v36 = vadd.f32 %v5839_v37, %v5360_v12  ;;  %v7796_v3 = vpop.f32.mrf.mxu1  ;;  %v5734_v13 = vadd.f32 %v5733_v51, %v5158_v19  ;;  %v5880_v48 = vmul.f32 %v7792_v59, %v7792_v59 }
 0x242   : > { %v5803_v16 = vadd.f32 %v5802_v4, %v5772_v29  ;;  %v5160_v47 = vadd.f32 %v5119_v5, %v10275_v23  ;;  %7074 = vst [vmem:[%s10243_s19 + $0x60] sm:$0xff] %v7031_v53   ;;  %v5774_v14 = vmul.f32 %v5159_v49, %v5159_v49  ;;  %v6966_v27 = vpack.c.bf16 %v5162_v6, %v5161_v45 }
 0x243   : > { %v5841_v56 = vadd.f32 %v7792_v59, %v5840_v36  ;;  %v5910_v33 = vadd.f32 %v5909_v20, %v5879_v30  ;;  %v5735_v32 = vadd.f32 %v5734_v13, %v5159_v49  ;;  %v5373_v54 = vpop.f32.mrf.mxu1  ;;  %v5881_v1 = vmul.f32 %v7793_v39, %v7793_v39 }
 0x244   : > { %v5804_v60 = vadd.f32 %v5803_v16, %v5773_v42  ;;  %v6961_v57 = vpack.c.bf16 %v5160_v47, %v5159_v49  ;;  %7062 = vst [vmem:[%s10189_s10 + $0x78] sm:$0xff] %v6966_v27   ;;  %v5775_v23 = vmul.f32 %v5160_v47, %v5160_v47  ;;  %v5882_v17 = vmul.f32 %v5373_v54, %v5373_v54 }
 0x245   : > { %v5911_v22 = vadd.f32 %v5910_v33, %v5880_v48  ;;  %v5842_v15 = vadd.f32 %v7793_v39, %v5841_v56  ;;  %v7797_v58 = vpop.f32.mrf.mxu1  ;;  %v5736_v63 = vadd.f32 %v5735_v32, %v5160_v47  ;;  %v5776_v38 = vmul.f32 %v5161_v45, %v5161_v45 }
 0x246   : > { %v5805_v19 = vadd.f32 %v5804_v60, %v5774_v14  ;;  %v7046_v2 = vpack.c.bf16 %v7797_v58, %v7796_v3  ;;  %7061 = vst [vmem:[%s10189_s10 + $0x70] sm:$0xff] %v6961_v57   ;;  %v5777_v29 = vmul.f32 %v5162_v6, %v5162_v6  ;;  %v5884_v25 = vmul.f32 %v7796_v3, %v7796_v3  ;;  %s5941_s10 = scalar_lea.sflag [#allocation3], %s10322_s20 }
 0x247   : > { %v5843_v18 = vadd.f32 %v5842_v15, %v5373_v54  ;;  %v5912_v62 = vadd.f32 %v5911_v22, %v5881_v1  ;;  %v5737_v59 = vadd.f32 %v5736_v63, %v5161_v45  ;;  %v5376_v40 = vpop.f32.mrf.mxu1  ;;  %v5885_v8 = vmul.f32 %v7797_v58, %v7797_v58 }
 0x248   : > { %v5806_v21 = vadd.f32 %v5805_v19, %v5775_v23  ;;  %7077 = vst [vmem:[%s10243_s19 + $0x78] sm:$0xff] %v7046_v2   ;;  %v7041_v10 = vpack.c.bf16 %v5376_v40, %v5373_v54  ;;  %v5883_v46 = vmul.f32 %v5376_v40, %v5376_v40 }
 0x249   : > { %v5913_v44 = vadd.f32 %v5912_v62, %v5882_v17  ;;  %v5844_v55 = vadd.f32 %v5843_v18, %v5376_v40  ;;  %v5738_v50 = vadd.f32 %v5737_v59, %v5162_v6 }
 0x24a   : > { %v5807_v28 = vadd.f32 %v5806_v21, %v5776_v38  ;;  %7076 = vst [vmem:[%s10243_s19 + $0x70] sm:$0xff] %v7041_v10   ;;  %s5982_s19 = sshll.u32 %s10444_s18, 4  ;;  %s7980_s18 = sshll.u32 %s8068_s22, 4  ;;  %s10349_s19 = int_to_ptr.vmem [resolvable:$true] %s5982_s19  ;;  %s7981_s18 = int_to_ptr.vmem [resolvable:$false] %s7980_s18 }
 0x24b   : > { %v5845_v0 = vadd.f32 %v7796_v3, %v5844_v55  ;;  %v5914_v7 = vadd.f32 %v5913_v44, %v5883_v46  ;;  %v5739_v35 = vrot.slane %v5738_v50, 4  ;;  %s7982_s0 = scalar_lea.vmem %s7981_s18, 32  ;;  %p7983_p0 = scmp.lt.s32.totalorder %s10342_s25, %s7981_s18 }
 0x24c   : > { %v5808_v43 = vadd.f32 %v5807_v28, %v5777_v29  ;;  %p7984_p1 = scmp.lt.s32.totalorder %s7982_s0, %s7976_s21 }
 0x24d   : > { %v5846_v61 = vadd.f32 %v7797_v58, %v5845_v0  ;;  %v5915_v42 = vadd.f32 %v5914_v7, %v5884_v25  ;;  %v5740_v24 = vadd.f32 %v5739_v35, %v5738_v50 }
 0x24e   : > { %v5809_v39 = vrot.slane %v5808_v43, 4  ;;  %p7985_p2 = por %p7984_p1, %p7983_p0 }
 0x24f   : > { %v5847_v31 = vrot.slane %v5846_v61, 4  ;;  %v5916_v52 = vadd.f32 %v5915_v42, %v5885_v8  ;;  %v5741_v11 = vrot.slane %v5740_v24, 2 }
 0x250   : > { %v5810_v41 = vadd.f32 %v5809_v39, %v5808_v43  ;;  %p7986_p3 = pnand %p7985_p2, %p7979_p13 }
 0x251   : > { %v5848_v37 = vadd.f32 %v5847_v31, %v5846_v61  ;;  %v5917_v26 = vrot.slane %v5916_v52, 4  ;;  %v5742_v9 = vadd.f32 %v5741_v11, %v5740_v24 }
 0x252   : > { %v5811_v34 = vrot.slane %v5810_v41, 2 }
 0x253   : > { %v5849_v51 = vrot.slane %v5848_v37, 2  ;;  %v5918_v4 = vadd.f32 %v5917_v26, %v5916_v52  ;;  %v5743_v12 = vrot.slane %v5742_v9, 1 }
 0x254   : > { %v5812_v45 = vadd.f32 %v5811_v34, %v5810_v41 }
 0x255   : > { %v5850_v49 = vadd.f32 %v5849_v51, %v5848_v37  ;;  %v5919_v5 = vrot.slane %v5918_v4, 2  ;;  %v5744_v20 = vadd.f32 %v5743_v12, %v5742_v9 }
 0x256   : > { %v5813_v53 = vrot.slane %v5812_v45, 1 }
 0x257   : > { %v5851_v36 = vrot.slane %v5850_v49, 1  ;;  %v5920_v30 = vadd.f32 %v5919_v5, %v5918_v4  ;;  %5745 = vst [vmem:[%s349_s23] sm:$0x1] %v5744_v20 }
 0x258   : > { %v5814_v16 = vadd.f32 %v5813_v53, %v5812_v45 }
 0x259   : > { %v5852_v3 = vadd.f32 %v5851_v36, %v5850_v49  ;;  %v5921_v13 = vrot.slane %v5920_v30, 1 }
 0x25a   : > { %5815 = vst [vmem:[%s352_s17] sm:$0x1] %v5814_v16 }
 0x25b   : > { %5853 = vst [vmem:[%s325_s12] sm:$0x1] %v5852_v3  ;;  %v5922_v6 = vadd.f32 %v5921_v13, %v5920_v30 }
 0x25c   : > { %7989 = shalt.err (!%p7986_p3)
}
 0x25d   : > { %s7990_s24 = scalar_lea.hbm %s10340_s9, 16  ;;  %s7994_s13 = scalar_lea.hbm %s10419_s7, 32 }
 0x25e   : > { %p7991_p4 = scmp.ne.s32.totalorder %s10340_s9, %s7990_s24  ;;  %p7995_p9 = scmp.lt.s32.totalorder %s10340_s9, %s10419_s7 }
 0x25f   : > { %p7996_p10 = scmp.lt.s32.totalorder %s7994_s13, %s7990_s24 }
 0x260   : > { %p7992_p7 = pnand %p7991_p4, %p8153_p5 }
 0x261   : > { %p7997_p11 = por %p7996_p10, %p7995_p9 }
 0x262   : > { %p7993_p8 = pneg %p7992_p7 }
 0x264   : > { %p7998_p12 = pnand %p7997_p11, %p7993_p8 }
 0x266   : > { %8001 = shalt.err (!%p7998_p12)
}
 0x267   : > { %7799 = dma.vmem_to_hbm [thread:$0]  (%p8153_p5), %s10342_s25, 16, %s10340_s9, %s5941_s10  }
 0x268   : > { %s10580_s0 = scalar_lea.vmem [#allocation4], %s10322_s20  ;;  %s5945_s18 = scalar_lea.sflag [#allocation5], %s10322_s20 }
 0x269   : > { %5923 = vst [vmem:[%s10580_s0] sm:$0x1] %v5922_v6  ;;  %s8002_s21 = scalar_lea.vmem %s10349_s19, 16  ;;  %s8069_s24 = smov [#allocation4]  }
 0x26a   : > { %p8003_p13 = scmp.ne.s32.totalorder %s10349_s19, %s8002_s21  ;;  %s8006_s12 = sshll.u32 %s8069_s24, 4  ;;  %s8007_s12 = int_to_ptr.vmem [resolvable:$false] %s8006_s12 }
 0x26b   : > { %s8008_s17 = scalar_lea.vmem %s8007_s12, 32  ;;  %p8009_p2 = scmp.lt.s32.totalorder %s10349_s19, %s8007_s12 }
 0x26c   : > { %p8004_p0 = pnand %p8003_p13, %p8153_p5  ;;  %p8010_p3 = scmp.lt.s32.totalorder %s8008_s17, %s8002_s21 }
 0x26e   : > { %p8005_p1 = pneg %p8004_p0  ;;  %p8011_p4 = por %p8010_p3, %p8009_p2 }
 0x270   : > { %p8012_p7 = pnand %p8011_p4, %p8005_p1 }
 0x272   : > { %8015 = shalt.err (!%p8012_p7)
}
 0x273   : > { %s8016_s25 = scalar_lea.hbm %s10347_s26, 16  ;;  %s8020_s10 = scalar_lea.hbm %s10420_s8, 32 }
 0x274   : > { %p8017_p8 = scmp.ne.s32.totalorder %s10347_s26, %s8016_s25  ;;  %p8021_p11 = scmp.lt.s32.totalorder %s10347_s26, %s10420_s8 }
 0x275   : > { %p8022_p12 = scmp.lt.s32.totalorder %s8020_s10, %s8016_s25 }
 0x276   : > { %p8018_p9 = pnand %p8017_p8, %p8153_p5 }
 0x277   : > { %p8023_p13 = por %p8022_p12, %p8021_p11 }
 0x278   : > { %p8019_p10 = pneg %p8018_p9 }
 0x27a   : > { %p8024_p0 = pnand %p8023_p13, %p8019_p10 }
 0x27c   : > { %8027 = shalt.err (!%p8024_p0)
}
 0x27d   : > { %7800 = dma.vmem_to_hbm [thread:$0]  (%p8153_p5), %s10349_s19, 16, %s10347_s26, %s5945_s18  }
 0x27e PF: > { %p7810_p1 = scmp.ge.s32.totalorder %s8066_s30, 2  ;;  %s6022_s22 = sand.u32 1, %s8054_s27  }
 0x27f   : > { %s6023_s0 = scalar_lea.sflag [#allocation3], %s6022_s22 }
 0x280   : > { %p7804_p2 = pnand %p7810_p1, %p8157_p6 }
 0x282   : > { %p7805_p3 = pneg %p7804_p2 }
 0x284   : > { %8045 = dma.done.wait (%p7805_p3), %s6023_s0, 16  }
 0x285   : > { %8047 = vsyncadd (%p7805_p3), %s6023_s0, 4294967280  ;;  %s6031_s21 = scalar_lea.sflag [#allocation5], %s6022_s22 }
 0x286   : > { %8049 = dma.done.wait (%p7805_p3), %s6031_s21, 16  }
 0x287   : > { %8051 = vsyncadd (%p7805_p3), %s6031_s21, 4294967280  ;;  %p22_p5 = scmp.ge.s32.totalorder %s8140_s11, 4   ;;  %s10581_s27 = smov %s8058_s28 }
 0x288   : > { %s10582_s28 = smov %s8062_s29  ;;  %s10583_s29 = smov %s8151_s14 }
 0x289   : > { %s10584_s30 = smov %s8140_s11  ;;  %24 = sbr.rel (!%p22_p5) target bundleno = 7 (0x7), region = 142 }
 0x28e   :  { %6035 = vsyncpa [#allocation3], 1 }
 0x28f   :  { %6037 = vsyncpa [#allocation3 + $0x1], 1 }
 0x290   :  { %6038 = vsyncpa [#allocation5], 1 }
 0x291   :  { %6040 = vsyncpa [#allocation5 + $0x1], 1 }

</bundles_post_ra>
